<compile_context>
chip_gen: v7x
topology: tpu7x:2x2x1
jax: 0.10.0
libtpu: 0.0.40
codegen_flags: <defaults>
</compile_context>

<pallas_src>
import functools
import math

import jax
import jax.numpy as jnp
from jax.experimental import pallas as pl
from jax.experimental.pallas import tpu as pltpu


# ----------------------------------------------------------------------------
# Config / helpers
# ----------------------------------------------------------------------------
_TM, _TN, _TK = 512, 512, 512           # matmul tile targets (capped by dims)
_BN_EPS = 1e-5


def _vmem_limit():
    # Generation-dependent scoped-VMEM cap (feedback: don't hardcode 32 MiB).
    try:
        cap = pltpu.get_tpu_info().vmem_capacity_bytes
        return min(int(cap * 3 // 4), 100 * 1024 * 1024)
    except Exception:  # pragma: no cover - conservative fallback
        return 64 * 1024 * 1024


_VMEM_LIMIT = _vmem_limit()


def _ceil_to(x, m):
    return -(-x // m) * m


def _choose_tile(dim, target, align):
    """Returns (padded_dim, tile) with padded_dim % tile == 0, tile % align == 0."""
    dp = _ceil_to(max(dim, 1), align)
    t = min(target, dp)
    return _ceil_to(dp, t), t


def _pick_rows(oh, ow, target_m=256):
    """Largest divisor R of oh with R*ow roughly <= target matmul M."""
    want = max(1, -(-target_m // ow))
    best = 1
    for d in range(1, oh + 1):
        if oh % d == 0 and d <= want:
            best = d
    return best


def _space_to_depth_pad(x, kh, kw, stride, pad, pad_value):
    """Spatial pad + fold the stride*stride phases into channels.

    Returns (xf [N, PH, PW, stride*stride*C], OH, OW) where
    xf[n, y, x, (di*stride+dj)*C + c] == padded[n, y*stride+di, x*stride+dj, c].
    For stride == 1 this is just the padded input (no extra copy, feedback item).
    """
    N, H, W, C = x.shape
    xp = jnp.pad(x, ((0, 0), (pad, pad), (pad, pad), (0, 0)),
                 constant_values=pad_value)
    Hp, Wp = H + 2 * pad, W + 2 * pad
    OH = (Hp - kh) // stride + 1
    OW = (Wp - kw) // stride + 1
    if stride == 1:
        return xp, OH, OW
    Hp2, Wp2 = _ceil_to(Hp, stride), _ceil_to(Wp, stride)
    if (Hp2, Wp2) != (Hp, Wp):
        xp = jnp.pad(xp, ((0, 0), (0, Hp2 - Hp), (0, Wp2 - Wp), (0, 0)),
                     constant_values=pad_value)
    xs = xp.reshape(N, Hp2 // stride, stride, Wp2 // stride, stride, C)
    xs = xs.transpose(0, 1, 3, 2, 4, 5)
    return xs.reshape(N, Hp2 // stride, Wp2 // stride, stride * stride * C), OH, OW


# ----------------------------------------------------------------------------
# Kernel 1: tiled matmul with fused bias / residual / ReLU epilogue (1x1 convs)
# ----------------------------------------------------------------------------
def _mm_kernel(x_ref, w_ref, b_ref, *refs, relu, has_res):
    if has_res:
        r_ref, o_ref, acc_ref = refs
    else:
        o_ref, acc_ref = refs
        r_ref = None

    @pl.when(pl.program_id(2) == 0)
    def _():
        acc_ref[...] = jnp.zeros_like(acc_ref)

    # bf16 x bf16 -> f32 on the MXU (no in-kernel casts of activations).
    acc_ref[...] += jnp.dot(x_ref[...], w_ref[...],
                            preferred_element_type=jnp.float32)

    @pl.when(pl.program_id(2) == pl.num_programs(2) - 1)
    def _():
        y = acc_ref[...] + b_ref[...]            # f32 epilogue (v5e-safe)
        if has_res:
            y = y + r_ref[...].astype(jnp.float32)
        if relu:
            y = jnp.maximum(y, 0.0)
        o_ref[...] = y.astype(o_ref.dtype)


def _matmul_bias_act(x, wp, b, relu, residual=None):
    """x: [M, Kp] bf16 (channels already 128-padded); wp: [Kp, Np] bf16 (BN
    folded, padded); b: [1, Np] f32; residual: optional [M, Np] bf16 fused
    into the epilogue. -> [M, Np] bf16 (channels kept padded)."""
    M, Kp = x.shape
    _, Np = wp.shape
    Mp, tm = _choose_tile(M, _TM, 16)            # bf16 sublane packing
    tn = min(_TN, Np)
    tk = min(_TK, Kp)

    xp = x if Mp == M else jnp.pad(x, ((0, Mp - M), (0, 0)))

    has_res = residual is not None
    args = [xp, wp, b]
    in_specs = [
        pl.BlockSpec((tm, tk), lambda i, j, k: (i, k)),
        pl.BlockSpec((tk, tn), lambda i, j, k: (k, j)),
        pl.BlockSpec((1, tn), lambda i, j, k: (0, j)),
    ]
    if has_res:
        rp = residual if Mp == M else jnp.pad(residual, ((0, Mp - M), (0, 0)))
        args.append(rp)
        # NOTE: this block stays resident across the whole K loop (2*tm*tn*2 B
        # of VMEM) though it is only consumed at the last k step.
        in_specs.append(pl.BlockSpec((tm, tn), lambda i, j, k: (i, j)))

    flops = 2 * Mp * Np * Kp
    bytes_accessed = (Mp * Kp * 2 + Kp * Np * 2 + Mp * Np * 2 + Np * 4
                      + (Mp * Np * 2 if has_res else 0))

    out = pl.pallas_call(
        functools.partial(_mm_kernel, relu=relu, has_res=has_res),
        out_shape=jax.ShapeDtypeStruct((Mp, Np), jnp.bfloat16),
        grid=(Mp // tm, Np // tn, Kp // tk),
        in_specs=in_specs,
        out_specs=pl.BlockSpec((tm, tn), lambda i, j, k: (i, j)),
        scratch_shapes=[pltpu.VMEM((tm, tn), jnp.float32)],
        compiler_params=pltpu.CompilerParams(
            dimension_semantics=("parallel", "parallel", "arbitrary"),
            vmem_limit_bytes=_VMEM_LIMIT),
        cost_estimate=pl.CostEstimate(flops=int(flops), transcendentals=0,
                                      bytes_accessed=int(bytes_accessed)),
    )(*args)
    return out if Mp == M else out[:M]


def _conv1x1(x, pc, relu, residual=None):
    """1x1 conv (+BN folded) on NHWC bf16 x via the tiled matmul."""
    N, H, W, Kp = x.shape
    Np = pc["w"].shape[1]
    x2 = x.reshape(N * H * W, Kp)
    r2 = residual.reshape(N * H * W, Np) if residual is not None else None
    y = _matmul_bias_act(x2, pc["w"], pc["b"], relu=relu, residual=r2)
    return y.reshape(N, H, W, Np)


# ----------------------------------------------------------------------------
# Kernel 2: direct conv on the phase-folded input (wide-K fused matmuls)
# ----------------------------------------------------------------------------
def _direct_conv_kernel(x_ref, w_ref, b_ref, o_ref, *, ngr, ngc, cfold, ow,
                        rows, relu, fuse):
    row0 = pl.program_id(1) * rows
    pieces = []
    for r in range(ngr):
        for c in range(ngc):
            pieces.append(x_ref[0, pl.ds(row0 + r, rows), pl.ds(c, ow), :])
    if fuse:
        # cfold % 128 == 0 -> lane-aligned concat, one wide-K MXU matmul
        # (K = ngr*ngc*cfold, e.g. 1152 / 2048 for the 3x3 convs).
        slab = jnp.concatenate(pieces, axis=-1)
        slab = slab.reshape(rows * ow, ngr * ngc * cfold)
        acc = jnp.dot(slab, w_ref[...], preferred_element_type=jnp.float32)
    else:
        # Stem (cfold = 32): a few medium-K matmuls, initialized from the
        # first group (no zero-fill), accumulated in f32.
        acc = None
        for g, piece in enumerate(pieces):
            part = jnp.dot(piece.reshape(rows * ow, cfold),
                           w_ref[g * cfold:(g + 1) * cfold, :],
                           preferred_element_type=jnp.float32)
            acc = part if acc is None else acc + part
    y = acc + b_ref[...]                          # f32 epilogue
    if relu:
        y = jnp.maximum(y, 0.0)
    o_ref[...] = y.reshape(o_ref.shape).astype(o_ref.dtype)


def _direct_conv(x, pc, *, relu):
    """kxk conv (+BN folded, ReLU) on NHWC bf16 x.  Weights are pre-folded to
    [ngroups*stride^2*cin_pad, cout_pad] bf16; outputs are 128-channel padded
    (lane-dense stores)."""
    kh, kw, s, pad = pc["kh"], pc["kw"], pc["stride"], pc["pad"]
    cin_p, cout_p = pc["cin_pad"], pc["cout_pad"]
    if x.shape[-1] != cin_p:                      # e.g. stem cin 3 -> padded 8
        x = jnp.pad(x, ((0, 0), (0, 0), (0, 0), (0, cin_p - x.shape[-1])))
    N = x.shape[0]
    xf, OH, OW = _space_to_depth_pad(x, kh, kw, s, pad, 0.0)
    _, PH, PW, CF = xf.shape
    ngr, ngc = -(-kh // s), -(-kw // s)
    cfold = s * s * cin_p
    assert CF == cfold
    R = _pick_rows(OH, OW)
    fuse = (cfold % 128 == 0)
    w, b = pc["w"], pc["b"]
    flops = 2 * N * OH * OW * ngr * ngc * cfold * cout_p
    bytes_accessed = xf.size * 2 + w.size * 2 + b.size * 4 + N * OH * OW * cout_p * 2
    # TODO(synk): OH band (halo) tiling of xf via manual DMA for very large
    #             feature maps; per-image blocks fit VMEM comfortably here.
    return pl.pallas_call(
        functools.partial(_direct_conv_kernel, ngr=ngr, ngc=ngc, cfold=cfold,
                          ow=OW, rows=R, relu=relu, fuse=fuse),
        out_shape=jax.ShapeDtypeStruct((N, OH, OW, cout_p), jnp.bfloat16),
        grid=(N, OH // R),
        in_specs=[
            pl.BlockSpec((1, PH, PW, CF), lambda n, rb: (n, 0, 0, 0)),
            pl.BlockSpec((ngr * ngc * cfold, cout_p), lambda n, rb: (0, 0)),
            pl.BlockSpec((1, cout_p), lambda n, rb: (0, 0)),
        ],
        out_specs=pl.BlockSpec((1, R, OW, cout_p), lambda n, rb: (n, rb, 0, 0)),
        compiler_params=pltpu.CompilerParams(
            dimension_semantics=("parallel", "parallel"),
            vmem_limit_bytes=_VMEM_LIMIT),
        cost_estimate=pl.CostEstimate(flops=int(flops), transcendentals=0,
                                      bytes_accessed=int(bytes_accessed)),
    )(xf, w, b)


# ----------------------------------------------------------------------------
# Kernel 3: 3x3 / stride-2 max pool on the phase-folded input (running max)
# ----------------------------------------------------------------------------
def _maxpool_kernel(x_ref, o_ref, *, kh, kw, stride, chans, ow, rows):
    row0 = pl.program_id(1) * rows
    acc = None
    for i in range(kh):
        for j in range(kw):
            ph = (i % stride) * stride + (j % stride)
            r, c = i // stride, j // stride
            piece = x_ref[0, pl.ds(row0 + r, rows), pl.ds(c, ow),
                          pl.ds(ph * chans, chans)]      # 128-aligned slice
            acc = piece if acc is None else jnp.maximum(acc, piece)
    o_ref[...] = acc.reshape(o_ref.shape)


def _maxpool3x3_s2(x):
    """PyTorch MaxPool2d(kernel=3, stride=2, padding=1) on NHWC bf16 x."""
    N, H, W, C = x.shape
    xf, OH, OW = _space_to_depth_pad(x, 3, 3, 2, 1, float("-inf"))
    _, PH, PW, CF = xf.shape
    R = _pick_rows(OH, OW)
    return pl.pallas_call(
        functools.partial(_maxpool_kernel, kh=3, kw=3, stride=2, chans=C,
                          ow=OW, rows=R),
        out_shape=jax.ShapeDtypeStruct((N, OH, OW, C), jnp.bfloat16),
        grid=(N, OH // R),
        in_specs=[pl.BlockSpec((1, PH, PW, CF), lambda n, rb: (n, 0, 0, 0))],
        out_specs=pl.BlockSpec((1, R, OW, C), lambda n, rb: (n, rb, 0, 0)),
        compiler_params=pltpu.CompilerParams(
            dimension_semantics=("parallel", "parallel"),
            vmem_limit_bytes=_VMEM_LIMIT),
    )(xf)


# ----------------------------------------------------------------------------
# Bottleneck (conv1x1 -> conv3x3 -> conv1x1 + fused residual add + ReLU)
# ----------------------------------------------------------------------------
def _bottleneck(x, p):
    stride = p["c2"]["stride"]
    h = _conv1x1(x, p["c1"], relu=True)
    h = _direct_conv(h, p["c2"], relu=True)
    xi = x if stride == 1 else x[:, ::stride, ::stride, :]
    if "ds" in p:
        idn = _conv1x1(xi, p["ds"], relu=False)
    else:
        # TODO(synk): identity shortcut assumes matching padded channel counts.
        idn = xi
    # Third 1x1 conv with residual add + ReLU fused into its epilogue.
    return _conv1x1(h, p["c3"], relu=True, residual=idn)


# ----------------------------------------------------------------------------
# Deterministic parameter construction (synthetic; BN folded, pre-padded)
# ----------------------------------------------------------------------------
def _make_bn_folded(key, c):
    k1, k2, k3, k4 = jax.random.split(key, 4)
    gamma = 1.0 + 0.1 * jax.random.normal(k1, (c,), jnp.float32)
    beta = 0.1 * jax.random.normal(k2, (c,), jnp.float32)
    mean = 0.1 * jax.random.normal(k3, (c,), jnp.float32)
    var = 1.0 + 0.5 * jax.random.uniform(k4, (c,), jnp.float32)
    scale = gamma / jnp.sqrt(var + _BN_EPS)
    bias = beta - mean * scale
    return scale, bias


def _make_1x1_params(kw_key, kbn_key, cin, cout):
    w = jax.random.normal(kw_key, (cin, cout), jnp.float32) / math.sqrt(cin)
    scale, bias = _make_bn_folded(kbn_key, cout)
    wf = w * scale[None, :]                      # fold BN scale into weights
    Kp, Np = _ceil_to(cin, 128), _ceil_to(cout, 128)
    wp = jnp.pad(wf, ((0, Kp - cin), (0, Np - cout))).astype(jnp.bfloat16)
    bp = jnp.pad(bias.reshape(1, cout), ((0, 0), (0, Np - cout)))
    return {"w": wp, "b": bp}


def _make_kxk_params(kw_key, kbn_key, kh, kw, cin, cout, *, stride, pad,
                     cin_pad, cout_pad):
    fan_in = kh * kw * cin
    w = jax.random.normal(kw_key, (kh, kw, cin, cout), jnp.float32) / math.sqrt(fan_in)
    scale, bias = _make_bn_folded(kbn_key, cout)
    wf = w * scale[None, None, None, :]
    s = stride
    ngr, ngc = -(-kh // s), -(-kw // s)
    # Group taps by spatial offset (r, c) = (i//s, j//s); within a group the
    # s*s phase sub-blocks line up with the phase-folded input channels.
    wg = jnp.zeros((ngr, ngc, s, s, cin_pad, cout_pad), jnp.float32)
    for i in range(kh):
        for j in range(kw):
            wg = wg.at[i // s, j // s, i % s, j % s, :cin, :cout].set(wf[i, j])
    wg = wg.reshape(ngr * ngc * s * s * cin_pad, cout_pad).astype(jnp.bfloat16)
    bp = jnp.pad(bias.reshape(1, cout), ((0, 0), (0, cout_pad - cout)))
    return {"w": wg, "b": bp, "kh": kh, "kw": kw, "stride": stride, "pad": pad,
            "cin_pad": cin_pad, "cout_pad": cout_pad}


def _make_bottleneck_params(key, cin, width, cout, stride):
    ks = jax.random.split(key, 8)
    wp = _ceil_to(width, 128)
    return {
        "c1": _make_1x1_params(ks[0], ks[1], cin, width),
        "c2": _make_kxk_params(ks[2], ks[3], 3, 3, width, width, stride=stride,
                               pad=1, cin_pad=wp, cout_pad=wp),
        "c3": _make_1x1_params(ks[4], ks[5], width, cout),
        "ds": _make_1x1_params(ks[6], ks[7], cin, cout),
    }


def make_backbone_params(key):
    k_stem_w, k_stem_bn, k_l1, k_l2 = jax.random.split(key, 4)
    return {
        "stem": _make_kxk_params(k_stem_w, k_stem_bn, 7, 7, 3, 64, stride=2,
                                 pad=3, cin_pad=8, cout_pad=128),
        "layer1": _make_bottleneck_params(k_l1, 64, 64, 256, stride=1),
        "layer2": _make_bottleneck_params(k_l2, 256, 128, 512, stride=2),
    }


# ----------------------------------------------------------------------------
# BackboneWrapper.forward equivalent
# ----------------------------------------------------------------------------
OUTPUT_LAYERS = (1, 2)
NUM_CHANNELS_OUTPUT = [[64, 256, 512, 1024, 2048][i] for i in OUTPUT_LAYERS]


def backbone_wrapper_forward(x_nchw, params):
    """x_nchw: [N, 3, H, W] f32 -> list of NCHW f32 feature maps (single
    tensor if len(OUTPUT_LAYERS) == 1), matching BackboneWrapper.forward."""
    x = jnp.transpose(x_nchw, (0, 2, 3, 1)).astype(jnp.bfloat16)   # bf16 NHWC
    x = _direct_conv(x, params["stem"], relu=True)                 # 128-ch padded
    x = _maxpool3x3_s2(x)
    feats = {}
    x = _bottleneck(x, params["layer1"])
    feats[1] = x
    x = _bottleneck(x, params["layer2"])
    feats[2] = x
    outs = [jnp.transpose(feats[l], (0, 3, 1, 2)).astype(jnp.float32)
            for l in OUTPUT_LAYERS]
    if len(outs) == 1:
        return outs[0]
    return outs


if __name__ == "__main__":
    key = jax.random.PRNGKey(0)
    k_param, k_x = jax.random.split(key)
    params = make_backbone_params(k_param)
    x = jax.random.normal(k_x, (2, 3, 16, 16), jnp.float32)

    fwd = jax.jit(lambda inp: backbone_wrapper_forward(inp, params))
    outs = jax.block_until_ready(fwd(x))

    # Expected shapes: layer1 -> [2, 256, 4, 4], layer2 -> [2, 512, 2, 2]
    assert isinstance(outs, (list, tuple)) and len(outs) == 2
    assert outs[0].shape == (2, 256, 4, 4), outs[0].shape
    assert outs[1].shape == (2, 512, 2, 2), outs[1].shape
    assert all(bool(jnp.all(jnp.isfinite(o))) for o in outs)
    print("KERNEL_OK")
</pallas_src>

<mosaic_0001>
module attributes {stable_mosaic.version = 11 : i64} {
  func.func @_direct_conv_kernel(%arg0: i32, %arg1: i32, %arg2: memref<1x11x11x32xbf16, #tpu.memory_space<vmem>>, %arg3: memref<512x128xbf16, #tpu.memory_space<vmem>>, %arg4: memref<1x128xf32, #tpu.memory_space<vmem>>, %arg5: memref<1x8x8x128xbf16, #tpu.memory_space<vmem>>) attributes {dimension_semantics = [#tpu.dimension_semantics<parallel>, #tpu.dimension_semantics<parallel>], iteration_bounds = array<i64: 2, 1>, scalar_prefetch = 0 : i64, scratch_operands = 0 : i64, tpu.core_type = #tpu.core_type<tc>, window_params = [{transform_indices = @transform_0, window_bounds = array<i64: 1, 11, 11, 32>}, {pipeline_mode = #tpu.pipeline_mode<synchronous>, transform_indices = @transform_1, window_bounds = array<i64: 512, 128>}, {pipeline_mode = #tpu.pipeline_mode<synchronous>, transform_indices = @transform_2, window_bounds = array<i64: 1, 128>}, {transform_indices = @transform_3, window_bounds = array<i64: 1, 8, 8, 128>}]} {
    %c8_i32 = arith.constant 8 : i32
    %0 = arith.muli %arg1, %c8_i32 : i32
    %c0_i32 = arith.constant 0 : i32
    %1 = arith.addi %0, %c0_i32 : i32
    %c0 = arith.constant 0 : index
    %2 = arith.index_cast %1 : i32 to index
    %c0_0 = arith.constant 0 : index
    %c0_1 = arith.constant 0 : index
    %3 = vector.load %arg2[%c0, %2, %c0_0, %c0_1] : memref<1x11x11x32xbf16, #tpu.memory_space<vmem>>, vector<1x8x8x32xbf16>
    %4 = vector.shape_cast %3 : vector<1x8x8x32xbf16> to vector<8x8x32xbf16>
    %c0_i32_2 = arith.constant 0 : i32
    %5 = arith.addi %0, %c0_i32_2 : i32
    %c0_3 = arith.constant 0 : index
    %6 = arith.index_cast %5 : i32 to index
    %c1 = arith.constant 1 : index
    %c0_4 = arith.constant 0 : index
    %7 = vector.load %arg2[%c0_3, %6, %c1, %c0_4] : memref<1x11x11x32xbf16, #tpu.memory_space<vmem>>, vector<1x8x8x32xbf16>
    %8 = vector.shape_cast %7 : vector<1x8x8x32xbf16> to vector<8x8x32xbf16>
    %c0_i32_5 = arith.constant 0 : i32
    %9 = arith.addi %0, %c0_i32_5 : i32
    %c0_6 = arith.constant 0 : index
    %10 = arith.index_cast %9 : i32 to index
    %c2 = arith.constant 2 : index
    %c0_7 = arith.constant 0 : index
    %11 = vector.load %arg2[%c0_6, %10, %c2, %c0_7] : memref<1x11x11x32xbf16, #tpu.memory_space<vmem>>, vector<1x8x8x32xbf16>
    %12 = vector.shape_cast %11 : vector<1x8x8x32xbf16> to vector<8x8x32xbf16>
    %c0_i32_8 = arith.constant 0 : i32
    %13 = arith.addi %0, %c0_i32_8 : i32
    %c0_9 = arith.constant 0 : index
    %14 = arith.index_cast %13 : i32 to index
    %c3 = arith.constant 3 : index
    %c0_10 = arith.constant 0 : index
    %15 = vector.load %arg2[%c0_9, %14, %c3, %c0_10] : memref<1x11x11x32xbf16, #tpu.memory_space<vmem>>, vector<1x8x8x32xbf16>
    %16 = vector.shape_cast %15 : vector<1x8x8x32xbf16> to vector<8x8x32xbf16>
    %c1_i32 = arith.constant 1 : i32
    %17 = arith.addi %0, %c1_i32 : i32
    %c0_11 = arith.constant 0 : index
    %18 = arith.index_cast %17 : i32 to index
    %c0_12 = arith.constant 0 : index
    %c0_13 = arith.constant 0 : index
    %19 = vector.load %arg2[%c0_11, %18, %c0_12, %c0_13] : memref<1x11x11x32xbf16, #tpu.memory_space<vmem>>, vector<1x8x8x32xbf16>
    %20 = vector.shape_cast %19 : vector<1x8x8x32xbf16> to vector<8x8x32xbf16>
    %c1_i32_14 = arith.constant 1 : i32
    %21 = arith.addi %0, %c1_i32_14 : i32
    %c0_15 = arith.constant 0 : index
    %22 = arith.index_cast %21 : i32 to index
    %c1_16 = arith.constant 1 : index
    %c0_17 = arith.constant 0 : index
    %23 = vector.load %arg2[%c0_15, %22, %c1_16, %c0_17] : memref<1x11x11x32xbf16, #tpu.memory_space<vmem>>, vector<1x8x8x32xbf16>
    %24 = vector.shape_cast %23 : vector<1x8x8x32xbf16> to vector<8x8x32xbf16>
    %c1_i32_18 = arith.constant 1 : i32
    %25 = arith.addi %0, %c1_i32_18 : i32
    %c0_19 = arith.constant 0 : index
    %26 = arith.index_cast %25 : i32 to index
    %c2_20 = arith.constant 2 : index
    %c0_21 = arith.constant 0 : index
    %27 = vector.load %arg2[%c0_19, %26, %c2_20, %c0_21] : memref<1x11x11x32xbf16, #tpu.memory_space<vmem>>, vector<1x8x8x32xbf16>
    %28 = vector.shape_cast %27 : vector<1x8x8x32xbf16> to vector<8x8x32xbf16>
    %c1_i32_22 = arith.constant 1 : i32
    %29 = arith.addi %0, %c1_i32_22 : i32
    %c0_23 = arith.constant 0 : index
    %30 = arith.index_cast %29 : i32 to index
    %c3_24 = arith.constant 3 : index
    %c0_25 = arith.constant 0 : index
    %31 = vector.load %arg2[%c0_23, %30, %c3_24, %c0_25] : memref<1x11x11x32xbf16, #tpu.memory_space<vmem>>, vector<1x8x8x32xbf16>
    %32 = vector.shape_cast %31 : vector<1x8x8x32xbf16> to vector<8x8x32xbf16>
    %c2_i32 = arith.constant 2 : i32
    %33 = arith.addi %0, %c2_i32 : i32
    %c0_26 = arith.constant 0 : index
    %34 = arith.index_cast %33 : i32 to index
    %c0_27 = arith.constant 0 : index
    %c0_28 = arith.constant 0 : index
    %35 = vector.load %arg2[%c0_26, %34, %c0_27, %c0_28] : memref<1x11x11x32xbf16, #tpu.memory_space<vmem>>, vector<1x8x8x32xbf16>
    %36 = vector.shape_cast %35 : vector<1x8x8x32xbf16> to vector<8x8x32xbf16>
    %c2_i32_29 = arith.constant 2 : i32
    %37 = arith.addi %0, %c2_i32_29 : i32
    %c0_30 = arith.constant 0 : index
    %38 = arith.index_cast %37 : i32 to index
    %c1_31 = arith.constant 1 : index
    %c0_32 = arith.constant 0 : index
    %39 = vector.load %arg2[%c0_30, %38, %c1_31, %c0_32] : memref<1x11x11x32xbf16, #tpu.memory_space<vmem>>, vector<1x8x8x32xbf16>
    %40 = vector.shape_cast %39 : vector<1x8x8x32xbf16> to vector<8x8x32xbf16>
    %c2_i32_33 = arith.constant 2 : i32
    %41 = arith.addi %0, %c2_i32_33 : i32
    %c0_34 = arith.constant 0 : index
    %42 = arith.index_cast %41 : i32 to index
    %c2_35 = arith.constant 2 : index
    %c0_36 = arith.constant 0 : index
    %43 = vector.load %arg2[%c0_34, %42, %c2_35, %c0_36] : memref<1x11x11x32xbf16, #tpu.memory_space<vmem>>, vector<1x8x8x32xbf16>
    %44 = vector.shape_cast %43 : vector<1x8x8x32xbf16> to vector<8x8x32xbf16>
    %c2_i32_37 = arith.constant 2 : i32
    %45 = arith.addi %0, %c2_i32_37 : i32
    %c0_38 = arith.constant 0 : index
    %46 = arith.index_cast %45 : i32 to index
    %c3_39 = arith.constant 3 : index
    %c0_40 = arith.constant 0 : index
    %47 = vector.load %arg2[%c0_38, %46, %c3_39, %c0_40] : memref<1x11x11x32xbf16, #tpu.memory_space<vmem>>, vector<1x8x8x32xbf16>
    %48 = vector.shape_cast %47 : vector<1x8x8x32xbf16> to vector<8x8x32xbf16>
    %c3_i32 = arith.constant 3 : i32
    %49 = arith.addi %0, %c3_i32 : i32
    %c0_41 = arith.constant 0 : index
    %50 = arith.index_cast %49 : i32 to index
    %c0_42 = arith.constant 0 : index
    %c0_43 = arith.constant 0 : index
    %51 = vector.load %arg2[%c0_41, %50, %c0_42, %c0_43] : memref<1x11x11x32xbf16, #tpu.memory_space<vmem>>, vector<1x8x8x32xbf16>
    %52 = vector.shape_cast %51 : vector<1x8x8x32xbf16> to vector<8x8x32xbf16>
    %c3_i32_44 = arith.constant 3 : i32
    %53 = arith.addi %0, %c3_i32_44 : i32
    %c0_45 = arith.constant 0 : index
    %54 = arith.index_cast %53 : i32 to index
    %c1_46 = arith.constant 1 : index
    %c0_47 = arith.constant 0 : index
    %55 = vector.load %arg2[%c0_45, %54, %c1_46, %c0_47] : memref<1x11x11x32xbf16, #tpu.memory_space<vmem>>, vector<1x8x8x32xbf16>
    %56 = vector.shape_cast %55 : vector<1x8x8x32xbf16> to vector<8x8x32xbf16>
    %c3_i32_48 = arith.constant 3 : i32
    %57 = arith.addi %0, %c3_i32_48 : i32
    %c0_49 = arith.constant 0 : index
    %58 = arith.index_cast %57 : i32 to index
    %c2_50 = arith.constant 2 : index
    %c0_51 = arith.constant 0 : index
    %59 = vector.load %arg2[%c0_49, %58, %c2_50, %c0_51] : memref<1x11x11x32xbf16, #tpu.memory_space<vmem>>, vector<1x8x8x32xbf16>
    %60 = vector.shape_cast %59 : vector<1x8x8x32xbf16> to vector<8x8x32xbf16>
    %c3_i32_52 = arith.constant 3 : i32
    %61 = arith.addi %0, %c3_i32_52 : i32
    %c0_53 = arith.constant 0 : index
    %62 = arith.index_cast %61 : i32 to index
    %c3_54 = arith.constant 3 : index
    %c0_55 = arith.constant 0 : index
    %63 = vector.load %arg2[%c0_53, %62, %c3_54, %c0_55] : memref<1x11x11x32xbf16, #tpu.memory_space<vmem>>, vector<1x8x8x32xbf16>
    %64 = vector.shape_cast %63 : vector<1x8x8x32xbf16> to vector<8x8x32xbf16>
    %65 = vector.shape_cast %4 : vector<8x8x32xbf16> to vector<64x32xbf16>
    %c0_56 = arith.constant 0 : index
    %c0_57 = arith.constant 0 : index
    %66 = vector.load %arg3[%c0_56, %c0_57] : memref<512x128xbf16, #tpu.memory_space<vmem>>, vector<32x128xbf16>
    %cst = arith.constant dense<0.000000e+00> : vector<64x128xf32>
    %67 = tpu.matmul %65, %66, %cst {dimension_numbers = #tpu.dot_dimension_numbers<[1], [0], [0], [1], [0, 0, 1, 1], [], []>} : vector<64x32xbf16>, vector<32x128xbf16>, vector<64x128xf32> -> vector<64x128xf32>
    %68 = vector.shape_cast %8 : vector<8x8x32xbf16> to vector<64x32xbf16>
    %c32 = arith.constant 32 : index
    %c0_58 = arith.constant 0 : index
    %69 = vector.load %arg3[%c32, %c0_58] : memref<512x128xbf16, #tpu.memory_space<vmem>>, vector<32x128xbf16>
    %cst_59 = arith.constant dense<0.000000e+00> : vector<64x128xf32>
    %70 = tpu.matmul %68, %69, %cst_59 {dimension_numbers = #tpu.dot_dimension_numbers<[1], [0], [0], [1], [0, 0, 1, 1], [], []>} : vector<64x32xbf16>, vector<32x128xbf16>, vector<64x128xf32> -> vector<64x128xf32>
    %71 = arith.addf %67, %70 : vector<64x128xf32>
    %72 = vector.shape_cast %12 : vector<8x8x32xbf16> to vector<64x32xbf16>
    %c64 = arith.constant 64 : index
    %c0_60 = arith.constant 0 : index
    %73 = vector.load %arg3[%c64, %c0_60] : memref<512x128xbf16, #tpu.memory_space<vmem>>, vector<32x128xbf16>
    %cst_61 = arith.constant dense<0.000000e+00> : vector<64x128xf32>
    %74 = tpu.matmul %72, %73, %cst_61 {dimension_numbers = #tpu.dot_dimension_numbers<[1], [0], [0], [1], [0, 0, 1, 1], [], []>} : vector<64x32xbf16>, vector<32x128xbf16>, vector<64x128xf32> -> vector<64x128xf32>
    %75 = arith.addf %71, %74 : vector<64x128xf32>
    %76 = vector.shape_cast %16 : vector<8x8x32xbf16> to vector<64x32xbf16>
    %c96 = arith.constant 96 : index
    %c0_62 = arith.constant 0 : index
    %77 = vector.load %arg3[%c96, %c0_62] : memref<512x128xbf16, #tpu.memory_space<vmem>>, vector<32x128xbf16>
    %cst_63 = arith.constant dense<0.000000e+00> : vector<64x128xf32>
    %78 = tpu.matmul %76, %77, %cst_63 {dimension_numbers = #tpu.dot_dimension_numbers<[1], [0], [0], [1], [0, 0, 1, 1], [], []>} : vector<64x32xbf16>, vector<32x128xbf16>, vector<64x128xf32> -> vector<64x128xf32>
    %79 = arith.addf %75, %78 : vector<64x128xf32>
    %80 = vector.shape_cast %20 : vector<8x8x32xbf16> to vector<64x32xbf16>
    %c128 = arith.constant 128 : index
    %c0_64 = arith.constant 0 : index
    %81 = vector.load %arg3[%c128, %c0_64] : memref<512x128xbf16, #tpu.memory_space<vmem>>, vector<32x128xbf16>
    %cst_65 = arith.constant dense<0.000000e+00> : vector<64x128xf32>
    %82 = tpu.matmul %80, %81, %cst_65 {dimension_numbers = #tpu.dot_dimension_numbers<[1], [0], [0], [1], [0, 0, 1, 1], [], []>} : vector<64x32xbf16>, vector<32x128xbf16>, vector<64x128xf32> -> vector<64x128xf32>
    %83 = arith.addf %79, %82 : vector<64x128xf32>
    %84 = vector.shape_cast %24 : vector<8x8x32xbf16> to vector<64x32xbf16>
    %c160 = arith.constant 160 : index
    %c0_66 = arith.constant 0 : index
    %85 = vector.load %arg3[%c160, %c0_66] : memref<512x128xbf16, #tpu.memory_space<vmem>>, vector<32x128xbf16>
    %cst_67 = arith.constant dense<0.000000e+00> : vector<64x128xf32>
    %86 = tpu.matmul %84, %85, %cst_67 {dimension_numbers = #tpu.dot_dimension_numbers<[1], [0], [0], [1], [0, 0, 1, 1], [], []>} : vector<64x32xbf16>, vector<32x128xbf16>, vector<64x128xf32> -> vector<64x128xf32>
    %87 = arith.addf %83, %86 : vector<64x128xf32>
    %88 = vector.shape_cast %28 : vector<8x8x32xbf16> to vector<64x32xbf16>
    %c192 = arith.constant 192 : index
    %c0_68 = arith.constant 0 : index
    %89 = vector.load %arg3[%c192, %c0_68] : memref<512x128xbf16, #tpu.memory_space<vmem>>, vector<32x128xbf16>
    %cst_69 = arith.constant dense<0.000000e+00> : vector<64x128xf32>
    %90 = tpu.matmul %88, %89, %cst_69 {dimension_numbers = #tpu.dot_dimension_numbers<[1], [0], [0], [1], [0, 0, 1, 1], [], []>} : vector<64x32xbf16>, vector<32x128xbf16>, vector<64x128xf32> -> vector<64x128xf32>
    %91 = arith.addf %87, %90 : vector<64x128xf32>
    %92 = vector.shape_cast %32 : vector<8x8x32xbf16> to vector<64x32xbf16>
    %c224 = arith.constant 224 : index
    %c0_70 = arith.constant 0 : index
    %93 = vector.load %arg3[%c224, %c0_70] : memref<512x128xbf16, #tpu.memory_space<vmem>>, vector<32x128xbf16>
    %cst_71 = arith.constant dense<0.000000e+00> : vector<64x128xf32>
    %94 = tpu.matmul %92, %93, %cst_71 {dimension_numbers = #tpu.dot_dimension_numbers<[1], [0], [0], [1], [0, 0, 1, 1], [], []>} : vector<64x32xbf16>, vector<32x128xbf16>, vector<64x128xf32> -> vector<64x128xf32>
    %95 = arith.addf %91, %94 : vector<64x128xf32>
    %96 = vector.shape_cast %36 : vector<8x8x32xbf16> to vector<64x32xbf16>
    %c256 = arith.constant 256 : index
    %c0_72 = arith.constant 0 : index
    %97 = vector.load %arg3[%c256, %c0_72] : memref<512x128xbf16, #tpu.memory_space<vmem>>, vector<32x128xbf16>
    %cst_73 = arith.constant dense<0.000000e+00> : vector<64x128xf32>
    %98 = tpu.matmul %96, %97, %cst_73 {dimension_numbers = #tpu.dot_dimension_numbers<[1], [0], [0], [1], [0, 0, 1, 1], [], []>} : vector<64x32xbf16>, vector<32x128xbf16>, vector<64x128xf32> -> vector<64x128xf32>
    %99 = arith.addf %95, %98 : vector<64x128xf32>
    %100 = vector.shape_cast %40 : vector<8x8x32xbf16> to vector<64x32xbf16>
    %c288 = arith.constant 288 : index
    %c0_74 = arith.constant 0 : index
    %101 = vector.load %arg3[%c288, %c0_74] : memref<512x128xbf16, #tpu.memory_space<vmem>>, vector<32x128xbf16>
    %cst_75 = arith.constant dense<0.000000e+00> : vector<64x128xf32>
    %102 = tpu.matmul %100, %101, %cst_75 {dimension_numbers = #tpu.dot_dimension_numbers<[1], [0], [0], [1], [0, 0, 1, 1], [], []>} : vector<64x32xbf16>, vector<32x128xbf16>, vector<64x128xf32> -> vector<64x128xf32>
    %103 = arith.addf %99, %102 : vector<64x128xf32>
    %104 = vector.shape_cast %44 : vector<8x8x32xbf16> to vector<64x32xbf16>
    %c320 = arith.constant 320 : index
    %c0_76 = arith.constant 0 : index
    %105 = vector.load %arg3[%c320, %c0_76] : memref<512x128xbf16, #tpu.memory_space<vmem>>, vector<32x128xbf16>
    %cst_77 = arith.constant dense<0.000000e+00> : vector<64x128xf32>
    %106 = tpu.matmul %104, %105, %cst_77 {dimension_numbers = #tpu.dot_dimension_numbers<[1], [0], [0], [1], [0, 0, 1, 1], [], []>} : vector<64x32xbf16>, vector<32x128xbf16>, vector<64x128xf32> -> vector<64x128xf32>
    %107 = arith.addf %103, %106 : vector<64x128xf32>
    %108 = vector.shape_cast %48 : vector<8x8x32xbf16> to vector<64x32xbf16>
    %c352 = arith.constant 352 : index
    %c0_78 = arith.constant 0 : index
    %109 = vector.load %arg3[%c352, %c0_78] : memref<512x128xbf16, #tpu.memory_space<vmem>>, vector<32x128xbf16>
    %cst_79 = arith.constant dense<0.000000e+00> : vector<64x128xf32>
    %110 = tpu.matmul %108, %109, %cst_79 {dimension_numbers = #tpu.dot_dimension_numbers<[1], [0], [0], [1], [0, 0, 1, 1], [], []>} : vector<64x32xbf16>, vector<32x128xbf16>, vector<64x128xf32> -> vector<64x128xf32>
    %111 = arith.addf %107, %110 : vector<64x128xf32>
    %112 = vector.shape_cast %52 : vector<8x8x32xbf16> to vector<64x32xbf16>
    %c384 = arith.constant 384 : index
    %c0_80 = arith.constant 0 : index
    %113 = vector.load %arg3[%c384, %c0_80] : memref<512x128xbf16, #tpu.memory_space<vmem>>, vector<32x128xbf16>
    %cst_81 = arith.constant dense<0.000000e+00> : vector<64x128xf32>
    %114 = tpu.matmul %112, %113, %cst_81 {dimension_numbers = #tpu.dot_dimension_numbers<[1], [0], [0], [1], [0, 0, 1, 1], [], []>} : vector<64x32xbf16>, vector<32x128xbf16>, vector<64x128xf32> -> vector<64x128xf32>
    %115 = arith.addf %111, %114 : vector<64x128xf32>
    %116 = vector.shape_cast %56 : vector<8x8x32xbf16> to vector<64x32xbf16>
    %c416 = arith.constant 416 : index
    %c0_82 = arith.constant 0 : index
    %117 = vector.load %arg3[%c416, %c0_82] : memref<512x128xbf16, #tpu.memory_space<vmem>>, vector<32x128xbf16>
    %cst_83 = arith.constant dense<0.000000e+00> : vector<64x128xf32>
    %118 = tpu.matmul %116, %117, %cst_83 {dimension_numbers = #tpu.dot_dimension_numbers<[1], [0], [0], [1], [0, 0, 1, 1], [], []>} : vector<64x32xbf16>, vector<32x128xbf16>, vector<64x128xf32> -> vector<64x128xf32>
    %119 = arith.addf %115, %118 : vector<64x128xf32>
    %120 = vector.shape_cast %60 : vector<8x8x32xbf16> to vector<64x32xbf16>
    %c448 = arith.constant 448 : index
    %c0_84 = arith.constant 0 : index
    %121 = vector.load %arg3[%c448, %c0_84] : memref<512x128xbf16, #tpu.memory_space<vmem>>, vector<32x128xbf16>
    %cst_85 = arith.constant dense<0.000000e+00> : vector<64x128xf32>
    %122 = tpu.matmul %120, %121, %cst_85 {dimension_numbers = #tpu.dot_dimension_numbers<[1], [0], [0], [1], [0, 0, 1, 1], [], []>} : vector<64x32xbf16>, vector<32x128xbf16>, vector<64x128xf32> -> vector<64x128xf32>
    %123 = arith.addf %119, %122 : vector<64x128xf32>
    %124 = vector.shape_cast %64 : vector<8x8x32xbf16> to vector<64x32xbf16>
    %c480 = arith.constant 480 : index
    %c0_86 = arith.constant 0 : index
    %125 = vector.load %arg3[%c480, %c0_86] : memref<512x128xbf16, #tpu.memory_space<vmem>>, vector<32x128xbf16>
    %cst_87 = arith.constant dense<0.000000e+00> : vector<64x128xf32>
    %126 = tpu.matmul %124, %125, %cst_87 {dimension_numbers = #tpu.dot_dimension_numbers<[1], [0], [0], [1], [0, 0, 1, 1], [], []>} : vector<64x32xbf16>, vector<32x128xbf16>, vector<64x128xf32> -> vector<64x128xf32>
    %127 = arith.addf %123, %126 : vector<64x128xf32>
    %c0_88 = arith.constant 0 : index
    %c0_89 = arith.constant 0 : index
    %128 = vector.load %arg4[%c0_88, %c0_89] : memref<1x128xf32, #tpu.memory_space<vmem>>, vector<1x128xf32>
    %129 = vector.broadcast %128 : vector<1x128xf32> to vector<64x128xf32>
    %130 = arith.addf %127, %129 : vector<64x128xf32>
    %cst_90 = arith.constant 0.000000e+00 : f32
    %131 = vector.broadcast %cst_90 : f32 to vector<64x128xf32>
    %132 = arith.maximumf %130, %131 : vector<64x128xf32>
    %133 = vector.shape_cast %132 : vector<64x128xf32> to vector<1x8x8x128xf32>
    %134 = arith.truncf %133 : vector<1x8x8x128xf32> to vector<1x8x8x128xbf16>
    %c0_91 = arith.constant 0 : index
    %c0_92 = arith.constant 0 : index
    %c0_93 = arith.constant 0 : index
    %c0_94 = arith.constant 0 : index
    %135 = vector.load %arg5[%c0_91, %c0_92, %c0_93, %c0_94] : memref<1x8x8x128xbf16, #tpu.memory_space<vmem>>, vector<1x8x8x128xbf16>
    tpu.vector_store %arg5[%c0_91, %c0_92, %c0_93, %c0_94], %134 {strides = array<i32>} : memref<1x8x8x128xbf16, #tpu.memory_space<vmem>>, vector<1x8x8x128xbf16>,
    return
  }
  func.func @transform_0(%arg0: i32, %arg1: i32) -> (i32, i32, i32, i32) {
    %c0_i32 = arith.constant 0 : i32
    %c0_i32_0 = arith.constant 0 : i32
    %c0_i32_1 = arith.constant 0 : i32
    %c0_i32_2 = arith.constant 0 : i32
    return %arg0, %c0_i32, %c0_i32_0, %c0_i32_1 : i32, i32, i32, i32
  }
  func.func @transform_1(%arg0: i32, %arg1: i32) -> (i32, i32) {
    %c0_i32 = arith.constant 0 : i32
    %c0_i32_0 = arith.constant 0 : i32
    %c0_i32_1 = arith.constant 0 : i32
    return %c0_i32, %c0_i32_0 : i32, i32
  }
  func.func @transform_2(%arg0: i32, %arg1: i32) -> (i32, i32) {
    %c0_i32 = arith.constant 0 : i32
    %c0_i32_0 = arith.constant 0 : i32
    %c0_i32_1 = arith.constant 0 : i32
    return %c0_i32, %c0_i32_0 : i32, i32
  }
  func.func @transform_3(%arg0: i32, %arg1: i32) -> (i32, i32, i32, i32) {
    %c0_i32 = arith.constant 0 : i32
    %c0_i32_0 = arith.constant 0 : i32
    %c0_i32_1 = arith.constant 0 : i32
    return %arg0, %arg1, %c0_i32, %c0_i32_0 : i32, i32, i32, i32
  }
}

module attributes {stable_mosaic.version = 11 : i64} {
  func.func @_maxpool_kernel(%arg0: i32, %arg1: i32, %arg2: memref<1x5x5x512xbf16, #tpu.memory_space<vmem>>, %arg3: memref<1x4x4x128xbf16, #tpu.memory_space<vmem>>) attributes {dimension_semantics = [#tpu.dimension_semantics<parallel>, #tpu.dimension_semantics<parallel>], iteration_bounds = array<i64: 2, 1>, scalar_prefetch = 0 : i64, scratch_operands = 0 : i64, tpu.core_type = #tpu.core_type<tc>, window_params = [{transform_indices = @transform_0, window_bounds = array<i64: 1, 5, 5, 512>}, {transform_indices = @transform_1, window_bounds = array<i64: 1, 4, 4, 128>}]} {
    %c4_i32 = arith.constant 4 : i32
    %0 = arith.muli %arg1, %c4_i32 : i32
    %c0_i32 = arith.constant 0 : i32
    %1 = arith.addi %0, %c0_i32 : i32
    %c0 = arith.constant 0 : index
    %2 = arith.index_cast %1 : i32 to index
    %c0_0 = arith.constant 0 : index
    %c0_1 = arith.constant 0 : index
    %3 = vector.load %arg2[%c0, %2, %c0_0, %c0_1] : memref<1x5x5x512xbf16, #tpu.memory_space<vmem>>, vector<1x4x4x128xbf16>
    %4 = vector.shape_cast %3 : vector<1x4x4x128xbf16> to vector<4x4x128xbf16>
    %c0_i32_2 = arith.constant 0 : i32
    %5 = arith.addi %0, %c0_i32_2 : i32
    %c0_3 = arith.constant 0 : index
    %6 = arith.index_cast %5 : i32 to index
    %c0_4 = arith.constant 0 : index
    %c128 = arith.constant 128 : index
    %7 = vector.load %arg2[%c0_3, %6, %c0_4, %c128] : memref<1x5x5x512xbf16, #tpu.memory_space<vmem>>, vector<1x4x4x128xbf16>
    %8 = vector.shape_cast %7 : vector<1x4x4x128xbf16> to vector<4x4x128xbf16>
    %9 = arith.maximumf %4, %8 : vector<4x4x128xbf16>
    %c0_i32_5 = arith.constant 0 : i32
    %10 = arith.addi %0, %c0_i32_5 : i32
    %c0_6 = arith.constant 0 : index
    %11 = arith.index_cast %10 : i32 to index
    %c1 = arith.constant 1 : index
    %c0_7 = arith.constant 0 : index
    %12 = vector.load %arg2[%c0_6, %11, %c1, %c0_7] : memref<1x5x5x512xbf16, #tpu.memory_space<vmem>>, vector<1x4x4x128xbf16>
    %13 = vector.shape_cast %12 : vector<1x4x4x128xbf16> to vector<4x4x128xbf16>
    %14 = arith.maximumf %9, %13 : vector<4x4x128xbf16>
    %c0_i32_8 = arith.constant 0 : i32
    %15 = arith.addi %0, %c0_i32_8 : i32
    %c0_9 = arith.constant 0 : index
    %16 = arith.index_cast %15 : i32 to index
    %c0_10 = arith.constant 0 : index
    %c256 = arith.constant 256 : index
    %17 = vector.load %arg2[%c0_9, %16, %c0_10, %c256] : memref<1x5x5x512xbf16, #tpu.memory_space<vmem>>, vector<1x4x4x128xbf16>
    %18 = vector.shape_cast %17 : vector<1x4x4x128xbf16> to vector<4x4x128xbf16>
    %19 = arith.maximumf %14, %18 : vector<4x4x128xbf16>
    %c0_i32_11 = arith.constant 0 : i32
    %20 = arith.addi %0, %c0_i32_11 : i32
    %c0_12 = arith.constant 0 : index
    %21 = arith.index_cast %20 : i32 to index
    %c0_13 = arith.constant 0 : index
    %c384 = arith.constant 384 : index
    %22 = vector.load %arg2[%c0_12, %21, %c0_13, %c384] : memref<1x5x5x512xbf16, #tpu.memory_space<vmem>>, vector<1x4x4x128xbf16>
    %23 = vector.shape_cast %22 : vector<1x4x4x128xbf16> to vector<4x4x128xbf16>
    %24 = arith.maximumf %19, %23 : vector<4x4x128xbf16>
    %c0_i32_14 = arith.constant 0 : i32
    %25 = arith.addi %0, %c0_i32_14 : i32
    %c0_15 = arith.constant 0 : index
    %26 = arith.index_cast %25 : i32 to index
    %c1_16 = arith.constant 1 : index
    %c256_17 = arith.constant 256 : index
    %27 = vector.load %arg2[%c0_15, %26, %c1_16, %c256_17] : memref<1x5x5x512xbf16, #tpu.memory_space<vmem>>, vector<1x4x4x128xbf16>
    %28 = vector.shape_cast %27 : vector<1x4x4x128xbf16> to vector<4x4x128xbf16>
    %29 = arith.maximumf %24, %28 : vector<4x4x128xbf16>
    %c1_i32 = arith.constant 1 : i32
    %30 = arith.addi %0, %c1_i32 : i32
    %c0_18 = arith.constant 0 : index
    %31 = arith.index_cast %30 : i32 to index
    %c0_19 = arith.constant 0 : index
    %c0_20 = arith.constant 0 : index
    %32 = vector.load %arg2[%c0_18, %31, %c0_19, %c0_20] : memref<1x5x5x512xbf16, #tpu.memory_space<vmem>>, vector<1x4x4x128xbf16>
    %33 = vector.shape_cast %32 : vector<1x4x4x128xbf16> to vector<4x4x128xbf16>
    %34 = arith.maximumf %29, %33 : vector<4x4x128xbf16>
    %c1_i32_21 = arith.constant 1 : i32
    %35 = arith.addi %0, %c1_i32_21 : i32
    %c0_22 = arith.constant 0 : index
    %36 = arith.index_cast %35 : i32 to index
    %c0_23 = arith.constant 0 : index
    %c128_24 = arith.constant 128 : index
    %37 = vector.load %arg2[%c0_22, %36, %c0_23, %c128_24] : memref<1x5x5x512xbf16, #tpu.memory_space<vmem>>, vector<1x4x4x128xbf16>
    %38 = vector.shape_cast %37 : vector<1x4x4x128xbf16> to vector<4x4x128xbf16>
    %39 = arith.maximumf %34, %38 : vector<4x4x128xbf16>
    %c1_i32_25 = arith.constant 1 : i32
    %40 = arith.addi %0, %c1_i32_25 : i32
    %c0_26 = arith.constant 0 : index
    %41 = arith.index_cast %40 : i32 to index
    %c1_27 = arith.constant 1 : index
    %c0_28 = arith.constant 0 : index
    %42 = vector.load %arg2[%c0_26, %41, %c1_27, %c0_28] : memref<1x5x5x512xbf16, #tpu.memory_space<vmem>>, vector<1x4x4x128xbf16>
    %43 = vector.shape_cast %42 : vector<1x4x4x128xbf16> to vector<4x4x128xbf16>
    %44 = arith.maximumf %39, %43 : vector<4x4x128xbf16>
    %45 = vector.shape_cast %44 : vector<4x4x128xbf16> to vector<1x4x4x128xbf16>
    %c0_29 = arith.constant 0 : index
    %c0_30 = arith.constant 0 : index
    %c0_31 = arith.constant 0 : index
    %c0_32 = arith.constant 0 : index
    %46 = vector.load %arg3[%c0_29, %c0_30, %c0_31, %c0_32] : memref<1x4x4x128xbf16, #tpu.memory_space<vmem>>, vector<1x4x4x128xbf16>
    tpu.vector_store %arg3[%c0_29, %c0_30, %c0_31, %c0_32], %45 {strides = array<i32>} : memref<1x4x4x128xbf16, #tpu.memory_space<vmem>>, vector<1x4x4x128xbf16>,
    return
  }
  func.func @transform_0(%arg0: i32, %arg1: i32) -> (i32, i32, i32, i32) {
    %c0_i32 = arith.constant 0 : i32
    %c0_i32_0 = arith.constant 0 : i32
    %c0_i32_1 = arith.constant 0 : i32
    %c0_i32_2 = arith.constant 0 : i32
    return %arg0, %c0_i32, %c0_i32_0, %c0_i32_1 : i32, i32, i32, i32
  }
  func.func @transform_1(%arg0: i32, %arg1: i32) -> (i32, i32, i32, i32) {
    %c0_i32 = arith.constant 0 : i32
    %c0_i32_0 = arith.constant 0 : i32
    %c0_i32_1 = arith.constant 0 : i32
    return %arg0, %arg1, %c0_i32, %c0_i32_0 : i32, i32, i32, i32
  }
}

module attributes {stable_mosaic.version = 11 : i64} {
  func.func @_mm_kernel(%arg0: i32, %arg1: i32, %arg2: i32, %arg3: memref<32x128xbf16, #tpu.memory_space<vmem>>, %arg4: memref<128x256xbf16, #tpu.memory_space<vmem>>, %arg5: memref<1x256xf32, #tpu.memory_space<vmem>>, %arg6: memref<32x256xbf16, #tpu.memory_space<vmem>>, %arg7: memref<32x256xf32, #tpu.memory_space<vmem>>) attributes {dimension_semantics = [#tpu.dimension_semantics<parallel>, #tpu.dimension_semantics<parallel>, #tpu.dimension_semantics<arbitrary>], iteration_bounds = array<i64: 1, 1, 1>, scalar_prefetch = 0 : i64, scratch_operands = 1 : i64, tpu.core_type = #tpu.core_type<tc>, window_params = [{transform_indices = @transform_0, window_bounds = array<i64: 32, 128>}, {transform_indices = @transform_1, window_bounds = array<i64: 128, 256>}, {transform_indices = @transform_2, window_bounds = array<i64: 1, 256>}, {transform_indices = @transform_3, window_bounds = array<i64: 32, 256>}]} {
    %c0_i32 = arith.constant 0 : i32
    %0 = arith.cmpi eq, %arg2, %c0_i32 : i32
    %1 = arith.extui %0 : i1 to i32
    %c0_i32_0 = arith.constant 0 : i32
    %2 = arith.cmpi ne, %1, %c0_i32_0 : i32
    scf.if %2 {
      %cst_10 = arith.constant 0.000000e+00 : f32
      %12 = vector.broadcast %cst_10 : f32 to vector<32x256xf32>
      %c0_11 = arith.constant 0 : index
      %c0_12 = arith.constant 0 : index
      %13 = vector.load %arg7[%c0_11, %c0_12] : memref<32x256xf32, #tpu.memory_space<vmem>>, vector<32x256xf32>
      tpu.vector_store %arg7[%c0_11, %c0_12], %12 {strides = array<i32>} : memref<32x256xf32, #tpu.memory_space<vmem>>, vector<32x256xf32>,
    } else {
    }
    %c0 = arith.constant 0 : index
    %c0_1 = arith.constant 0 : index
    %3 = vector.load %arg7[%c0, %c0_1] : memref<32x256xf32, #tpu.memory_space<vmem>>, vector<32x256xf32>
    %c0_2 = arith.constant 0 : index
    %c0_3 = arith.constant 0 : index
    %4 = vector.load %arg3[%c0_2, %c0_3] : memref<32x128xbf16, #tpu.memory_space<vmem>>, vector<32x128xbf16>
    %c0_4 = arith.constant 0 : index
    %c0_5 = arith.constant 0 : index
    %5 = vector.load %arg4[%c0_4, %c0_5] : memref<128x256xbf16, #tpu.memory_space<vmem>>, vector<128x256xbf16>
    %cst = arith.constant dense<0.000000e+00> : vector<32x256xf32>
    %6 = tpu.matmul %4, %5, %cst {dimension_numbers = #tpu.dot_dimension_numbers<[1], [0], [0], [1], [0, 0, 1, 1], [], []>} : vector<32x128xbf16>, vector<128x256xbf16>, vector<32x256xf32> -> vector<32x256xf32>
    %7 = arith.addf %3, %6 : vector<32x256xf32>
    %c0_6 = arith.constant 0 : index
    %c0_7 = arith.constant 0 : index
    %8 = vector.load %arg7[%c0_6, %c0_7] : memref<32x256xf32, #tpu.memory_space<vmem>>, vector<32x256xf32>
    tpu.vector_store %arg7[%c0_6, %c0_7], %7 {strides = array<i32>} : memref<32x256xf32, #tpu.memory_space<vmem>>, vector<32x256xf32>,
    %c0_i32_8 = arith.constant 0 : i32
    %9 = arith.cmpi eq, %arg2, %c0_i32_8 : i32
    %10 = arith.extui %9 : i1 to i32
    %c0_i32_9 = arith.constant 0 : i32
    %11 = arith.cmpi ne, %10, %c0_i32_9 : i32
    scf.if %11 {
      %c0_10 = arith.constant 0 : index
      %c0_11 = arith.constant 0 : index
      %12 = vector.load %arg7[%c0_10, %c0_11] : memref<32x256xf32, #tpu.memory_space<vmem>>, vector<32x256xf32>
      %c0_12 = arith.constant 0 : index
      %c0_13 = arith.constant 0 : index
      %13 = vector.load %arg5[%c0_12, %c0_13] : memref<1x256xf32, #tpu.memory_space<vmem>>, vector<1x256xf32>
      %14 = vector.broadcast %13 : vector<1x256xf32> to vector<32x256xf32>
      %15 = arith.addf %12, %14 : vector<32x256xf32>
      %16 = arith.truncf %15 : vector<32x256xf32> to vector<32x256xbf16>
      %c0_14 = arith.constant 0 : index
      %c0_15 = arith.constant 0 : index
      %17 = vector.load %arg6[%c0_14, %c0_15] : memref<32x256xbf16, #tpu.memory_space<vmem>>, vector<32x256xbf16>
      tpu.vector_store %arg6[%c0_14, %c0_15], %16 {strides = array<i32>} : memref<32x256xbf16, #tpu.memory_space<vmem>>, vector<32x256xbf16>,
    } else {
    }
    return
  }
  func.func @transform_0(%arg0: i32, %arg1: i32, %arg2: i32) -> (i32, i32) {
    %c0_i32 = arith.constant 0 : i32
    return %arg0, %arg2 : i32, i32
  }
  func.func @transform_1(%arg0: i32, %arg1: i32, %arg2: i32) -> (i32, i32) {
    %c0_i32 = arith.constant 0 : i32
    return %arg2, %arg1 : i32, i32
  }
  func.func @transform_2(%arg0: i32, %arg1: i32, %arg2: i32) -> (i32, i32) {
    %c0_i32 = arith.constant 0 : i32
    %c0_i32_0 = arith.constant 0 : i32
    return %c0_i32, %arg1 : i32, i32
  }
  func.func @transform_3(%arg0: i32, %arg1: i32, %arg2: i32) -> (i32, i32) {
    %c0_i32 = arith.constant 0 : i32
    return %arg0, %arg1 : i32, i32
  }
}

module attributes {stable_mosaic.version = 11 : i64} {
  func.func @_mm_kernel(%arg0: i32, %arg1: i32, %arg2: i32, %arg3: memref<32x128xbf16, #tpu.memory_space<vmem>>, %arg4: memref<128x128xbf16, #tpu.memory_space<vmem>>, %arg5: memref<1x128xf32, #tpu.memory_space<vmem>>, %arg6: memref<32x128xbf16, #tpu.memory_space<vmem>>, %arg7: memref<32x128xf32, #tpu.memory_space<vmem>>) attributes {dimension_semantics = [#tpu.dimension_semantics<parallel>, #tpu.dimension_semantics<parallel>, #tpu.dimension_semantics<arbitrary>], iteration_bounds = array<i64: 1, 1, 1>, scalar_prefetch = 0 : i64, scratch_operands = 1 : i64, tpu.core_type = #tpu.core_type<tc>, window_params = [{transform_indices = @transform_0, window_bounds = array<i64: 32, 128>}, {transform_indices = @transform_1, window_bounds = array<i64: 128, 128>}, {transform_indices = @transform_2, window_bounds = array<i64: 1, 128>}, {transform_indices = @transform_3, window_bounds = array<i64: 32, 128>}]} {
    %c0_i32 = arith.constant 0 : i32
    %0 = arith.cmpi eq, %arg2, %c0_i32 : i32
    %1 = arith.extui %0 : i1 to i32
    %c0_i32_0 = arith.constant 0 : i32
    %2 = arith.cmpi ne, %1, %c0_i32_0 : i32
    scf.if %2 {
      %cst_10 = arith.constant 0.000000e+00 : f32
      %12 = vector.broadcast %cst_10 : f32 to vector<32x128xf32>
      %c0_11 = arith.constant 0 : index
      %c0_12 = arith.constant 0 : index
      %13 = vector.load %arg7[%c0_11, %c0_12] : memref<32x128xf32, #tpu.memory_space<vmem>>, vector<32x128xf32>
      tpu.vector_store %arg7[%c0_11, %c0_12], %12 {strides = array<i32>} : memref<32x128xf32, #tpu.memory_space<vmem>>, vector<32x128xf32>,
    } else {
    }
    %c0 = arith.constant 0 : index
    %c0_1 = arith.constant 0 : index
    %3 = vector.load %arg7[%c0, %c0_1] : memref<32x128xf32, #tpu.memory_space<vmem>>, vector<32x128xf32>
    %c0_2 = arith.constant 0 : index
    %c0_3 = arith.constant 0 : index
    %4 = vector.load %arg3[%c0_2, %c0_3] : memref<32x128xbf16, #tpu.memory_space<vmem>>, vector<32x128xbf16>
    %c0_4 = arith.constant 0 : index
    %c0_5 = arith.constant 0 : index
    %5 = vector.load %arg4[%c0_4, %c0_5] : memref<128x128xbf16, #tpu.memory_space<vmem>>, vector<128x128xbf16>
    %cst = arith.constant dense<0.000000e+00> : vector<32x128xf32>
    %6 = tpu.matmul %4, %5, %cst {dimension_numbers = #tpu.dot_dimension_numbers<[1], [0], [0], [1], [0, 0, 1, 1], [], []>} : vector<32x128xbf16>, vector<128x128xbf16>, vector<32x128xf32> -> vector<32x128xf32>
    %7 = arith.addf %3, %6 : vector<32x128xf32>
    %c0_6 = arith.constant 0 : index
    %c0_7 = arith.constant 0 : index
    %8 = vector.load %arg7[%c0_6, %c0_7] : memref<32x128xf32, #tpu.memory_space<vmem>>, vector<32x128xf32>
    tpu.vector_store %arg7[%c0_6, %c0_7], %7 {strides = array<i32>} : memref<32x128xf32, #tpu.memory_space<vmem>>, vector<32x128xf32>,
    %c0_i32_8 = arith.constant 0 : i32
    %9 = arith.cmpi eq, %arg2, %c0_i32_8 : i32
    %10 = arith.extui %9 : i1 to i32
    %c0_i32_9 = arith.constant 0 : i32
    %11 = arith.cmpi ne, %10, %c0_i32_9 : i32
    scf.if %11 {
      %c0_10 = arith.constant 0 : index
      %c0_11 = arith.constant 0 : index
      %12 = vector.load %arg7[%c0_10, %c0_11] : memref<32x128xf32, #tpu.memory_space<vmem>>, vector<32x128xf32>
      %c0_12 = arith.constant 0 : index
      %c0_13 = arith.constant 0 : index
      %13 = vector.load %arg5[%c0_12, %c0_13] : memref<1x128xf32, #tpu.memory_space<vmem>>, vector<1x128xf32>
      %14 = vector.broadcast %13 : vector<1x128xf32> to vector<32x128xf32>
      %15 = arith.addf %12, %14 : vector<32x128xf32>
      %cst_14 = arith.constant 0.000000e+00 : f32
      %16 = vector.broadcast %cst_14 : f32 to vector<32x128xf32>
      %17 = arith.maximumf %15, %16 : vector<32x128xf32>
      %18 = arith.truncf %17 : vector<32x128xf32> to vector<32x128xbf16>
      %c0_15 = arith.constant 0 : index
      %c0_16 = arith.constant 0 : index
      %19 = vector.load %arg6[%c0_15, %c0_16] : memref<32x128xbf16, #tpu.memory_space<vmem>>, vector<32x128xbf16>
      tpu.vector_store %arg6[%c0_15, %c0_16], %18 {strides = array<i32>} : memref<32x128xbf16, #tpu.memory_space<vmem>>, vector<32x128xbf16>,
    } else {
    }
    return
  }
  func.func @transform_0(%arg0: i32, %arg1: i32, %arg2: i32) -> (i32, i32) {
    %c0_i32 = arith.constant 0 : i32
    return %arg0, %arg2 : i32, i32
  }
  func.func @transform_1(%arg0: i32, %arg1: i32, %arg2: i32) -> (i32, i32) {
    %c0_i32 = arith.constant 0 : i32
    return %arg2, %arg1 : i32, i32
  }
  func.func @transform_2(%arg0: i32, %arg1: i32, %arg2: i32) -> (i32, i32) {
    %c0_i32 = arith.constant 0 : i32
    %c0_i32_0 = arith.constant 0 : i32
    return %c0_i32, %arg1 : i32, i32
  }
  func.func @transform_3(%arg0: i32, %arg1: i32, %arg2: i32) -> (i32, i32) {
    %c0_i32 = arith.constant 0 : i32
    return %arg0, %arg1 : i32, i32
  }
}

module attributes {stable_mosaic.version = 11 : i64} {
  func.func @_direct_conv_kernel(%arg0: i32, %arg1: i32, %arg2: memref<1x6x6x128xbf16, #tpu.memory_space<vmem>>, %arg3: memref<1152x128xbf16, #tpu.memory_space<vmem>>, %arg4: memref<1x128xf32, #tpu.memory_space<vmem>>, %arg5: memref<1x4x4x128xbf16, #tpu.memory_space<vmem>>) attributes {dimension_semantics = [#tpu.dimension_semantics<parallel>, #tpu.dimension_semantics<parallel>], iteration_bounds = array<i64: 2, 1>, scalar_prefetch = 0 : i64, scratch_operands = 0 : i64, tpu.core_type = #tpu.core_type<tc>, window_params = [{transform_indices = @transform_0, window_bounds = array<i64: 1, 6, 6, 128>}, {pipeline_mode = #tpu.pipeline_mode<synchronous>, transform_indices = @transform_1, window_bounds = array<i64: 1152, 128>}, {pipeline_mode = #tpu.pipeline_mode<synchronous>, transform_indices = @transform_2, window_bounds = array<i64: 1, 128>}, {transform_indices = @transform_3, window_bounds = array<i64: 1, 4, 4, 128>}]} {
    %c4_i32 = arith.constant 4 : i32
    %0 = arith.muli %arg1, %c4_i32 : i32
    %c0_i32 = arith.constant 0 : i32
    %1 = arith.addi %0, %c0_i32 : i32
    %c0 = arith.constant 0 : index
    %2 = arith.index_cast %1 : i32 to index
    %c0_0 = arith.constant 0 : index
    %c0_1 = arith.constant 0 : index
    %3 = vector.load %arg2[%c0, %2, %c0_0, %c0_1] : memref<1x6x6x128xbf16, #tpu.memory_space<vmem>>, vector<1x4x4x128xbf16>
    %4 = vector.shape_cast %3 : vector<1x4x4x128xbf16> to vector<4x4x128xbf16>
    %c0_i32_2 = arith.constant 0 : i32
    %5 = arith.addi %0, %c0_i32_2 : i32
    %c0_3 = arith.constant 0 : index
    %6 = arith.index_cast %5 : i32 to index
    %c1 = arith.constant 1 : index
    %c0_4 = arith.constant 0 : index
    %7 = vector.load %arg2[%c0_3, %6, %c1, %c0_4] : memref<1x6x6x128xbf16, #tpu.memory_space<vmem>>, vector<1x4x4x128xbf16>
    %8 = vector.shape_cast %7 : vector<1x4x4x128xbf16> to vector<4x4x128xbf16>
    %c0_i32_5 = arith.constant 0 : i32
    %9 = arith.addi %0, %c0_i32_5 : i32
    %c0_6 = arith.constant 0 : index
    %10 = arith.index_cast %9 : i32 to index
    %c2 = arith.constant 2 : index
    %c0_7 = arith.constant 0 : index
    %11 = vector.load %arg2[%c0_6, %10, %c2, %c0_7] : memref<1x6x6x128xbf16, #tpu.memory_space<vmem>>, vector<1x4x4x128xbf16>
    %12 = vector.shape_cast %11 : vector<1x4x4x128xbf16> to vector<4x4x128xbf16>
    %c1_i32 = arith.constant 1 : i32
    %13 = arith.addi %0, %c1_i32 : i32
    %c0_8 = arith.constant 0 : index
    %14 = arith.index_cast %13 : i32 to index
    %c0_9 = arith.constant 0 : index
    %c0_10 = arith.constant 0 : index
    %15 = vector.load %arg2[%c0_8, %14, %c0_9, %c0_10] : memref<1x6x6x128xbf16, #tpu.memory_space<vmem>>, vector<1x4x4x128xbf16>
    %16 = vector.shape_cast %15 : vector<1x4x4x128xbf16> to vector<4x4x128xbf16>
    %c1_i32_11 = arith.constant 1 : i32
    %17 = arith.addi %0, %c1_i32_11 : i32
    %c0_12 = arith.constant 0 : index
    %18 = arith.index_cast %17 : i32 to index
    %c1_13 = arith.constant 1 : index
    %c0_14 = arith.constant 0 : index
    %19 = vector.load %arg2[%c0_12, %18, %c1_13, %c0_14] : memref<1x6x6x128xbf16, #tpu.memory_space<vmem>>, vector<1x4x4x128xbf16>
    %20 = vector.shape_cast %19 : vector<1x4x4x128xbf16> to vector<4x4x128xbf16>
    %c1_i32_15 = arith.constant 1 : i32
    %21 = arith.addi %0, %c1_i32_15 : i32
    %c0_16 = arith.constant 0 : index
    %22 = arith.index_cast %21 : i32 to index
    %c2_17 = arith.constant 2 : index
    %c0_18 = arith.constant 0 : index
    %23 = vector.load %arg2[%c0_16, %22, %c2_17, %c0_18] : memref<1x6x6x128xbf16, #tpu.memory_space<vmem>>, vector<1x4x4x128xbf16>
    %24 = vector.shape_cast %23 : vector<1x4x4x128xbf16> to vector<4x4x128xbf16>
    %c2_i32 = arith.constant 2 : i32
    %25 = arith.addi %0, %c2_i32 : i32
    %c0_19 = arith.constant 0 : index
    %26 = arith.index_cast %25 : i32 to index
    %c0_20 = arith.constant 0 : index
    %c0_21 = arith.constant 0 : index
    %27 = vector.load %arg2[%c0_19, %26, %c0_20, %c0_21] : memref<1x6x6x128xbf16, #tpu.memory_space<vmem>>, vector<1x4x4x128xbf16>
    %28 = vector.shape_cast %27 : vector<1x4x4x128xbf16> to vector<4x4x128xbf16>
    %c2_i32_22 = arith.constant 2 : i32
    %29 = arith.addi %0, %c2_i32_22 : i32
    %c0_23 = arith.constant 0 : index
    %30 = arith.index_cast %29 : i32 to index
    %c1_24 = arith.constant 1 : index
    %c0_25 = arith.constant 0 : index
    %31 = vector.load %arg2[%c0_23, %30, %c1_24, %c0_25] : memref<1x6x6x128xbf16, #tpu.memory_space<vmem>>, vector<1x4x4x128xbf16>
    %32 = vector.shape_cast %31 : vector<1x4x4x128xbf16> to vector<4x4x128xbf16>
    %c2_i32_26 = arith.constant 2 : i32
    %33 = arith.addi %0, %c2_i32_26 : i32
    %c0_27 = arith.constant 0 : index
    %34 = arith.index_cast %33 : i32 to index
    %c2_28 = arith.constant 2 : index
    %c0_29 = arith.constant 0 : index
    %35 = vector.load %arg2[%c0_27, %34, %c2_28, %c0_29] : memref<1x6x6x128xbf16, #tpu.memory_space<vmem>>, vector<1x4x4x128xbf16>
    %36 = vector.shape_cast %35 : vector<1x4x4x128xbf16> to vector<4x4x128xbf16>
    %37 = tpu.concatenate %4, %8, %12, %16, %20, %24, %28, %32, %36 in 2 : vector<4x4x128xbf16>, vector<4x4x128xbf16>, vector<4x4x128xbf16>, vector<4x4x128xbf16>, vector<4x4x128xbf16>, vector<4x4x128xbf16>, vector<4x4x128xbf16>, vector<4x4x128xbf16>, vector<4x4x128xbf16> -> vector<4x4x1152xbf16>
    %38 = vector.shape_cast %37 : vector<4x4x1152xbf16> to vector<16x1152xbf16>
    %c0_30 = arith.constant 0 : index
    %c0_31 = arith.constant 0 : index
    %39 = vector.load %arg3[%c0_30, %c0_31] : memref<1152x128xbf16, #tpu.memory_space<vmem>>, vector<1152x128xbf16>
    %cst = arith.constant dense<0.000000e+00> : vector<16x128xf32>
    %40 = tpu.matmul %38, %39, %cst {dimension_numbers = #tpu.dot_dimension_numbers<[1], [0], [0], [1], [0, 0, 1, 1], [], []>} : vector<16x1152xbf16>, vector<1152x128xbf16>, vector<16x128xf32> -> vector<16x128xf32>
    %c0_32 = arith.constant 0 : index
    %c0_33 = arith.constant 0 : index
    %41 = vector.load %arg4[%c0_32, %c0_33] : memref<1x128xf32, #tpu.memory_space<vmem>>, vector<1x128xf32>
    %42 = vector.broadcast %41 : vector<1x128xf32> to vector<16x128xf32>
    %43 = arith.addf %40, %42 : vector<16x128xf32>
    %cst_34 = arith.constant 0.000000e+00 : f32
    %44 = vector.broadcast %cst_34 : f32 to vector<16x128xf32>
    %45 = arith.maximumf %43, %44 : vector<16x128xf32>
    %46 = vector.shape_cast %45 : vector<16x128xf32> to vector<1x4x4x128xf32>
    %47 = arith.truncf %46 : vector<1x4x4x128xf32> to vector<1x4x4x128xbf16>
    %c0_35 = arith.constant 0 : index
    %c0_36 = arith.constant 0 : index
    %c0_37 = arith.constant 0 : index
    %c0_38 = arith.constant 0 : index
    %48 = vector.load %arg5[%c0_35, %c0_36, %c0_37, %c0_38] : memref<1x4x4x128xbf16, #tpu.memory_space<vmem>>, vector<1x4x4x128xbf16>
    tpu.vector_store %arg5[%c0_35, %c0_36, %c0_37, %c0_38], %47 {strides = array<i32>} : memref<1x4x4x128xbf16, #tpu.memory_space<vmem>>, vector<1x4x4x128xbf16>,
    return
  }
  func.func @transform_0(%arg0: i32, %arg1: i32) -> (i32, i32, i32, i32) {
    %c0_i32 = arith.constant 0 : i32
    %c0_i32_0 = arith.constant 0 : i32
    %c0_i32_1 = arith.constant 0 : i32
    %c0_i32_2 = arith.constant 0 : i32
    return %arg0, %c0_i32, %c0_i32_0, %c0_i32_1 : i32, i32, i32, i32
  }
  func.func @transform_1(%arg0: i32, %arg1: i32) -> (i32, i32) {
    %c0_i32 = arith.constant 0 : i32
    %c0_i32_0 = arith.constant 0 : i32
    %c0_i32_1 = arith.constant 0 : i32
    return %c0_i32, %c0_i32_0 : i32, i32
  }
  func.func @transform_2(%arg0: i32, %arg1: i32) -> (i32, i32) {
    %c0_i32 = arith.constant 0 : i32
    %c0_i32_0 = arith.constant 0 : i32
    %c0_i32_1 = arith.constant 0 : i32
    return %c0_i32, %c0_i32_0 : i32, i32
  }
  func.func @transform_3(%arg0: i32, %arg1: i32) -> (i32, i32, i32, i32) {
    %c0_i32 = arith.constant 0 : i32
    %c0_i32_0 = arith.constant 0 : i32
    %c0_i32_1 = arith.constant 0 : i32
    return %arg0, %arg1, %c0_i32, %c0_i32_0 : i32, i32, i32, i32
  }
}

module attributes {stable_mosaic.version = 11 : i64} {
  func.func @_mm_kernel(%arg0: i32, %arg1: i32, %arg2: i32, %arg3: memref<32x128xbf16, #tpu.memory_space<vmem>>, %arg4: memref<128x256xbf16, #tpu.memory_space<vmem>>, %arg5: memref<1x256xf32, #tpu.memory_space<vmem>>, %arg6: memref<32x256xbf16, #tpu.memory_space<vmem>>, %arg7: memref<32x256xbf16, #tpu.memory_space<vmem>>, %arg8: memref<32x256xf32, #tpu.memory_space<vmem>>) attributes {dimension_semantics = [#tpu.dimension_semantics<parallel>, #tpu.dimension_semantics<parallel>, #tpu.dimension_semantics<arbitrary>], iteration_bounds = array<i64: 1, 1, 1>, scalar_prefetch = 0 : i64, scratch_operands = 1 : i64, tpu.core_type = #tpu.core_type<tc>, window_params = [{transform_indices = @transform_0, window_bounds = array<i64: 32, 128>}, {transform_indices = @transform_1, window_bounds = array<i64: 128, 256>}, {transform_indices = @transform_2, window_bounds = array<i64: 1, 256>}, {transform_indices = @transform_3, window_bounds = array<i64: 32, 256>}, {transform_indices = @transform_4, window_bounds = array<i64: 32, 256>}]} {
    %c0_i32 = arith.constant 0 : i32
    %0 = arith.cmpi eq, %arg2, %c0_i32 : i32
    %1 = arith.extui %0 : i1 to i32
    %c0_i32_0 = arith.constant 0 : i32
    %2 = arith.cmpi ne, %1, %c0_i32_0 : i32
    scf.if %2 {
      %cst_10 = arith.constant 0.000000e+00 : f32
      %12 = vector.broadcast %cst_10 : f32 to vector<32x256xf32>
      %c0_11 = arith.constant 0 : index
      %c0_12 = arith.constant 0 : index
      %13 = vector.load %arg8[%c0_11, %c0_12] : memref<32x256xf32, #tpu.memory_space<vmem>>, vector<32x256xf32>
      tpu.vector_store %arg8[%c0_11, %c0_12], %12 {strides = array<i32>} : memref<32x256xf32, #tpu.memory_space<vmem>>, vector<32x256xf32>,
    } else {
    }
    %c0 = arith.constant 0 : index
    %c0_1 = arith.constant 0 : index
    %3 = vector.load %arg8[%c0, %c0_1] : memref<32x256xf32, #tpu.memory_space<vmem>>, vector<32x256xf32>
    %c0_2 = arith.constant 0 : index
    %c0_3 = arith.constant 0 : index
    %4 = vector.load %arg3[%c0_2, %c0_3] : memref<32x128xbf16, #tpu.memory_space<vmem>>, vector<32x128xbf16>
    %c0_4 = arith.constant 0 : index
    %c0_5 = arith.constant 0 : index
    %5 = vector.load %arg4[%c0_4, %c0_5] : memref<128x256xbf16, #tpu.memory_space<vmem>>, vector<128x256xbf16>
    %cst = arith.constant dense<0.000000e+00> : vector<32x256xf32>
    %6 = tpu.matmul %4, %5, %cst {dimension_numbers = #tpu.dot_dimension_numbers<[1], [0], [0], [1], [0, 0, 1, 1], [], []>} : vector<32x128xbf16>, vector<128x256xbf16>, vector<32x256xf32> -> vector<32x256xf32>
    %7 = arith.addf %3, %6 : vector<32x256xf32>
    %c0_6 = arith.constant 0 : index
    %c0_7 = arith.constant 0 : index
    %8 = vector.load %arg8[%c0_6, %c0_7] : memref<32x256xf32, #tpu.memory_space<vmem>>, vector<32x256xf32>
    tpu.vector_store %arg8[%c0_6, %c0_7], %7 {strides = array<i32>} : memref<32x256xf32, #tpu.memory_space<vmem>>, vector<32x256xf32>,
    %c0_i32_8 = arith.constant 0 : i32
    %9 = arith.cmpi eq, %arg2, %c0_i32_8 : i32
    %10 = arith.extui %9 : i1 to i32
    %c0_i32_9 = arith.constant 0 : i32
    %11 = arith.cmpi ne, %10, %c0_i32_9 : i32
    scf.if %11 {
      %c0_10 = arith.constant 0 : index
      %c0_11 = arith.constant 0 : index
      %12 = vector.load %arg8[%c0_10, %c0_11] : memref<32x256xf32, #tpu.memory_space<vmem>>, vector<32x256xf32>
      %c0_12 = arith.constant 0 : index
      %c0_13 = arith.constant 0 : index
      %13 = vector.load %arg5[%c0_12, %c0_13] : memref<1x256xf32, #tpu.memory_space<vmem>>, vector<1x256xf32>
      %14 = vector.broadcast %13 : vector<1x256xf32> to vector<32x256xf32>
      %15 = arith.addf %12, %14 : vector<32x256xf32>
      %c0_14 = arith.constant 0 : index
      %c0_15 = arith.constant 0 : index
      %16 = vector.load %arg6[%c0_14, %c0_15] : memref<32x256xbf16, #tpu.memory_space<vmem>>, vector<32x256xbf16>
      %17 = arith.extf %16 : vector<32x256xbf16> to vector<32x256xf32>
      %18 = arith.addf %15, %17 : vector<32x256xf32>
      %cst_16 = arith.constant 0.000000e+00 : f32
      %19 = vector.broadcast %cst_16 : f32 to vector<32x256xf32>
      %20 = arith.maximumf %18, %19 : vector<32x256xf32>
      %21 = arith.truncf %20 : vector<32x256xf32> to vector<32x256xbf16>
      %c0_17 = arith.constant 0 : index
      %c0_18 = arith.constant 0 : index
      %22 = vector.load %arg7[%c0_17, %c0_18] : memref<32x256xbf16, #tpu.memory_space<vmem>>, vector<32x256xbf16>
      tpu.vector_store %arg7[%c0_17, %c0_18], %21 {strides = array<i32>} : memref<32x256xbf16, #tpu.memory_space<vmem>>, vector<32x256xbf16>,
    } else {
    }
    return
  }
  func.func @transform_0(%arg0: i32, %arg1: i32, %arg2: i32) -> (i32, i32) {
    %c0_i32 = arith.constant 0 : i32
    return %arg0, %arg2 : i32, i32
  }
  func.func @transform_1(%arg0: i32, %arg1: i32, %arg2: i32) -> (i32, i32) {
    %c0_i32 = arith.constant 0 : i32
    return %arg2, %arg1 : i32, i32
  }
  func.func @transform_2(%arg0: i32, %arg1: i32, %arg2: i32) -> (i32, i32) {
    %c0_i32 = arith.constant 0 : i32
    %c0_i32_0 = arith.constant 0 : i32
    return %c0_i32, %arg1 : i32, i32
  }
  func.func @transform_3(%arg0: i32, %arg1: i32, %arg2: i32) -> (i32, i32) {
    %c0_i32 = arith.constant 0 : i32
    return %arg0, %arg1 : i32, i32
  }
  func.func @transform_4(%arg0: i32, %arg1: i32, %arg2: i32) -> (i32, i32) {
    %c0_i32 = arith.constant 0 : i32
    return %arg0, %arg1 : i32, i32
  }
}

module attributes {stable_mosaic.version = 11 : i64} {
  func.func @_mm_kernel(%arg0: i32, %arg1: i32, %arg2: i32, %arg3: memref<16x256xbf16, #tpu.memory_space<vmem>>, %arg4: memref<256x512xbf16, #tpu.memory_space<vmem>>, %arg5: memref<1x512xf32, #tpu.memory_space<vmem>>, %arg6: memref<16x512xbf16, #tpu.memory_space<vmem>>, %arg7: memref<16x512xf32, #tpu.memory_space<vmem>>) attributes {dimension_semantics = [#tpu.dimension_semantics<parallel>, #tpu.dimension_semantics<parallel>, #tpu.dimension_semantics<arbitrary>], iteration_bounds = array<i64: 1, 1, 1>, scalar_prefetch = 0 : i64, scratch_operands = 1 : i64, tpu.core_type = #tpu.core_type<tc>, window_params = [{transform_indices = @transform_0, window_bounds = array<i64: 16, 256>}, {transform_indices = @transform_1, window_bounds = array<i64: 256, 512>}, {transform_indices = @transform_2, window_bounds = array<i64: 1, 512>}, {transform_indices = @transform_3, window_bounds = array<i64: 16, 512>}]} {
    %c0_i32 = arith.constant 0 : i32
    %0 = arith.cmpi eq, %arg2, %c0_i32 : i32
    %1 = arith.extui %0 : i1 to i32
    %c0_i32_0 = arith.constant 0 : i32
    %2 = arith.cmpi ne, %1, %c0_i32_0 : i32
    scf.if %2 {
      %cst_10 = arith.constant 0.000000e+00 : f32
      %12 = vector.broadcast %cst_10 : f32 to vector<16x512xf32>
      %c0_11 = arith.constant 0 : index
      %c0_12 = arith.constant 0 : index
      %13 = vector.load %arg7[%c0_11, %c0_12] : memref<16x512xf32, #tpu.memory_space<vmem>>, vector<16x512xf32>
      tpu.vector_store %arg7[%c0_11, %c0_12], %12 {strides = array<i32>} : memref<16x512xf32, #tpu.memory_space<vmem>>, vector<16x512xf32>,
    } else {
    }
    %c0 = arith.constant 0 : index
    %c0_1 = arith.constant 0 : index
    %3 = vector.load %arg7[%c0, %c0_1] : memref<16x512xf32, #tpu.memory_space<vmem>>, vector<16x512xf32>
    %c0_2 = arith.constant 0 : index
    %c0_3 = arith.constant 0 : index
    %4 = vector.load %arg3[%c0_2, %c0_3] : memref<16x256xbf16, #tpu.memory_space<vmem>>, vector<16x256xbf16>
    %c0_4 = arith.constant 0 : index
    %c0_5 = arith.constant 0 : index
    %5 = vector.load %arg4[%c0_4, %c0_5] : memref<256x512xbf16, #tpu.memory_space<vmem>>, vector<256x512xbf16>
    %cst = arith.constant dense<0.000000e+00> : vector<16x512xf32>
    %6 = tpu.matmul %4, %5, %cst {dimension_numbers = #tpu.dot_dimension_numbers<[1], [0], [0], [1], [0, 0, 1, 1], [], []>} : vector<16x256xbf16>, vector<256x512xbf16>, vector<16x512xf32> -> vector<16x512xf32>
    %7 = arith.addf %3, %6 : vector<16x512xf32>
    %c0_6 = arith.constant 0 : index
    %c0_7 = arith.constant 0 : index
    %8 = vector.load %arg7[%c0_6, %c0_7] : memref<16x512xf32, #tpu.memory_space<vmem>>, vector<16x512xf32>
    tpu.vector_store %arg7[%c0_6, %c0_7], %7 {strides = array<i32>} : memref<16x512xf32, #tpu.memory_space<vmem>>, vector<16x512xf32>,
    %c0_i32_8 = arith.constant 0 : i32
    %9 = arith.cmpi eq, %arg2, %c0_i32_8 : i32
    %10 = arith.extui %9 : i1 to i32
    %c0_i32_9 = arith.constant 0 : i32
    %11 = arith.cmpi ne, %10, %c0_i32_9 : i32
    scf.if %11 {
      %c0_10 = arith.constant 0 : index
      %c0_11 = arith.constant 0 : index
      %12 = vector.load %arg7[%c0_10, %c0_11] : memref<16x512xf32, #tpu.memory_space<vmem>>, vector<16x512xf32>
      %c0_12 = arith.constant 0 : index
      %c0_13 = arith.constant 0 : index
      %13 = vector.load %arg5[%c0_12, %c0_13] : memref<1x512xf32, #tpu.memory_space<vmem>>, vector<1x512xf32>
      %14 = vector.broadcast %13 : vector<1x512xf32> to vector<16x512xf32>
      %15 = arith.addf %12, %14 : vector<16x512xf32>
      %16 = arith.truncf %15 : vector<16x512xf32> to vector<16x512xbf16>
      %c0_14 = arith.constant 0 : index
      %c0_15 = arith.constant 0 : index
      %17 = vector.load %arg6[%c0_14, %c0_15] : memref<16x512xbf16, #tpu.memory_space<vmem>>, vector<16x512xbf16>
      tpu.vector_store %arg6[%c0_14, %c0_15], %16 {strides = array<i32>} : memref<16x512xbf16, #tpu.memory_space<vmem>>, vector<16x512xbf16>,
    } else {
    }
    return
  }
  func.func @transform_0(%arg0: i32, %arg1: i32, %arg2: i32) -> (i32, i32) {
    %c0_i32 = arith.constant 0 : i32
    return %arg0, %arg2 : i32, i32
  }
  func.func @transform_1(%arg0: i32, %arg1: i32, %arg2: i32) -> (i32, i32) {
    %c0_i32 = arith.constant 0 : i32
    return %arg2, %arg1 : i32, i32
  }
  func.func @transform_2(%arg0: i32, %arg1: i32, %arg2: i32) -> (i32, i32) {
    %c0_i32 = arith.constant 0 : i32
    %c0_i32_0 = arith.constant 0 : i32
    return %c0_i32, %arg1 : i32, i32
  }
  func.func @transform_3(%arg0: i32, %arg1: i32, %arg2: i32) -> (i32, i32) {
    %c0_i32 = arith.constant 0 : i32
    return %arg0, %arg1 : i32, i32
  }
}

module attributes {stable_mosaic.version = 11 : i64} {
  func.func @_mm_kernel(%arg0: i32, %arg1: i32, %arg2: i32, %arg3: memref<32x256xbf16, #tpu.memory_space<vmem>>, %arg4: memref<256x128xbf16, #tpu.memory_space<vmem>>, %arg5: memref<1x128xf32, #tpu.memory_space<vmem>>, %arg6: memref<32x128xbf16, #tpu.memory_space<vmem>>, %arg7: memref<32x128xf32, #tpu.memory_space<vmem>>) attributes {dimension_semantics = [#tpu.dimension_semantics<parallel>, #tpu.dimension_semantics<parallel>, #tpu.dimension_semantics<arbitrary>], iteration_bounds = array<i64: 1, 1, 1>, scalar_prefetch = 0 : i64, scratch_operands = 1 : i64, tpu.core_type = #tpu.core_type<tc>, window_params = [{transform_indices = @transform_0, window_bounds = array<i64: 32, 256>}, {transform_indices = @transform_1, window_bounds = array<i64: 256, 128>}, {transform_indices = @transform_2, window_bounds = array<i64: 1, 128>}, {transform_indices = @transform_3, window_bounds = array<i64: 32, 128>}]} {
    %c0_i32 = arith.constant 0 : i32
    %0 = arith.cmpi eq, %arg2, %c0_i32 : i32
    %1 = arith.extui %0 : i1 to i32
    %c0_i32_0 = arith.constant 0 : i32
    %2 = arith.cmpi ne, %1, %c0_i32_0 : i32
    scf.if %2 {
      %cst_10 = arith.constant 0.000000e+00 : f32
      %12 = vector.broadcast %cst_10 : f32 to vector<32x128xf32>
      %c0_11 = arith.constant 0 : index
      %c0_12 = arith.constant 0 : index
      %13 = vector.load %arg7[%c0_11, %c0_12] : memref<32x128xf32, #tpu.memory_space<vmem>>, vector<32x128xf32>
      tpu.vector_store %arg7[%c0_11, %c0_12], %12 {strides = array<i32>} : memref<32x128xf32, #tpu.memory_space<vmem>>, vector<32x128xf32>,
    } else {
    }
    %c0 = arith.constant 0 : index
    %c0_1 = arith.constant 0 : index
    %3 = vector.load %arg7[%c0, %c0_1] : memref<32x128xf32, #tpu.memory_space<vmem>>, vector<32x128xf32>
    %c0_2 = arith.constant 0 : index
    %c0_3 = arith.constant 0 : index
    %4 = vector.load %arg3[%c0_2, %c0_3] : memref<32x256xbf16, #tpu.memory_space<vmem>>, vector<32x256xbf16>
    %c0_4 = arith.constant 0 : index
    %c0_5 = arith.constant 0 : index
    %5 = vector.load %arg4[%c0_4, %c0_5] : memref<256x128xbf16, #tpu.memory_space<vmem>>, vector<256x128xbf16>
    %cst = arith.constant dense<0.000000e+00> : vector<32x128xf32>
    %6 = tpu.matmul %4, %5, %cst {dimension_numbers = #tpu.dot_dimension_numbers<[1], [0], [0], [1], [0, 0, 1, 1], [], []>} : vector<32x256xbf16>, vector<256x128xbf16>, vector<32x128xf32> -> vector<32x128xf32>
    %7 = arith.addf %3, %6 : vector<32x128xf32>
    %c0_6 = arith.constant 0 : index
    %c0_7 = arith.constant 0 : index
    %8 = vector.load %arg7[%c0_6, %c0_7] : memref<32x128xf32, #tpu.memory_space<vmem>>, vector<32x128xf32>
    tpu.vector_store %arg7[%c0_6, %c0_7], %7 {strides = array<i32>} : memref<32x128xf32, #tpu.memory_space<vmem>>, vector<32x128xf32>,
    %c0_i32_8 = arith.constant 0 : i32
    %9 = arith.cmpi eq, %arg2, %c0_i32_8 : i32
    %10 = arith.extui %9 : i1 to i32
    %c0_i32_9 = arith.constant 0 : i32
    %11 = arith.cmpi ne, %10, %c0_i32_9 : i32
    scf.if %11 {
      %c0_10 = arith.constant 0 : index
      %c0_11 = arith.constant 0 : index
      %12 = vector.load %arg7[%c0_10, %c0_11] : memref<32x128xf32, #tpu.memory_space<vmem>>, vector<32x128xf32>
      %c0_12 = arith.constant 0 : index
      %c0_13 = arith.constant 0 : index
      %13 = vector.load %arg5[%c0_12, %c0_13] : memref<1x128xf32, #tpu.memory_space<vmem>>, vector<1x128xf32>
      %14 = vector.broadcast %13 : vector<1x128xf32> to vector<32x128xf32>
      %15 = arith.addf %12, %14 : vector<32x128xf32>
      %cst_14 = arith.constant 0.000000e+00 : f32
      %16 = vector.broadcast %cst_14 : f32 to vector<32x128xf32>
      %17 = arith.maximumf %15, %16 : vector<32x128xf32>
      %18 = arith.truncf %17 : vector<32x128xf32> to vector<32x128xbf16>
      %c0_15 = arith.constant 0 : index
      %c0_16 = arith.constant 0 : index
      %19 = vector.load %arg6[%c0_15, %c0_16] : memref<32x128xbf16, #tpu.memory_space<vmem>>, vector<32x128xbf16>
      tpu.vector_store %arg6[%c0_15, %c0_16], %18 {strides = array<i32>} : memref<32x128xbf16, #tpu.memory_space<vmem>>, vector<32x128xbf16>,
    } else {
    }
    return
  }
  func.func @transform_0(%arg0: i32, %arg1: i32, %arg2: i32) -> (i32, i32) {
    %c0_i32 = arith.constant 0 : i32
    return %arg0, %arg2 : i32, i32
  }
  func.func @transform_1(%arg0: i32, %arg1: i32, %arg2: i32) -> (i32, i32) {
    %c0_i32 = arith.constant 0 : i32
    return %arg2, %arg1 : i32, i32
  }
  func.func @transform_2(%arg0: i32, %arg1: i32, %arg2: i32) -> (i32, i32) {
    %c0_i32 = arith.constant 0 : i32
    %c0_i32_0 = arith.constant 0 : i32
    return %c0_i32, %arg1 : i32, i32
  }
  func.func @transform_3(%arg0: i32, %arg1: i32, %arg2: i32) -> (i32, i32) {
    %c0_i32 = arith.constant 0 : i32
    return %arg0, %arg1 : i32, i32
  }
}

module attributes {stable_mosaic.version = 11 : i64} {
  func.func @_direct_conv_kernel(%arg0: i32, %arg1: i32, %arg2: memref<1x3x3x512xbf16, #tpu.memory_space<vmem>>, %arg3: memref<2048x128xbf16, #tpu.memory_space<vmem>>, %arg4: memref<1x128xf32, #tpu.memory_space<vmem>>, %arg5: memref<1x2x2x128xbf16, #tpu.memory_space<vmem>>) attributes {dimension_semantics = [#tpu.dimension_semantics<parallel>, #tpu.dimension_semantics<parallel>], iteration_bounds = array<i64: 2, 1>, scalar_prefetch = 0 : i64, scratch_operands = 0 : i64, tpu.core_type = #tpu.core_type<tc>, window_params = [{transform_indices = @transform_0, window_bounds = array<i64: 1, 3, 3, 512>}, {pipeline_mode = #tpu.pipeline_mode<synchronous>, transform_indices = @transform_1, window_bounds = array<i64: 2048, 128>}, {pipeline_mode = #tpu.pipeline_mode<synchronous>, transform_indices = @transform_2, window_bounds = array<i64: 1, 128>}, {transform_indices = @transform_3, window_bounds = array<i64: 1, 2, 2, 128>}]} {
    %c2_i32 = arith.constant 2 : i32
    %0 = arith.muli %arg1, %c2_i32 : i32
    %c0_i32 = arith.constant 0 : i32
    %1 = arith.addi %0, %c0_i32 : i32
    %c0 = arith.constant 0 : index
    %2 = arith.index_cast %1 : i32 to index
    %c0_0 = arith.constant 0 : index
    %c0_1 = arith.constant 0 : index
    %3 = vector.load %arg2[%c0, %2, %c0_0, %c0_1] : memref<1x3x3x512xbf16, #tpu.memory_space<vmem>>, vector<1x2x2x512xbf16>
    %4 = vector.shape_cast %3 : vector<1x2x2x512xbf16> to vector<2x2x512xbf16>
    %c0_i32_2 = arith.constant 0 : i32
    %5 = arith.addi %0, %c0_i32_2 : i32
    %c0_3 = arith.constant 0 : index
    %6 = arith.index_cast %5 : i32 to index
    %c1 = arith.constant 1 : index
    %c0_4 = arith.constant 0 : index
    %7 = vector.load %arg2[%c0_3, %6, %c1, %c0_4] : memref<1x3x3x512xbf16, #tpu.memory_space<vmem>>, vector<1x2x2x512xbf16>
    %8 = vector.shape_cast %7 : vector<1x2x2x512xbf16> to vector<2x2x512xbf16>
    %c1_i32 = arith.constant 1 : i32
    %9 = arith.addi %0, %c1_i32 : i32
    %c0_5 = arith.constant 0 : index
    %10 = arith.index_cast %9 : i32 to index
    %c0_6 = arith.constant 0 : index
    %c0_7 = arith.constant 0 : index
    %11 = vector.load %arg2[%c0_5, %10, %c0_6, %c0_7] : memref<1x3x3x512xbf16, #tpu.memory_space<vmem>>, vector<1x2x2x512xbf16>
    %12 = vector.shape_cast %11 : vector<1x2x2x512xbf16> to vector<2x2x512xbf16>
    %c1_i32_8 = arith.constant 1 : i32
    %13 = arith.addi %0, %c1_i32_8 : i32
    %c0_9 = arith.constant 0 : index
    %14 = arith.index_cast %13 : i32 to index
    %c1_10 = arith.constant 1 : index
    %c0_11 = arith.constant 0 : index
    %15 = vector.load %arg2[%c0_9, %14, %c1_10, %c0_11] : memref<1x3x3x512xbf16, #tpu.memory_space<vmem>>, vector<1x2x2x512xbf16>
    %16 = vector.shape_cast %15 : vector<1x2x2x512xbf16> to vector<2x2x512xbf16>
    %17 = tpu.concatenate %4, %8, %12, %16 in 2 : vector<2x2x512xbf16>, vector<2x2x512xbf16>, vector<2x2x512xbf16>, vector<2x2x512xbf16> -> vector<2x2x2048xbf16>
    %18 = vector.shape_cast %17 : vector<2x2x2048xbf16> to vector<4x2048xbf16>
    %c0_12 = arith.constant 0 : index
    %c0_13 = arith.constant 0 : index
    %19 = vector.load %arg3[%c0_12, %c0_13] : memref<2048x128xbf16, #tpu.memory_space<vmem>>, vector<2048x128xbf16>
    %cst = arith.constant dense<0.000000e+00> : vector<4x128xf32>
    %20 = tpu.matmul %18, %19, %cst {dimension_numbers = #tpu.dot_dimension_numbers<[1], [0], [0], [1], [0, 0, 1, 1], [], []>} : vector<4x2048xbf16>, vector<2048x128xbf16>, vector<4x128xf32> -> vector<4x128xf32>
    %c0_14 = arith.constant 0 : index
    %c0_15 = arith.constant 0 : index
    %21 = vector.load %arg4[%c0_14, %c0_15] : memref<1x128xf32, #tpu.memory_space<vmem>>, vector<1x128xf32>
    %22 = vector.broadcast %21 : vector<1x128xf32> to vector<4x128xf32>
    %23 = arith.addf %20, %22 : vector<4x128xf32>
    %cst_16 = arith.constant 0.000000e+00 : f32
    %24 = vector.broadcast %cst_16 : f32 to vector<4x128xf32>
    %25 = arith.maximumf %23, %24 : vector<4x128xf32>
    %26 = vector.shape_cast %25 : vector<4x128xf32> to vector<1x2x2x128xf32>
    %27 = arith.truncf %26 : vector<1x2x2x128xf32> to vector<1x2x2x128xbf16>
    %c0_17 = arith.constant 0 : index
    %c0_18 = arith.constant 0 : index
    %c0_19 = arith.constant 0 : index
    %c0_20 = arith.constant 0 : index
    %28 = vector.load %arg5[%c0_17, %c0_18, %c0_19, %c0_20] : memref<1x2x2x128xbf16, #tpu.memory_space<vmem>>, vector<1x2x2x128xbf16>
    tpu.vector_store %arg5[%c0_17, %c0_18, %c0_19, %c0_20], %27 {strides = array<i32>} : memref<1x2x2x128xbf16, #tpu.memory_space<vmem>>, vector<1x2x2x128xbf16>,
    return
  }
  func.func @transform_0(%arg0: i32, %arg1: i32) -> (i32, i32, i32, i32) {
    %c0_i32 = arith.constant 0 : i32
    %c0_i32_0 = arith.constant 0 : i32
    %c0_i32_1 = arith.constant 0 : i32
    %c0_i32_2 = arith.constant 0 : i32
    return %arg0, %c0_i32, %c0_i32_0, %c0_i32_1 : i32, i32, i32, i32
  }
  func.func @transform_1(%arg0: i32, %arg1: i32) -> (i32, i32) {
    %c0_i32 = arith.constant 0 : i32
    %c0_i32_0 = arith.constant 0 : i32
    %c0_i32_1 = arith.constant 0 : i32
    return %c0_i32, %c0_i32_0 : i32, i32
  }
  func.func @transform_2(%arg0: i32, %arg1: i32) -> (i32, i32) {
    %c0_i32 = arith.constant 0 : i32
    %c0_i32_0 = arith.constant 0 : i32
    %c0_i32_1 = arith.constant 0 : i32
    return %c0_i32, %c0_i32_0 : i32, i32
  }
  func.func @transform_3(%arg0: i32, %arg1: i32) -> (i32, i32, i32, i32) {
    %c0_i32 = arith.constant 0 : i32
    %c0_i32_0 = arith.constant 0 : i32
    %c0_i32_1 = arith.constant 0 : i32
    return %arg0, %arg1, %c0_i32, %c0_i32_0 : i32, i32, i32, i32
  }
}

module attributes {stable_mosaic.version = 11 : i64} {
  func.func @_mm_kernel(%arg0: i32, %arg1: i32, %arg2: i32, %arg3: memref<16x128xbf16, #tpu.memory_space<vmem>>, %arg4: memref<128x512xbf16, #tpu.memory_space<vmem>>, %arg5: memref<1x512xf32, #tpu.memory_space<vmem>>, %arg6: memref<16x512xbf16, #tpu.memory_space<vmem>>, %arg7: memref<16x512xbf16, #tpu.memory_space<vmem>>, %arg8: memref<16x512xf32, #tpu.memory_space<vmem>>) attributes {dimension_semantics = [#tpu.dimension_semantics<parallel>, #tpu.dimension_semantics<parallel>, #tpu.dimension_semantics<arbitrary>], iteration_bounds = array<i64: 1, 1, 1>, scalar_prefetch = 0 : i64, scratch_operands = 1 : i64, tpu.core_type = #tpu.core_type<tc>, window_params = [{transform_indices = @transform_0, window_bounds = array<i64: 16, 128>}, {transform_indices = @transform_1, window_bounds = array<i64: 128, 512>}, {transform_indices = @transform_2, window_bounds = array<i64: 1, 512>}, {transform_indices = @transform_3, window_bounds = array<i64: 16, 512>}, {transform_indices = @transform_4, window_bounds = array<i64: 16, 512>}]} {
    %c0_i32 = arith.constant 0 : i32
    %0 = arith.cmpi eq, %arg2, %c0_i32 : i32
    %1 = arith.extui %0 : i1 to i32
    %c0_i32_0 = arith.constant 0 : i32
    %2 = arith.cmpi ne, %1, %c0_i32_0 : i32
    scf.if %2 {
      %cst_10 = arith.constant 0.000000e+00 : f32
      %12 = vector.broadcast %cst_10 : f32 to vector<16x512xf32>
      %c0_11 = arith.constant 0 : index
      %c0_12 = arith.constant 0 : index
      %13 = vector.load %arg8[%c0_11, %c0_12] : memref<16x512xf32, #tpu.memory_space<vmem>>, vector<16x512xf32>
      tpu.vector_store %arg8[%c0_11, %c0_12], %12 {strides = array<i32>} : memref<16x512xf32, #tpu.memory_space<vmem>>, vector<16x512xf32>,
    } else {
    }
    %c0 = arith.constant 0 : index
    %c0_1 = arith.constant 0 : index
    %3 = vector.load %arg8[%c0, %c0_1] : memref<16x512xf32, #tpu.memory_space<vmem>>, vector<16x512xf32>
    %c0_2 = arith.constant 0 : index
    %c0_3 = arith.constant 0 : index
    %4 = vector.load %arg3[%c0_2, %c0_3] : memref<16x128xbf16, #tpu.memory_space<vmem>>, vector<16x128xbf16>
    %c0_4 = arith.constant 0 : index
    %c0_5 = arith.constant 0 : index
    %5 = vector.load %arg4[%c0_4, %c0_5] : memref<128x512xbf16, #tpu.memory_space<vmem>>, vector<128x512xbf16>
    %cst = arith.constant dense<0.000000e+00> : vector<16x512xf32>
    %6 = tpu.matmul %4, %5, %cst {dimension_numbers = #tpu.dot_dimension_numbers<[1], [0], [0], [1], [0, 0, 1, 1], [], []>} : vector<16x128xbf16>, vector<128x512xbf16>, vector<16x512xf32> -> vector<16x512xf32>
    %7 = arith.addf %3, %6 : vector<16x512xf32>
    %c0_6 = arith.constant 0 : index
    %c0_7 = arith.constant 0 : index
    %8 = vector.load %arg8[%c0_6, %c0_7] : memref<16x512xf32, #tpu.memory_space<vmem>>, vector<16x512xf32>
    tpu.vector_store %arg8[%c0_6, %c0_7], %7 {strides = array<i32>} : memref<16x512xf32, #tpu.memory_space<vmem>>, vector<16x512xf32>,
    %c0_i32_8 = arith.constant 0 : i32
    %9 = arith.cmpi eq, %arg2, %c0_i32_8 : i32
    %10 = arith.extui %9 : i1 to i32
    %c0_i32_9 = arith.constant 0 : i32
    %11 = arith.cmpi ne, %10, %c0_i32_9 : i32
    scf.if %11 {
      %c0_10 = arith.constant 0 : index
      %c0_11 = arith.constant 0 : index
      %12 = vector.load %arg8[%c0_10, %c0_11] : memref<16x512xf32, #tpu.memory_space<vmem>>, vector<16x512xf32>
      %c0_12 = arith.constant 0 : index
      %c0_13 = arith.constant 0 : index
      %13 = vector.load %arg5[%c0_12, %c0_13] : memref<1x512xf32, #tpu.memory_space<vmem>>, vector<1x512xf32>
      %14 = vector.broadcast %13 : vector<1x512xf32> to vector<16x512xf32>
      %15 = arith.addf %12, %14 : vector<16x512xf32>
      %c0_14 = arith.constant 0 : index
      %c0_15 = arith.constant 0 : index
      %16 = vector.load %arg6[%c0_14, %c0_15] : memref<16x512xbf16, #tpu.memory_space<vmem>>, vector<16x512xbf16>
      %17 = arith.extf %16 : vector<16x512xbf16> to vector<16x512xf32>
      %18 = arith.addf %15, %17 : vector<16x512xf32>
      %cst_16 = arith.constant 0.000000e+00 : f32
      %19 = vector.broadcast %cst_16 : f32 to vector<16x512xf32>
      %20 = arith.maximumf %18, %19 : vector<16x512xf32>
      %21 = arith.truncf %20 : vector<16x512xf32> to vector<16x512xbf16>
      %c0_17 = arith.constant 0 : index
      %c0_18 = arith.constant 0 : index
      %22 = vector.load %arg7[%c0_17, %c0_18] : memref<16x512xbf16, #tpu.memory_space<vmem>>, vector<16x512xbf16>
      tpu.vector_store %arg7[%c0_17, %c0_18], %21 {strides = array<i32>} : memref<16x512xbf16, #tpu.memory_space<vmem>>, vector<16x512xbf16>,
    } else {
    }
    return
  }
  func.func @transform_0(%arg0: i32, %arg1: i32, %arg2: i32) -> (i32, i32) {
    %c0_i32 = arith.constant 0 : i32
    return %arg0, %arg2 : i32, i32
  }
  func.func @transform_1(%arg0: i32, %arg1: i32, %arg2: i32) -> (i32, i32) {
    %c0_i32 = arith.constant 0 : i32
    return %arg2, %arg1 : i32, i32
  }
  func.func @transform_2(%arg0: i32, %arg1: i32, %arg2: i32) -> (i32, i32) {
    %c0_i32 = arith.constant 0 : i32
    %c0_i32_0 = arith.constant 0 : i32
    return %c0_i32, %arg1 : i32, i32
  }
  func.func @transform_3(%arg0: i32, %arg1: i32, %arg2: i32) -> (i32, i32) {
    %c0_i32 = arith.constant 0 : i32
    return %arg0, %arg1 : i32, i32
  }
  func.func @transform_4(%arg0: i32, %arg1: i32, %arg2: i32) -> (i32, i32) {
    %c0_i32 = arith.constant 0 : i32
    return %arg0, %arg1 : i32, i32
  }
}

</mosaic_0001>

<bundles_post_ra>
// kernel: _lambda_.11
= control target key start
LH: loop header
LB: loop body
LE: loop exit
PB: predicated region body
PF: predicated region fallthrough
CT: control target
= control target key end

     0   :  { %6 = vsyncpa [#allocation3], 0  ;;  %s903_s0 = inlined_call_operand.hbm [shape: bf16[2,5,5,512], index: 0, kind: input, shape index: {}]   ;;  %s904_s1 = inlined_call_operand.hbm [shape: bf16[2,4,4,128], index: 1, kind: output, shape index: {}]  }
   0x1   :  { %8 = vsyncpa [#allocation3 + $0x1], 0 }
   0x2   :  { %9 = vsyncpa [#allocation4], 0 }
   0x3   :  { %11 = vsyncpa [#allocation4 + $0x1], 0  ;;  %s680_s6 = smov 0   ;;  %s682_s7 = smov 0  }
   0x4   :  { %s684_s8 = smov 0   ;;  %s686_s9 = smov 0  }
   0x5   :  { %s688_s10 = smov 0   ;;  %s690_s11 = smov 0  }
   0x6 LB: > { %s456_s12 = sadd.s32 4294967295, %s662_s11   ;;  %s457_s13 = sadd.s32 4294967294, %s662_s11   ;;  %s662_s11 = sphi %s690_s11, %s17_s11   ;;  %s658_s10 = sphi %s688_s10, %s919_s10   ;;  %s654_s9 = sphi %s686_s9, %s918_s9   ;;  %s650_s8 = sphi %s684_s8, %s917_s8   ;;  %s646_s7 = sphi %s682_s7, %s916_s7   ;;  %s642_s6 = sphi %s680_s6, %s915_s6  }
   0x7   : > { %s29_s14 = sadd.s32 1, %s658_s10  ;;  %s36_s15 = sadd.s32 1, %s650_s8 }
   0x8   : > { %p31_p0 = scmp.ge.s32.totalorder %s29_s14, 2  ;;  %p43_p1 = scmp.ne.s32.totalorder %s650_s8, %s646_s7 }
   0x9   : > { %p44_p2 = scmp.eq.s32.totalorder %s662_s11, 0  ;;  %p49_p3 = scmp.ne.s32.totalorder %s646_s7, %s642_s6 }
   0xa   : > { %s921_s14 = smov (%p31_p0, %s29_s14), 0  ;;  %p50_p5 = scmp.eq.s32.totalorder %s456_s12, 0 }
   0xb   : > { %p721_p4 = por %p44_p2, %p43_p1  ;;  %s33_s17 = ssub.s32 %s658_s10, %s921_s14 }
   0xc   : > { %p75_p6 = scmp.eq.s32.totalorder %s456_s12, 1  ;;  %p34_p7 = scmp.eq.s32.totalorder %s33_s17, 0 }
   0xd   : > { %p727_p8 = por %p50_p5, %p49_p3  ;;  %p81_p10 = scmp.eq.s32.totalorder %s457_s13, 1 }
   0xe   : > { %p731_p9 = por %p75_p6, %p43_p1  ;;  %p496_p13 = scmp.lt.s32.totalorder %s662_s11, 2 }
   0xf   : > { %s736_s20 = scalar_select %p34_p7, %s650_s8, %s36_s15  }
  0x10   : > { %s908_s19 = scalar_select %p731_p9, 1, 0 }
  0x11   : > { %p738_p11 = por %p81_p10, %p49_p3  ;;  %s101_s22 = sand.u32 1, %s650_s8  }
  0x12   : > { %s481_s23 = smul.u32 80, %s101_s22  ;;  %p748_p0 = pnand %p496_p13, %p721_p4 }
  0x13   : > { %s909_s21 = scalar_select %p738_p11, 1, 0 }
  0x14   : > { %s482_s24 = smul.u32 1280, %s658_s10  ;;  %s105_s29 = scalar_lea.vmem [#allocation2], %s481_s23 }
  0x15   : > { %s112_s30 = sshll.u32 %s105_s29, 4  ;;  %s760_s2 = scalar_lea.sflag [#allocation3], %s101_s22  ;;  %s757_s30 = int_to_ptr.vmem [resolvable:$true] %s112_s30 }
  0x16   : > { %s755_s28 = scalar_lea.hbm %s903_s0, %s482_s24  ;;  %p552_p3 = pneg %p748_p0 }
  0x17   : > { %s550_s3 = scalar_lea.hbm %s755_s28, 1280  ;;  %s555_s12 = scalar_lea.hbm %s903_s0, 2560 }
  0x18   : > { %p551_p2 = scmp.ne.s32.totalorder %s755_s28, %s550_s3  ;;  %p556_p6 = scmp.lt.u32.totalorder %s755_s28, %s903_s0 }
  0x19   : > { %p557_p7 = scmp.lt.u32.totalorder %s555_s12, %s550_s3  ;;  %p559_p13 = scmp.lt.u32.totalorder %s550_s3, %s755_s28 }
  0x1a   : > { %p553_p4 = pnand %p552_p3, %p551_p2 }
  0x1b   : > { %p558_p10 = por %p557_p7, %p556_p6 }
  0x1c   : > { %p554_p5 = pneg %p553_p4 }
  0x1d   : > { %p560_p12 = por %p559_p13, %p558_p10 }
  0x1f   : > { %p561_p1 = pnand %p560_p12, %p554_p5 }
  0x21   : > { %564 = shalt.err (!%p561_p1)
}
  0x22   : > { %s565_s16 = scalar_lea.vmem %s757_s30, 1280  ;;  %s664_s17 = smov [#allocation2]  }
  0x23   : > { %p566_p2 = scmp.ne.s32.totalorder %s757_s30, %s565_s16  ;;  %s570_s22 = sshll.u32 %s664_s17, 4  ;;  %s571_s22 = int_to_ptr.vmem [resolvable:$false] %s570_s22 }
  0x24   : > { %s572_s23 = scalar_lea.vmem %s571_s22, 2560  ;;  %p573_p9 = scmp.lt.s32.totalorder %s757_s30, %s571_s22 }
  0x25   : > { %p568_p4 = pnand %p566_p2, %p552_p3  ;;  %p574_p6 = scmp.lt.s32.totalorder %s572_s23, %s565_s16 }
  0x27   : > { %p569_p11 = pneg %p568_p4  ;;  %p575_p7 = por %p574_p6, %p573_p9 }
  0x29   : > { %p576_p10 = pnand %p575_p7, %p569_p11 }
  0x2b   : > { %579 = shalt.err (!%p576_p10)
}
  0x2c   : > { %s665_s24 = smov 256   ;;  %s666_s26 = smov 16  }
  0x2d   : > { %491 = dma.hbm_to_vmem [thread:$0]  (!%p748_p0), %s755_s28, 1280, %s757_s30, %s760_s2, %s665_s24, %s665_s24, %s666_s26  }
  0x2e   : > { %p120_p12 = scmp.lt.s32.totalorder %s662_s11, 3  ;;  %p911_p1 = scmp.ge.s32.totalorder %s662_s11, 1 }
  0x30   : > { %p121_p3 = pnand %p911_p1, %p120_p12 }
  0x31   : > { %s792_s27 = sand.u32 (!%p121_p3), 1, %s646_s7  }
  0x32   : > { %124 = sbr.rel (%p121_p3) target bundleno = 113 (0x71), region = 24  ;;  %s127_s3 = scalar_lea.sflag (!%p121_p3), [#allocation3], %s792_s27 }
  0x33   : > { %s483_s29 = smul.u32 (!%p121_p3), 80, %s792_s27 }
  0x35   : > { %s796_s4 = scalar_lea.vmem (!%p121_p3), [#allocation2], %s483_s29 }
  0x39   : > { %633 = dma.done.wait (%p727_p8), %s127_s3, 1280  }
  0x3a   : > { %635 = vsyncadd (%p727_p8), %s127_s3, 4294966016  ;;  %v166_v0 = vld [vmem:[%s796_s4] sm:$0x7]  ;;  %v158_v4 = vld [vmem:[%s796_s4 + $0x4] sm:$0x3]  ;;  %s462_s18 = sshll.u32 %s792_s27, 3 }
  0x3b   : > { %v171_v1 = vshrl.u32 %v166_v0, 16  ;;  %v174_v2 = vshll.u32 %v166_v0, 16  ;;  %v154_v3 = vld [vmem:[%s796_s4] sm:$0x3]  ;;  %v230_v5 = vld [vmem:[%s796_s4 + $0x8] sm:$0x7] }
  0x3c   : > { %v235_v8 = vshrl.u32 %v230_v5, 16  ;;  %v238_v9 = vshll.u32 %v230_v5, 16  ;;  %v471_v10 = vld [vmem:[%s796_s4 + $0x10] sm:$0x7]  ;;  %v162_v13 = vmax.bf16 %v158_v4, %v154_v3  ;;  %v159_v21 = vld [vmem:[%s796_s4 + $0x14] sm:$0x3] }
  0x3d   : > { %v173_v6 = vrot.slane %v171_v1, 4  ;;  %v176_v7 = vrot.slane %v174_v2, 5  ;;  %v303_v11 = vshrl.u32 %v471_v10, 16  ;;  %v306_v12 = vshll.u32 %v471_v10, 16  ;;  %v155_v17 = vld [vmem:[%s796_s4 + $0x10] sm:$0x3] }
  0x3e   : > { %v237_v15 = vrot.slane %v235_v8, 4  ;;  %v240_v16 = vrot.slane %v238_v9, 5  ;;  %v167_v18 = vld [vmem:[%s796_s4 + $0x10] sm:$0x7]  ;;  %v231_v26 = vld [vmem:[%s796_s4 + $0x18] sm:$0x7]  ;;  %v163_v33 = vmax.bf16 %v159_v21, %v155_v17 }
  0x3f   : > { %v177_v14 = vor.u32 %v176_v7, %v173_v6  ;;  %v305_v19 = vrot.slane %v303_v11, 4  ;;  %v308_v20 = vrot.slane %v306_v12, 5  ;;  %v180_v22 = vshrl.u32 %v167_v18, 16  ;;  %v214_v27 = vld [vmem:[%s796_s4 + $0x8] sm:$0x3]  ;;  %s835_s25 = scalar_lea.vmem [#allocation5], %s462_s18 }
  0x40   : > { %v183_v23 = vshll.u32 %v167_v18, 16  ;;  %v241_v25 = vor.u32 %v240_v16, %v237_v15  ;;  %v244_v31 = vshrl.u32 %v231_v26, 16  ;;  %v247_v34 = vshll.u32 %v231_v26, 16  ;;  %v472_v35 = vld [vmem:[%s796_s4 + $0x20] sm:$0x7]  ;;  %s366_s28 = sshll.u32 %s835_s25, 4  ;;  %s848_s28 = int_to_ptr.vmem [resolvable:$true] %s366_s28 }
  0x41   : > { %v178_v24 = vrot.slane %v177_v14, 4  ;;  %v309_v28 = vor.u32 %v308_v20, %v305_v19  ;;  %v182_v29 = vrot.slane %v180_v22, 4  ;;  %v222_v36 = vld [vmem:[%s796_s4 + $0xc] sm:$0x3]  ;;  %v312_v40 = vshrl.u32 %v472_v35, 16  ;;  %s480_s30 = sshll.u32 %s654_s9, 7 }
  0x42   : > { %v185_v30 = vrot.slane %v183_v23, 5  ;;  %v242_v37 = vrot.slane %v241_v25, 4  ;;  %v246_v39 = vrot.slane %v244_v31, 4  ;;  %v249_v42 = vrot.slane %v247_v34, 5  ;;  %v156_v44 = vld [vmem:[%s796_s4 + $0x20] sm:$0x3]  ;;  %s853_s12 = scalar_lea.hbm %s904_s1, %s480_s30 }
  0x43   : > { %v210_v32 = vmax.bf16 %v178_v24, %v162_v13  ;;  %v315_v43 = vshll.u32 %v472_v35, 16  ;;  %v168_v45 = vld [vmem:[%s796_s4 + $0x20] sm:$0x7]  ;;  %v310_v46 = vrot.slane %v309_v28, 4  ;;  %v160_v48 = vld [vmem:[%s796_s4 + $0x24] sm:$0x3] }
  0x44   : > { %v186_v38 = vor.u32 %v185_v30, %v182_v29  ;;  %v189_v49 = vshrl.u32 %v168_v45, 16  ;;  %v192_v50 = vshll.u32 %v168_v45, 16  ;;  %v215_v52 = vld [vmem:[%s796_s4 + $0x18] sm:$0x3]  ;;  %v250_v53 = vor.u32 %v249_v42, %v246_v39  ;;  %v232_v56 = vld [vmem:[%s796_s4 + $0x28] sm:$0x7] }
  0x45   : > { %v218_v41 = vmax.bf16 %v214_v27, %v210_v32  ;;  %v314_v54 = vrot.slane %v312_v40, 4  ;;  %v317_v55 = vrot.slane %v315_v43, 5  ;;  %v463_v57 = vld [vmem:[%s796_s4 + $0x10] sm:$0x3]  ;;  %v253_v61 = vshrl.u32 %v232_v56, 16  ;;  %s351_s13 = scalar_lea.sflag [#allocation4], %s792_s27 }
  0x46   : > { %v187_v47 = vrot.slane %v186_v38, 4  ;;  %v191_v59 = vrot.slane %v189_v49, 4  ;;  %v194_v60 = vrot.slane %v192_v50, 5  ;;  %v223_v63 = vld [vmem:[%s796_s4 + $0x1c] sm:$0x3]  ;;  %v251_v0 = vrot.slane %v250_v53, 4 }
  0x47   : > { %v226_v51 = vmax.bf16 %v222_v36, %v218_v41  ;;  %v164_v1 = vmax.bf16 %v160_v48, %v156_v44  ;;  %v256_v2 = vshll.u32 %v232_v56, 16  ;;  %v473_v3 = vld [vmem:[%s796_s4 + $0x30] sm:$0x7]  ;;  %v467_v4 = vld [vmem:[%s796_s4 + $0x14] sm:$0x3]  ;;  %v255_v7 = vrot.slane %v253_v61, 4 }
  0x48   : > { %v211_v58 = vmax.bf16 %v187_v47, %v163_v33  ;;  %v195_v6 = vor.u32 %v194_v60, %v191_v59  ;;  %v321_v8 = vshrl.u32 %v473_v3, 16  ;;  %v169_v9 = vld [vmem:[%s796_s4 + $0x30] sm:$0x7]  ;;  %v318_v11 = vor.u32 %v317_v55, %v314_v54  ;;  %v161_v18 = vld [vmem:[%s796_s4 + $0x34] sm:$0x3]  ;;  %s580_s15 = scalar_lea.vmem %s848_s28, 128 }
  0x49   : > { %v274_v62 = vmax.bf16 %v242_v37, %v226_v51  ;;  %v258_v12 = vrot.slane %v256_v2, 5  ;;  %v324_v13 = vshll.u32 %v473_v3, 16  ;;  %v157_v14 = vld [vmem:[%s796_s4 + $0x30] sm:$0x3]  ;;  %v233_v19 = vld [vmem:[%s796_s4 + $0x38] sm:$0x7]  ;;  %p581_p8 = scmp.ne.s32.totalorder %s848_s28, %s580_s15 }
  0x4a   : > { %v219_v5 = vmax.bf16 %v215_v52, %v211_v58  ;;  %v196_v16 = vrot.slane %v195_v6, 4  ;;  %v323_v17 = vrot.slane %v321_v8, 4  ;;  %v464_v21 = vld [vmem:[%s796_s4 + $0x20] sm:$0x3]  ;;  %v216_v22 = vld [vmem:[%s796_s4 + $0x28] sm:$0x3]  ;;  %v165_v35 = vmax.bf16 %v161_v18, %v157_v14 }
  0x4b   : > { %v286_v10 = vmax.bf16 %v463_v57, %v274_v62  ;;  %v259_v23 = vor.u32 %v258_v12, %v255_v7  ;;  %v326_v24 = vrot.slane %v324_v13, 5  ;;  %v198_v25 = vshrl.u32 %v169_v9, 16  ;;  %v474_v30 = vld [vmem:[%s796_s4 + $0x40] sm:$0x7]  ;;  %v468_v32 = vld [vmem:[%s796_s4 + $0x24] sm:$0x3] }
  0x4c   : > { %v227_v15 = vmax.bf16 %v223_v63, %v219_v5  ;;  %v212_v27 = vmax.bf16 %v196_v16, %v164_v1  ;;  %v201_v28 = vshll.u32 %v169_v9, 16  ;;  %v262_v29 = vshrl.u32 %v233_v19, 16  ;;  %v224_v34 = vld [vmem:[%s796_s4 + $0x2c] sm:$0x3]  ;;  %v465_v49 = vld [vmem:[%s796_s4 + $0x30] sm:$0x3] }
  0x4d   : > { %v294_v20 = vmax.bf16 %v467_v4, %v286_v10  ;;  %v319_v33 = vrot.slane %v318_v11, 4  ;;  %v200_v36 = vrot.slane %v198_v25, 4  ;;  %v260_v39 = vrot.slane %v259_v23, 4  ;;  %v469_v54 = vld [vmem:[%s796_s4 + $0x34] sm:$0x3]  ;;  %p912_p9 = scmp.ne.s32.totalorder %s908_s19, 0 }
  0x4e   : > { %v275_v26 = vmax.bf16 %v251_v0, %v227_v15  ;;  %v220_v38 = vmax.bf16 %v216_v22, %v212_v27  ;;  %v203_v40 = vrot.slane %v201_v28, 5  ;;  %v327_v41 = vor.u32 %v326_v24, %v323_v17  ;;  %v217_v56 = vld [vmem:[%s796_s4 + $0x38] sm:$0x3]  ;;  %v225_v62 = vld [vmem:[%s796_s4 + $0x3c] sm:$0x3]  ;;  %s667_s9 = smov [#allocation5]  }
  0x4f   : > { %v342_v31 = vmax.bf16 %v310_v46, %v294_v20  ;;  %v264_v42 = vrot.slane %v262_v29, 4  ;;  %v265_v43 = vshll.u32 %v233_v19, 16  ;;  %v330_v44 = vshrl.u32 %v474_v30, 16  ;;  %v466_v5 = vld [vmem:[%s796_s4 + $0x40] sm:$0x3]  ;;  %p582_p11 = pnand %p581_p8, %p912_p9  ;;  %s584_s16 = sshll.u32 %s667_s9, 4  ;;  %s585_s16 = int_to_ptr.vmem [resolvable:$false] %s584_s16 }
  0x50   : > { %v287_v37 = vmax.bf16 %v464_v21, %v275_v26  ;;  %v228_v46 = vmax.bf16 %v224_v34, %v220_v38  ;;  %v204_v47 = vor.u32 %v203_v40, %v200_v36  ;;  %v333_v48 = vshll.u32 %v474_v30, 16  ;;  %v470_v7 = vld [vmem:[%s796_s4 + $0x44] sm:$0x3]  ;;  %s586_s17 = scalar_lea.vmem %s585_s16, 256  ;;  %p587_p5 = scmp.lt.s32.totalorder %s848_s28, %s585_s16 }
  0x51   : > { %346 = vst [vmem:[%s835_s25] sm:$0x3] %v342_v31  ;;  %v267_v50 = vrot.slane %v265_v43, 5  ;;  %v328_v55 = vrot.slane %v327_v41, 4  ;;  %v332_v60 = vrot.slane %v330_v44, 4  ;;  %p583_p0 = pneg %p582_p11  ;;  %p588_p13 = scmp.lt.s32.totalorder %s586_s17, %s580_s15 }
  0x52   : > { %v295_v45 = vmax.bf16 %v468_v32, %v287_v37  ;;  %v276_v52 = vmax.bf16 %v260_v39, %v228_v46  ;;  %v205_v53 = vrot.slane %v204_v47, 4  ;;  %v335_v61 = vrot.slane %v333_v48, 5 }
  0x53   : > { %v268_v57 = vor.u32 %v267_v50, %v264_v42  ;;  %p589_p2 = por %p588_p13, %p587_p5 }
  0x54   : > { %v343_v51 = vmax.bf16 %v319_v33, %v295_v45  ;;  %v288_v58 = vmax.bf16 %v465_v49, %v276_v52  ;;  %v213_v59 = vmax.bf16 %v205_v53, %v165_v35  ;;  %v336_v4 = vor.u32 %v335_v61, %v332_v60 }
  0x55   : > { %v269_v1 = vrot.slane %v268_v57, 4  ;;  %p590_p4 = pnand %p589_p2, %p583_p0 }
  0x56   : > { %347 = vst [vmem:[%s835_s25 + $0x2] sm:$0x3] %v343_v51  ;;  %v296_v63 = vmax.bf16 %v469_v54, %v288_v58  ;;  %v221_v0 = vmax.bf16 %v217_v56, %v213_v59  ;;  %v337_v9 = vrot.slane %v336_v4, 4 }
  0x58   : > { %v344_v2 = vmax.bf16 %v328_v55, %v296_v63  ;;  %v229_v3 = vmax.bf16 %v225_v62, %v221_v0 }
  0x5a   : > { %348 = vst [vmem:[%s835_s25 + $0x4] sm:$0x3] %v344_v2  ;;  %v277_v6 = vmax.bf16 %v269_v1, %v229_v3 }
  0x5c   : > { %v289_v8 = vmax.bf16 %v466_v5, %v277_v6 }
  0x5e   : > { %v297_v10 = vmax.bf16 %v470_v7, %v289_v8 }
  0x60   : > { %v345_v11 = vmax.bf16 %v337_v9, %v297_v10 }
  0x62   : > { %349 = vst [vmem:[%s835_s25 + $0x6] sm:$0x3] %v345_v11 }
  0x63   : > { %593 = shalt.err (!%p590_p4)
}
  0x64   : > { %s594_s22 = scalar_lea.hbm %s853_s12, 128  ;;  %s598_s26 = scalar_lea.hbm %s904_s1, 256 }
  0x65   : > { %p595_p6 = scmp.ne.s32.totalorder %s853_s12, %s594_s22  ;;  %p599_p12 = scmp.lt.u32.totalorder %s853_s12, %s904_s1 }
  0x66   : > { %p600_p1 = scmp.lt.u32.totalorder %s598_s26, %s594_s22  ;;  %p602_p8 = scmp.lt.u32.totalorder %s594_s22, %s853_s12 }
  0x67   : > { %p596_p7 = pnand %p595_p6, %p912_p9 }
  0x68   : > { %p601_p3 = por %p600_p1, %p599_p12 }
  0x69   : > { %p597_p10 = pneg %p596_p7 }
  0x6a   : > { %p603_p11 = por %p602_p8, %p601_p3 }
  0x6c   : > { %p604_p0 = pnand %p603_p11, %p597_p10 }
  0x6e   : > { %607 = shalt.err (!%p604_p0)
}
  0x6f   : > { %s668_s4 = smov 32   ;;  %s669_s18 = smov 2  }
  0x70   : > { %486 = dma.vmem_to_hbm [thread:$0]  (%p912_p9), %s848_s28, 128, %s853_s12, %s351_s13, %s668_s4, %s668_s4, %s669_s18  }
  0x71 PF: > { %s381_s25 = sand.u32 1, %s642_s6   ;;  %p913_p5 = scmp.ne.s32.totalorder %s909_s21, 0 }
  0x72   : > { %p914_p13 = scmp.ge.s32.totalorder %s662_s11, 2  ;;  %s382_s30 = scalar_lea.sflag [#allocation4], %s381_s25 }
  0x74   : > { %p493_p2 = pnand %p914_p13, %p913_p5 }
  0x76   : > { %637 = dma.done.wait (!%p493_p2), %s382_s30, 128  }
  0x77   : > { %639 = vsyncadd (!%p493_p2), %s382_s30, 4294967168  ;;  %s17_s11 = sadd.s32 1, %s662_s11   ;;  %s915_s6 = smov %s646_s7 }
  0x78   : > { %p14_p4 = scmp.ge.s32.totalorder %s17_s11, 4   ;;  %s916_s7 = smov %s650_s8 }
  0x79   : > { %s917_s8 = smov %s736_s20  ;;  %s918_s9 = smov %s658_s10 }
  0x7a   : > { %s919_s10 = smov %s921_s14  ;;  %16 = sbr.rel (!%p14_p4) target bundleno = 6 (0x6), region = 71 }
  0x81   :  { %387 = vsyncpa [#allocation3], 1 }
  0x82   :  { %389 = vsyncpa [#allocation3 + $0x1], 1 }
  0x83   :  { %390 = vsyncpa [#allocation4], 1 }
  0x84   :  { %392 = vsyncpa [#allocation4 + $0x1], 1 }

// kernel: _lambda_.14
= control target key start
LH: loop header
LB: loop body
LE: loop exit
PB: predicated region body
PF: predicated region fallthrough
CT: control target
= control target key end

     0   :  { %8 = vsyncpa [#allocation4], 0  ;;  %s587_s0 = inlined_call_operand.hbm [shape: bf16[32,128], index: 0, kind: input, shape index: {}]   ;;  %s588_s1 = inlined_call_operand.hbm [shape: bf16[128,256], index: 1, kind: input, shape index: {}]   ;;  %s589_s2 = inlined_call_operand.hbm [shape: f32[1,256], index: 2, kind: input, shape index: {}]   ;;  %s590_s3 = inlined_call_operand.hbm [shape: bf16[32,256], index: 3, kind: output, shape index: {}]  }
   0x1   :  { %9 = vsyncpa [#allocation7], 0 }
   0x2   :  { %10 = vsyncpa [#allocation5], 0  ;;  %s504_s12 = smov [#allocation6]   ;;  %s410_s16 = scalar_lea.hbm %s588_s1, 2048 }
   0x3   :  { %s28_s13 = sshll.u32 %s504_s12, 4  ;;  %p411_p0 = scmp.ne.s32.totalorder %s588_s1, %s410_s16  ;;  %s29_s13 = int_to_ptr.vmem [resolvable:$true] %s28_s13 }
   0x4   :  { %p414_p1 = scmp.lt.u32.totalorder %s410_s16, %s588_s1 }
   0x6   :  { %p416_p2 = pnand %p414_p1, %p411_p0 }
   0x8   :  { %419 = shalt.err (!%p416_p2)
}
   0x9   :  { %s420_s21 = scalar_lea.vmem %s29_s13, 2048  ;;  %p425_p4 = scmp.lt.s32.totalorder %s29_s13, %s29_s13 }
   0xa   :  { %p421_p3 = scmp.ne.s32.totalorder %s29_s13, %s420_s21  ;;  %p426_p5 = scmp.lt.s32.totalorder %s420_s21, %s420_s21 }
   0xc   :  { %p427_p6 = por %p426_p5, %p425_p4 }
   0xe   :  { %p428_p7 = pnand %p427_p6, %p421_p3 }
  0x10   :  { %431 = shalt.err (!%p428_p7)
}
  0x11   :  { %s505_s22 = smov 128   ;;  %s506_s23 = smov 8  }
  0x12   :  { %34 = dma.hbm_to_vmem [thread:$0]  %s588_s1, 2048, %s29_s13, [#allocation7], %s505_s22, %s505_s22, %s506_s23  }
  0x13   :  { %s507_s26 = smov [#allocation3]   ;;  %s432_s30 = scalar_lea.hbm %s587_s0, 256 }
  0x14   :  { %s16_s27 = sshll.u32 %s507_s26, 4  ;;  %p433_p8 = scmp.ne.s32.totalorder %s587_s0, %s432_s30  ;;  %s17_s27 = int_to_ptr.vmem [resolvable:$true] %s16_s27 }
  0x15   :  { %p436_p9 = scmp.lt.u32.totalorder %s432_s30, %s587_s0 }
  0x17   :  { %p438_p10 = pnand %p436_p9, %p433_p8 }
  0x19   :  { %441 = shalt.err (!%p438_p10)
}
  0x1a   :  { %s442_s8 = scalar_lea.vmem %s17_s27, 256  ;;  %p447_p12 = scmp.lt.s32.totalorder %s17_s27, %s17_s27 }
  0x1b   :  { %p443_p11 = scmp.ne.s32.totalorder %s17_s27, %s442_s8  ;;  %p448_p13 = scmp.lt.s32.totalorder %s442_s8, %s442_s8 }
  0x1d   :  { %p449_p0 = por %p448_p13, %p447_p12 }
  0x1f   :  { %p450_p1 = pnand %p449_p0, %p443_p11 }
  0x21   :  { %453 = shalt.err (!%p450_p1)
}
  0x22   :  { %s508_s1 = smov 64   ;;  %s509_s9 = smov 4  }
  0x23   :  { %22 = dma.hbm_to_vmem [thread:$0]  %s587_s0, 256, %s17_s27, [#allocation4], %s508_s1, %s508_s1, %s509_s9  }
  0x24   :  { %s510_s12 = smov [#allocation8]   ;;  %s454_s16 = scalar_lea.hbm %s589_s2, 32 }
  0x25   :  { %s41_s13 = sshll.u32 %s510_s12, 4  ;;  %p455_p2 = scmp.ne.s32.totalorder %s589_s2, %s454_s16  ;;  %s42_s13 = int_to_ptr.vmem [resolvable:$true] %s41_s13 }
  0x26   :  { %p458_p3 = scmp.lt.u32.totalorder %s454_s16, %s589_s2 }
  0x28   :  { %p460_p4 = pnand %p458_p3, %p455_p2 }
  0x2a   :  { %463 = shalt.err (!%p460_p4)
}
  0x2b   :  { %s464_s21 = scalar_lea.vmem %s42_s13, 32  ;;  %p469_p6 = scmp.lt.s32.totalorder %s42_s13, %s42_s13 }
  0x2c   :  { %p465_p5 = scmp.ne.s32.totalorder %s42_s13, %s464_s21  ;;  %p470_p7 = scmp.lt.s32.totalorder %s464_s21, %s464_s21 }
  0x2e   :  { %p471_p8 = por %p470_p7, %p469_p6 }
  0x30   :  { %p472_p9 = pnand %p471_p8, %p465_p5 }
  0x32   :  { %475 = shalt.err (!%p472_p9)
}
  0x33   :  { %44 = dma.hbm_to_vmem [thread:$0]  %s589_s2, 32, %s42_s13, [#allocation7]  }
  0x34   :  { %498 = dma.done.wait [#allocation4], 256  }
  0x35   :  { %499 = vsyncadd [#allocation4], 4294967040 }
  0x36   :  { %500 = dma.done.wait [#allocation7], 2080  }
  0x37   :  { %501 = vsyncadd [#allocation7], 4294965216  ;;  %v511_v0 = vmov 0   ;;  %v384_v1 = vld [vmem:[#allocation6 + $0x4] ss:$8 sps:$4 sm:$0xff]   ;;  %v408_v17 = vld [vmem:[#allocation3] sm:$0xff]   ;;  %v269_v19 = vlaneseq }
  0x38   :  { %219 = vmatprep.mubr.bf16.mxu0 %v511_v0  ;;  %229 = vmatprep.mubr.bf16.mxu1 %v511_v0  ;;  %v386_v2 = vld [vmem:[#allocation6] ss:$8 sps:$4 sm:$0xff]   ;;  %v387_v3 = vld [vmem:[#allocation6 + $0x14] ss:$8 sps:$4 sm:$0xff]   ;;  %v389_v4 = vld [vmem:[#allocation6 + $0x10] ss:$8 sps:$4 sm:$0xff]  }
  0x39   :  { %187 = vmatprep.subr.bf16.mxu0 %v384_v1  ;;  %359 = vmatprep.subr.bf16.mxu1 %v384_v1  ;;  %v390_v5 = vld [vmem:[#allocation6 + $0x24] ss:$8 sps:$4 sm:$0xff]   ;;  %v392_v6 = vld [vmem:[#allocation6 + $0x20] ss:$8 sps:$4 sm:$0xff]   ;;  %v393_v7 = vld [vmem:[#allocation6 + $0x34] ss:$8 sps:$4 sm:$0xff]  }
  0x3a   :  { %188 = vmatpush1.bf16.msra.mxu0 %v386_v2  ;;  %367 = vmatpush1.bf16.msra.mxu1 %v386_v2  ;;  %v395_v8 = vld [vmem:[#allocation6 + $0x30] ss:$8 sps:$4 sm:$0xff]   ;;  %v396_v9 = vld [vmem:[#allocation6 + $0x44] ss:$8 sps:$4 sm:$0xff]   ;;  %v398_v10 = vld [vmem:[#allocation6 + $0x40] ss:$8 sps:$4 sm:$0xff]  }
  0x3b   :  { %189 = vmatprep.subr.bf16.mxu0 %v387_v3  ;;  %360 = vmatprep.subr.bf16.mxu1 %v387_v3  ;;  %v399_v11 = vld [vmem:[#allocation6 + $0x54] ss:$8 sps:$4 sm:$0xff]   ;;  %v401_v12 = vld [vmem:[#allocation6 + $0x50] ss:$8 sps:$4 sm:$0xff]   ;;  %v402_v13 = vld [vmem:[#allocation6 + $0x64] ss:$8 sps:$4 sm:$0xff]  }
  0x3c   :  { %v404_v14 = vld [vmem:[#allocation6 + $0x60] ss:$8 sps:$4 sm:$0xff]   ;;  %v405_v15 = vld [vmem:[#allocation6 + $0x74] ss:$8 sps:$4 sm:$0xff]   ;;  %v407_v16 = vld [vmem:[#allocation6 + $0x70] ss:$8 sps:$4 sm:$0xff]  }
  0x3d   :  { %v409_v18 = vld [vmem:[#allocation3 + $0x8] sm:$0xff]   ;;  %v270_v20 = vshrl.u32 %v269_v19, 7  ;;  %v267_v22 = vld [vmem:[#allocation8] sm:$0x3]  ;;  %s512_s2 = smov [#allocation9]  }
  0x3e   :  { %190 = vmatpush1.bf16.msra.mxu0 %v389_v4  ;;  %368 = vmatpush1.bf16.msra.mxu1 %v389_v4  ;;  %s320_s25 = sshll.u32 %s512_s2, 4  ;;  %s321_s25 = int_to_ptr.vmem [resolvable:$true] %s320_s25 }
  0x3f   :  { %191 = vmatprep.subr.bf16.mxu0 %v390_v5  ;;  %361 = vmatprep.subr.bf16.mxu1 %v390_v5  ;;  %v271_v21 = vsub.s32 0, %v270_v20  ;;  %v275_v23 = vsub.s32 1, %v270_v20  ;;  %s476_s26 = scalar_lea.vmem %s321_s25, 512  ;;  %p481_p11 = scmp.lt.s32.totalorder %s321_s25, %s321_s25 }
  0x40   :  { %p477_p10 = scmp.ne.s32.totalorder %s321_s25, %s476_s26  ;;  %p482_p12 = scmp.lt.s32.totalorder %s476_s26, %s476_s26 }
  0x41   :  { %v272_v24 = vrot.slane %v267_v22, %v271_v21  ;;  %v276_v25 = vrot.slane %v267_v22, %v275_v23 }
  0x42   :  { %192 = vmatpush1.bf16.msra.mxu0 %v392_v6  ;;  %369 = vmatpush1.bf16.msra.mxu1 %v392_v6  ;;  %p483_p13 = por %p482_p12, %p481_p11 }
  0x43   :  { %193 = vmatprep.subr.bf16.mxu0 %v393_v7  ;;  %362 = vmatprep.subr.bf16.mxu1 %v393_v7 }
  0x44   :  { %p484_p0 = pnand %p483_p13, %p477_p10 }
  0x46   :  { %194 = vmatpush1.bf16.msra.mxu0 %v395_v8  ;;  %370 = vmatpush1.bf16.msra.mxu1 %v395_v8 }
  0x47   :  { %195 = vmatprep.subr.bf16.mxu0 %v396_v9  ;;  %363 = vmatprep.subr.bf16.mxu1 %v396_v9 }
  0x4a   :  { %196 = vmatpush1.bf16.msra.mxu0 %v398_v10  ;;  %371 = vmatpush1.bf16.msra.mxu1 %v398_v10 }
  0x4b   :  { %197 = vmatprep.subr.bf16.mxu0 %v399_v11  ;;  %364 = vmatprep.subr.bf16.mxu1 %v399_v11 }
  0x4e   :  { %198 = vmatpush1.bf16.msra.mxu0 %v401_v12  ;;  %372 = vmatpush1.bf16.msra.mxu1 %v401_v12 }
  0x4f   :  { %199 = vmatprep.subr.bf16.mxu0 %v402_v13  ;;  %365 = vmatprep.subr.bf16.mxu1 %v402_v13 }
  0x52   :  { %200 = vmatpush1.bf16.msra.mxu0 %v404_v14  ;;  %373 = vmatpush1.bf16.msra.mxu1 %v404_v14 }
  0x53   :  { %201 = vmatprep.subr.bf16.mxu0 %v405_v15  ;;  %366 = vmatprep.subr.bf16.mxu1 %v405_v15 }
  0x56   :  { %202 = vmatpush1.bf16.msra.mxu0 %v407_v16  ;;  %374 = vmatpush1.bf16.msra.mxu1 %v407_v16 }
  0x59   :  { %220 = vmatmul.mubr.bf16.vlgmr.msra.gmra.mrb[0].mxu0 %v408_v17  ;;  %230 = vmatmul.mubr.bf16.vlgmr.msra.gmra.mrb[0].mxu1 %v409_v18 }
 0x12c   :  { %v221_v26 = vpop.f32.mrb[0].mxu0  ;;  %v231_v27 = vpop.f32.mrb[0].mxu1 }
 0x12d   :  { %v279_v28 = vadd.f32 %v272_v24, %v221_v26  ;;  %v283_v29 = vadd.f32 %v272_v24, %v231_v27  ;;  %v223_v30 = vpop.f32.mrb[1].mxu0  ;;  %v233_v31 = vpop.f32.mrb[1].mxu1 }
 0x12e   :  { %v280_v32 = vadd.f32 %v276_v25, %v223_v30  ;;  %v284_v33 = vadd.f32 %v276_v25, %v233_v31  ;;  %v225_v34 = vpop.f32.mrb[2].mxu0  ;;  %v235_v35 = vpop.f32.mrb[2].mxu1 }
 0x12f   :  { %v281_v36 = vadd.f32 %v272_v24, %v225_v34  ;;  %v285_v37 = vadd.f32 %v272_v24, %v235_v35  ;;  %v227_v38 = vpop.f32.mrb[3].mxu0  ;;  %v237_v39 = vpop.f32.mrb[3].mxu1 }
 0x130   :  { %v355_v40 = vpack.c.bf16 %v280_v32, %v279_v28  ;;  %v357_v41 = vpack.c.bf16 %v284_v33, %v283_v29  ;;  %v282_v42 = vadd.f32 %v276_v25, %v227_v38  ;;  %v286_v43 = vadd.f32 %v276_v25, %v237_v39 }
 0x132   :  { %311 = vst [vmem:[#allocation9] sm:$0xff] %v355_v40  ;;  %313 = vst [vmem:[#allocation9 + $0x10] sm:$0xff] %v357_v41  ;;  %v356_v44 = vpack.c.bf16 %v282_v42, %v281_v36  ;;  %v358_v45 = vpack.c.bf16 %v286_v43, %v285_v37 }
 0x134   :  { %312 = vst [vmem:[#allocation9 + $0x8] sm:$0xff] %v356_v44  ;;  %314 = vst [vmem:[#allocation9 + $0x18] sm:$0xff] %v358_v45 }
 0x135   :  { %487 = shalt.err (!%p484_p0)
}
 0x136   :  { %s488_s29 = scalar_lea.hbm %s590_s3, 512 }
 0x137   :  { %p489_p1 = scmp.ne.s32.totalorder %s590_s3, %s488_s29  ;;  %p492_p2 = scmp.lt.u32.totalorder %s488_s29, %s590_s3 }
 0x139   :  { %p494_p3 = pnand %p492_p2, %p489_p1 }
 0x13b   :  { %497 = shalt.err (!%p494_p3)
}
 0x13c   :  { %326 = dma.vmem_to_hbm [thread:$0]  %s321_s25, 512, %s590_s3, [#allocation5], %s505_s22, %s505_s22, %s506_s23  }
 0x13d   :  { %502 = dma.done.wait [#allocation5], 512  }
 0x13e   :  { %503 = vsyncadd [#allocation5], 4294966784 }
 0x13f   :  { %330 = vsyncpa [#allocation4], 1 }
 0x140   :  { %331 = vsyncpa [#allocation7], 1 }
 0x141   :  { %332 = vsyncpa [#allocation5], 1 }

// kernel: _lambda_.10
= control target key start
LH: loop header
LB: loop body
LE: loop exit
PB: predicated region body
PF: predicated region fallthrough
CT: control target
= control target key end

     0   :  { %8 = vsyncpa [#allocation3], 0  ;;  %s5912_s0 = inlined_call_operand.hbm [shape: bf16[2,11,11,32], index: 0, kind: input, shape index: {}]   ;;  %s5913_s1 = inlined_call_operand.hbm [shape: bf16[512,128], index: 1, kind: input, shape index: {}]   ;;  %s5914_s2 = inlined_call_operand.hbm [shape: f32[1,128], index: 2, kind: input, shape index: {}]   ;;  %s5915_s3 = inlined_call_operand.hbm [shape: bf16[2,8,8,128], index: 3, kind: output, shape index: {}]  }
   0x1   :  { %10 = vsyncpa [#allocation3 + $0x1], 0 }
   0x2   :  { %11 = vsyncpa [#allocation6], 0 }
   0x3   :  { %12 = vsyncpa [#allocation4], 0 }
   0x4   :  { %14 = vsyncpa [#allocation4 + $0x1], 0  ;;  %s4675_s12 = smov 0   ;;  %s4677_s13 = smov 0  }
   0x5   :  { %s4679_s14 = smov 0   ;;  %s4681_s15 = smov 0  }
   0x6   :  { %s4683_s16 = smov 0   ;;  %s4685_s17 = smov 0  }
   0x7 LB: > { %s3598_s18 = sadd.s32 4294967295, %s4645_s17   ;;  %s3599_s19 = sadd.s32 4294967294, %s4645_s17   ;;  %s4645_s17 = sphi %s4685_s17, %s20_s17   ;;  %s4641_s16 = sphi %s4683_s16, %s5943_s16   ;;  %s4637_s15 = sphi %s4681_s15, %s5942_s15   ;;  %s4633_s14 = sphi %s4679_s14, %s5941_s14   ;;  %s4629_s13 = sphi %s4677_s13, %s5940_s13   ;;  %s4625_s12 = sphi %s4675_s12, %s5939_s12  }
   0x8   : > { %p52_p0 = scmp.ne.s32.totalorder %s4629_s13, %s4625_s12  ;;  %p4709_p1 = scmp.eq.s32.totalorder %s3598_s18, 0 }
   0x9   : > { %p4713_p2 = scmp.eq.s32.totalorder %s3598_s18, 1  ;;  %p126_p3 = scmp.eq.s32.totalorder %s3599_s19, 1 }
   0xa   : > { %s5920_s20 = scalar_select %p4709_p1, 1, 0 }
   0xb   : > { %p4719_p4 = por %p4709_p1, %p52_p0  ;;  %p3600_p5 = scmp.ge.s32.totalorder %s4645_s17, 1 }
   0xc   : > { %p4724_p6 = por %p126_p3, %p52_p0  ;;  %p133_p7 = scmp.lt.s32.totalorder %s4645_s17, 3 }
   0xd   : > { %s5922_s22 = scalar_select %p4719_p4, 1, 0 }
   0xe   : > { %s5923_s23 = scalar_select %p4724_p6, 1, 0 }
   0xf   : > { %p4729_p8 = pnand %p3600_p5, %p133_p7  ;;  %s4647_s25 = smov [#allocation5]  }
  0x10   : > { %s145_s26 = sshll.u32 %s4647_s25, 4  ;;  %s4648_s28 = smov [#allocation7]   ;;  %s4733_s26 = int_to_ptr.vmem [resolvable:$true] %s145_s26 }
  0x11   : > { %p4350_p9 = pneg %p4729_p8  ;;  %s159_s29 = sshll.u32 %s4648_s28, 4  ;;  %s4744_s29 = int_to_ptr.vmem [resolvable:$true] %s159_s29 }
  0x12   : > { %s4473_s5 = scalar_lea.hbm %s5913_s1, 4096 }
  0x13   : > { %p4740_p11 = pnand %p4350_p9, %p4709_p1  ;;  %p4474_p12 = scmp.ne.s32.totalorder %s5913_s1, %s4473_s5 }
  0x14   : > { %p4480_p5 = scmp.lt.u32.totalorder %s4473_s5, %s5913_s1 }
  0x15   : > { %p4475_p13 = pneg %p4740_p11 }
  0x17   : > { %p4476_p0 = pnand %p4475_p13, %p4474_p12 }
  0x19   : > { %p4477_p3 = pneg %p4476_p0 }
  0x1b   : > { %p4482_p7 = pnand %p4480_p5, %p4477_p3 }
  0x1d   : > { %4485 = shalt.err (!%p4482_p7)
}
  0x1e   : > { %s4486_s10 = scalar_lea.vmem %s4733_s26, 4096  ;;  %p4494_p1 = scmp.lt.s32.totalorder %s4733_s26, %s4733_s26 }
  0x1f   : > { %p4487_p9 = scmp.ne.s32.totalorder %s4733_s26, %s4486_s10  ;;  %p4495_p12 = scmp.lt.s32.totalorder %s4486_s10, %s4486_s10 }
  0x21   : > { %p4489_p10 = pnand %p4487_p9, %p4475_p13  ;;  %p4496_p0 = por %p4495_p12, %p4494_p1 }
  0x23   : > { %p4490_p6 = pneg %p4489_p10 }
  0x25   : > { %p4497_p4 = pnand %p4496_p0, %p4490_p6 }
  0x27   : > { %4500 = shalt.err (!%p4497_p4)
}
  0x28   : > { %s4649_s11 = smov 64   ;;  %s4650_s18 = smov 4  }
  0x29   : > { %4353 = dma.hbm_to_vmem [thread:$0]  (!%p4740_p11), %s5913_s1, 4096, %s4733_s26, [#allocation6], %s4649_s11, %s4649_s11, %s4650_s18  }
  0x2a   : > { %s4501_s4 = scalar_lea.hbm %s5914_s2, 16 }
  0x2b   : > { %p4502_p1 = scmp.ne.s32.totalorder %s5914_s2, %s4501_s4  ;;  %p4508_p10 = scmp.lt.u32.totalorder %s4501_s4, %s5914_s2 }
  0x2d   : > { %p4504_p4 = pnand %p4502_p1, %p4475_p13 }
  0x2f   : > { %p4505_p6 = pneg %p4504_p4 }
  0x31   : > { %p4510_p3 = pnand %p4508_p10, %p4505_p6 }
  0x33   : > { %4513 = shalt.err (!%p4510_p3)
}
  0x34   : > { %s4514_s26 = scalar_lea.vmem %s4744_s29, 16  ;;  %s4521_s9 = scalar_lea.vmem %s4744_s29, 32 }
  0x35   : > { %p4515_p5 = scmp.ne.s32.totalorder %s4744_s29, %s4514_s26  ;;  %p4522_p12 = scmp.lt.s32.totalorder %s4744_s29, %s4744_s29 }
  0x36   : > { %p4523_p0 = scmp.lt.s32.totalorder %s4521_s9, %s4514_s26 }
  0x37   : > { %p4517_p7 = pnand %p4515_p5, %p4475_p13 }
  0x38   : > { %p4524_p1 = por %p4523_p0, %p4522_p12 }
  0x39   : > { %p4518_p9 = pneg %p4517_p7 }
  0x3b   : > { %p4525_p4 = pnand %p4524_p1, %p4518_p9 }
  0x3d   : > { %4528 = shalt.err (!%p4525_p4)
}
  0x3e   : > { %4356 = dma.hbm_to_vmem [thread:$0]  (!%p4740_p11), %s5914_s2, 16, %s4744_s29, [#allocation6]  }
  0x3f   : > { %s32_s25 = sadd.s32 1, %s4641_s16  ;;  %s39_s28 = sadd.s32 1, %s4633_s14 }
  0x40   : > { %p34_p13 = scmp.ge.s32.totalorder %s32_s25, 2  ;;  %p46_p6 = scmp.ne.s32.totalorder %s4633_s14, %s4629_s13 }
  0x41   : > { %p47_p10 = scmp.eq.s32.totalorder %s4645_s17, 0  ;;  %p4367_p3 = scmp.lt.s32.totalorder %s4645_s17, 2 }
  0x42   : > { %s5945_s25 = smov (%p34_p13, %s32_s25), 0  ;;  %p4812_p7 = por %p4713_p2, %p46_p6 }
  0x43   : > { %p48_p5 = por %p47_p10, %p46_p6  ;;  %s36_s30 = ssub.s32 %s4641_s16, %s5945_s25 }
  0x44   : > { %s5926_s27 = scalar_select %p4812_p7, 1, 0 }
  0x45   : > { %s170_s4 = sand.u32 1, %s4633_s14   ;;  %p37_p9 = scmp.eq.s32.totalorder %s36_s30, 0 }
  0x46   : > { %s4335_s29 = smul.u32 88, %s170_s4  ;;  %p4819_p11 = pnand %p4367_p3, %p48_p5 }
  0x47   : > { %s4824_s6 = scalar_select %p37_p9, %s4633_s14, %s39_s28  }
  0x48   : > { %s4336_s7 = smul.u32 1408, %s4641_s16  ;;  %s174_s8 = scalar_lea.vmem [#allocation2], %s4335_s29 }
  0x49   : > { %s181_s26 = sshll.u32 %s174_s8, 4  ;;  %s4834_s19 = scalar_lea.sflag [#allocation3], %s170_s4  ;;  %s4832_s26 = int_to_ptr.vmem [resolvable:$true] %s181_s26 }
  0x4a   : > { %s4830_s10 = scalar_lea.hbm %s5912_s0, %s4336_s7  ;;  %p4531_p12 = pneg %p4819_p11 }
  0x4b   : > { %s4529_s30 = scalar_lea.hbm %s4830_s10, 1408  ;;  %s4534_s7 = scalar_lea.hbm %s5912_s0, 2816 }
  0x4c   : > { %p4530_p2 = scmp.ne.s32.totalorder %s4830_s10, %s4529_s30  ;;  %p4535_p4 = scmp.lt.u32.totalorder %s4830_s10, %s5912_s0 }
  0x4d   : > { %p4536_p13 = scmp.lt.u32.totalorder %s4534_s7, %s4529_s30  ;;  %p4538_p10 = scmp.lt.u32.totalorder %s4529_s30, %s4830_s10 }
  0x4e   : > { %p4532_p0 = pnand %p4531_p12, %p4530_p2 }
  0x4f   : > { %p4537_p6 = por %p4536_p13, %p4535_p4 }
  0x50   : > { %p4533_p1 = pneg %p4532_p0 }
  0x51   : > { %p4539_p3 = por %p4538_p10, %p4537_p6 }
  0x53   : > { %p4540_p5 = pnand %p4539_p3, %p4533_p1 }
  0x55   : > { %4543 = shalt.err (!%p4540_p5)
}
  0x56   : > { %s4544_s4 = scalar_lea.vmem %s4832_s26, 1408  ;;  %s4651_s9 = smov [#allocation2]  }
  0x57   : > { %p4545_p9 = scmp.ne.s32.totalorder %s4832_s26, %s4544_s4  ;;  %s4549_s28 = sshll.u32 %s4651_s9, 4  ;;  %s4550_s28 = int_to_ptr.vmem [resolvable:$false] %s4549_s28 }
  0x58   : > { %s4551_s29 = scalar_lea.vmem %s4550_s28, 2816  ;;  %p4552_p7 = scmp.lt.s32.totalorder %s4832_s26, %s4550_s28 }
  0x59   : > { %p4547_p2 = pnand %p4545_p9, %p4531_p12  ;;  %p4553_p4 = scmp.lt.s32.totalorder %s4551_s29, %s4544_s4 }
  0x5b   : > { %p4548_p0 = pneg %p4547_p2  ;;  %p4554_p13 = por %p4553_p4, %p4552_p7 }
  0x5d   : > { %p4555_p6 = pnand %p4554_p13, %p4548_p0 }
  0x5f   : > { %4558 = shalt.err (!%p4555_p6)
}
  0x60   : > { %4360 = dma.hbm_to_vmem [thread:$0]  (!%p4819_p11), %s4830_s10, 1408, %s4832_s26, %s4834_s19, %s4649_s11, %s4649_s11, %s4650_s18  }
  0x61   : > { %193 = sbr.rel (%p4729_p8) target bundleno = 564 (0x234), region = 32  ;;  %s4868_s30 = sand.u32 (!%p4729_p8), 1, %s4629_s13  }
  0x62   : > { %s4337_s7 = smul.u32 (!%p4729_p8), 88, %s4868_s30  ;;  %s196_s8 = scalar_lea.sflag (!%p4729_p8), [#allocation3], %s4868_s30 }
  0x63   : > { %p5928_p7 = scmp.ne.s32.totalorder (!%p4729_p8), %s5922_s22, 0 }
  0x64   : > { %s4872_s21 = scalar_lea.vmem (!%p4729_p8), [#allocation2], %s4337_s7 }
  0x68   : > { %4612 = dma.done.wait (%p5928_p7), %s196_s8, 1408  }
  0x69   : > { %4614 = vsyncadd (%p5928_p7), %s196_s8, 4294965888  ;;  %p5929_p11 = scmp.ne.s32.totalorder %s5920_s20, 0 }
  0x6b   : > { %4616 = dma.done.wait (%p5929_p11), [#allocation6], 4112  }
  0x6c   : > { %4618 = vsyncadd (%p5929_p11), [#allocation6], 4294963184  ;;  %v4425_v0 = vld [vmem:[#allocation5 + $0x80] sm:$0xff]   ;;  %v4426_v1 = vld [vmem:[#allocation5 + $0x10] sm:$0xff]   ;;  %vm523_vm0 = vcmask 261120   ;;  %vm726_vm4 = vcmask 1042432  }
  0x6d   : > { %4119 = vmatprep.subr.bf16.mxu0 %v4425_v0  ;;  %v4427_v2 = vld [vmem:[#allocation5 + $0x88] sm:$0xff]   ;;  %4023 = vmatprep.subr.bf16.mxu1 %v4426_v1  ;;  %v4428_v3 = vld [vmem:[#allocation5 + $0x18] sm:$0xff]   ;;  %vm380_vm1 = vsmask.f32 3328  ;;  %vm381_vm2 = vsmask.f32 7440 }
  0x6e   : > { %4120 = vmatpush3.bf16.msra.mxu0 %v4425_v0  ;;  %4024 = vmatpush3.bf16.msra.mxu1 %v4426_v1  ;;  %v3641_v4 = vld [vmem:[%s4872_s21 + $0x10] sm:$0xf]  ;;  %v3642_v5 = vld [vmem:[%s4872_s21 + $0x18] sm:$0xf]  ;;  %v3643_v6 = vld [vmem:[%s4872_s21 + $0x20] sm:$0xf] }
  0x6f   : > { %4121 = vmatprep.subr.bf16.mxu0 %v4427_v2  ;;  %4025 = vmatprep.subr.bf16.mxu1 %v4428_v3  ;;  %v3801_v7 = vcombine.low %v3641_v4, %v3642_v5  ;;  %v2020_v8 = vshrl.u32 %v3641_v4, 16  ;;  %v2023_v9 = vshll.u32 %v3641_v4, 16  ;;  %v2034_v10 = vshrl.u32 %v3642_v5, 16  ;;  %v3644_v11 = vld [vmem:[%s4872_s21 + $0x28] sm:$0xf]  ;;  %v4886_v12 = vld [vmem:[#allocation5] sm:$0xff]   ;;  %vm4922_vm3 = vmor %vm380_vm1, %vm381_vm2 }
  0x70   : > { %v2037_v13 = vshll.u32 %v3642_v5, 16  ;;  %v3802_v14 = vcombine.low %v3643_v6, %v3644_v11  ;;  %v2048_v15 = vshrl.u32 %v3643_v6, 16  ;;  %v2051_v16 = vshll.u32 %v3643_v6, 16  ;;  %v4889_v17 = vld [vmem:[%s4872_s21] sm:$0xf]  ;;  %v4436_v46 = vld [vmem:[#allocation5 + $0x98] sm:$0xff]  }
  0x71   : > { %v4432_v18 = vld [vmem:[#allocation5 + $0x90] sm:$0xff]   ;;  %4123 = vmatprep.mubr.msk.bf16.mxu0 %vm523_vm0, %v3801_v7  ;;  %v2022_v19 = vrot.slane %v2020_v8, 4  ;;  %v2025_v20 = vrot.slane %v2023_v9, 5  ;;  %v2036_v21 = vrot.slane %v2034_v10, 4  ;;  %v2062_v22 = vshrl.u32 %v3644_v11, 16  ;;  %s3608_s20 = sshll.u32 %s4868_s30, 5 }
  0x72   : > { %4122 = vmatpush3.bf16.msra.mxu0 %v4427_v2  ;;  %v4893_v23 = vld [vmem:[%s4872_s21 + $0x8] sm:$0xf]  ;;  %4026 = vmatpush3.bf16.msra.mxu1 %v4428_v3  ;;  %v2039_v24 = vrot.slane %v2037_v13, 5  ;;  %v2050_v25 = vrot.slane %v2048_v15, 4  ;;  %v2053_v26 = vrot.slane %v2051_v16, 5  ;;  %v2065_v27 = vshll.u32 %v3644_v11, 16 }
  0x73   : > { %v4896_v28 = vld [vmem:[%s4872_s21 + $0x4] sm:$0x1]  ;;  %4131 = vmatprep.subr.bf16.mxu0 %v4432_v18  ;;  %v2026_v29 = vor.u32 %v2025_v20, %v2022_v19  ;;  %v2064_v30 = vrot.slane %v2062_v22, 4  ;;  %v4899_v31 = vld [vmem:[%s4872_s21 + $0xc] sm:$0x1]  ;;  %v384_v32 = vshrl.u32 %v4889_v17, 16  ;;  %4035 = vmatprep.subr.bf16.mxu1 %v4886_v12 }
  0x74   : > { %v387_v33 = vshll.u32 %v4889_v17, 16  ;;  %v2040_v34 = vor.u32 %v2039_v24, %v2036_v21  ;;  %v2054_v35 = vor.u32 %v2053_v26, %v2050_v25  ;;  %v2067_v36 = vrot.slane %v2065_v27, 5  ;;  %v4916_v51 = vld [vmem:[%s4872_s21 + $0x10] sm:$0xf]  ;;  %v4929_v56 = vld [vmem:[%s4872_s21 + $0x18] sm:$0xf] }
  0x75   : > { %4124 = vmatmul.mubr.msk.bf16.vlgmr.msra.gmra.mrb[0].mxu0 %vm523_vm0, %v3802_v14  ;;  %v393_v37 = vshll.u32 %v4896_v28, 16  ;;  %v4906_v38 = vrot.slane %v2026_v29, 4  ;;  %v386_v39 = vrot.slane %v384_v32, 4  ;;  %v398_v41 = vshrl.u32 %v4893_v23, 16  ;;  %v4933_v61 = vld [vmem:[%s4872_s21 + $0x14] sm:$0x1] }
  0x76   : > { %v389_v40 = vrot.slane %v387_v33, 5  ;;  %4132 = vmatpush3.bf16.msra.mxu0 %v4432_v18  ;;  %v4909_v42 = vrot.slane %v2040_v34, 4  ;;  %v4911_v43 = vrot.slane %v2054_v35, 4  ;;  %v2068_v44 = vor.u32 %v2067_v36, %v2064_v30  ;;  %v4937_v63 = vld [vmem:[%s4872_s21 + $0x1c] sm:$0x1]  ;;  %s229_s22 = scalar_lea.vmem [#allocation8], %s3608_s20 }
  0x77   : > { %v395_v45 = vrot.slane %v393_v37, 5  ;;  %v400_v48 = vrot.slane %v398_v41, 4  ;;  %v401_v49 = vshll.u32 %v4893_v23, 16  ;;  %v407_v50 = vshll.u32 %v4899_v31, 16  ;;  %4133 = vmatprep.subr.bf16.mxu0 %v4436_v46  ;;  %v3645_v8 = vld [vmem:[%s4872_s21 + $0x30] sm:$0xf] }
  0x78   : > { %v390_v47 = vor.u32 %v389_v40, %v386_v39  ;;  %v4918_v52 = vrot.slane %v2068_v44, 4  ;;  %v731_v54 = vrot.slane %v4896_v28, 5  ;;  %v735_v55 = vrot.slane %v4899_v31, 5  ;;  %v3646_v9 = vld [vmem:[%s4872_s21 + $0x38] sm:$0xf]  ;;  %s3481_s24 = sshll.u32 %s229_s22, 4  ;;  %s5858_s24 = int_to_ptr.vmem [resolvable:$true] %s3481_s24 }
  0x79   : > { %v412_v57 = vshrl.u32 %v4916_v51, 16  ;;  %v403_v59 = vrot.slane %v401_v49, 5  ;;  %v409_v60 = vrot.slane %v407_v50, 5  ;;  %v415_v62 = vshll.u32 %v4916_v51, 16  ;;  %v4949_v20 = vld [vmem:[#allocation5 + $0xa0] sm:$0xff]   ;;  %s3903_s11 = sshll.u32 %s4637_s15, 9 }
  0x7a   : > { %v391_v58 = vrot.slane %v390_v47, 4  ;;  %4134 = vmatpush3.bf16.msra.mxu0 %v4436_v46  ;;  %v421_v1 = vshll.u32 %v4933_v61, 16  ;;  %v426_v2 = vshrl.u32 %v4929_v56, 16  ;;  %v429_v3 = vshll.u32 %v4929_v56, 16  ;;  %v3647_v26 = vld [vmem:[%s4872_s21 + $0x40] sm:$0xf]  ;;  %s5863_s26 = scalar_lea.hbm %s5915_s3, %s3903_s11 }
  0x7b   : > { %v414_v0 = vrot.slane %v412_v57, 4  ;;  %v404_v5 = vor.u32 %v403_v59, %v400_v48  ;;  %v417_v6 = vrot.slane %v415_v62, 5  ;;  %v435_v7 = vshll.u32 %v4937_v63, 16  ;;  %v3648_v27 = vld [vmem:[%s4872_s21 + $0x48] sm:$0xf]  ;;  %4143 = vmatprep.subr.bf16.mxu0 %v4949_v20  ;;  %s3466_s10 = scalar_lea.sflag [#allocation4], %s4868_s30 }
  0x7c   : > { %v396_v4 = vsel %vm4922_vm3, %v391_v58, %v395_v45  ;;  %v423_v10 = vrot.slane %v421_v1, 5  ;;  %v428_v11 = vrot.slane %v426_v2, 4  ;;  %v431_v13 = vrot.slane %v429_v3, 5  ;;  %v4956_v34 = vld [vmem:[%s4872_s21 + $0x20] sm:$0xf]  ;;  %s4559_s15 = scalar_lea.vmem %s5858_s24, 512 }
  0x7d   : > { %v739_v14 = vrot.slane %v4933_v61, 5  ;;  %v405_v15 = vrot.slane %v404_v5, 4  ;;  %v418_v16 = vor.u32 %v417_v6, %v414_v0  ;;  %v437_v18 = vrot.slane %v435_v7, 5  ;;  %v4965_v40 = vld [vmem:[%s4872_s21 + $0x28] sm:$0xf]  ;;  %v4435_v1 = vld [vmem:[#allocation5 + $0x8] sm:$0xff]   ;;  %p4560_p8 = scmp.ne.s32.totalorder %s5858_s24, %s4559_s15 }
  0x7e   : > { %v743_v19 = vrot.slane %v4937_v63, 5  ;;  %v432_v21 = vor.u32 %v431_v13, %v428_v11  ;;  %v3803_v22 = vcombine.low %v3645_v8, %v3646_v9  ;;  %v2076_v24 = vshrl.u32 %v3645_v8, 16  ;;  %v4968_v41 = vld [vmem:[%s4872_s21 + $0x24] sm:$0x1]  ;;  %v4977_v48 = vld [vmem:[%s4872_s21 + $0x2c] sm:$0x1] }
  0x7f   : > { %v2079_v25 = vshll.u32 %v3645_v8, 16  ;;  %v410_v29 = vsel %vm4922_vm3, %v405_v15, %v409_v60  ;;  %v419_v30 = vrot.slane %v418_v16, 4  ;;  %v2090_v32 = vshrl.u32 %v3646_v9, 16  ;;  %v4993_v6 = vld [vmem:[%s4872_s21 + $0x30] sm:$0xf]  ;;  %p5936_p12 = scmp.ne.s32.totalorder %s5926_s27, 0 }
  0x80   : > { %v2093_v33 = vshll.u32 %v3646_v9, 16  ;;  %v3705_v35 = vcombine.low %v396_v4, %v410_v29  ;;  %v433_v36 = vrot.slane %v432_v21, 4  ;;  %4127 = vmatprep.mubr.msk.bf16.mxu0 %vm523_vm0, %v3803_v22  ;;  %v4960_v37 = vrot.slane %v2076_v24, 4  ;;  %v5000_v11 = vld [vmem:[%s4872_s21 + $0x38] sm:$0xf]  ;;  %s4652_s19 = smov [#allocation8]  }
  0x81   : > { %v4962_v39 = vrot.slane %v2079_v25, 5  ;;  %v424_v44 = vsel %vm4922_vm3, %v419_v30, %v423_v10  ;;  %v4972_v45 = vrot.slane %v2090_v32, 4  ;;  %v3804_v47 = vcombine.low %v3647_v26, %v3648_v27  ;;  %v5010_v25 = vld [vmem:[%s4872_s21 + $0x3c] sm:$0x1]  ;;  %p4561_p1 = pnand %p4560_p8, %p5936_p12  ;;  %s4563_s4 = sshll.u32 %s4652_s19, 4  ;;  %s4564_s4 = int_to_ptr.vmem [resolvable:$false] %s4563_s4 }
  0x82   : > { %v4974_v46 = vrot.slane %v2093_v33, 5  ;;  %4027 = vmatprep.mubr.msk.bf16.mxu1 %vm523_vm0, %v3705_v35  ;;  %v438_v49 = vsel %vm4922_vm3, %v433_v36, %v437_v18  ;;  %v2104_v50 = vshrl.u32 %v3647_v26, 16  ;;  %v2107_v57 = vshll.u32 %v3647_v26, 16  ;;  %v5006_v18 = vld [vmem:[%s4872_s21 + $0x34] sm:$0x1]  ;;  %s4565_s9 = scalar_lea.vmem %s4564_s4, 1024  ;;  %p4566_p3 = scmp.lt.s32.totalorder %s5858_s24, %s4564_s4 }
  0x83   : > { %v2118_v58 = vshrl.u32 %v3648_v27, 16  ;;  %v3706_v59 = vcombine.low %v424_v44, %v438_v49  ;;  %4128 = vmatmul.mubr.msk.bf16.gmra.mrb[4].mxu0 %vm523_vm0, %v3804_v47  ;;  %v2121_v60 = vshll.u32 %v3648_v27, 16  ;;  %v440_v62 = vshrl.u32 %v4956_v34, 16  ;;  %v5014_v27 = vld [vmem:[#allocation5 + $0x20] sm:$0xff]   ;;  %p4562_p10 = pneg %p4561_p1  ;;  %p4567_p5 = scmp.lt.s32.totalorder %s4565_s9, %s4559_s15 }
  0x84   : > { %v443_v0 = vshll.u32 %v4956_v34, 16  ;;  %v4985_v2 = vrot.slane %v2104_v50, 4  ;;  %v4987_v3 = vrot.slane %v2107_v57, 5  ;;  %v449_v5 = vshll.u32 %v4968_v41, 16  ;;  %v5018_v35 = vld [vmem:[%s4872_s21 + $0x14] sm:$0x1] }
  0x85   : > { %v4989_v4 = vrot.slane %v2118_v58, 4  ;;  %4028 = vmatmul.mubr.msk.bf16.vlgmr.msra.gmra.mrb[0].mxu1 %vm523_vm0, %v3706_v59  ;;  %v4996_v7 = vrot.slane %v2121_v60, 5  ;;  %v442_v8 = vrot.slane %v440_v62, 4  ;;  %v454_v10 = vshrl.u32 %v4965_v40, 16  ;;  %v5022_v50 = vld [vmem:[%s4872_s21 + $0x1c] sm:$0x1]  ;;  %p4568_p9 = por %p4567_p5, %p4566_p3 }
  0x86   : > { %v445_v9 = vrot.slane %v443_v0, 5  ;;  %4036 = vmatpush3.bf16.msra.mxu1 %v4886_v12  ;;  %v451_v13 = vrot.slane %v449_v5, 5  ;;  %v457_v15 = vshll.u32 %v4965_v40, 16  ;;  %v463_v16 = vshll.u32 %v4977_v48, 16  ;;  %v5027_v62 = vld [vmem:[%s4872_s21 + $0x24] sm:$0x1] }
  0x87   : > { %v468_v21 = vshrl.u32 %v4993_v6, 16  ;;  %v456_v24 = vrot.slane %v454_v10, 4  ;;  %4037 = vmatprep.subr.bf16.mxu1 %v4435_v1  ;;  %v471_v26 = vshll.u32 %v4993_v6, 16  ;;  %v477_v12 = vshll.u32 %v5006_v18, 16  ;;  %v5033_v10 = vld [vmem:[%s4872_s21 + $0x2c] sm:$0x1]  ;;  %p4569_p2 = pnand %p4568_p9, %p4562_p10 }
  0x88   : > { %v446_v22 = vor.u32 %v445_v9, %v442_v8  ;;  %v459_v29 = vrot.slane %v457_v15, 5  ;;  %v465_v30 = vrot.slane %v463_v16, 5  ;;  %v482_v33 = vshrl.u32 %v5000_v11, 16 }
  0x89   : > { %v470_v32 = vrot.slane %v468_v21, 4  ;;  %v473_v44 = vrot.slane %v471_v26, 5  ;;  %v479_v47 = vrot.slane %v477_v12, 5  ;;  %v485_v49 = vshll.u32 %v5000_v11, 16 }
  0x8a   : > { %v447_v36 = vrot.slane %v446_v22, 4  ;;  %v460_v57 = vor.u32 %v459_v29, %v456_v24  ;;  %v484_v58 = vrot.slane %v482_v33, 4  ;;  %v491_v59 = vshll.u32 %v5010_v25, 16  ;;  %4038 = vmatpush3.bf16.msra.mxu1 %v4435_v1 }
  0x8b   : > { %v2029_v60 = vshll.u32 %v5018_v35, 16  ;;  %v474_v5 = vor.u32 %v473_v44, %v470_v32  ;;  %v487_v8 = vrot.slane %v485_v49, 5  ;;  %v2043_v9 = vshll.u32 %v5022_v50, 16  ;;  %4047 = vmatprep.subr.bf16.mxu1 %v5014_v27 }
  0x8c   : > { %v452_v0 = vsel %vm4922_vm3, %v447_v36, %v451_v13  ;;  %vm727_vm5 = vcmask 1046532   ;;  %v461_v15 = vrot.slane %v460_v57, 4  ;;  %v493_v1 = vrot.slane %v491_v59, 5  ;;  %v5046_v36 = vld [vmem:[%s4872_s21 + $0x34] sm:$0x1] }
  0x8d   : > { %v2031_v16 = vrot.slane %v2029_v60, 5  ;;  %v2057_v21 = vshll.u32 %v5027_v62, 16  ;;  %v475_v22 = vrot.slane %v474_v5, 4  ;;  %v488_v13 = vor.u32 %v487_v8, %v484_v58  ;;  %v5057_v59 = vld [vmem:[%s4872_s21 + $0x44] sm:$0x1]  ;;  %vm5115_vm6 = vmor %vm726_vm4, %vm727_vm5 }
  0x8e   : > { %v2045_v24 = vrot.slane %v2043_v9, 5  ;;  %v2071_v26 = vshll.u32 %v5033_v10, 16  ;;  %v466_v12 = vsel %vm4922_vm3, %v461_v15, %v465_v30  ;;  %v3715_v33 = vcombine.low %v4889_v17, %v4893_v23  ;;  %v5054_v30 = vld [vmem:[%s4872_s21 + $0x3c] sm:$0x1] }
  0x8f   : > { %v2032_v29 = vsel %vm4922_vm3, %v4906_v38, %v2031_v16  ;;  %v2059_v32 = vrot.slane %v2057_v21, 5  ;;  %v3707_v44 = vcombine.low %v452_v0, %v466_v12  ;;  %v480_v49 = vsel %vm4922_vm3, %v475_v22, %v479_v47  ;;  %v5065_v47 = vld [vmem:[%s4872_s21 + $0x4c] sm:$0x1]  ;;  %v5083_v16 = vld [vmem:[%s4872_s21 + $0x10] sm:$0xe] }
  0x90   : > { %v489_v57 = vrot.slane %v488_v13, 4  ;;  %v2046_v58 = vsel %vm4922_vm3, %v4909_v42, %v2045_v24  ;;  %v2073_v23 = vrot.slane %v2071_v26, 5  ;;  %v3716_v60 = vcombine.low %v4916_v51, %v4929_v56  ;;  %v5086_v22 = vld [vmem:[%s4872_s21 + $0x18] sm:$0xe]  ;;  %v5183_v51 = vld [vmem:[%s4872_s21 + $0x48] sm:$0xe] }
  0x91   : > { %v3811_v38 = vcombine.low %v2032_v29, %v2046_v58  ;;  %v2060_v17 = vsel %vm4922_vm3, %v4911_v43, %v2059_v32  ;;  %4031 = vmatprep.mubr.msk.bf16.mxu1 %vm523_vm0, %v3707_v44  ;;  %v2082_v0 = vor.u32 %v4962_v39, %v4960_v37  ;;  %v2085_v5 = vshll.u32 %v5046_v36, 16  ;;  %v5105_v44 = vld [vmem:[%s4872_s21 + $0x28] sm:$0xe] }
  0x92   : > { %v494_v42 = vsel %vm4922_vm3, %v489_v57, %v493_v1  ;;  %v2096_v43 = vor.u32 %v4974_v46, %v4972_v45  ;;  %v2074_v9 = vsel %vm4922_vm3, %v4918_v52, %v2073_v23  ;;  %v2099_v15 = vshll.u32 %v5054_v30, 16  ;;  %v4443_v46 = vld [vmem:[#allocation5 + $0xa8] sm:$0xff]   ;;  %v5125_v23 = vld [vmem:[#allocation5 + $0xb0] sm:$0xff]  }
  0x93   : > { %v3708_v8 = vcombine.low %v480_v49, %v494_v42  ;;  %4135 = vmatprep.mubr.msk.bf16.mxu0 %vm523_vm0, %v3811_v38  ;;  %v2110_v1 = vor.u32 %v4987_v3, %v4985_v2  ;;  %v3812_v37 = vcombine.low %v2060_v17, %v2074_v9  ;;  %v2083_v39 = vrot.slane %v2082_v0, 4  ;;  %v5093_v3 = vld [vmem:[%s4872_s21 + $0x20] sm:$0xe] }
  0x94   : > { %v2087_v21 = vrot.slane %v2085_v5, 5  ;;  %v2097_v45 = vrot.slane %v2096_v43, 4  ;;  %v2101_v13 = vrot.slane %v2099_v15, 5  ;;  %v2113_v24 = vshll.u32 %v5057_v59, 16 }
  0x95   : > { %4032 = vmatmul.mubr.msk.bf16.gmra.mrb[4].mxu1 %vm523_vm0, %v3708_v8  ;;  %v2111_v52 = vrot.slane %v2110_v1, 4  ;;  %v2124_v2 = vor.u32 %v4996_v7, %v4989_v4  ;;  %4136 = vmatmul.mubr.msk.bf16.vlgmr.msra.gmra.mrb[0].mxu0 %vm523_vm0, %v3812_v37  ;;  %v2127_v12 = vshll.u32 %v5065_v47, 16  ;;  %v3717_v29 = vcombine.low %v4956_v34, %v4965_v40  ;;  %v5108_v4 = vld [vmem:[%s4872_s21] sm:$0xe]  ;;  %v5121_v40 = vld [vmem:[%s4872_s21 + $0x8] sm:$0xe] }
  0x96   : > { %4039 = vmatprep.mubr.msk.bf16.mxu1 %vm523_vm0, %v3715_v33  ;;  %v2088_v26 = vsel %vm4922_vm3, %v2083_v39, %v2087_v21  ;;  %v3718_v32 = vcombine.low %v4993_v6, %v5000_v11  ;;  %4144 = vmatpush3.bf16.msra.mxu0 %v4949_v20  ;;  %v2102_v7 = vsel %vm4922_vm3, %v2097_v45, %v2101_v13  ;;  %v2115_v33 = vrot.slane %v2113_v24, 5  ;;  %v5147_v21 = vld [vmem:[%s4872_s21 + $0x10] sm:$0xe]  ;;  %v5150_v45 = vld [vmem:[%s4872_s21 + $0x18] sm:$0xe] }
  0x97   : > { %v2125_v49 = vrot.slane %v2124_v2, 4  ;;  %v3821_v34 = vrot.slane %v5083_v16, 9  ;;  %v3813_v58 = vcombine.low %v2088_v26, %v2102_v7  ;;  %v2129_v38 = vrot.slane %v2127_v12, 5  ;;  %4145 = vmatprep.subr.bf16.mxu0 %v4443_v46  ;;  %v5160_v24 = vld [vmem:[%s4872_s21 + $0x30] sm:$0xe]  ;;  %v5175_v7 = vld [vmem:[#allocation5 + $0x30] sm:$0xff]  }
  0x98   : > { %v2262_v20 = vrot.slane %v5018_v35, 5  ;;  %v3822_v17 = vrot.slane %v5086_v22, 9  ;;  %v2116_v42 = vsel %vm4922_vm3, %v2111_v52, %v2115_v33  ;;  %v2266_v0 = vrot.slane %v5022_v50, 5  ;;  %v4442_v50 = vld [vmem:[#allocation5 + $0x28] sm:$0xff]  }
  0x99   : > { %v3823_v5 = vrot.slane %v5093_v3, 9  ;;  %v2270_v43 = vrot.slane %v5027_v62, 5  ;;  %4139 = vmatprep.mubr.msk.bf16.mxu0 %vm523_vm0, %v3813_v58  ;;  %v2130_v35 = vsel %vm4922_vm3, %v2125_v49, %v2129_v38  ;;  %v3824_v9 = vrot.slane %v5105_v44, 9  ;;  %v5163_v2 = vld [vmem:[%s4872_s21 + $0x38] sm:$0xe] }
  0x9a   : > { %v2263_v8 = vsel %vm5115_vm6, %v3821_v34, %v2262_v20  ;;  %v2274_v15 = vrot.slane %v5033_v10, 5  ;;  %v3814_v1 = vcombine.low %v2116_v42, %v2130_v35  ;;  %4146 = vmatpush3.bf16.msra.mxu0 %v4443_v46  ;;  %v2267_v62 = vsel %vm5115_vm6, %v3822_v17, %v2266_v0  ;;  %v5180_v34 = vld [vmem:[%s4872_s21 + $0x40] sm:$0xe]  ;;  %v5227_v42 = vld [vmem:[%s4872_s21 + $0x30] sm:$0xe] }
  0x9b   : > { %v5143_v37 = vsel %vm5115_vm6, %v3823_v5, %v2270_v43  ;;  %v3725_v39 = vrot.slane %v5108_v4, 9  ;;  %v3829_v13 = vcombine.low %v2263_v8, %v2267_v62  ;;  %v3726_v46 = vrot.slane %v5121_v40, 9  ;;  %4155 = vmatprep.subr.bf16.mxu0 %v5125_v23  ;;  %v5200_v58 = vld [vmem:[%s4872_s21 + $0x20] sm:$0xe]  ;;  %v5236_v35 = vld [vmem:[%s4872_s21 + $0x38] sm:$0xe] }
  0x9c   : > { %v5154_v10 = vsel %vm5115_vm6, %v3824_v9, %v2274_v15  ;;  %v3727_v52 = vrot.slane %v5147_v21, 9  ;;  %v3728_v33 = vrot.slane %v5150_v45, 9  ;;  %v3825_v49 = vrot.slane %v5160_v24, 9  ;;  %v3665_v15 = vld [vmem:[%s4872_s21 + $0x14] sm:$0x3] }
  0x9d   : > { %4040 = vmatmul.mubr.msk.bf16.vlgmr.msra.gmra.mrb[0].mxu1 %vm523_vm0, %v3716_v60  ;;  %v3830_v26 = vcombine.low %v5143_v37, %v5154_v10  ;;  %v732_v12 = vsel %vm5115_vm6, %v3725_v39, %v731_v54  ;;  %4140 = vmatmul.mubr.msk.bf16.gmra.mrb[4].mxu0 %vm523_vm0, %v3814_v1  ;;  %v736_v28 = vsel %vm5115_vm6, %v3726_v46, %v735_v55  ;;  %v2278_v56 = vrot.slane %v5046_v36, 5  ;;  %v3666_v39 = vld [vmem:[%s4872_s21 + $0x1c] sm:$0x3] }
  0x9e   : > { %4048 = vmatpush3.bf16.msra.mxu1 %v5014_v27  ;;  %v5195_v54 = vsel %vm5115_vm6, %v3727_v52, %v739_v14  ;;  %v3826_v60 = vrot.slane %v5163_v2, 9  ;;  %v5203_v27 = vld [vmem:[%s4872_s21 + $0x28] sm:$0xe]  ;;  %4043 = vmatprep.mubr.msk.bf16.mxu1 %vm523_vm0, %v3717_v29  ;;  %v3733_v31 = vcombine.low %v732_v12, %v736_v28  ;;  %v5210_v55 = vsel %vm5115_vm6, %v3728_v33, %v743_v19  ;;  %v3667_v52 = vld [vmem:[%s4872_s21 + $0x24] sm:$0x3] }
  0x9f   : > { %4049 = vmatprep.subr.bf16.mxu1 %v4442_v50  ;;  %v2282_v61 = vrot.slane %v5054_v30, 5  ;;  %v3827_v14 = vrot.slane %v5180_v34, 9  ;;  %vm874_vm7 = vsmask.f32 2304  ;;  %vm875_vm8 = vsmask.f32 6416  ;;  %4147 = vmatprep.mubr.msk.bf16.mxu0 %vm523_vm0, %v3829_v13 }
  0xa0   : > { %v3734_v36 = vcombine.low %v5195_v54, %v5210_v55  ;;  %v2279_v29 = vsel %vm5115_vm6, %v3825_v49, %v2278_v56  ;;  %v2286_v63 = vrot.slane %v5057_v59, 5  ;;  %v3828_v19 = vrot.slane %v5183_v51, 9  ;;  %v5284_v49 = vld [vmem:[#allocation5 + $0xc0] sm:$0xff]   ;;  %vm5289_vm9 = vmor %vm874_vm7, %vm875_vm8 }
  0xa1   : > { %v2283_v30 = vsel %vm5115_vm6, %v3826_v60, %v2282_v61  ;;  %v2290_v38 = vrot.slane %v5065_v47, 5  ;;  %v3729_v20 = vrot.slane %v5200_v58, 9  ;;  %v747_v17 = vrot.slane %v4968_v41, 5 }
  0xa2   : > { %4050 = vmatpush3.bf16.msra.mxu1 %v4442_v50  ;;  %v3831_v0 = vcombine.low %v2279_v29, %v2283_v30  ;;  %v5231_v59 = vsel %vm5115_vm6, %v3827_v14, %v2286_v63  ;;  %v3730_v5 = vrot.slane %v5203_v27, 9  ;;  %v751_v43 = vrot.slane %v4977_v48, 5  ;;  %v4448_v50 = vld [vmem:[#allocation5 + $0xb8] sm:$0xff]  }
  0xa3   : > { %4059 = vmatprep.subr.bf16.mxu1 %v5175_v7  ;;  %v5241_v41 = vsel %vm5115_vm6, %v3828_v19, %v2290_v38  ;;  %v5245_v47 = vsel %vm5115_vm6, %v3729_v20, %v747_v17  ;;  %v3731_v8 = vrot.slane %v5227_v42, 9  ;;  %v755_v9 = vrot.slane %v5006_v18, 5  ;;  %v4447_v20 = vld [vmem:[#allocation5 + $0x38] sm:$0xff]  }
  0xa4   : > { %v3832_v48 = vcombine.low %v5231_v59, %v5241_v41  ;;  %v5254_v1 = vsel %vm5115_vm6, %v3730_v5, %v751_v43  ;;  %v3732_v62 = vrot.slane %v5236_v35, 9  ;;  %v759_v37 = vrot.slane %v5010_v25, 5  ;;  %v3668_v5 = vld [vmem:[%s4872_s21 + $0x2c] sm:$0x3] }
  0xa5   : > { %4044 = vmatmul.mubr.msk.bf16.gmra.mrb[4].mxu1 %vm523_vm0, %v3718_v32  ;;  %v3735_v18 = vcombine.low %v5245_v47, %v5254_v1  ;;  %v5267_v13 = vsel %vm5115_vm6, %v3731_v8, %v755_v9  ;;  %v2406_v10 = vshrl.u32 %v5083_v16, 16  ;;  %v2409_v46 = vshll.u32 %v5083_v16, 16  ;;  %4148 = vmatmul.mubr.msk.bf16.vlgmr.msra.gmra.mrb[0].mxu0 %vm523_vm0, %v3830_v26 }
  0xa6   : > { %4051 = vmatprep.mubr.msk.bf16.mxu1 %vm523_vm0, %v3733_v31  ;;  %v5276_v6 = vsel %vm5115_vm6, %v3732_v62, %v759_v37  ;;  %v2415_v11 = vshrl.u32 %v3665_v15, 16  ;;  %v2418_v25 = vshll.u32 %v3665_v15, 16  ;;  %v2424_v32 = vshrl.u32 %v5086_v22, 16  ;;  %4156 = vmatpush3.bf16.msra.mxu0 %v5125_v23 }
  0xa7   : > { %4151 = vmatprep.mubr.msk.bf16.mxu0 %vm523_vm0, %v3831_v0  ;;  %v3736_v16 = vcombine.low %v5267_v13, %v5276_v6  ;;  %v2408_v12 = vrot.slane %v2406_v10, 5  ;;  %v2411_v33 = vrot.slane %v2409_v46, 6  ;;  %v2427_v26 = vshll.u32 %v5086_v22, 16  ;;  %4157 = vmatprep.subr.bf16.mxu0 %v4448_v50  ;;  %v260_v46 = vld [vmem:[%s4872_s21 + $0x4] sm:$0x3] }
  0xa8   : > { %v2417_v28 = vrot.slane %v2415_v11, 5  ;;  %v2420_v56 = vrot.slane %v2418_v25, 6  ;;  %v2426_v60 = vrot.slane %v2424_v32, 5  ;;  %v2433_v31 = vshrl.u32 %v3666_v39, 16  ;;  %v5312_v11 = vld [vmem:[#allocation5 + $0x40] sm:$0xff]  }
  0xa9   : > { %v2412_v61 = vor.u32 %v2411_v33, %v2408_v12  ;;  %v2429_v14 = vrot.slane %v2427_v26, 6  ;;  %v2436_v23 = vshll.u32 %v3666_v39, 16  ;;  %v2442_v29 = vshrl.u32 %v5093_v3, 16  ;;  %v263_v6 = vld [vmem:[%s4872_s21 + $0x1c] sm:$0x3] }
  0xaa   : > { %v2421_v22 = vor.u32 %v2420_v56, %v2417_v28  ;;  %v2435_v19 = vrot.slane %v2433_v31, 5  ;;  %v2445_v30 = vshll.u32 %v5093_v3, 16  ;;  %v2451_v38 = vshrl.u32 %v3667_v52, 16  ;;  %4158 = vmatpush3.bf16.msra.mxu0 %v4448_v50 }
  0xab   : > { %v2413_v17 = vrot.slane %v2412_v61, 4  ;;  %v2430_v0 = vor.u32 %v2429_v14, %v2426_v60  ;;  %v2438_v59 = vrot.slane %v2436_v23, 6  ;;  %v2444_v43 = vrot.slane %v2442_v29, 5  ;;  %4167 = vmatprep.subr.bf16.mxu0 %v5284_v49 }
  0xac   : > { %v2447_v41 = vrot.slane %v2445_v30, 6  ;;  %v2453_v47 = vrot.slane %v2451_v38, 5  ;;  %v2454_v8 = vshll.u32 %v3667_v52, 16  ;;  %v2460_v9 = vshrl.u32 %v5105_v44, 16  ;;  %v261_v52 = vld [vmem:[%s4872_s21 + $0xc] sm:$0x3] }
  0xad   : > { %4052 = vmatmul.mubr.msk.bf16.vlgmr.msra.gmra.mrb[0].mxu1 %vm523_vm0, %v3734_v36  ;;  %v2422_v3 = vsel %vm5289_vm9, %v2413_v17, %v2421_v22  ;;  %v2431_v15 = vrot.slane %v2430_v0, 4  ;;  %v2439_v1 = vor.u32 %v2438_v59, %v2435_v19  ;;  %v2463_v50 = vshll.u32 %v5105_v44, 16  ;;  %4152 = vmatmul.mubr.msk.bf16.gmra.mrb[4].mxu0 %vm523_vm0, %v3832_v48  ;;  %v262_v59 = vld [vmem:[%s4872_s21 + $0x14] sm:$0x3] }
  0xae   : > { %4060 = vmatpush3.bf16.msra.mxu1 %v5175_v7  ;;  %v2448_v62 = vor.u32 %v2447_v41, %v2444_v43  ;;  %v2456_v37 = vrot.slane %v2454_v8, 6  ;;  %v2462_v39 = vrot.slane %v2460_v9, 5  ;;  %v2469_v10 = vshrl.u32 %v3668_v5, 16  ;;  %4055 = vmatprep.mubr.msk.bf16.mxu1 %vm523_vm0, %v3735_v18 }
  0xaf   : > { %4061 = vmatprep.subr.bf16.mxu1 %v4447_v20  ;;  %v2440_v54 = vsel %vm5289_vm9, %v2431_v15, %v2439_v1  ;;  %v2465_v55 = vrot.slane %v2463_v50, 6  ;;  %v2472_v36 = vshll.u32 %v3668_v5, 16  ;;  %v878_v44 = vshrl.u32 %v5108_v4, 16 }
  0xb0   : > { %v3839_v7 = vcombine.low %v2422_v3, %v2440_v54  ;;  %v2449_v48 = vrot.slane %v2448_v62, 4  ;;  %v2457_v25 = vor.u32 %v2456_v37, %v2453_v47  ;;  %v2471_v32 = vrot.slane %v2469_v10, 5  ;;  %v4452_v47 = vld [vmem:[#allocation5 + $0xc8] sm:$0xff]   ;;  %v5333_v62 = vld [vmem:[#allocation5 + $0xd0] sm:$0xff]  }
  0xb1   : > { %v2466_v12 = vor.u32 %v2465_v55, %v2462_v39  ;;  %v2474_v33 = vrot.slane %v2472_v36, 6  ;;  %v880_v26 = vrot.slane %v878_v44, 5  ;;  %v881_v18 = vshll.u32 %v5108_v4, 16 }
  0xb2   : > { %4062 = vmatpush3.bf16.msra.mxu1 %v4447_v20  ;;  %4159 = vmatprep.mubr.msk.bf16.mxu0 %vm523_vm0, %v3839_v7  ;;  %v2458_v28 = vsel %vm5289_vm9, %v2449_v48, %v2457_v25  ;;  %v887_v56 = vshrl.u32 %v260_v46, 16  ;;  %v890_v60 = vshll.u32 %v260_v46, 16  ;;  %v896_v31 = vshrl.u32 %v5121_v40, 16  ;;  %v3669_v25 = vld [vmem:[%s4872_s21 + $0x34] sm:$0x3] }
  0xb3   : > { %v2467_v61 = vrot.slane %v2466_v12, 4  ;;  %v2475_v14 = vor.u32 %v2474_v33, %v2471_v32  ;;  %v883_v23 = vrot.slane %v881_v18, 6  ;;  %v899_v29 = vshll.u32 %v5121_v40, 16  ;;  %4071 = vmatprep.subr.bf16.mxu1 %v5312_v11 }
  0xb4   : > { %v889_v22 = vrot.slane %v887_v56, 5  ;;  %v892_v4 = vrot.slane %v890_v60, 6  ;;  %v898_v19 = vrot.slane %v896_v31, 5  ;;  %v905_v30 = vshrl.u32 %v261_v52, 16  ;;  %v3670_v60 = vld [vmem:[%s4872_s21 + $0x3c] sm:$0x3] }
  0xb5   : > { %4056 = vmatmul.mubr.msk.bf16.gmra.mrb[4].mxu1 %vm523_vm0, %v3736_v16  ;;  %v2476_v38 = vsel %vm5289_vm9, %v2467_v61, %v2475_v14  ;;  %v884_v20 = vor.u32 %v883_v23, %v880_v26  ;;  %v901_v17 = vrot.slane %v899_v29, 6  ;;  %v908_v0 = vshll.u32 %v261_v52, 16 }
  0xb6   : > { %v3840_v40 = vcombine.low %v2458_v28, %v2476_v38  ;;  %v893_v5 = vor.u32 %v892_v4, %v889_v22  ;;  %v907_v43 = vrot.slane %v905_v30, 5  ;;  %v914_v41 = vshrl.u32 %v5147_v21, 16 }
  0xb7   : > { %v885_v8 = vrot.slane %v884_v20, 4  ;;  %v902_v9 = vor.u32 %v901_v17, %v898_v19  ;;  %v910_v3 = vrot.slane %v908_v0, 6  ;;  %v917_v13 = vshll.u32 %v5147_v21, 16  ;;  %v3671_v20 = vld [vmem:[%s4872_s21 + $0x44] sm:$0x3] }
  0xb8   : > { %4160 = vmatmul.mubr.msk.bf16.vlgmr.msra.gmra.mrb[0].mxu0 %vm523_vm0, %v3840_v40  ;;  %v916_v16 = vrot.slane %v914_v41, 5  ;;  %v923_v15 = vshrl.u32 %v262_v59, 16  ;;  %v926_v1 = vshll.u32 %v262_v59, 16  ;;  %v932_v50 = vshrl.u32 %v5150_v45, 16 }
  0xb9   : > { %v894_v37 = vsel %vm5289_vm9, %v885_v8, %v893_v5  ;;  %v903_v39 = vrot.slane %v902_v9, 4  ;;  %v911_v10 = vor.u32 %v910_v3, %v907_v43  ;;  %v919_v46 = vrot.slane %v917_v13, 6  ;;  %4168 = vmatpush3.bf16.msra.mxu0 %v5284_v49 }
  0xba   : > { %v925_v21 = vrot.slane %v923_v15, 5  ;;  %v928_v54 = vrot.slane %v926_v1, 6  ;;  %v934_v55 = vrot.slane %v932_v50, 5  ;;  %v935_v36 = vshll.u32 %v5150_v45, 16  ;;  %4169 = vmatprep.subr.bf16.mxu0 %v4452_v47 }
  0xbb   : > { %v912_v52 = vsel %vm5289_vm9, %v903_v39, %v911_v10  ;;  %v920_v44 = vor.u32 %v919_v46, %v916_v16  ;;  %v941_v7 = vshrl.u32 %v263_v6, 16  ;;  %v944_v48 = vshll.u32 %v263_v6, 16  ;;  %v4451_v6 = vld [vmem:[#allocation5 + $0x48] sm:$0xff]  }
  0xbc   : > { %v3743_v32 = vcombine.low %v894_v37, %v912_v52  ;;  %v929_v12 = vor.u32 %v928_v54, %v925_v21  ;;  %v937_v33 = vrot.slane %v935_v36, 6  ;;  %v2478_v26 = vshrl.u32 %v5160_v24, 16 }
  0xbd   : > { %v921_v49 = vrot.slane %v920_v44, 4  ;;  %v943_v18 = vrot.slane %v941_v7, 5  ;;  %v946_v28 = vrot.slane %v944_v48, 6  ;;  %v2481_v56 = vshll.u32 %v5160_v24, 16  ;;  %4170 = vmatpush3.bf16.msra.mxu0 %v4452_v47  ;;  %v5363_v48 = vld [vmem:[#allocation5 + $0x50] sm:$0xff]  }
  0xbe   : > { %4063 = vmatprep.mubr.msk.bf16.mxu1 %vm523_vm0, %v3743_v32  ;;  %v938_v45 = vor.u32 %v937_v33, %v934_v55  ;;  %v2480_v31 = vrot.slane %v2478_v26, 5  ;;  %v2487_v61 = vshrl.u32 %v3669_v25, 16  ;;  %v2490_v14 = vshll.u32 %v3669_v25, 16  ;;  %4179 = vmatprep.subr.bf16.mxu0 %v5333_v62  ;;  %v264_v33 = vld [vmem:[%s4872_s21 + $0x24] sm:$0x3] }
  0xbf   : > { %v930_v23 = vsel %vm5289_vm9, %v921_v49, %v929_v12  ;;  %v947_v29 = vor.u32 %v946_v28, %v943_v18  ;;  %v2483_v22 = vrot.slane %v2481_v56, 6  ;;  %v2496_v4 = vshrl.u32 %v5163_v2, 16  ;;  %v265_v28 = vld [vmem:[%s4872_s21 + $0x2c] sm:$0x3] }
  0xc0   : > { %v939_v19 = vrot.slane %v938_v45, 4  ;;  %v2489_v24 = vrot.slane %v2487_v61, 5  ;;  %v2492_v30 = vrot.slane %v2490_v14, 6  ;;  %v2499_v38 = vshll.u32 %v5163_v2, 16  ;;  %v3672_v2 = vld [vmem:[%s4872_s21 + $0x4c] sm:$0x3] }
  0xc1   : > { %v2484_v17 = vor.u32 %v2483_v22, %v2480_v31  ;;  %v2498_v0 = vrot.slane %v2496_v4, 5  ;;  %v2505_v59 = vshrl.u32 %v3670_v60, 16  ;;  %v2508_v40 = vshll.u32 %v3670_v60, 16 }
  0xc2   : > { %v948_v5 = vsel %vm5289_vm9, %v939_v19, %v947_v29  ;;  %v2493_v43 = vor.u32 %v2492_v30, %v2489_v24  ;;  %v2501_v41 = vrot.slane %v2499_v38, 6  ;;  %v2514_v47 = vshrl.u32 %v5180_v34, 16 }
  0xc3   : > { %v3744_v8 = vcombine.low %v930_v23, %v948_v5  ;;  %v2485_v9 = vrot.slane %v2484_v17, 4  ;;  %v2507_v3 = vrot.slane %v2505_v59, 5  ;;  %v2510_v13 = vrot.slane %v2508_v40, 6  ;;  %v266_v5 = vld [vmem:[%s4872_s21 + $0x34] sm:$0x3] }
  0xc4   : > { %v2502_v16 = vor.u32 %v2501_v41, %v2498_v0  ;;  %v2516_v15 = vrot.slane %v2514_v47, 5  ;;  %v2517_v1 = vshll.u32 %v5180_v34, 16  ;;  %v2523_v50 = vshrl.u32 %v3671_v20, 16 }
  0xc5   : > { %4064 = vmatmul.mubr.msk.bf16.vlgmr.msra.gmra.mrb[0].mxu1 %vm523_vm0, %v3744_v8  ;;  %v2494_v37 = vsel %vm5289_vm9, %v2485_v9, %v2493_v43  ;;  %v2511_v39 = vor.u32 %v2510_v13, %v2507_v3  ;;  %v2526_v10 = vshll.u32 %v3671_v20, 16  ;;  %v2532_v46 = vshrl.u32 %v5183_v51, 16  ;;  %v267_v13 = vld [vmem:[%s4872_s21 + $0x3c] sm:$0x3] }
  0xc6   : > { %4072 = vmatpush3.bf16.msra.mxu1 %v5312_v11  ;;  %v2503_v21 = vrot.slane %v2502_v16, 4  ;;  %v2519_v54 = vrot.slane %v2517_v1, 6  ;;  %v2525_v55 = vrot.slane %v2523_v50, 5  ;;  %v2535_v36 = vshll.u32 %v5183_v51, 16  ;;  %v3673_v50 = vld [vmem:[%s4872_s21 + $0x18] sm:$0xf] }
  0xc7   : > { %v2528_v34 = vrot.slane %v2526_v10, 6  ;;  %v2534_v52 = vrot.slane %v2532_v46, 5  ;;  %v2541_v44 = vshrl.u32 %v3672_v2, 16  ;;  %v2544_v7 = vshll.u32 %v3672_v2, 16  ;;  %4073 = vmatprep.subr.bf16.mxu1 %v4451_v6 }
  0xc8   : > { %v2512_v25 = vsel %vm5289_vm9, %v2503_v21, %v2511_v39  ;;  %v2520_v32 = vor.u32 %v2519_v54, %v2516_v15  ;;  %v2537_v12 = vrot.slane %v2535_v36, 6  ;;  %v950_v11 = vshrl.u32 %v5200_v58, 16  ;;  %v3674_v21 = vld [vmem:[%s4872_s21 + $0x20] sm:$0xf] }
  0xc9   : > { %v3841_v26 = vcombine.low %v2494_v37, %v2512_v25  ;;  %v2529_v49 = vor.u32 %v2528_v34, %v2525_v55  ;;  %v2543_v18 = vrot.slane %v2541_v44, 5  ;;  %v2546_v51 = vrot.slane %v2544_v7, 6 }
  0xca   : > { %v2521_v56 = vrot.slane %v2520_v32, 4  ;;  %v2538_v45 = vor.u32 %v2537_v12, %v2534_v52  ;;  %v952_v60 = vrot.slane %v950_v11, 5  ;;  %v953_v31 = vshll.u32 %v5200_v58, 16  ;;  %4074 = vmatpush3.bf16.msra.mxu1 %v4451_v6  ;;  %v3675_v11 = vld [vmem:[%s4872_s21 + $0x28] sm:$0xf] }
  0xcb   : > { %4163 = vmatprep.mubr.msk.bf16.mxu0 %vm523_vm0, %v3841_v26  ;;  %v2547_v61 = vor.u32 %v2546_v51, %v2543_v18  ;;  %v959_v14 = vshrl.u32 %v264_v33, 16  ;;  %v962_v23 = vshll.u32 %v264_v33, 16  ;;  %v968_v29 = vshrl.u32 %v5203_v27, 16  ;;  %4083 = vmatprep.subr.bf16.mxu1 %v5363_v48  ;;  %v3676_v26 = vld [vmem:[%s4872_s21 + $0x30] sm:$0xf] }
  0xcc   : > { %v2530_v22 = vsel %vm5289_vm9, %v2521_v56, %v2529_v49  ;;  %v2539_v4 = vrot.slane %v2538_v45, 4  ;;  %v955_v19 = vrot.slane %v953_v31, 6  ;;  %v971_v24 = vshll.u32 %v5203_v27, 16 }
  0xcd   : > { %v961_v30 = vrot.slane %v959_v14, 5  ;;  %v964_v58 = vrot.slane %v962_v23, 6  ;;  %v970_v38 = vrot.slane %v968_v29, 5  ;;  %v977_v20 = vshrl.u32 %v265_v28, 16  ;;  %v3609_v29 = vld [vmem:[%s4872_s21 + $0x8] sm:$0xf] }
  0xce   : > { %v2548_v17 = vsel %vm5289_vm9, %v2539_v4, %v2547_v61  ;;  %v956_v0 = vor.u32 %v955_v19, %v952_v60  ;;  %v973_v59 = vrot.slane %v971_v24, 6  ;;  %v980_v40 = vshll.u32 %v265_v28, 16  ;;  %v4463_v4 = vld [vmem:[#allocation5 + $0xd8] sm:$0xff]  }
  0xcf   : > { %v3842_v43 = vcombine.low %v2530_v22, %v2548_v17  ;;  %v965_v41 = vor.u32 %v964_v58, %v961_v30  ;;  %v979_v47 = vrot.slane %v977_v20, 5  ;;  %v986_v8 = vshrl.u32 %v5227_v42, 16  ;;  %v3610_v22 = vld [vmem:[%s4872_s21 + $0x10] sm:$0xf]  ;;  %v5412_v20 = vld [vmem:[%s4872_s21 + $0x20] sm:$0xf] }
  0xd0   : > { %v957_v27 = vrot.slane %v956_v0, 4  ;;  %v974_v9 = vor.u32 %v973_v59, %v970_v38  ;;  %v982_v3 = vrot.slane %v980_v40, 6  ;;  %v989_v6 = vshll.u32 %v5227_v42, 16  ;;  %v5409_v38 = vld [vmem:[%s4872_s21 + $0x18] sm:$0xf] }
  0xd1   : > { %4164 = vmatmul.mubr.msk.bf16.gmra.mrb[4].mxu0 %vm523_vm0, %v3842_v43  ;;  %v988_v16 = vrot.slane %v986_v8, 5  ;;  %v995_v2 = vshrl.u32 %v266_v5, 16  ;;  %v998_v15 = vshll.u32 %v266_v5, 16  ;;  %v1004_v1 = vshrl.u32 %v5236_v35, 16  ;;  %v3677_v5 = vld [vmem:[%s4872_s21 + $0x38] sm:$0xf] }
  0xd2   : > { %v966_v37 = vsel %vm5289_vm9, %v957_v27, %v965_v41  ;;  %v975_v39 = vrot.slane %v974_v9, 4  ;;  %v983_v10 = vor.u32 %v982_v3, %v979_v47  ;;  %v991_v46 = vrot.slane %v989_v6, 6  ;;  %v3678_v43 = vld [vmem:[%s4872_s21 + $0x40] sm:$0xf] }
  0xd3   : > { %v997_v54 = vrot.slane %v995_v2, 5  ;;  %v1000_v55 = vrot.slane %v998_v15, 6  ;;  %v1006_v42 = vrot.slane %v1004_v1, 5  ;;  %v1007_v36 = vshll.u32 %v5236_v35, 16 }
  0xd4   : > { %v984_v34 = vsel %vm5289_vm9, %v975_v39, %v983_v10  ;;  %v992_v52 = vor.u32 %v991_v46, %v988_v16  ;;  %v1013_v44 = vshrl.u32 %v267_v13, 16  ;;  %v1016_v7 = vshll.u32 %v267_v13, 16  ;;  %v5426_v16 = vld [vmem:[#allocation5 + $0xe0] sm:$0xff]   ;;  %v3679_v46 = vld [vmem:[%s4872_s21 + $0x48] sm:$0xf] }
  0xd5   : > { %v3745_v25 = vcombine.low %v966_v37, %v984_v34  ;;  %v1001_v32 = vor.u32 %v1000_v55, %v997_v54  ;;  %v1009_v12 = vrot.slane %v1007_v36, 6  ;;  %v3849_v33 = vcombine.low %v3673_v50, %v3674_v21  ;;  %v3680_v36 = vld [vmem:[%s4872_s21 + $0x50] sm:$0xf] }
  0xd6   : > { %v993_v49 = vrot.slane %v992_v52, 4  ;;  %v1015_v18 = vrot.slane %v1013_v44, 5  ;;  %v1018_v51 = vrot.slane %v1016_v7, 6  ;;  %v2784_v28 = vshrl.u32 %v3673_v50, 16 }
  0xd7   : > { %4067 = vmatprep.mubr.msk.bf16.mxu1 %vm523_vm0, %v3745_v25  ;;  %v1010_v35 = vor.u32 %v1009_v12, %v1006_v42  ;;  %4171 = vmatprep.mubr.msk.bf16.mxu0 %vm523_vm0, %v3849_v33  ;;  %v2787_v56 = vshll.u32 %v3673_v50, 16  ;;  %v2798_v45 = vshrl.u32 %v3674_v21, 16  ;;  %v2801_v60 = vshll.u32 %v3674_v21, 16  ;;  %v3613_v25 = vld [vmem:[%s4872_s21 + $0x28] sm:$0xf] }
  0xd8   : > { %v1002_v31 = vsel %vm5289_vm9, %v993_v49, %v1001_v32  ;;  %v1019_v61 = vor.u32 %v1018_v51, %v1015_v18  ;;  %v5398_v14 = vrot.slane %v2784_v28, 4  ;;  %v3850_v23 = vcombine.low %v3675_v11, %v3676_v26 }
  0xd9   : > { %v1011_v19 = vrot.slane %v1010_v35, 4  ;;  %v5402_v24 = vrot.slane %v2787_v56, 5  ;;  %v5404_v30 = vrot.slane %v2798_v45, 4  ;;  %v5406_v58 = vrot.slane %v2801_v60, 5  ;;  %v3615_v35 = vld [vmem:[%s4872_s21 + $0x38] sm:$0xf] }
  0xda   : > { %4172 = vmatmul.mubr.msk.bf16.vlgmr.msra.gmra.mrb[0].mxu0 %vm523_vm0, %v3850_v23  ;;  %v2812_v17 = vshrl.u32 %v3675_v11, 16  ;;  %v2815_v0 = vshll.u32 %v3675_v11, 16  ;;  %v2826_v59 = vshrl.u32 %v3676_v26, 16  ;;  %v2829_v40 = vshll.u32 %v3676_v26, 16  ;;  %v3614_v26 = vld [vmem:[%s4872_s21 + $0x30] sm:$0xf] }
  0xdb   : > { %v1020_v41 = vsel %vm5289_vm9, %v1011_v19, %v1019_v61  ;;  %v3753_v47 = vcombine.low %v3609_v29, %v3610_v22  ;;  %v1256_v8 = vshrl.u32 %v3609_v29, 16  ;;  %v1259_v27 = vshll.u32 %v3609_v29, 16  ;;  %4180 = vmatpush3.bf16.msra.mxu0 %v5333_v62  ;;  %v3616_v61 = vld [vmem:[%s4872_s21 + $0x40] sm:$0xf]  ;;  %v4462_v19 = vld [vmem:[#allocation5 + $0x58] sm:$0xff]  }
  0xdc   : > { %v3746_v9 = vcombine.low %v1002_v31, %v1020_v41  ;;  %v5420_v3 = vrot.slane %v2812_v17, 4  ;;  %v5422_v13 = vrot.slane %v2815_v0, 5  ;;  %v5424_v6 = vrot.slane %v2826_v59, 4  ;;  %4181 = vmatprep.subr.bf16.mxu0 %v4463_v4 }
  0xdd   : > { %v5428_v2 = vrot.slane %v2829_v40, 5  ;;  %v5430_v15 = vrot.slane %v1256_v8, 4  ;;  %v5432_v1 = vrot.slane %v1259_v27, 5  ;;  %v1270_v50 = vshrl.u32 %v3610_v22, 16  ;;  %v5481_v40 = vld [vmem:[%s4872_s21 + $0x24] sm:$0x1] }
  0xde   : > { %4068 = vmatmul.mubr.msk.bf16.gmra.mrb[4].mxu1 %vm523_vm0, %v3746_v9  ;;  %v1273_v62 = vshll.u32 %v3610_v22, 16  ;;  %v3754_v37 = vcombine.low %v5409_v38, %v5412_v20  ;;  %v1284_v39 = vshrl.u32 %v5409_v38, 16  ;;  %v1287_v10 = vshll.u32 %v5409_v38, 16  ;;  %v5474_v38 = vld [vmem:[%s4872_s21 + $0x1c] sm:$0x1] }
  0xdf   : > { %4075 = vmatprep.mubr.msk.bf16.mxu1 %vm523_vm0, %v3753_v47  ;;  %v5441_v21 = vrot.slane %v1270_v50, 4  ;;  %v1298_v54 = vshrl.u32 %v5412_v20, 16  ;;  %v1301_v55 = vshll.u32 %v5412_v20, 16  ;;  %v3851_v42 = vcombine.low %v3677_v5, %v3678_v43  ;;  %4182 = vmatpush3.bf16.msra.mxu0 %v4463_v4  ;;  %v5487_v8 = vld [vmem:[%s4872_s21 + $0x2c] sm:$0x1]  ;;  %v5489_v27 = vld [vmem:[#allocation5 + $0x60] sm:$0xff]  }
  0xe0   : > { %v5446_v34 = vrot.slane %v1273_v62, 5  ;;  %v5448_v52 = vrot.slane %v1284_v39, 4  ;;  %v5450_v44 = vrot.slane %v1287_v10, 5  ;;  %v2840_v7 = vshrl.u32 %v3677_v5, 16  ;;  %4191 = vmatprep.subr.bf16.mxu0 %v5426_v16 }
  0xe1   : > { %v5454_v32 = vrot.slane %v1298_v54, 4  ;;  %v5456_v12 = vrot.slane %v1301_v55, 5  ;;  %4175 = vmatprep.mubr.msk.bf16.mxu0 %vm523_vm0, %v3851_v42  ;;  %v2843_v33 = vshll.u32 %v3677_v5, 16  ;;  %v2854_v11 = vshrl.u32 %v3678_v43, 16 }
  0xe2   : > { %v5460_v49 = vrot.slane %v2840_v7, 4  ;;  %v2857_v18 = vshll.u32 %v3678_v43, 16  ;;  %v3852_v51 = vcombine.low %v3679_v46, %v3680_v36  ;;  %v2868_v28 = vshrl.u32 %v3679_v46, 16 }
  0xe3   : > { %v5463_v56 = vrot.slane %v2843_v33, 5  ;;  %v5465_v45 = vrot.slane %v2854_v11, 4  ;;  %v2871_v60 = vshll.u32 %v3679_v46, 16  ;;  %v2882_v31 = vshrl.u32 %v3680_v36, 16 }
  0xe4   : > { %v5468_v23 = vrot.slane %v2857_v18, 5  ;;  %4176 = vmatmul.mubr.msk.bf16.gmra.mrb[4].mxu0 %vm523_vm0, %v3852_v51  ;;  %v5471_v29 = vrot.slane %v2868_v28, 4  ;;  %v2885_v22 = vshll.u32 %v3680_v36, 16  ;;  %v3755_v4 = vcombine.low %v3613_v25, %v3614_v26 }
  0xe5   : > { %v5476_v20 = vrot.slane %v2871_v60, 5  ;;  %v5478_v17 = vrot.slane %v2882_v31, 4  ;;  %v1312_v0 = vshrl.u32 %v3613_v25, 16  ;;  %v1315_v59 = vshll.u32 %v3613_v25, 16 }
  0xe6   : > { %4076 = vmatmul.mubr.msk.bf16.vlgmr.msra.gmra.mrb[0].mxu1 %vm523_vm0, %v3754_v37  ;;  %v5484_v5 = vrot.slane %v2885_v22, 5  ;;  %v1326_v43 = vshrl.u32 %v3614_v26, 16  ;;  %v1329_v41 = vshll.u32 %v3614_v26, 16  ;;  %v3756_v47 = vcombine.low %v3615_v35, %v3616_v61  ;;  %v5498_v37 = vld [vmem:[%s4872_s21 + $0x34] sm:$0x1] }
  0xe7   : > { %4084 = vmatpush3.bf16.msra.mxu1 %v5363_v48  ;;  %4079 = vmatprep.mubr.msk.bf16.mxu1 %vm523_vm0, %v3755_v4  ;;  %v5493_v9 = vrot.slane %v1312_v0, 4  ;;  %v5495_v50 = vrot.slane %v1315_v59, 5  ;;  %v1340_v62 = vshrl.u32 %v3615_v35, 16  ;;  %v1343_v39 = vshll.u32 %v3615_v35, 16  ;;  %v5540_v0 = vld [vmem:[%s4872_s21 + $0x1c] sm:$0x1] }
  0xe8   : > { %v5500_v10 = vrot.slane %v1326_v43, 4  ;;  %v5502_v46 = vrot.slane %v1329_v41, 5  ;;  %4085 = vmatprep.subr.bf16.mxu1 %v4462_v19  ;;  %v1354_v54 = vshrl.u32 %v3616_v61, 16  ;;  %v1357_v55 = vshll.u32 %v3616_v61, 16 }
  0xe9   : > { %v5504_v42 = vrot.slane %v1340_v62, 4  ;;  %v5506_v48 = vrot.slane %v1343_v39, 5  ;;  %v2790_v36 = vor.u32 %v5402_v24, %v5398_v14  ;;  %v2793_v7 = vshll.u32 %v5474_v38, 16  ;;  %v5522_v24 = vld [vmem:[%s4872_s21 + $0xc] sm:$0x1] }
  0xea   : > { %v5511_v25 = vrot.slane %v1354_v54, 4  ;;  %v5513_v33 = vrot.slane %v1357_v55, 5  ;;  %v2804_v11 = vor.u32 %v5406_v58, %v5404_v30  ;;  %v2807_v26 = vshll.u32 %v5481_v40, 16  ;;  %v5555_v55 = vld [vmem:[%s4872_s21 + $0x3c] sm:$0x1] }
  0xeb   : > { %4086 = vmatpush3.bf16.msra.mxu1 %v4462_v19  ;;  %v2791_v18 = vrot.slane %v2790_v36, 4  ;;  %v2795_v51 = vrot.slane %v2793_v7, 5  ;;  %v2818_v28 = vor.u32 %v5422_v13, %v5420_v3  ;;  %v2821_v14 = vshll.u32 %v5487_v8, 16  ;;  %v5531_v13 = vld [vmem:[%s4872_s21 + $0x14] sm:$0x1] }
  0xec   : > { %v2805_v35 = vrot.slane %v2804_v11, 4  ;;  %v2809_v60 = vrot.slane %v2807_v26, 5  ;;  %v2832_v31 = vor.u32 %v5428_v2, %v5424_v6  ;;  %v2835_v30 = vshll.u32 %v5498_v37, 16  ;;  %4095 = vmatprep.subr.bf16.mxu1 %v5489_v27  ;;  %v4468_v26 = vld [vmem:[#allocation5 + $0xe8] sm:$0xff]  }
  0xed   : > { %v2796_v58 = vsel %vm4922_vm3, %v2791_v18, %v2795_v51  ;;  %v2819_v61 = vrot.slane %v2818_v28, 4  ;;  %v2823_v3 = vrot.slane %v2821_v14, 5  ;;  %v1262_v22 = vor.u32 %v5432_v1, %v5430_v15  ;;  %v5547_v1 = vld [vmem:[%s4872_s21 + $0x24] sm:$0x1] }
  0xee   : > { %4080 = vmatmul.mubr.msk.bf16.gmra.mrb[4].mxu1 %vm523_vm0, %v3756_v47  ;;  %v2810_v6 = vsel %vm4922_vm3, %v2805_v35, %v2809_v60  ;;  %v2833_v2 = vrot.slane %v2832_v31, 4  ;;  %v2837_v4 = vrot.slane %v2835_v30, 5  ;;  %v1265_v19 = vshll.u32 %v5522_v24, 16 }
  0xef   : > { %v3859_v59 = vcombine.low %v2796_v58, %v2810_v6  ;;  %v2824_v43 = vsel %vm4922_vm3, %v2819_v61, %v2823_v3  ;;  %v1263_v41 = vrot.slane %v1262_v22, 4  ;;  %v1276_v15 = vor.u32 %v5446_v34, %v5441_v21  ;;  %v5562_v34 = vld [vmem:[%s4872_s21 + $0x44] sm:$0x1]  ;;  %v5578_v58 = vld [vmem:[%s4872_s21 + $0x4c] sm:$0x1] }
  0xf0   : > { %v2838_v47 = vsel %vm4922_vm3, %v2833_v2, %v2837_v4  ;;  %v1267_v62 = vrot.slane %v1265_v19, 5  ;;  %v1279_v39 = vshll.u32 %v5531_v13, 16  ;;  %v1290_v54 = vor.u32 %v5450_v44, %v5448_v52  ;;  %v5583_v22 = vld [vmem:[%s4872_s21 + $0x54] sm:$0x1]  ;;  %v5585_v6 = vld [vmem:[#allocation5 + $0xf0] sm:$0xff]  }
  0xf1   : > { %4183 = vmatprep.mubr.msk.bf16.mxu0 %vm523_vm0, %v3859_v59  ;;  %v3860_v36 = vcombine.low %v2824_v43, %v2838_v47  ;;  %v1277_v7 = vrot.slane %v1276_v15, 4  ;;  %v1293_v11 = vshll.u32 %v5540_v0, 16  ;;  %v1304_v21 = vor.u32 %v5456_v12, %v5454_v32  ;;  %v5592_v4 = vld [vmem:[%s4872_s21 + $0x2c] sm:$0x1]  ;;  %v5601_v15 = vld [vmem:[%s4872_s21 + $0x34] sm:$0x1] }
  0xf2   : > { %v1268_v18 = vsel %vm4922_vm3, %v1263_v41, %v1267_v62  ;;  %v1281_v51 = vrot.slane %v1279_v39, 5  ;;  %v1291_v52 = vrot.slane %v1290_v54, 4  ;;  %v1307_v44 = vshll.u32 %v5547_v1, 16  ;;  %v4467_v47 = vld [vmem:[#allocation5 + $0x68] sm:$0xff]  }
  0xf3   : > { %4184 = vmatmul.mubr.msk.bf16.vlgmr.msra.gmra.mrb[0].mxu0 %vm523_vm0, %v3860_v36  ;;  %v1295_v28 = vrot.slane %v1293_v11, 5  ;;  %v1305_v14 = vrot.slane %v1304_v21, 4  ;;  %v2846_v35 = vor.u32 %v5463_v56, %v5460_v49  ;;  %v2849_v32 = vshll.u32 %v5555_v55, 16  ;;  %v5609_v54 = vld [vmem:[%s4872_s21 + $0x3c] sm:$0x1] }
  0xf4   : > { %v1282_v12 = vsel %vm4922_vm3, %v1277_v7, %v1281_v51  ;;  %v1309_v60 = vrot.slane %v1307_v44, 5  ;;  %4192 = vmatpush3.bf16.msra.mxu0 %v5426_v16  ;;  %v2860_v31 = vor.u32 %v5468_v23, %v5465_v45  ;;  %v2863_v30 = vshll.u32 %v5562_v34, 16 }
  0xf5   : > { %v3763_v61 = vcombine.low %v1268_v18, %v1282_v12  ;;  %v1296_v49 = vsel %vm4922_vm3, %v1291_v52, %v1295_v28  ;;  %v2847_v56 = vrot.slane %v2846_v35, 4  ;;  %v2851_v3 = vrot.slane %v2849_v32, 5  ;;  %4193 = vmatprep.subr.bf16.mxu0 %v4468_v26  ;;  %v5637_v32 = vld [vmem:[%s4872_s21 + $0x20] sm:$0xe] }
  0xf6   : > { %v1310_v16 = vsel %vm4922_vm3, %v1305_v14, %v1309_v60  ;;  %v2861_v45 = vrot.slane %v2860_v31, 4  ;;  %v2865_v23 = vrot.slane %v2863_v30, 5  ;;  %v2874_v2 = vor.u32 %v5476_v20, %v5471_v29  ;;  %v5642_v31 = vld [vmem:[%s4872_s21 + $0x28] sm:$0xe]  ;;  %v5645_v30 = vld [vmem:[%s4872_s21 + $0x30] sm:$0xe] }
  0xf7   : > { %4087 = vmatprep.mubr.msk.bf16.mxu1 %vm523_vm0, %v3763_v61  ;;  %v3764_v19 = vcombine.low %v1296_v49, %v1310_v16  ;;  %v2852_v59 = vsel %vm4922_vm3, %v2847_v56, %v2851_v3  ;;  %v2877_v43 = vshll.u32 %v5578_v58, 16  ;;  %v2888_v41 = vor.u32 %v5484_v5, %v5478_v17 }
  0xf8   : > { %v2866_v62 = vsel %vm4922_vm3, %v2861_v45, %v2865_v23  ;;  %v2875_v29 = vrot.slane %v2874_v2, 4  ;;  %v2891_v20 = vshll.u32 %v5583_v22, 16  ;;  %v1318_v39 = vor.u32 %v5495_v50, %v5493_v9  ;;  %4194 = vmatpush3.bf16.msra.mxu0 %v4468_v26  ;;  %v5618_v26 = vld [vmem:[#allocation5 + $0x70] sm:$0xff]  }
  0xf9   : > { %4088 = vmatmul.mubr.msk.bf16.vlgmr.msra.gmra.mrb[0].mxu1 %vm523_vm0, %v3764_v19  ;;  %v3861_v36 = vcombine.low %v2852_v59, %v2866_v62  ;;  %v2879_v17 = vrot.slane %v2877_v43, 5  ;;  %v2889_v5 = vrot.slane %v2888_v41, 4  ;;  %v1321_v7 = vshll.u32 %v5592_v4, 16  ;;  %4203 = vmatprep.subr.bf16.mxu0 %v5585_v6  ;;  %v5664_v41 = vld [vmem:[%s4872_s21 + $0x10] sm:$0xe] }
  0xfa   : > { %4096 = vmatpush3.bf16.msra.mxu1 %v5489_v27  ;;  %v2893_v11 = vrot.slane %v2891_v20, 5  ;;  %v1319_v21 = vrot.slane %v1318_v39, 4  ;;  %v1332_v9 = vor.u32 %v5502_v46, %v5500_v10  ;;  %v1335_v50 = vshll.u32 %v5601_v15, 16  ;;  %v5624_v27 = vld [vmem:[%s4872_s21 + $0x44] sm:$0x1] }
  0xfb   : > { %4187 = vmatprep.mubr.msk.bf16.mxu0 %vm523_vm0, %v3861_v36  ;;  %v2880_v18 = vsel %vm4922_vm3, %v2875_v29, %v2879_v17  ;;  %v1323_v51 = vrot.slane %v1321_v7, 5  ;;  %4097 = vmatprep.subr.bf16.mxu1 %v4467_v47  ;;  %v1346_v52 = vor.u32 %v5506_v48, %v5504_v42  ;;  %v1349_v10 = vshll.u32 %v5609_v54, 16  ;;  %v5630_v46 = vld [vmem:[%s4872_s21 + $0x18] sm:$0xe]  ;;  %v5683_v17 = vld [vmem:[%s4872_s21 + $0x20] sm:$0xe] }
  0xfc   : > { %v2894_v44 = vsel %vm4922_vm3, %v2889_v5, %v2893_v11  ;;  %v1333_v28 = vrot.slane %v1332_v9, 4  ;;  %v1337_v14 = vrot.slane %v1335_v50, 5  ;;  %v1360_v35 = vor.u32 %v5513_v33, %v5511_v25  ;;  %v5652_v33 = vld [vmem:[%s4872_s21 + $0x8] sm:$0xe]  ;;  %v5673_v20 = vld [vmem:[%s4872_s21 + $0x18] sm:$0xe] }
  0xfd   : > { %v3862_v12 = vcombine.low %v2880_v18, %v2894_v44  ;;  %v1324_v60 = vsel %vm4922_vm3, %v1319_v21, %v1323_v51  ;;  %v1347_v42 = vrot.slane %v1346_v52, 4  ;;  %v1351_v48 = vrot.slane %v1349_v10, 5  ;;  %v5686_v5 = vld [vmem:[%s4872_s21 + $0x38] sm:$0xe]  ;;  %v5692_v21 = vld [vmem:[%s4872_s21 + $0x40] sm:$0xe] }
  0xfe   : > { %v1338_v61 = vsel %vm4922_vm3, %v1333_v28, %v1337_v14  ;;  %v1361_v49 = vrot.slane %v1360_v35, 4  ;;  %v1363_v56 = vshll.u32 %v5624_v27, 16  ;;  %4098 = vmatpush3.bf16.msra.mxu1 %v4467_v47  ;;  %v3869_v25 = vrot.slane %v5630_v46, 9  ;;  %v5699_v51 = vld [vmem:[%s4872_s21 + $0x48] sm:$0xe] }
  0xff   : > { %4188 = vmatmul.mubr.msk.bf16.gmra.mrb[4].mxu0 %vm523_vm0, %v3862_v12  ;;  %v3765_v3 = vcombine.low %v1324_v60, %v1338_v61  ;;  %v1352_v16 = vsel %vm4922_vm3, %v1347_v42, %v1351_v48  ;;  %v3026_v45 = vrot.slane %v5474_v38, 5  ;;  %v3870_v23 = vrot.slane %v5637_v32, 9  ;;  %4107 = vmatprep.subr.bf16.mxu1 %v5618_v26  ;;  %v4472_v52 = vld [vmem:[#allocation5 + $0xf8] sm:$0xff]  }
 0x100   : > { %v1365_v2 = vrot.slane %v1363_v56, 5  ;;  %v3030_v19 = vrot.slane %v5481_v40, 5  ;;  %v3871_v59 = vrot.slane %v5642_v31, 9  ;;  %v3034_v43 = vrot.slane %v5487_v8, 5  ;;  %v5708_v35 = vld [vmem:[%s4872_s21 + $0x50] sm:$0xe] }
 0x101   : > { %4091 = vmatprep.mubr.msk.bf16.mxu1 %vm523_vm0, %v3765_v3  ;;  %v3027_v38 = vsel %vm5115_vm6, %v3869_v25, %v3026_v45  ;;  %v3872_v47 = vrot.slane %v5645_v30, 9  ;;  %v3038_v62 = vrot.slane %v5498_v37, 5  ;;  %v3773_v29 = vrot.slane %v5652_v33, 9  ;;  %v5725_v56 = vld [vmem:[%s4872_s21 + $0x30] sm:$0xe] }
 0x102   : > { %v1366_v40 = vsel %vm4922_vm3, %v1361_v49, %v1365_v2  ;;  %v3031_v8 = vsel %vm5115_vm6, %v3870_v23, %v3030_v19  ;;  %v3035_v39 = vsel %vm5115_vm6, %v3871_v59, %v3034_v43  ;;  %v1498_v36 = vrot.slane %v5522_v24, 5  ;;  %v5737_v45 = vld [vmem:[%s4872_s21 + $0x40] sm:$0xe] }
 0x103   : > { %v3766_v37 = vcombine.low %v1352_v16, %v1366_v40  ;;  %v3877_v7 = vcombine.low %v3027_v38, %v3031_v8  ;;  %v3039_v53 = vsel %vm5115_vm6, %v3872_v47, %v3038_v62  ;;  %v3774_v11 = vrot.slane %v5664_v41, 9  ;;  %v5734_v16 = vld [vmem:[%s4872_s21 + $0x38] sm:$0xe]  ;;  %v3697_v40 = vld [vmem:[%s4872_s21 + $0x1c] sm:$0x3] }
 0x104   : > { %v3878_v9 = vcombine.low %v3035_v39, %v3039_v53  ;;  %v1499_v50 = vsel %vm5115_vm6, %v3773_v29, %v1498_v36  ;;  %v1502_v24 = vrot.slane %v5531_v13, 5  ;;  %v3775_v18 = vrot.slane %v5673_v20, 9  ;;  %v4471_v39 = vld [vmem:[#allocation5 + $0x78] sm:$0xff]  }
 0x105   : > { %4092 = vmatmul.mubr.msk.bf16.gmra.mrb[4].mxu1 %vm523_vm0, %v3766_v37  ;;  %4195 = vmatprep.mubr.msk.bf16.mxu0 %vm523_vm0, %v3877_v7  ;;  %v1506_v10 = vrot.slane %v5540_v0, 5  ;;  %v3776_v44 = vrot.slane %v5683_v17, 9  ;;  %v1510_v28 = vrot.slane %v5547_v1, 5  ;;  %v3873_v14 = vrot.slane %v5686_v5, 9  ;;  %v5716_v0 = vld [vmem:[%s4872_s21 + $0x28] sm:$0xe] }
 0x106   : > { %v1503_v13 = vsel %vm5115_vm6, %v3774_v11, %v1502_v24  ;;  %v3042_v12 = vrot.slane %v5555_v55, 5  ;;  %v3874_v60 = vrot.slane %v5692_v21, 9  ;;  %v3046_v42 = vrot.slane %v5562_v34, 5  ;;  %v3698_v7 = vld [vmem:[%s4872_s21 + $0x24] sm:$0x3] }
 0x107   : > { %4196 = vmatmul.mubr.msk.bf16.vlgmr.msra.gmra.mrb[0].mxu0 %vm523_vm0, %v3878_v9  ;;  %v3781_v1 = vcombine.low %v1499_v50, %v1503_v13  ;;  %v1507_v48 = vsel %vm5115_vm6, %v3775_v18, %v1506_v10  ;;  %v1511_v61 = vsel %vm5115_vm6, %v3776_v44, %v1510_v28  ;;  %v3875_v49 = vrot.slane %v5699_v51, 9  ;;  %v3699_v28 = vld [vmem:[%s4872_s21 + $0x2c] sm:$0x3] }
 0x108   : > { %v3782_v55 = vcombine.low %v1507_v48, %v1511_v61  ;;  %4204 = vmatpush3.bf16.msra.mxu0 %v5585_v6  ;;  %v3043_v34 = vsel %vm5115_vm6, %v3873_v14, %v3042_v12  ;;  %v3047_v25 = vsel %vm5115_vm6, %v3874_v60, %v3046_v42  ;;  %v3050_v3 = vrot.slane %v5578_v58, 5 }
 0x109   : > { %4099 = vmatprep.mubr.msk.bf16.mxu1 %vm523_vm0, %v3781_v1  ;;  %v3879_v23 = vcombine.low %v3043_v34, %v3047_v25  ;;  %v3876_v2 = vrot.slane %v5708_v35, 9  ;;  %v3054_v6 = vrot.slane %v5583_v22, 5  ;;  %v3777_v19 = vrot.slane %v5716_v0, 9  ;;  %4205 = vmatprep.subr.bf16.mxu0 %v4472_v52  ;;  %v3700_v25 = vld [vmem:[%s4872_s21 + $0x34] sm:$0x3] }
 0x10a   : > { %v3051_v59 = vsel %vm5115_vm6, %v3875_v49, %v3050_v3  ;;  %v1514_v58 = vrot.slane %v5592_v4, 5  ;;  %v3778_v43 = vrot.slane %v5725_v56, 9  ;;  %v1518_v38 = vrot.slane %v5601_v15, 5 }
 0x10b   : > { %4199 = vmatprep.mubr.msk.bf16.mxu0 %vm523_vm0, %v3879_v23  ;;  %v3055_v47 = vsel %vm5115_vm6, %v3876_v2, %v3054_v6  ;;  %v3779_v22 = vrot.slane %v5734_v16, 9  ;;  %v1522_v62 = vrot.slane %v5609_v54, 5  ;;  %v3780_v29 = vrot.slane %v5737_v45, 9 }
 0x10c   : > { %v3880_v8 = vcombine.low %v3051_v59, %v3055_v47  ;;  %v1515_v4 = vsel %vm5115_vm6, %v3777_v19, %v1514_v58  ;;  %v1519_v15 = vsel %vm5115_vm6, %v3778_v43, %v1518_v38  ;;  %v1526_v36 = vrot.slane %v5624_v27, 5  ;;  %4206 = vmatpush3.bf16.msra.mxu0 %v4472_v52 }
 0x10d   : > { %4100 = vmatmul.mubr.msk.bf16.vlgmr.msra.gmra.mrb[0].mxu1 %vm523_vm0, %v3782_v55  ;;  %v3783_v37 = vcombine.low %v1515_v4, %v1519_v15  ;;  %v1523_v54 = vsel %vm5115_vm6, %v3779_v22, %v1522_v62  ;;  %v3170_v53 = vshrl.u32 %v5630_v46, 16  ;;  %v3173_v11 = vshll.u32 %v5630_v46, 16  ;;  %v3633_v4 = vld [vmem:[%s4872_s21 + $0xc] sm:$0x3] }
 0x10e   : > { %4108 = vmatpush3.bf16.msra.mxu1 %v5618_v26  ;;  %v1527_v9 = vsel %vm5115_vm6, %v3780_v29, %v1526_v36  ;;  %v3179_v50 = vshrl.u32 %v3697_v40, 16  ;;  %v3182_v27 = vshll.u32 %v3697_v40, 16  ;;  %v3188_v24 = vshrl.u32 %v5637_v32, 16 }
 0x10f   : > { %4200 = vmatmul.mubr.msk.bf16.gmra.mrb[4].mxu0 %vm523_vm0, %v3880_v8  ;;  %4103 = vmatprep.mubr.msk.bf16.mxu1 %vm523_vm0, %v3783_v37  ;;  %v3784_v18 = vcombine.low %v1523_v54, %v1527_v9  ;;  %v3172_v52 = vrot.slane %v3170_v53, 5  ;;  %v3175_v10 = vrot.slane %v3173_v11, 6  ;;  %v3191_v44 = vshll.u32 %v5637_v32, 16 }
 0x110   : > { %4109 = vmatprep.subr.bf16.mxu1 %v4471_v39  ;;  %v3181_v46 = vrot.slane %v3179_v50, 5  ;;  %v3184_v26 = vrot.slane %v3182_v27, 6  ;;  %v3190_v57 = vrot.slane %v3188_v24, 5  ;;  %v3197_v14 = vshrl.u32 %v3698_v7, 16 }
 0x111   : > { %v3176_v13 = vor.u32 %v3175_v10, %v3172_v52  ;;  %v3193_v12 = vrot.slane %v3191_v44, 6  ;;  %v3200_v60 = vshll.u32 %v3698_v7, 16  ;;  %v3206_v42 = vshrl.u32 %v5642_v31, 16 }
 0x112   : > { %4110 = vmatpush3.bf16.msra.mxu1 %v4471_v39  ;;  %v3185_v1 = vor.u32 %v3184_v26, %v3181_v46  ;;  %v3199_v48 = vrot.slane %v3197_v14, 5  ;;  %v3209_v61 = vshll.u32 %v5642_v31, 16  ;;  %v3215_v49 = vshrl.u32 %v3699_v28, 16 }
 0x113   : > { %v3177_v55 = vrot.slane %v3176_v13, 4  ;;  %v3194_v32 = vor.u32 %v3193_v12, %v3190_v57  ;;  %v3202_v34 = vrot.slane %v3200_v60, 6  ;;  %v3208_v3 = vrot.slane %v3206_v42, 5  ;;  %v3635_v42 = vld [vmem:[%s4872_s21 + $0x1c] sm:$0x3] }
 0x114   : > { %v3211_v23 = vrot.slane %v3209_v61, 6  ;;  %v3217_v2 = vrot.slane %v3215_v49, 5  ;;  %v3218_v6 = vshll.u32 %v3699_v28, 16  ;;  %v3224_v19 = vshrl.u32 %v5645_v30, 16 }
 0x115   : > { %4104 = vmatmul.mubr.msk.bf16.gmra.mrb[4].mxu1 %vm523_vm0, %v3784_v18  ;;  %v3186_v59 = vsel %vm5289_vm9, %v3177_v55, %v3185_v1  ;;  %v3195_v58 = vrot.slane %v3194_v32, 4  ;;  %v3203_v43 = vor.u32 %v3202_v34, %v3199_v48  ;;  %v3227_v31 = vshll.u32 %v5645_v30, 16  ;;  %v3634_v30 = vld [vmem:[%s4872_s21 + $0x14] sm:$0x3] }
 0x116   : > { %v3212_v38 = vor.u32 %v3211_v23, %v3208_v3  ;;  %v3220_v47 = vrot.slane %v3218_v6, 6  ;;  %v3226_v22 = vrot.slane %v3224_v19, 5  ;;  %v3233_v62 = vshrl.u32 %v3700_v25, 16 }
 0x117   : > { %v3204_v29 = vsel %vm5289_vm9, %v3195_v58, %v3203_v43  ;;  %v3229_v40 = vrot.slane %v3227_v31, 6  ;;  %v3236_v8 = vshll.u32 %v3700_v25, 16  ;;  %v1642_v15 = vshrl.u32 %v5652_v33, 16  ;;  %v3636_v25 = vld [vmem:[%s4872_s21 + $0x24] sm:$0x3] }
 0x118   : > { %v3887_v39 = vcombine.low %v3186_v59, %v3204_v29  ;;  %v3213_v36 = vrot.slane %v3212_v38, 4  ;;  %v3221_v37 = vor.u32 %v3220_v47, %v3217_v2  ;;  %v3235_v54 = vrot.slane %v3233_v62, 5 }
 0x119   : > { %v3230_v7 = vor.u32 %v3229_v40, %v3226_v22  ;;  %v3238_v53 = vrot.slane %v3236_v8, 6  ;;  %v1644_v11 = vrot.slane %v1642_v15, 5  ;;  %v1645_v9 = vshll.u32 %v5652_v33, 16  ;;  %v3701_v8 = vld [vmem:[%s4872_s21 + $0x3c] sm:$0x3] }
 0x11a   : > { %4207 = vmatprep.mubr.msk.bf16.mxu0 %vm523_vm0, %v3887_v39  ;;  %v3222_v50 = vsel %vm5289_vm9, %v3213_v36, %v3221_v37  ;;  %v1651_v27 = vshrl.u32 %v3633_v4, 16  ;;  %v1654_v24 = vshll.u32 %v3633_v4, 16  ;;  %v1660_v18 = vshrl.u32 %v5664_v41, 16 }
 0x11b   : > { %v3231_v52 = vrot.slane %v3230_v7, 4  ;;  %v3239_v10 = vor.u32 %v3238_v53, %v3235_v54  ;;  %v1647_v44 = vrot.slane %v1645_v9, 6  ;;  %v1663_v28 = vshll.u32 %v5664_v41, 16 }
 0x11c   : > { %v1653_v46 = vrot.slane %v1651_v27, 5  ;;  %v1656_v26 = vrot.slane %v1654_v24, 6  ;;  %v1662_v57 = vrot.slane %v1660_v18, 5  ;;  %v1669_v33 = vshrl.u32 %v3634_v30, 16 }
 0x11d   : > { %v3240_v14 = vsel %vm5289_vm9, %v3231_v52, %v3239_v10  ;;  %v1648_v13 = vor.u32 %v1647_v44, %v1644_v11  ;;  %v1665_v12 = vrot.slane %v1663_v28, 6  ;;  %v1672_v60 = vshll.u32 %v3634_v30, 16  ;;  %v3702_v30 = vld [vmem:[%s4872_s21 + $0x44] sm:$0x3] }
 0x11e   : > { %v3888_v1 = vcombine.low %v3222_v50, %v3240_v14  ;;  %v1657_v48 = vor.u32 %v1656_v26, %v1653_v46  ;;  %v1671_v61 = vrot.slane %v1669_v33, 5  ;;  %v1678_v49 = vshrl.u32 %v5673_v20, 16  ;;  %v3703_v14 = vld [vmem:[%s4872_s21 + $0x4c] sm:$0x3] }
 0x11f   : > { %v1649_v55 = vrot.slane %v1648_v13, 4  ;;  %v1666_v32 = vor.u32 %v1665_v12, %v1662_v57  ;;  %v1674_v41 = vrot.slane %v1672_v60, 6  ;;  %v1681_v34 = vshll.u32 %v5673_v20, 16 }
 0x120   : > { %4208 = vmatmul.mubr.msk.bf16.vlgmr.msra.gmra.mrb[0].mxu0 %vm523_vm0, %v3888_v1  ;;  %v1680_v3 = vrot.slane %v1678_v49, 5  ;;  %v1687_v23 = vshrl.u32 %v3635_v42, 16  ;;  %v1690_v2 = vshll.u32 %v3635_v42, 16  ;;  %v1696_v6 = vshrl.u32 %v5683_v17, 16 }
 0x121   : > { %v1658_v19 = vsel %vm5289_vm9, %v1649_v55, %v1657_v48  ;;  %v1667_v59 = vrot.slane %v1666_v32, 4  ;;  %v1675_v58 = vor.u32 %v1674_v41, %v1671_v61  ;;  %v1683_v43 = vrot.slane %v1681_v34, 6  ;;  %v3704_v32 = vld [vmem:[%s4872_s21 + $0x54] sm:$0x3] }
 0x122   : > { %v1689_v31 = vrot.slane %v1687_v23, 5  ;;  %v1692_v38 = vrot.slane %v1690_v2, 6  ;;  %v1698_v47 = vrot.slane %v1696_v6, 5  ;;  %v1699_v20 = vshll.u32 %v5683_v17, 16 }
 0x123   : > { %v1676_v22 = vsel %vm5289_vm9, %v1667_v59, %v1675_v58  ;;  %v1684_v62 = vor.u32 %v1683_v43, %v1680_v3  ;;  %v1705_v29 = vshrl.u32 %v3636_v25, 16  ;;  %v1708_v40 = vshll.u32 %v3636_v25, 16 }
 0x124   : > { %v3791_v4 = vcombine.low %v1658_v19, %v1676_v22  ;;  %v1693_v15 = vor.u32 %v1692_v38, %v1689_v31  ;;  %v1701_v39 = vrot.slane %v1699_v20, 6  ;;  %v3242_v36 = vshrl.u32 %v5686_v5, 16 }
 0x125   : > { %v1685_v37 = vrot.slane %v1684_v62, 4  ;;  %v1707_v54 = vrot.slane %v1705_v29, 5  ;;  %v1710_v7 = vrot.slane %v1708_v40, 6  ;;  %v3245_v53 = vshll.u32 %v5686_v5, 16  ;;  %v3637_v62 = vld [vmem:[%s4872_s21 + $0x2c] sm:$0x3] }
 0x126   : > { %4111 = vmatprep.mubr.msk.bf16.mxu1 %vm523_vm0, %v3791_v4  ;;  %v1702_v17 = vor.u32 %v1701_v39, %v1698_v47  ;;  %v3244_v11 = vrot.slane %v3242_v36, 5  ;;  %v3251_v9 = vshrl.u32 %v3701_v8, 16  ;;  %v3254_v50 = vshll.u32 %v3701_v8, 16 }
 0x127   : > { %v1694_v27 = vsel %vm5289_vm9, %v1685_v37, %v1693_v15  ;;  %v1711_v24 = vor.u32 %v1710_v7, %v1707_v54  ;;  %v3247_v18 = vrot.slane %v3245_v53, 6  ;;  %v3260_v52 = vshrl.u32 %v5692_v21, 16 }
 0x128   : > { %v1703_v10 = vrot.slane %v1702_v17, 4  ;;  %v3253_v44 = vrot.slane %v3251_v9, 5  ;;  %v3256_v28 = vrot.slane %v3254_v50, 6  ;;  %v3263_v5 = vshll.u32 %v5692_v21, 16 }
 0x129   : > { %v3248_v46 = vor.u32 %v3247_v18, %v3244_v11  ;;  %v3262_v26 = vrot.slane %v3260_v52, 5  ;;  %v3269_v57 = vshrl.u32 %v3702_v30, 16  ;;  %v3272_v33 = vshll.u32 %v3702_v30, 16 }
 0x12a   : > { %v1712_v13 = vsel %vm5289_vm9, %v1703_v10, %v1711_v24  ;;  %v3257_v12 = vor.u32 %v3256_v28, %v3253_v44  ;;  %v3265_v60 = vrot.slane %v3263_v5, 6  ;;  %v3278_v42 = vshrl.u32 %v5699_v51, 16 }
 0x12b   : > { %v3792_v1 = vcombine.low %v1694_v27, %v1712_v13  ;;  %v3249_v48 = vrot.slane %v3248_v46, 4  ;;  %v3271_v61 = vrot.slane %v3269_v57, 5  ;;  %v3274_v49 = vrot.slane %v3272_v33, 6  ;;  %v3639_v46 = vld [vmem:[%s4872_s21 + $0x3c] sm:$0x3] }
 0x12c   : > { %v3266_v55 = vor.u32 %v3265_v60, %v3262_v26  ;;  %v3280_v41 = vrot.slane %v3278_v42, 5  ;;  %v3281_v21 = vshll.u32 %v5699_v51, 16  ;;  %v3287_v34 = vshrl.u32 %v3703_v14, 16  ;;  %v3640_v42 = vld [vmem:[%s4872_s21 + $0x44] sm:$0x3] }
 0x12d   : > { %4112 = vmatmul.mubr.msk.bf16.vlgmr.msra.gmra.mrb[0].mxu1 %vm523_vm0, %v3792_v1  ;;  %v3258_v25 = vsel %vm5289_vm9, %v3249_v48, %v3257_v12  ;;  %v3275_v3 = vor.u32 %v3274_v49, %v3271_v61  ;;  %v3290_v23 = vshll.u32 %v3703_v14, 16  ;;  %v3296_v2 = vshrl.u32 %v5708_v35, 16 }
 0x12e   : > { %v3267_v6 = vrot.slane %v3266_v55, 4  ;;  %v3283_v19 = vrot.slane %v3281_v21, 6  ;;  %v3289_v59 = vrot.slane %v3287_v34, 5  ;;  %v3299_v58 = vshll.u32 %v5708_v35, 16  ;;  %v3638_v35 = vld [vmem:[%s4872_s21 + $0x34] sm:$0x3] }
 0x12f   : > { %v3292_v43 = vrot.slane %v3290_v23, 6  ;;  %v3298_v31 = vrot.slane %v3296_v2, 5  ;;  %v3305_v51 = vshrl.u32 %v3704_v32, 16  ;;  %v3308_v38 = vshll.u32 %v3704_v32, 16 }
 0x130   : > { %v3276_v47 = vsel %vm5289_vm9, %v3267_v6, %v3275_v3  ;;  %v3284_v20 = vor.u32 %v3283_v19, %v3280_v41  ;;  %v3301_v22 = vrot.slane %v3299_v58, 6  ;;  %v1714_v29 = vshrl.u32 %v5716_v0, 16 }
 0x131   : > { %v3889_v40 = vcombine.low %v3258_v25, %v3276_v47  ;;  %v3293_v8 = vor.u32 %v3292_v43, %v3289_v59  ;;  %v3307_v4 = vrot.slane %v3305_v51, 5  ;;  %v3310_v15 = vrot.slane %v3308_v38, 6 }
 0x132   : > { %v3285_v39 = vrot.slane %v3284_v20, 4  ;;  %v3302_v36 = vor.u32 %v3301_v22, %v3298_v31  ;;  %v1716_v37 = vrot.slane %v1714_v29, 5  ;;  %v1717_v54 = vshll.u32 %v5716_v0, 16 }
 0x133   : > { %4211 = vmatprep.mubr.msk.bf16.mxu0 %vm523_vm0, %v3889_v40  ;;  %v3311_v7 = vor.u32 %v3310_v15, %v3307_v4  ;;  %v1723_v53 = vshrl.u32 %v3637_v62, 16  ;;  %v1726_v17 = vshll.u32 %v3637_v62, 16  ;;  %v1732_v30 = vshrl.u32 %v5725_v56, 16 }
 0x134   : > { %v3294_v11 = vsel %vm5289_vm9, %v3285_v39, %v3293_v8  ;;  %v3303_v9 = vrot.slane %v3302_v36, 4  ;;  %v1719_v50 = vrot.slane %v1717_v54, 6  ;;  %v1735_v27 = vshll.u32 %v5725_v56, 16  ;;  %v3897_v36 = vld [vmem:[#allocation7] ss:$0 sm:$0xff] }
 0x135   : > { %v1725_v24 = vrot.slane %v1723_v53, 5  ;;  %v1728_v18 = vrot.slane %v1726_v17, 6  ;;  %v1734_v52 = vrot.slane %v1732_v30, 5  ;;  %v1741_v0 = vshrl.u32 %v3638_v35, 16 }
 0x136   : > { %v3312_v10 = vsel %vm5289_vm9, %v3303_v9, %v3311_v7  ;;  %v1720_v44 = vor.u32 %v1719_v50, %v1716_v37  ;;  %v1737_v28 = vrot.slane %v1735_v27, 6  ;;  %v1744_v5 = vshll.u32 %v3638_v35, 16 }
 0x137   : > { %v3890_v26 = vcombine.low %v3294_v11, %v3312_v10  ;;  %v1729_v57 = vor.u32 %v1728_v18, %v1725_v24  ;;  %v1743_v33 = vrot.slane %v1741_v0, 5  ;;  %v1750_v14 = vshrl.u32 %v5734_v16, 16 }
 0x138   : > { %v1721_v13 = vrot.slane %v1720_v44, 4  ;;  %v1738_v12 = vor.u32 %v1737_v28, %v1734_v52  ;;  %v1746_v56 = vrot.slane %v1744_v5, 6  ;;  %v1753_v60 = vshll.u32 %v5734_v16, 16 }
 0x139   : > { %4212 = vmatmul.mubr.msk.bf16.gmra.mrb[4].mxu0 %vm523_vm0, %v3890_v26  ;;  %v1752_v1 = vrot.slane %v1750_v14, 5  ;;  %v1759_v48 = vshrl.u32 %v3639_v46, 16  ;;  %v1762_v61 = vshll.u32 %v3639_v46, 16  ;;  %v1768_v49 = vshrl.u32 %v5737_v45, 16 }
 0x13a   : > { %v1730_v55 = vsel %vm5289_vm9, %v1721_v13, %v1729_v57  ;;  %v1739_v32 = vrot.slane %v1738_v12, 4  ;;  %v1747_v41 = vor.u32 %v1746_v56, %v1743_v33  ;;  %v1755_v21 = vrot.slane %v1753_v60, 6 }
 0x13b   : > { %v1761_v34 = vrot.slane %v1759_v48, 5  ;;  %v1764_v25 = vrot.slane %v1762_v61, 6  ;;  %v1770_v3 = vrot.slane %v1768_v49, 5  ;;  %v1771_v23 = vshll.u32 %v5737_v45, 16 }
 0x13c   : > { %v1748_v16 = vsel %vm5289_vm9, %v1739_v32, %v1747_v41  ;;  %v1756_v2 = vor.u32 %v1755_v21, %v1752_v1  ;;  %v1777_v6 = vshrl.u32 %v3640_v42, 16  ;;  %v1780_v19 = vshll.u32 %v3640_v42, 16 }
 0x13d   : > { %v3793_v59 = vcombine.low %v1730_v55, %v1748_v16  ;;  %v1765_v58 = vor.u32 %v1764_v25, %v1761_v34  ;;  %v1773_v43 = vrot.slane %v1771_v23, 6 }
 0x13e   : > { %v1757_v31 = vrot.slane %v1756_v2, 4  ;;  %v1779_v51 = vrot.slane %v1777_v6, 5  ;;  %v1782_v38 = vrot.slane %v1780_v19, 6 }
 0x13f   : > { %4115 = vmatprep.mubr.msk.bf16.mxu1 %vm523_vm0, %v3793_v59  ;;  %v1774_v47 = vor.u32 %v1773_v43, %v1770_v3 }
 0x140   : > { %v1783_v20 = vor.u32 %v1782_v38, %v1779_v51  ;;  %v1766_v22 = vsel %vm5289_vm9, %v1757_v31, %v1765_v58 }
 0x141   : > { %v1775_v45 = vrot.slane %v1774_v47, 4 }
 0x143   : > { %v1784_v62 = vsel %vm5289_vm9, %v1775_v45, %v1783_v20 }
 0x144   : > { %v3794_v29 = vcombine.low %v1766_v22, %v1784_v62 }
 0x146   : > { %4116 = vmatmul.mubr.msk.bf16.gmra.mrb[4].mxu1 %vm523_vm0, %v3794_v29 }
 0x1f3   : > { %v4209_v40 = vpop.f32.mrb[0].mxu0 }
 0x1f4   : > { %v3387_v8 = vpop.f32.mrb[1].mxu0 }
 0x1f5   : > { %v4210_v4 = vpop.f32.mrb[2].mxu0 }
 0x1f6   : > { %v3390_v15 = vpop.f32.mrb[3].mxu0 }
 0x200   : > { %v4113_v39 = vpop.f32.mrb[0].mxu1 }
 0x201   : > { %v4215_v35 = vadd.f32 %v4209_v40, %v4113_v39  ;;  %v1859_v37 = vpop.f32.mrb[1].mxu1 }
 0x202   : > { %v4216_v54 = vadd.f32 %v3387_v8, %v1859_v37  ;;  %v4114_v7 = vpop.f32.mrb[2].mxu1 }
 0x203   : > { %v3435_v53 = vadd.f32 %v4215_v35, %v3897_v36  ;;  %v4217_v17 = vadd.f32 %v4210_v4, %v4114_v7  ;;  %v1862_v30 = vpop.f32.mrb[3].mxu1 }
 0x204   : > { %v3433_v11 = vadd.f32 %v4216_v54, %v3897_v36  ;;  %v4218_v63 = vadd.f32 %v3390_v15, %v1862_v30 }
 0x205   : > { %v3436_v9 = vadd.f32 %v4217_v17, %v3897_v36  ;;  %v3443_v27 = vmax.f32 %v3435_v53, 0.0 }
 0x206   : > { %v3434_v50 = vadd.f32 %v4218_v63, %v3897_v36  ;;  %v3441_v18 = vmax.f32 %v3433_v11, 0.0 }
 0x207   : > { %v3444_v24 = vmax.f32 %v3436_v9, 0.0 }
 0x208   : > { %v3442_v52 = vmax.f32 %v3434_v50, 0.0 }
 0x209   : > { %v3912_v0 = vpack.c.bf16 %v3444_v24, %v3443_v27 }
 0x20a   : > { %v3907_v10 = vpack.c.bf16 %v3442_v52, %v3441_v18 }
 0x20b   : > { %3924 = vst [vmem:[%s229_s22 + $0x8] sm:$0xff] %v3912_v0  }
 0x20c   : > { %3908 = vst [vmem:[%s229_s22] sm:$0xff] %v3907_v10   ;;  %v4213_v44 = vpop.f32.mrb[4].mxu0 }
 0x20d   : > { %v3403_v28 = vpop.f32.mrb[5].mxu0 }
 0x20e   : > { %v4214_v5 = vpop.f32.mrb[6].mxu0 }
 0x20f   : > { %v3406_v46 = vpop.f32.mrb[7].mxu0 }
 0x219   : > { %v4117_v26 = vpop.f32.mrb[4].mxu1 }
 0x21a   : > { %v4219_v57 = vadd.f32 %v4213_v44, %v4117_v26  ;;  %v1875_v33 = vpop.f32.mrb[5].mxu1 }
 0x21b   : > { %v4220_v14 = vadd.f32 %v3403_v28, %v1875_v33  ;;  %v4118_v13 = vpop.f32.mrb[6].mxu1 }
 0x21c   : > { %v3439_v12 = vadd.f32 %v4219_v57, %v3897_v36  ;;  %v4221_v56 = vadd.f32 %v4214_v5, %v4118_v13  ;;  %v1878_v60 = vpop.f32.mrb[7].mxu1 }
 0x21d   : > { %v3437_v42 = vadd.f32 %v4220_v14, %v3897_v36  ;;  %v4222_v1 = vadd.f32 %v3406_v46, %v1878_v60 }
 0x21e   : > { %v3440_v48 = vadd.f32 %v4221_v56, %v3897_v36  ;;  %v3447_v49 = vmax.f32 %v3439_v12, 0.0 }
 0x21f   : > { %v3438_v61 = vadd.f32 %v4222_v1, %v3897_v36  ;;  %v3445_v32 = vmax.f32 %v3437_v42, 0.0 }
 0x220   : > { %v3448_v55 = vmax.f32 %v3440_v48, 0.0 }
 0x221   : > { %v3446_v41 = vmax.f32 %v3438_v61, 0.0 }
 0x222   : > { %v3922_v21 = vpack.c.bf16 %v3448_v55, %v3447_v49 }
 0x223   : > { %v3917_v34 = vpack.c.bf16 %v3446_v41, %v3445_v32 }
 0x224   : > { %3926 = vst [vmem:[%s229_s22 + $0x18] sm:$0xff] %v3922_v21  }
 0x225   : > { %3925 = vst [vmem:[%s229_s22 + $0x10] sm:$0xff] %v3917_v34  }
 0x226   : > { %4572 = shalt.err (!%p4569_p2)
}
 0x227   : > { %s4573_s28 = scalar_lea.hbm %s5863_s26, 512  ;;  %s4577_s8 = scalar_lea.hbm %s5915_s3, 1024 }
 0x228   : > { %p4574_p0 = scmp.ne.s32.totalorder %s5863_s26, %s4573_s28  ;;  %p4578_p6 = scmp.lt.u32.totalorder %s5863_s26, %s5915_s3 }
 0x229   : > { %p4579_p7 = scmp.lt.u32.totalorder %s4577_s8, %s4573_s28  ;;  %p4581_p8 = scmp.lt.u32.totalorder %s4573_s28, %s5863_s26 }
 0x22a   : > { %p4575_p4 = pnand %p4574_p0, %p5936_p12 }
 0x22b   : > { %p4580_p11 = por %p4579_p7, %p4578_p6 }
 0x22c   : > { %p4576_p13 = pneg %p4575_p4 }
 0x22d   : > { %p4582_p1 = por %p4581_p8, %p4580_p11 }
 0x22f   : > { %p4583_p10 = pnand %p4582_p1, %p4576_p13 }
 0x231   : > { %4586 = shalt.err (!%p4583_p10)
}
 0x232   : > { %s4653_s22 = smov 64   ;;  %s4654_s11 = smov 4  }
 0x233   : > { %4348 = dma.vmem_to_hbm [thread:$0]  (%p5936_p12), %s5858_s24, 512, %s5863_s26, %s3466_s10, %s4653_s22, %s4653_s22, %s4654_s11  }
 0x234 PF: > { %s3496_s18 = sand.u32 1, %s4625_s12   ;;  %p5937_p3 = scmp.ne.s32.totalorder %s5923_s23, 0 }
 0x235   : > { %p5938_p5 = scmp.ge.s32.totalorder %s4645_s17, 2  ;;  %s3497_s5 = scalar_lea.sflag [#allocation4], %s3496_s18 }
 0x237   : > { %p4362_p9 = pnand %p5938_p5, %p5937_p3 }
 0x239   : > { %4620 = dma.done.wait (!%p4362_p9), %s3497_s5, 512  }
 0x23a   : > { %4622 = vsyncadd (!%p4362_p9), %s3497_s5, 4294966784  ;;  %s20_s17 = sadd.s32 1, %s4645_s17   ;;  %s5939_s12 = smov %s4629_s13 }
 0x23b   : > { %p17_p2 = scmp.ge.s32.totalorder %s20_s17, 4   ;;  %s5940_s13 = smov %s4633_s14 }
 0x23c   : > { %s5941_s14 = smov %s4824_s6  ;;  %s5942_s15 = smov %s4641_s16 }
 0x23d   : > { %s5943_s16 = smov %s5945_s25  ;;  %19 = sbr.rel (!%p17_p2) target bundleno = 7 (0x7), region = 89 }
 0x244   :  { %3502 = vsyncpa [#allocation3], 1 }
 0x245   :  { %3504 = vsyncpa [#allocation3 + $0x1], 1 }
 0x246   :  { %3505 = vsyncpa [#allocation6], 1 }
 0x247   :  { %3506 = vsyncpa [#allocation4], 1 }
 0x248   :  { %3508 = vsyncpa [#allocation4 + $0x1], 1 }

// kernel: _lambda_.12
= control target key start
LH: loop header
LB: loop body
LE: loop exit
PB: predicated region body
PF: predicated region fallthrough
CT: control target
= control target key end

     0   :  { %8 = vsyncpa [#allocation4], 0  ;;  %s524_s0 = inlined_call_operand.hbm [shape: bf16[32,128], index: 0, kind: input, shape index: {}]   ;;  %s525_s1 = inlined_call_operand.hbm [shape: bf16[128,128], index: 1, kind: input, shape index: {}]   ;;  %s526_s2 = inlined_call_operand.hbm [shape: f32[1,128], index: 2, kind: input, shape index: {}]   ;;  %s527_s3 = inlined_call_operand.hbm [shape: bf16[32,128], index: 3, kind: output, shape index: {}]  }
   0x1   :  { %9 = vsyncpa [#allocation7], 0 }
   0x2   :  { %10 = vsyncpa [#allocation5], 0  ;;  %s434_s12 = smov [#allocation6]   ;;  %s435_s14 = smov [#allocation3]  }
   0x3   :  { %s28_s13 = sshll.u32 %s434_s12, 4  ;;  %s16_s15 = sshll.u32 %s435_s14, 4  ;;  %s29_s13 = int_to_ptr.vmem [resolvable:$true] %s28_s13  ;;  %s460_s15 = int_to_ptr.vmem [resolvable:$true] %s16_s15 }
   0x4   :  { %s340_s18 = scalar_lea.hbm %s525_s1, 1024 }
   0x5   :  { %p341_p0 = scmp.ne.s32.totalorder %s525_s1, %s340_s18  ;;  %p344_p1 = scmp.lt.u32.totalorder %s340_s18, %s525_s1 }
   0x7   :  { %p346_p2 = pnand %p344_p1, %p341_p0 }
   0x9   :  { %349 = shalt.err (!%p346_p2)
}
   0xa   :  { %s350_s23 = scalar_lea.vmem %s29_s13, 1024  ;;  %p355_p4 = scmp.lt.s32.totalorder %s29_s13, %s29_s13 }
   0xb   :  { %p351_p3 = scmp.ne.s32.totalorder %s29_s13, %s350_s23  ;;  %p356_p5 = scmp.lt.s32.totalorder %s350_s23, %s350_s23 }
   0xd   :  { %p357_p6 = por %p356_p5, %p355_p4 }
   0xf   :  { %p358_p7 = pnand %p357_p6, %p351_p3 }
  0x11   :  { %361 = shalt.err (!%p358_p7)
}
  0x12   :  { %s436_s24 = smov 64   ;;  %s437_s25 = smov 4  }
  0x13   :  { %34 = dma.hbm_to_vmem [thread:$0]  %s525_s1, 1024, %s29_s13, [#allocation7], %s436_s24, %s436_s24, %s437_s25  }
  0x14   :  { %s362_s30 = scalar_lea.hbm %s524_s0, 256 }
  0x15   :  { %p363_p8 = scmp.ne.s32.totalorder %s524_s0, %s362_s30  ;;  %p366_p9 = scmp.lt.u32.totalorder %s362_s30, %s524_s0 }
  0x17   :  { %p368_p10 = pnand %p366_p9, %p363_p8 }
  0x19   :  { %371 = shalt.err (!%p368_p10)
}
  0x1a   :  { %s372_s8 = scalar_lea.vmem %s460_s15, 256  ;;  %p377_p12 = scmp.lt.s32.totalorder %s460_s15, %s460_s15 }
  0x1b   :  { %p373_p11 = scmp.ne.s32.totalorder %s460_s15, %s372_s8  ;;  %p378_p13 = scmp.lt.s32.totalorder %s372_s8, %s372_s8 }
  0x1d   :  { %p379_p0 = por %p378_p13, %p377_p12 }
  0x1f   :  { %p380_p1 = pnand %p379_p0, %p373_p11 }
  0x21   :  { %383 = shalt.err (!%p380_p1)
}
  0x22   :  { %22 = dma.hbm_to_vmem [thread:$0]  %s524_s0, 256, %s460_s15, [#allocation4], %s436_s24, %s436_s24, %s437_s25  }
  0x23   :  { %s438_s10 = smov [#allocation8]   ;;  %s384_s14 = scalar_lea.hbm %s526_s2, 16 }
  0x24   :  { %s41_s11 = sshll.u32 %s438_s10, 4  ;;  %p385_p2 = scmp.ne.s32.totalorder %s526_s2, %s384_s14  ;;  %s42_s11 = int_to_ptr.vmem [resolvable:$true] %s41_s11 }
  0x25   :  { %p388_p3 = scmp.lt.u32.totalorder %s384_s14, %s526_s2 }
  0x27   :  { %p390_p4 = pnand %p388_p3, %p385_p2 }
  0x29   :  { %393 = shalt.err (!%p390_p4)
}
  0x2a   :  { %s394_s20 = scalar_lea.vmem %s42_s11, 16  ;;  %s398_s0 = scalar_lea.vmem %s42_s11, 32 }
  0x2b   :  { %p395_p5 = scmp.ne.s32.totalorder %s42_s11, %s394_s20  ;;  %p399_p6 = scmp.lt.s32.totalorder %s42_s11, %s42_s11 }
  0x2c   :  { %p400_p7 = scmp.lt.s32.totalorder %s398_s0, %s394_s20 }
  0x2e   :  { %p401_p8 = por %p400_p7, %p399_p6 }
  0x30   :  { %p402_p9 = pnand %p401_p8, %p395_p5 }
  0x32   :  { %405 = shalt.err (!%p402_p9)
}
  0x33   :  { %44 = dma.hbm_to_vmem [thread:$0]  %s526_s2, 16, %s42_s11, [#allocation7]  }
  0x34   :  { %428 = dma.done.wait [#allocation4], 256  }
  0x35   :  { %429 = vsyncadd [#allocation4], 4294967040 }
  0x36   :  { %430 = dma.done.wait [#allocation7], 1040  }
  0x37   :  { %431 = vsyncadd [#allocation7], 4294966256  ;;  %v330_v0 = vld [vmem:[#allocation6] sm:$0xff]   ;;  %v331_v1 = vld [vmem:[#allocation6 + $0x8] sm:$0xff]   ;;  %s439_s2 = smov [#allocation9]  }
  0x38   :  { %304 = vmatprep.subr.bf16.mxu0 %v330_v0  ;;  %v332_v2 = vld [vmem:[#allocation6 + $0x10] sm:$0xff]   ;;  %v333_v3 = vld [vmem:[#allocation6 + $0x18] sm:$0xff]   ;;  %v334_v5 = vld [vmem:[#allocation6 + $0x20] sm:$0xff]   ;;  %s251_s22 = sshll.u32 %s439_s2, 4  ;;  %s252_s22 = int_to_ptr.vmem [resolvable:$true] %s251_s22 }
  0x39   :  { %305 = vmatpush3.bf16.msra.mxu0 %v330_v0  ;;  %v338_v4 = vld [vmem:[#allocation3] sm:$0xff]   ;;  %v335_v6 = vld [vmem:[#allocation6 + $0x28] sm:$0xff]   ;;  %v337_v8 = vld [vmem:[#allocation6 + $0x38] sm:$0xff]   ;;  %s406_s23 = scalar_lea.vmem %s252_s22, 256  ;;  %p411_p11 = scmp.lt.s32.totalorder %s252_s22, %s252_s22 }
  0x3a   :  { %306 = vmatprep.subr.bf16.mxu0 %v331_v1  ;;  %320 = vmatprep.mubr.bf16.mxu0 %v338_v4  ;;  %v336_v7 = vld [vmem:[#allocation6 + $0x30] sm:$0xff]   ;;  %v339_v9 = vld [vmem:[#allocation3 + $0x8] sm:$0xff]   ;;  %v274_v10 = vld [vmem:[#allocation8] ss:$0 sm:$0xff]  ;;  %p407_p10 = scmp.ne.s32.totalorder %s252_s22, %s406_s23  ;;  %p412_p12 = scmp.lt.s32.totalorder %s406_s23, %s406_s23 }
  0x3c   :  { %p413_p13 = por %p412_p12, %p411_p11 }
  0x3d   :  { %307 = vmatpush3.bf16.msra.mxu0 %v331_v1 }
  0x3e   :  { %308 = vmatprep.subr.bf16.mxu0 %v332_v2  ;;  %p414_p0 = pnand %p413_p13, %p407_p10 }
  0x41   :  { %309 = vmatpush3.bf16.msra.mxu0 %v332_v2 }
  0x42   :  { %310 = vmatprep.subr.bf16.mxu0 %v333_v3 }
  0x45   :  { %311 = vmatpush3.bf16.msra.mxu0 %v333_v3 }
  0x46   :  { %312 = vmatprep.subr.bf16.mxu0 %v334_v5 }
  0x49   :  { %313 = vmatpush3.bf16.msra.mxu0 %v334_v5 }
  0x4a   :  { %314 = vmatprep.subr.bf16.mxu0 %v335_v6 }
  0x4d   :  { %315 = vmatpush3.bf16.msra.mxu0 %v335_v6 }
  0x4e   :  { %316 = vmatprep.subr.bf16.mxu0 %v336_v7 }
  0x51   :  { %317 = vmatpush3.bf16.msra.mxu0 %v336_v7 }
  0x52   :  { %318 = vmatprep.subr.bf16.mxu0 %v337_v8 }
  0x55   :  { %319 = vmatpush3.bf16.msra.mxu0 %v337_v8 }
  0x58   :  { %321 = vmatmul.mubr.bf16.vlgmr.msra.gmra.mrb[0].mxu0 %v339_v9 }
 0x12b   :  { %v322_v11 = vpop.f32.mrb[0].mxu0 }
 0x12c   :  { %v220_v12 = vadd.f32 %v322_v11, %v274_v10  ;;  %v181_v13 = vpop.f32.mrb[1].mxu0 }
 0x12d   :  { %v218_v14 = vadd.f32 %v274_v10, %v181_v13  ;;  %v323_v15 = vpop.f32.mrb[2].mxu0 }
 0x12e   :  { %v221_v16 = vadd.f32 %v323_v15, %v274_v10  ;;  %v184_v17 = vpop.f32.mrb[3].mxu0  ;;  %v224_v19 = vmax.f32 %v220_v12, 0.0 }
 0x12f   :  { %v219_v18 = vadd.f32 %v274_v10, %v184_v17  ;;  %v222_v21 = vmax.f32 %v218_v14, 0.0 }
 0x130   :  { %v225_v20 = vmax.f32 %v221_v16, 0.0 }
 0x131   :  { %v223_v22 = vmax.f32 %v219_v18, 0.0 }
 0x132   :  { %v291_v23 = vpack.c.bf16 %v225_v20, %v224_v19 }
 0x133   :  { %v286_v24 = vpack.c.bf16 %v223_v22, %v222_v21 }
 0x134   :  { %293 = vst [vmem:[#allocation9 + $0x8] sm:$0xff] %v291_v23  }
 0x135   :  { %287 = vst [vmem:[#allocation9] sm:$0xff] %v286_v24  }
 0x136   :  { %417 = shalt.err (!%p414_p0)
}
 0x137   :  { %s418_s28 = scalar_lea.hbm %s527_s3, 256 }
 0x138   :  { %p419_p1 = scmp.ne.s32.totalorder %s527_s3, %s418_s28  ;;  %p422_p2 = scmp.lt.u32.totalorder %s418_s28, %s527_s3 }
 0x13a   :  { %p424_p3 = pnand %p422_p2, %p419_p1 }
 0x13c   :  { %427 = shalt.err (!%p424_p3)
}
 0x13d   :  { %257 = dma.vmem_to_hbm [thread:$0]  %s252_s22, 256, %s527_s3, [#allocation5], %s436_s24, %s436_s24, %s437_s25  }
 0x13e   :  { %432 = dma.done.wait [#allocation5], 256  }
 0x13f   :  { %433 = vsyncadd [#allocation5], 4294967040 }
 0x140   :  { %261 = vsyncpa [#allocation4], 1 }
 0x141   :  { %262 = vsyncpa [#allocation7], 1 }
 0x142   :  { %263 = vsyncpa [#allocation5], 1 }

// kernel: _lambda_.15
= control target key start
LH: loop header
LB: loop body
LE: loop exit
PB: predicated region body
PF: predicated region fallthrough
CT: control target
= control target key end

     0   :  { %9 = vsyncpa [#allocation4], 0  ;;  %s686_s0 = inlined_call_operand.hbm [shape: bf16[32,128], index: 0, kind: input, shape index: {}]   ;;  %s687_s1 = inlined_call_operand.hbm [shape: bf16[128,256], index: 1, kind: input, shape index: {}]   ;;  %s688_s2 = inlined_call_operand.hbm [shape: f32[1,256], index: 2, kind: input, shape index: {}]   ;;  %s689_s3 = inlined_call_operand.hbm [shape: bf16[32,256], index: 3, kind: input, shape index: {}]   ;;  %s690_s4 = inlined_call_operand.hbm [shape: bf16[32,256], index: 4, kind: output, shape index: {}]  }
   0x1   :  { %10 = vsyncpa [#allocation7], 0 }
   0x2   :  { %11 = vsyncpa [#allocation10], 0 }
   0x3   :  { %12 = vsyncpa [#allocation5], 0  ;;  %s575_s15 = smov [#allocation6]   ;;  %s457_s19 = scalar_lea.hbm %s687_s1, 2048 }
   0x4   :  { %s30_s16 = sshll.u32 %s575_s15, 4  ;;  %p458_p0 = scmp.ne.s32.totalorder %s687_s1, %s457_s19  ;;  %s31_s16 = int_to_ptr.vmem [resolvable:$true] %s30_s16 }
   0x5   :  { %p461_p1 = scmp.lt.u32.totalorder %s457_s19, %s687_s1 }
   0x7   :  { %p463_p2 = pnand %p461_p1, %p458_p0 }
   0x9   :  { %466 = shalt.err (!%p463_p2)
}
   0xa   :  { %s467_s24 = scalar_lea.vmem %s31_s16, 2048  ;;  %p472_p4 = scmp.lt.s32.totalorder %s31_s16, %s31_s16 }
   0xb   :  { %p468_p3 = scmp.ne.s32.totalorder %s31_s16, %s467_s24  ;;  %p473_p5 = scmp.lt.s32.totalorder %s467_s24, %s467_s24 }
   0xd   :  { %p474_p6 = por %p473_p5, %p472_p4 }
   0xf   :  { %p475_p7 = pnand %p474_p6, %p468_p3 }
  0x11   :  { %478 = shalt.err (!%p475_p7)
}
  0x12   :  { %s576_s25 = smov 128   ;;  %s577_s26 = smov 8  }
  0x13   :  { %36 = dma.hbm_to_vmem [thread:$0]  %s687_s1, 2048, %s31_s16, [#allocation7], %s576_s25, %s576_s25, %s577_s26  }
  0x14   :  { %s578_s29 = smov [#allocation3]   ;;  %s479_s7 = scalar_lea.hbm %s686_s0, 256 }
  0x15   :  { %s18_s30 = sshll.u32 %s578_s29, 4  ;;  %p480_p8 = scmp.ne.s32.totalorder %s686_s0, %s479_s7  ;;  %s19_s30 = int_to_ptr.vmem [resolvable:$true] %s18_s30 }
  0x16   :  { %p483_p9 = scmp.lt.u32.totalorder %s479_s7, %s686_s0 }
  0x18   :  { %p485_p10 = pnand %p483_p9, %p480_p8 }
  0x1a   :  { %488 = shalt.err (!%p485_p10)
}
  0x1b   :  { %s489_s12 = scalar_lea.vmem %s19_s30, 256  ;;  %p494_p12 = scmp.lt.s32.totalorder %s19_s30, %s19_s30 }
  0x1c   :  { %p490_p11 = scmp.ne.s32.totalorder %s19_s30, %s489_s12  ;;  %p495_p13 = scmp.lt.s32.totalorder %s489_s12, %s489_s12 }
  0x1e   :  { %p496_p0 = por %p495_p13, %p494_p12 }
  0x20   :  { %p497_p1 = pnand %p496_p0, %p490_p11 }
  0x22   :  { %500 = shalt.err (!%p497_p1)
}
  0x23   :  { %s579_s1 = smov 64   ;;  %s580_s13 = smov 4  }
  0x24   :  { %24 = dma.hbm_to_vmem [thread:$0]  %s686_s0, 256, %s19_s30, [#allocation4], %s579_s1, %s579_s1, %s580_s13  }
  0x25   :  { %s581_s16 = smov [#allocation8]   ;;  %s582_s18 = smov [#allocation9]  }
  0x26   :  { %s43_s17 = sshll.u32 %s581_s16, 4  ;;  %s52_s19 = sshll.u32 %s582_s18, 4  ;;  %s44_s17 = int_to_ptr.vmem [resolvable:$true] %s43_s17  ;;  %s637_s19 = int_to_ptr.vmem [resolvable:$true] %s52_s19 }
  0x27   :  { %s501_s22 = scalar_lea.hbm %s688_s2, 32 }
  0x28   :  { %p502_p2 = scmp.ne.s32.totalorder %s688_s2, %s501_s22  ;;  %p505_p3 = scmp.lt.u32.totalorder %s501_s22, %s688_s2 }
  0x2a   :  { %p507_p4 = pnand %p505_p3, %p502_p2 }
  0x2c   :  { %510 = shalt.err (!%p507_p4)
}
  0x2d   :  { %s511_s0 = scalar_lea.vmem %s44_s17, 32  ;;  %p516_p6 = scmp.lt.s32.totalorder %s44_s17, %s44_s17 }
  0x2e   :  { %p512_p5 = scmp.ne.s32.totalorder %s44_s17, %s511_s0  ;;  %p517_p7 = scmp.lt.s32.totalorder %s511_s0, %s511_s0 }
  0x30   :  { %p518_p8 = por %p517_p7, %p516_p6 }
  0x32   :  { %p519_p9 = pnand %p518_p8, %p512_p5 }
  0x34   :  { %522 = shalt.err (!%p519_p9)
}
  0x35   :  { %46 = dma.hbm_to_vmem [thread:$0]  %s688_s2, 32, %s44_s17, [#allocation7]  }
  0x36   :  { %s523_s7 = scalar_lea.hbm %s689_s3, 512 }
  0x37   :  { %p524_p10 = scmp.ne.s32.totalorder %s689_s3, %s523_s7  ;;  %p527_p11 = scmp.lt.u32.totalorder %s523_s7, %s689_s3 }
  0x39   :  { %p529_p12 = pnand %p527_p11, %p524_p10 }
  0x3b   :  { %532 = shalt.err (!%p529_p12)
}
  0x3c   :  { %s533_s12 = scalar_lea.vmem %s637_s19, 512  ;;  %p538_p0 = scmp.lt.s32.totalorder %s637_s19, %s637_s19 }
  0x3d   :  { %p534_p13 = scmp.ne.s32.totalorder %s637_s19, %s533_s12  ;;  %p539_p1 = scmp.lt.s32.totalorder %s533_s12, %s533_s12 }
  0x3f   :  { %p540_p2 = por %p539_p1, %p538_p0 }
  0x41   :  { %p541_p3 = pnand %p540_p2, %p534_p13 }
  0x43   :  { %544 = shalt.err (!%p541_p3)
}
  0x44   :  { %58 = dma.hbm_to_vmem [thread:$0]  %s689_s3, 512, %s637_s19, [#allocation10], %s576_s25, %s576_s25, %s577_s26  }
  0x45   :  { %567 = dma.done.wait [#allocation4], 256  }
  0x46   :  { %568 = vsyncadd [#allocation4], 4294967040 }
  0x47   :  { %569 = dma.done.wait [#allocation7], 2080  }
  0x48   :  { %570 = vsyncadd [#allocation7], 4294965216 }
  0x49   :  { %571 = dma.done.wait [#allocation10], 512  }
  0x4a   :  { %572 = vsyncadd [#allocation10], 4294966784  ;;  %v583_v0 = vmov 0   ;;  %v431_v1 = vld [vmem:[#allocation6 + $0x4] ss:$8 sps:$4 sm:$0xff]   ;;  %v455_v17 = vld [vmem:[#allocation3] sm:$0xff]   ;;  %v286_v19 = vlaneseq }
  0x4b   :  { %236 = vmatprep.mubr.bf16.mxu0 %v583_v0  ;;  %246 = vmatprep.mubr.bf16.mxu1 %v583_v0  ;;  %v433_v2 = vld [vmem:[#allocation6] ss:$8 sps:$4 sm:$0xff]   ;;  %v434_v3 = vld [vmem:[#allocation6 + $0x14] ss:$8 sps:$4 sm:$0xff]   ;;  %v436_v4 = vld [vmem:[#allocation6 + $0x10] ss:$8 sps:$4 sm:$0xff]  }
  0x4c   :  { %204 = vmatprep.subr.bf16.mxu0 %v431_v1  ;;  %405 = vmatprep.subr.bf16.mxu1 %v431_v1  ;;  %v437_v5 = vld [vmem:[#allocation6 + $0x24] ss:$8 sps:$4 sm:$0xff]   ;;  %v439_v6 = vld [vmem:[#allocation6 + $0x20] ss:$8 sps:$4 sm:$0xff]   ;;  %v440_v7 = vld [vmem:[#allocation6 + $0x34] ss:$8 sps:$4 sm:$0xff]  }
  0x4d   :  { %205 = vmatpush1.bf16.msra.mxu0 %v433_v2  ;;  %413 = vmatpush1.bf16.msra.mxu1 %v433_v2  ;;  %v442_v8 = vld [vmem:[#allocation6 + $0x30] ss:$8 sps:$4 sm:$0xff]   ;;  %v443_v9 = vld [vmem:[#allocation6 + $0x44] ss:$8 sps:$4 sm:$0xff]   ;;  %v445_v10 = vld [vmem:[#allocation6 + $0x40] ss:$8 sps:$4 sm:$0xff]  }
  0x4e   :  { %206 = vmatprep.subr.bf16.mxu0 %v434_v3  ;;  %406 = vmatprep.subr.bf16.mxu1 %v434_v3  ;;  %v446_v11 = vld [vmem:[#allocation6 + $0x54] ss:$8 sps:$4 sm:$0xff]   ;;  %v448_v12 = vld [vmem:[#allocation6 + $0x50] ss:$8 sps:$4 sm:$0xff]   ;;  %v449_v13 = vld [vmem:[#allocation6 + $0x64] ss:$8 sps:$4 sm:$0xff]  }
  0x4f   :  { %v451_v14 = vld [vmem:[#allocation6 + $0x60] ss:$8 sps:$4 sm:$0xff]   ;;  %v452_v15 = vld [vmem:[#allocation6 + $0x74] ss:$8 sps:$4 sm:$0xff]   ;;  %v454_v16 = vld [vmem:[#allocation6 + $0x70] ss:$8 sps:$4 sm:$0xff]  }
  0x50   :  { %v456_v18 = vld [vmem:[#allocation3 + $0x8] sm:$0xff]   ;;  %v287_v20 = vshrl.u32 %v286_v19, 7  ;;  %v284_v22 = vld [vmem:[#allocation8] sm:$0x3]  ;;  %v304_v24 = vld [vmem:[#allocation9] sm:$0xff]  ;;  %s584_s3 = smov [#allocation11]  }
  0x51   :  { %207 = vmatpush1.bf16.msra.mxu0 %v436_v4  ;;  %414 = vmatpush1.bf16.msra.mxu1 %v436_v4  ;;  %v306_v25 = vld [vmem:[#allocation9 + $0x10] sm:$0xff]  ;;  %v305_v28 = vld [vmem:[#allocation9 + $0x8] sm:$0xff]  ;;  %v307_v29 = vld [vmem:[#allocation9 + $0x18] sm:$0xff]  ;;  %v308_v30 = vunpack.c.l.bf16 %v304_v24  ;;  %v309_v34 = vunpack.c.h.bf16 %v304_v24  ;;  %s365_s13 = sshll.u32 %s584_s3, 4  ;;  %s366_s13 = int_to_ptr.vmem [resolvable:$true] %s365_s13 }
  0x52   :  { %208 = vmatprep.subr.bf16.mxu0 %v437_v5  ;;  %407 = vmatprep.subr.bf16.mxu1 %v437_v5  ;;  %v288_v21 = vsub.s32 0, %v287_v20  ;;  %v292_v23 = vsub.s32 1, %v287_v20  ;;  %v312_v31 = vunpack.c.l.bf16 %v306_v25  ;;  %v313_v35 = vunpack.c.h.bf16 %v306_v25  ;;  %s545_s14 = scalar_lea.vmem %s366_s13, 512  ;;  %p550_p5 = scmp.lt.s32.totalorder %s366_s13, %s366_s13 }
  0x53   :  { %v310_v40 = vunpack.c.l.bf16 %v305_v28  ;;  %v314_v41 = vunpack.c.l.bf16 %v307_v29  ;;  %v311_v46 = vunpack.c.h.bf16 %v305_v28  ;;  %v315_v47 = vunpack.c.h.bf16 %v307_v29  ;;  %p546_p4 = scmp.ne.s32.totalorder %s366_s13, %s545_s14  ;;  %p551_p6 = scmp.lt.s32.totalorder %s545_s14, %s545_s14 }
  0x54   :  { %v289_v26 = vrot.slane %v284_v22, %v288_v21  ;;  %v293_v27 = vrot.slane %v284_v22, %v292_v23 }
  0x55   :  { %209 = vmatpush1.bf16.msra.mxu0 %v439_v6  ;;  %415 = vmatpush1.bf16.msra.mxu1 %v439_v6  ;;  %p552_p7 = por %p551_p6, %p550_p5 }
  0x56   :  { %210 = vmatprep.subr.bf16.mxu0 %v440_v7  ;;  %408 = vmatprep.subr.bf16.mxu1 %v440_v7 }
  0x57   :  { %p553_p8 = pnand %p552_p7, %p546_p4 }
  0x59   :  { %211 = vmatpush1.bf16.msra.mxu0 %v442_v8  ;;  %416 = vmatpush1.bf16.msra.mxu1 %v442_v8 }
  0x5a   :  { %212 = vmatprep.subr.bf16.mxu0 %v443_v9  ;;  %409 = vmatprep.subr.bf16.mxu1 %v443_v9 }
  0x5d   :  { %213 = vmatpush1.bf16.msra.mxu0 %v445_v10  ;;  %417 = vmatpush1.bf16.msra.mxu1 %v445_v10 }
  0x5e   :  { %214 = vmatprep.subr.bf16.mxu0 %v446_v11  ;;  %410 = vmatprep.subr.bf16.mxu1 %v446_v11 }
  0x61   :  { %215 = vmatpush1.bf16.msra.mxu0 %v448_v12  ;;  %418 = vmatpush1.bf16.msra.mxu1 %v448_v12 }
  0x62   :  { %216 = vmatprep.subr.bf16.mxu0 %v449_v13  ;;  %411 = vmatprep.subr.bf16.mxu1 %v449_v13 }
  0x65   :  { %217 = vmatpush1.bf16.msra.mxu0 %v451_v14  ;;  %419 = vmatpush1.bf16.msra.mxu1 %v451_v14 }
  0x66   :  { %218 = vmatprep.subr.bf16.mxu0 %v452_v15  ;;  %412 = vmatprep.subr.bf16.mxu1 %v452_v15 }
  0x69   :  { %219 = vmatpush1.bf16.msra.mxu0 %v454_v16  ;;  %420 = vmatpush1.bf16.msra.mxu1 %v454_v16 }
  0x6c   :  { %237 = vmatmul.mubr.bf16.vlgmr.msra.gmra.mrb[0].mxu0 %v455_v17  ;;  %247 = vmatmul.mubr.bf16.vlgmr.msra.gmra.mrb[0].mxu1 %v456_v18 }
 0x13f   :  { %v238_v32 = vpop.f32.mrb[0].mxu0  ;;  %v248_v33 = vpop.f32.mrb[0].mxu1 }
 0x140   :  { %v296_v36 = vadd.f32 %v289_v26, %v238_v32  ;;  %v300_v37 = vadd.f32 %v289_v26, %v248_v33  ;;  %v240_v38 = vpop.f32.mrb[1].mxu0  ;;  %v250_v39 = vpop.f32.mrb[1].mxu1 }
 0x141   :  { %v297_v42 = vadd.f32 %v293_v27, %v240_v38  ;;  %v301_v43 = vadd.f32 %v293_v27, %v250_v39  ;;  %v242_v44 = vpop.f32.mrb[2].mxu0  ;;  %v252_v45 = vpop.f32.mrb[2].mxu1 }
 0x142   :  { %v316_v48 = vadd.f32 %v308_v30, %v296_v36  ;;  %v320_v49 = vadd.f32 %v312_v31, %v300_v37  ;;  %v298_v50 = vadd.f32 %v289_v26, %v242_v44  ;;  %v302_v51 = vadd.f32 %v289_v26, %v252_v45  ;;  %v244_v52 = vpop.f32.mrb[3].mxu0  ;;  %v254_v53 = vpop.f32.mrb[3].mxu1 }
 0x143   :  { %v317_v54 = vadd.f32 %v309_v34, %v297_v42  ;;  %v321_v55 = vadd.f32 %v313_v35, %v301_v43  ;;  %v299_v56 = vadd.f32 %v293_v27, %v244_v52  ;;  %v303_v57 = vadd.f32 %v293_v27, %v254_v53 }
 0x144   :  { %v324_v58 = vmax.f32 %v316_v48, 0.0  ;;  %v328_v59 = vmax.f32 %v320_v49, 0.0  ;;  %v318_v60 = vadd.f32 %v310_v40, %v298_v50  ;;  %v322_v61 = vadd.f32 %v314_v41, %v302_v51 }
 0x145   :  { %v325_v62 = vmax.f32 %v317_v54, 0.0  ;;  %v329_v63 = vmax.f32 %v321_v55, 0.0  ;;  %v319_v0 = vadd.f32 %v311_v46, %v299_v56  ;;  %v323_v1 = vadd.f32 %v315_v47, %v303_v57 }
 0x146   :  { %v326_v2 = vmax.f32 %v318_v60, 0.0  ;;  %v330_v3 = vmax.f32 %v322_v61, 0.0 }
 0x147   :  { %v401_v4 = vpack.c.bf16 %v325_v62, %v324_v58  ;;  %v403_v5 = vpack.c.bf16 %v329_v63, %v328_v59  ;;  %v327_v6 = vmax.f32 %v319_v0, 0.0  ;;  %v331_v7 = vmax.f32 %v323_v1, 0.0 }
 0x149   :  { %356 = vst [vmem:[#allocation11] sm:$0xff] %v401_v4  ;;  %358 = vst [vmem:[#allocation11 + $0x10] sm:$0xff] %v403_v5  ;;  %v402_v8 = vpack.c.bf16 %v327_v6, %v326_v2  ;;  %v404_v9 = vpack.c.bf16 %v331_v7, %v330_v3 }
 0x14b   :  { %357 = vst [vmem:[#allocation11 + $0x8] sm:$0xff] %v402_v8  ;;  %359 = vst [vmem:[#allocation11 + $0x18] sm:$0xff] %v404_v9 }
 0x14c   :  { %556 = shalt.err (!%p553_p8)
}
 0x14d   :  { %s557_s17 = scalar_lea.hbm %s690_s4, 512 }
 0x14e   :  { %p558_p9 = scmp.ne.s32.totalorder %s690_s4, %s557_s17  ;;  %p561_p10 = scmp.lt.u32.totalorder %s557_s17, %s690_s4 }
 0x150   :  { %p563_p11 = pnand %p561_p10, %p558_p9 }
 0x152   :  { %566 = shalt.err (!%p563_p11)
}
 0x153   :  { %371 = dma.vmem_to_hbm [thread:$0]  %s366_s13, 512, %s690_s4, [#allocation5], %s576_s25, %s576_s25, %s577_s26  }
 0x154   :  { %573 = dma.done.wait [#allocation5], 512  }
 0x155   :  { %574 = vsyncadd [#allocation5], 4294966784 }
 0x156   :  { %375 = vsyncpa [#allocation4], 1 }
 0x157   :  { %376 = vsyncpa [#allocation7], 1 }
 0x158   :  { %377 = vsyncpa [#allocation10], 1 }
 0x159   :  { %378 = vsyncpa [#allocation5], 1 }

// kernel: _lambda_.13
= control target key start
LH: loop header
LB: loop body
LE: loop exit
PB: predicated region body
PF: predicated region fallthrough
CT: control target
= control target key end

     0   :  { %8 = vsyncpa [#allocation3], 0  ;;  %s2649_s0 = inlined_call_operand.hbm [shape: bf16[2,6,6,128], index: 0, kind: input, shape index: {}]   ;;  %s2650_s1 = inlined_call_operand.hbm [shape: bf16[1152,128], index: 1, kind: input, shape index: {}]   ;;  %s2651_s2 = inlined_call_operand.hbm [shape: f32[1,128], index: 2, kind: input, shape index: {}]   ;;  %s2652_s3 = inlined_call_operand.hbm [shape: bf16[2,4,4,128], index: 3, kind: output, shape index: {}]  }
   0x1   :  { %10 = vsyncpa [#allocation3 + $0x1], 0 }
   0x2   :  { %11 = vsyncpa [#allocation6], 0 }
   0x3   :  { %12 = vsyncpa [#allocation4], 0 }
   0x4   :  { %14 = vsyncpa [#allocation4 + $0x1], 0  ;;  %s2309_s12 = smov 0   ;;  %s2311_s13 = smov 0  }
   0x5   :  { %s2313_s14 = smov 0   ;;  %s2315_s15 = smov 0  }
   0x6   :  { %s2317_s16 = smov 0   ;;  %s2319_s17 = smov 0  }
   0x7 LB: > { %s1652_s18 = sadd.s32 4294967295, %s2276_s17   ;;  %s1653_s19 = sadd.s32 4294967294, %s2276_s17   ;;  %s2276_s17 = sphi %s2319_s17, %s20_s17   ;;  %s2272_s16 = sphi %s2317_s16, %s2674_s16   ;;  %s2268_s15 = sphi %s2315_s15, %s2673_s15   ;;  %s2264_s14 = sphi %s2313_s14, %s2672_s14   ;;  %s2260_s13 = sphi %s2311_s13, %s2671_s13   ;;  %s2256_s12 = sphi %s2309_s12, %s2670_s12  }
   0x8   : > { %p52_p0 = scmp.ne.s32.totalorder %s2260_s13, %s2256_s12  ;;  %p2343_p1 = scmp.eq.s32.totalorder %s1652_s18, 0 }
   0x9   : > { %p2347_p2 = scmp.eq.s32.totalorder %s1652_s18, 1  ;;  %p126_p3 = scmp.eq.s32.totalorder %s1653_s19, 1 }
   0xa   : > { %s2657_s20 = scalar_select %p2343_p1, 1, 0 }
   0xb   : > { %p2353_p4 = por %p2343_p1, %p52_p0  ;;  %p1654_p5 = scmp.ge.s32.totalorder %s2276_s17, 1 }
   0xc   : > { %p2358_p6 = por %p126_p3, %p52_p0  ;;  %p133_p7 = scmp.lt.s32.totalorder %s2276_s17, 3 }
   0xd   : > { %s2659_s22 = scalar_select %p2353_p4, 1, 0 }
   0xe   : > { %s2660_s23 = scalar_select %p2358_p6, 1, 0 }
   0xf   : > { %p2363_p8 = pnand %p1654_p5, %p133_p7  ;;  %s2278_s25 = smov [#allocation5]  }
  0x10   : > { %s145_s26 = sshll.u32 %s2278_s25, 4  ;;  %s2279_s28 = smov [#allocation7]   ;;  %s2367_s26 = int_to_ptr.vmem [resolvable:$true] %s145_s26 }
  0x11   : > { %p1930_p9 = pneg %p2363_p8  ;;  %s159_s29 = sshll.u32 %s2279_s28, 4  ;;  %s2378_s29 = int_to_ptr.vmem [resolvable:$true] %s159_s29 }
  0x12   : > { %s2104_s5 = scalar_lea.hbm %s2650_s1, 9216 }
  0x13   : > { %p2374_p11 = pnand %p1930_p9, %p2343_p1  ;;  %p2105_p12 = scmp.ne.s32.totalorder %s2650_s1, %s2104_s5 }
  0x14   : > { %p2111_p5 = scmp.lt.u32.totalorder %s2104_s5, %s2650_s1 }
  0x15   : > { %p2106_p13 = pneg %p2374_p11 }
  0x17   : > { %p2107_p0 = pnand %p2106_p13, %p2105_p12 }
  0x19   : > { %p2108_p3 = pneg %p2107_p0 }
  0x1b   : > { %p2113_p7 = pnand %p2111_p5, %p2108_p3 }
  0x1d   : > { %2116 = shalt.err (!%p2113_p7)
}
  0x1e   : > { %s2117_s10 = scalar_lea.vmem %s2367_s26, 9216  ;;  %p2125_p1 = scmp.lt.s32.totalorder %s2367_s26, %s2367_s26 }
  0x1f   : > { %p2118_p9 = scmp.ne.s32.totalorder %s2367_s26, %s2117_s10  ;;  %p2126_p12 = scmp.lt.s32.totalorder %s2117_s10, %s2117_s10 }
  0x21   : > { %p2120_p10 = pnand %p2118_p9, %p2106_p13  ;;  %p2127_p0 = por %p2126_p12, %p2125_p1 }
  0x23   : > { %p2121_p6 = pneg %p2120_p10 }
  0x25   : > { %p2128_p4 = pnand %p2127_p0, %p2121_p6 }
  0x27   : > { %2131 = shalt.err (!%p2128_p4)
}
  0x28   : > { %s2280_s11 = smov 64   ;;  %s2281_s18 = smov 4  }
  0x29   : > { %1933 = dma.hbm_to_vmem [thread:$0]  (!%p2374_p11), %s2650_s1, 9216, %s2367_s26, [#allocation6], %s2280_s11, %s2280_s11, %s2281_s18  }
  0x2a   : > { %s2132_s4 = scalar_lea.hbm %s2651_s2, 16 }
  0x2b   : > { %p2133_p1 = scmp.ne.s32.totalorder %s2651_s2, %s2132_s4  ;;  %p2139_p10 = scmp.lt.u32.totalorder %s2132_s4, %s2651_s2 }
  0x2d   : > { %p2135_p4 = pnand %p2133_p1, %p2106_p13 }
  0x2f   : > { %p2136_p6 = pneg %p2135_p4 }
  0x31   : > { %p2141_p3 = pnand %p2139_p10, %p2136_p6 }
  0x33   : > { %2144 = shalt.err (!%p2141_p3)
}
  0x34   : > { %s2145_s26 = scalar_lea.vmem %s2378_s29, 16  ;;  %s2152_s9 = scalar_lea.vmem %s2378_s29, 32 }
  0x35   : > { %p2146_p5 = scmp.ne.s32.totalorder %s2378_s29, %s2145_s26  ;;  %p2153_p12 = scmp.lt.s32.totalorder %s2378_s29, %s2378_s29 }
  0x36   : > { %p2154_p0 = scmp.lt.s32.totalorder %s2152_s9, %s2145_s26 }
  0x37   : > { %p2148_p7 = pnand %p2146_p5, %p2106_p13 }
  0x38   : > { %p2155_p1 = por %p2154_p0, %p2153_p12 }
  0x39   : > { %p2149_p9 = pneg %p2148_p7 }
  0x3b   : > { %p2156_p4 = pnand %p2155_p1, %p2149_p9 }
  0x3d   : > { %2159 = shalt.err (!%p2156_p4)
}
  0x3e   : > { %1936 = dma.hbm_to_vmem [thread:$0]  (!%p2374_p11), %s2651_s2, 16, %s2378_s29, [#allocation6]  }
  0x3f   : > { %s32_s25 = sadd.s32 1, %s2272_s16  ;;  %s39_s28 = sadd.s32 1, %s2264_s14 }
  0x40   : > { %p34_p13 = scmp.ge.s32.totalorder %s32_s25, 2  ;;  %p46_p6 = scmp.ne.s32.totalorder %s2264_s14, %s2260_s13 }
  0x41   : > { %p47_p10 = scmp.eq.s32.totalorder %s2276_s17, 0  ;;  %p1947_p3 = scmp.lt.s32.totalorder %s2276_s17, 2 }
  0x42   : > { %s2676_s25 = smov (%p34_p13, %s32_s25), 0  ;;  %p2446_p7 = por %p2347_p2, %p46_p6 }
  0x43   : > { %p48_p5 = por %p47_p10, %p46_p6  ;;  %s36_s30 = ssub.s32 %s2272_s16, %s2676_s25 }
  0x44   : > { %s2663_s27 = scalar_select %p2446_p7, 1, 0 }
  0x45   : > { %s170_s4 = sand.u32 1, %s2264_s14   ;;  %p37_p9 = scmp.eq.s32.totalorder %s36_s30, 0 }
  0x46   : > { %s1915_s29 = smul.u32 24, %s170_s4  ;;  %p2453_p11 = pnand %p1947_p3, %p48_p5 }
  0x47   : > { %s2458_s6 = scalar_select %p37_p9, %s2264_s14, %s39_s28  }
  0x48   : > { %s1916_s7 = smul.u32 384, %s2272_s16  ;;  %s174_s8 = scalar_lea.vmem [#allocation2], %s1915_s29 }
  0x49   : > { %s181_s26 = sshll.u32 %s174_s8, 4  ;;  %s2468_s19 = scalar_lea.sflag [#allocation3], %s170_s4  ;;  %s2466_s26 = int_to_ptr.vmem [resolvable:$true] %s181_s26 }
  0x4a   : > { %s2464_s10 = scalar_lea.hbm %s2649_s0, %s1916_s7  ;;  %p2162_p12 = pneg %p2453_p11 }
  0x4b   : > { %s2160_s30 = scalar_lea.hbm %s2464_s10, 384  ;;  %s2165_s7 = scalar_lea.hbm %s2649_s0, 768 }
  0x4c   : > { %p2161_p2 = scmp.ne.s32.totalorder %s2464_s10, %s2160_s30  ;;  %p2166_p4 = scmp.lt.u32.totalorder %s2464_s10, %s2649_s0 }
  0x4d   : > { %p2167_p13 = scmp.lt.u32.totalorder %s2165_s7, %s2160_s30  ;;  %p2169_p10 = scmp.lt.u32.totalorder %s2160_s30, %s2464_s10 }
  0x4e   : > { %p2163_p0 = pnand %p2162_p12, %p2161_p2 }
  0x4f   : > { %p2168_p6 = por %p2167_p13, %p2166_p4 }
  0x50   : > { %p2164_p1 = pneg %p2163_p0 }
  0x51   : > { %p2170_p3 = por %p2169_p10, %p2168_p6 }
  0x53   : > { %p2171_p5 = pnand %p2170_p3, %p2164_p1 }
  0x55   : > { %2174 = shalt.err (!%p2171_p5)
}
  0x56   : > { %s2175_s4 = scalar_lea.vmem %s2466_s26, 384  ;;  %s2282_s9 = smov [#allocation2]  }
  0x57   : > { %p2176_p9 = scmp.ne.s32.totalorder %s2466_s26, %s2175_s4  ;;  %s2180_s28 = sshll.u32 %s2282_s9, 4  ;;  %s2181_s28 = int_to_ptr.vmem [resolvable:$false] %s2180_s28 }
  0x58   : > { %s2182_s29 = scalar_lea.vmem %s2181_s28, 768  ;;  %p2183_p7 = scmp.lt.s32.totalorder %s2466_s26, %s2181_s28 }
  0x59   : > { %p2178_p2 = pnand %p2176_p9, %p2162_p12  ;;  %p2184_p4 = scmp.lt.s32.totalorder %s2182_s29, %s2175_s4 }
  0x5b   : > { %p2179_p0 = pneg %p2178_p2  ;;  %p2185_p13 = por %p2184_p4, %p2183_p7 }
  0x5d   : > { %p2186_p6 = pnand %p2185_p13, %p2179_p0 }
  0x5f   : > { %2189 = shalt.err (!%p2186_p6)
}
  0x60   : > { %1940 = dma.hbm_to_vmem [thread:$0]  (!%p2453_p11), %s2464_s10, 384, %s2466_s26, %s2468_s19, %s2280_s11, %s2280_s11, %s2281_s18  }
  0x61   : > { %193 = sbr.rel (%p2363_p8) target bundleno = 443 (0x1bb), region = 32  ;;  %s2502_s30 = sand.u32 (!%p2363_p8), 1, %s2260_s13  }
  0x62   : > { %s1917_s7 = smul.u32 (!%p2363_p8), 24, %s2502_s30  ;;  %s196_s8 = scalar_lea.sflag (!%p2363_p8), [#allocation3], %s2502_s30 }
  0x63   : > { %p2665_p7 = scmp.ne.s32.totalorder (!%p2363_p8), %s2659_s22, 0 }
  0x64   : > { %s2506_s21 = scalar_lea.vmem (!%p2363_p8), [#allocation2], %s1917_s7 }
  0x68   : > { %2243 = dma.done.wait (%p2665_p7), %s196_s8, 384  }
  0x69   : > { %2245 = vsyncadd (%p2665_p7), %s196_s8, 4294966912  ;;  %p2666_p11 = scmp.ne.s32.totalorder %s2657_s20, 0 }
  0x6b   : > { %2247 = dma.done.wait (%p2666_p11), [#allocation6], 9232  }
  0x6c   : > { %2249 = vsyncadd (%p2666_p11), [#allocation6], 4294958064  ;;  %v2008_v0 = vld [vmem:[#allocation5 + $0x40] sm:$0xff]   ;;  %v2012_v4 = vld [vmem:[#allocation5 + $0x48] sm:$0xff]   ;;  %v462_v29 = vlaneseq  ;;  %v2283_v32 = vmov 1983009808  }
  0x6d   : > { %v2009_v1 = vld [vmem:[#allocation5] sm:$0xff]   ;;  %1798 = vmatprep.subr.bf16.mxu0 %v2008_v0  ;;  %v2013_v5 = vld [vmem:[#allocation5 + $0x8] sm:$0xff]   ;;  %v2016_v8 = vld [vmem:[#allocation5 + $0x50] sm:$0xff]   ;;  %v460_v33 = vunpack.c.l.s4 %v2283_v32  ;;  %vm2285_vm0 = vmmov 0   ;;  %s1662_s20 = sshll.u32 %s2502_s30, 3  ;;  %s1797_s11 = sshll.u32 %s2268_s15, 7 }
  0x6e   : > { %v2010_v2 = vld [vmem:[#allocation5 + $0xc0] sm:$0xff]   ;;  %1799 = vmatpush3.bf16.msra.mxu0 %v2009_v1  ;;  %v2014_v6 = vld [vmem:[#allocation5 + $0xc8] sm:$0xff]   ;;  %v2017_v9 = vld [vmem:[#allocation5 + $0x10] sm:$0xff]   ;;  %v463_v34 = vshrl.u32 %v462_v29, 7  ;;  %s229_s22 = scalar_lea.vmem [#allocation8], %s1662_s20  ;;  %s2600_s26 = scalar_lea.hbm %s2652_s3, %s1797_s11 }
  0x6f   : > { %v2011_v3 = vld [vmem:[#allocation5 + $0x80] sm:$0xff]   ;;  %1820 = vmatprep.subr.bf16.mxu1 %v2010_v2  ;;  %1800 = vmatprep.subr.bf16.mxu0 %v2012_v4  ;;  %v2015_v7 = vld [vmem:[#allocation5 + $0x88] sm:$0xff]   ;;  %v2018_v10 = vld [vmem:[#allocation5 + $0xd0] sm:$0xff]   ;;  %v461_v39 = vunpack.c.0.s8 %v460_v33  ;;  %s1539_s24 = sshll.u32 %s229_s22, 4  ;;  %s1524_s10 = scalar_lea.sflag [#allocation4], %s2502_s30  ;;  %s2595_s24 = int_to_ptr.vmem [resolvable:$true] %s1539_s24 }
  0x70   : > { %1821 = vmatpush3.bf16.msra.mxu1 %v2011_v3  ;;  %v2019_v11 = vld [vmem:[#allocation5 + $0x90] sm:$0xff]   ;;  %v2020_v12 = vld [vmem:[#allocation5 + $0x58] sm:$0xff]   ;;  %v2024_v16 = vld [vmem:[#allocation5 + $0x60] sm:$0xff]   ;;  %s2190_s15 = scalar_lea.vmem %s2595_s24, 128  ;;  %p2667_p12 = scmp.ne.s32.totalorder %s2663_s27, 0 }
  0x71   : > { %1822 = vmatprep.subr.bf16.mxu1 %v2014_v6  ;;  %v2021_v13 = vld [vmem:[#allocation5 + $0x18] sm:$0xff]   ;;  %v2025_v17 = vld [vmem:[#allocation5 + $0x20] sm:$0xff]   ;;  %v2028_v20 = vld [vmem:[#allocation5 + $0x68] sm:$0xff]   ;;  %v2524_v60 = vsub.s32 %v461_v39, %v463_v34  ;;  %p2191_p8 = scmp.ne.s32.totalorder %s2595_s24, %s2190_s15  ;;  %s2286_s19 = smov [#allocation8]  }
  0x72   : > { %1801 = vmatpush3.bf16.msra.mxu0 %v2013_v5  ;;  %v2022_v14 = vld [vmem:[#allocation5 + $0xd8] sm:$0xff]   ;;  %v2026_v18 = vld [vmem:[#allocation5 + $0xe0] sm:$0xff]   ;;  %v2029_v21 = vld [vmem:[#allocation5 + $0x28] sm:$0xff]   ;;  %s2194_s4 = sshll.u32 %s2286_s19, 4  ;;  %s2195_s4 = int_to_ptr.vmem [resolvable:$false] %s2194_s4 }
  0x73   : > { %1802 = vmatprep.subr.bf16.mxu0 %v2016_v8  ;;  %v2023_v15 = vld [vmem:[#allocation5 + $0x98] sm:$0xff]   ;;  %v2027_v19 = vld [vmem:[#allocation5 + $0xa0] sm:$0xff]   ;;  %v2030_v22 = vld [vmem:[#allocation5 + $0xe8] sm:$0xff]   ;;  %p2192_p1 = pnand %p2191_p8, %p2667_p12  ;;  %s2196_s9 = scalar_lea.vmem %s2195_s4, 256 }
  0x74   : > { %1823 = vmatpush3.bf16.msra.mxu1 %v2015_v7  ;;  %v2031_v23 = vld [vmem:[#allocation5 + $0xa8] sm:$0xff]   ;;  %v2032_v24 = vld [vmem:[#allocation5 + $0x70] sm:$0xff]   ;;  %v2036_v28 = vld [vmem:[#allocation5 + $0x78] sm:$0xff]   ;;  %p2197_p3 = scmp.lt.s32.totalorder %s2595_s24, %s2195_s4  ;;  %p2198_p5 = scmp.lt.s32.totalorder %s2196_s9, %s2190_s15 }
  0x75   : > { %1824 = vmatprep.subr.bf16.mxu1 %v2018_v10  ;;  %v2033_v25 = vld [vmem:[#allocation5 + $0x30] sm:$0xff]   ;;  %v2037_v30 = vld [vmem:[#allocation5 + $0x38] sm:$0xff]   ;;  %v2044_v51 = vld [vmem:[#allocation5 + $0x140] sm:$0xff]   ;;  %p2193_p10 = pneg %p2192_p1 }
  0x76   : > { %1803 = vmatpush3.bf16.msra.mxu0 %v2017_v9  ;;  %v2034_v26 = vld [vmem:[#allocation5 + $0xf0] sm:$0xff]   ;;  %v2038_v31 = vld [vmem:[#allocation5 + $0xf8] sm:$0xff]   ;;  %p2199_p9 = por %p2198_p5, %p2197_p3 }
  0x77   : > { %1804 = vmatprep.subr.bf16.mxu0 %v2020_v12  ;;  %v2035_v27 = vld [vmem:[#allocation5 + $0xb0] sm:$0xff]   ;;  %v2043_v50 = vld [vmem:[#allocation5 + $0xb8] sm:$0xff]  }
  0x78   : > { %1825 = vmatpush3.bf16.msra.mxu1 %v2019_v11  ;;  %v2039_v35 = vld [vmem:[%s2506_s21] ss:$0 sps:$4 sm:$0x77]   ;;  %v2040_v36 = vld [vmem:[%s2506_s21 + $0x4] ss:$0 sps:$4 sm:$0x77]   ;;  %p2200_p2 = pnand %p2199_p9, %p2193_p10 }
  0x79   : > { %1826 = vmatprep.subr.bf16.mxu1 %v2022_v14  ;;  %v2041_v37 = vld [vmem:[%s2506_s21 + $0x8] ss:$0 sps:$4 sm:$0x77]   ;;  %v2042_v38 = vld [vmem:[%s2506_s21 + $0xc] ss:$0 sps:$4 sm:$0x77]  }
  0x7a   : > { %1805 = vmatpush3.bf16.msra.mxu0 %v2021_v13  ;;  %v290_v40 = vshrl.u32 %v2039_v35, 16  ;;  %v292_v41 = vshll.u32 %v2039_v35, 16  ;;  %v297_v42 = vshrl.u32 %v2040_v36, 16  ;;  %v299_v43 = vshll.u32 %v2040_v36, 16  ;;  %v235_v44 = vld [vmem:[%s2506_s21] sm:$0x3] }
  0x7b   : > { %1806 = vmatprep.subr.bf16.mxu0 %v2024_v16  ;;  %v236_v45 = vld [vmem:[%s2506_s21 + $0x4] sm:$0x3]  ;;  %v304_v46 = vshrl.u32 %v2041_v37, 16  ;;  %v306_v47 = vshll.u32 %v2041_v37, 16  ;;  %v311_v48 = vshrl.u32 %v2042_v38, 16  ;;  %v313_v49 = vshll.u32 %v2042_v38, 16 }
  0x7c   : > { %1827 = vmatpush3.bf16.msra.mxu1 %v2023_v15  ;;  %v237_v52 = vld [vmem:[%s2506_s21 + $0x8] sm:$0x3]  ;;  %v294_v53 = vrot.slane %v292_v41, 1  ;;  %v301_v54 = vrot.slane %v299_v43, 1  ;;  %v238_v57 = vld [vmem:[%s2506_s21 + $0xc] sm:$0x3] }
  0x7d   : > { %1828 = vmatprep.subr.bf16.mxu1 %v2026_v18  ;;  %v308_v55 = vrot.slane %v306_v47, 1  ;;  %v315_v56 = vrot.slane %v313_v49, 1  ;;  %v1663_v63 = vld [vmem:[%s2506_s21 + $0x4] sm:$0x3]  ;;  %v1664_v0 = vld [vmem:[%s2506_s21 + $0x8] sm:$0x3] }
  0x7e   : > { %1807 = vmatpush3.bf16.msra.mxu0 %v2025_v17  ;;  %v295_v58 = vor.u32 %v294_v53, %v290_v40  ;;  %v302_v59 = vor.u32 %v301_v54, %v297_v42  ;;  %v1665_v3 = vld [vmem:[%s2506_s21 + $0xc] sm:$0x3]  ;;  %v1666_v4 = vld [vmem:[%s2506_s21 + $0x10] sm:$0x3]  ;;  %v2052_v38 = vld [vmem:[#allocation5 + $0x148] sm:$0xff]  }
  0x7f   : > { %1808 = vmatprep.subr.bf16.mxu0 %v2028_v20  ;;  %v309_v61 = vor.u32 %v308_v55, %v304_v46  ;;  %v316_v62 = vor.u32 %v315_v56, %v311_v48  ;;  %v2045_v5 = vld [vmem:[%s2506_s21] ss:$0 sps:$4 sm:$0x66]   ;;  %v2046_v6 = vld [vmem:[%s2506_s21 + $0x4] ss:$0 sps:$4 sm:$0x66]  }
  0x80   : > { %1829 = vmatpush3.bf16.msra.mxu1 %v2027_v19  ;;  %v457_v1 = vcombine.low %v235_v44, %v295_v58  ;;  %v498_v2 = vcombine.low %v236_v45, %v302_v59  ;;  %v2047_v9 = vld [vmem:[%s2506_s21 + $0x8] ss:$0 sps:$4 sm:$0x66]   ;;  %v2048_v10 = vld [vmem:[%s2506_s21 + $0xc] ss:$0 sps:$4 sm:$0x66]  }
  0x81   : > { %1830 = vmatprep.subr.bf16.mxu1 %v2030_v22  ;;  %v539_v7 = vcombine.low %v237_v52, %v309_v61  ;;  %v580_v8 = vcombine.low %v238_v57, %v316_v62  ;;  %v329_v13 = vrot.slane %v2045_v5, 1  ;;  %v330_v14 = vrot.slane %v2046_v6, 1  ;;  %v2050_v19 = vld [vmem:[#allocation5 + $0x1c0] sm:$0xff]   ;;  %v2053_v41 = vld [vmem:[#allocation5 + $0x108] sm:$0xff]   ;;  %v2056_v45 = vld [vmem:[#allocation5 + $0x150] sm:$0xff]  }
  0x82   : > { %1809 = vmatpush3.bf16.msra.mxu0 %v2029_v21  ;;  %v465_v11 = vrot.slane %v457_v1, %v2524_v60  ;;  %v506_v12 = vrot.slane %v498_v2, %v2524_v60  ;;  %v331_v17 = vrot.slane %v2047_v9, 1  ;;  %v332_v18 = vrot.slane %v2048_v10, 1  ;;  %v2049_v36 = vld [vmem:[#allocation5 + $0x100] sm:$0xff]   ;;  %v2054_v44 = vld [vmem:[#allocation5 + $0x1c8] sm:$0xff]   ;;  %v2057_v47 = vld [vmem:[#allocation5 + $0x110] sm:$0xff]  }
  0x83   : > { %1810 = vmatprep.subr.bf16.mxu0 %v2032_v24  ;;  %v547_v15 = vrot.slane %v539_v7, %v2524_v60  ;;  %v588_v16 = vrot.slane %v580_v8, %v2524_v60  ;;  %v458_v21 = vcombine.low %v329_v13, %v1663_v63  ;;  %v499_v22 = vcombine.low %v330_v14, %v1664_v0  ;;  %v2051_v40 = vld [vmem:[#allocation5 + $0x180] sm:$0xff]   ;;  %v2055_v46 = vld [vmem:[#allocation5 + $0x188] sm:$0xff]   ;;  %v2058_v48 = vld [vmem:[#allocation5 + $0x1d0] sm:$0xff]  }
  0x84   : > { %1831 = vmatpush3.bf16.msra.mxu1 %v2031_v23  ;;  %v1712_v20 = vcombine.low %v465_v11, %v506_v12  ;;  %v540_v24 = vcombine.low %v331_v17, %v1665_v3  ;;  %v2060_v49 = vld [vmem:[#allocation5 + $0x158] sm:$0xff]   ;;  %v2064_v53 = vld [vmem:[#allocation5 + $0x160] sm:$0xff]   ;;  %v2068_v57 = vld [vmem:[#allocation5 + $0x168] sm:$0xff]  }
  0x85   : > { %1832 = vmatprep.subr.bf16.mxu1 %v2034_v26  ;;  %v1714_v23 = vcombine.low %v547_v15, %v588_v16  ;;  %v2062_v52 = vld [vmem:[#allocation5 + $0x1d8] sm:$0xff]   ;;  %v2065_v55 = vld [vmem:[#allocation5 + $0x120] sm:$0xff]   ;;  %v2069_v59 = vld [vmem:[#allocation5 + $0x128] sm:$0xff]  }
  0x86   : > { %1811 = vmatpush3.bf16.msra.mxu0 %v2033_v25  ;;  %v581_v25 = vcombine.low %v332_v18, %v1666_v4  ;;  %v782_v26 = vrot.slane %v1712_v20, %v2524_v60  ;;  %v2063_v54 = vld [vmem:[#allocation5 + $0x198] sm:$0xff]   ;;  %v2066_v56 = vld [vmem:[#allocation5 + $0x1e0] sm:$0xff]   ;;  %v2070_v61 = vld [vmem:[#allocation5 + $0x1e8] sm:$0xff]  }
  0x87   : > { %1812 = vmatprep.subr.bf16.mxu0 %v2036_v28  ;;  %v513_v28 = vrot.slane %v499_v22, %v2524_v60  ;;  %v796_v29 = vrot.slane %v1714_v23, %v2524_v60  ;;  %v2067_v58 = vld [vmem:[#allocation5 + $0x1a0] sm:$0xff]   ;;  %v2072_v62 = vld [vmem:[#allocation5 + $0x170] sm:$0xff]   ;;  %v2071_v63 = vld [vmem:[#allocation5 + $0x1a8] sm:$0xff]  }
  0x88   : > { %1833 = vmatpush3.bf16.msra.mxu1 %v2035_v27  ;;  %v472_v27 = vrot.slane %v458_v21, %v2524_v60  ;;  %v2073_v0 = vld [vmem:[#allocation5 + $0x130] sm:$0xff]   ;;  %v2076_v2 = vld [vmem:[#allocation5 + $0x178] sm:$0xff]  }
  0x89   : > { %1834 = vmatprep.subr.bf16.mxu1 %v2038_v31  ;;  %v595_v31 = vrot.slane %v581_v25, %v2524_v60  ;;  %v805_v33 = vcombine.high %v782_v26, %v796_v29  ;;  %v804_v34 = vcombine.low %v782_v26, %v796_v29  ;;  %v2074_v1 = vld [vmem:[#allocation5 + $0x1f0] sm:$0xff]   ;;  %v2077_v4 = vld [vmem:[#allocation5 + $0x138] sm:$0xff]  }
  0x8a   : > { %1813 = vmatpush3.bf16.msra.mxu0 %v2037_v30  ;;  %v554_v30 = vrot.slane %v540_v24, %v2524_v60  ;;  %v1713_v32 = vcombine.low %v472_v27, %v513_v28  ;;  %v2075_v3 = vld [vmem:[#allocation5 + $0x1b0] sm:$0xff]   ;;  %v2078_v7 = vld [vmem:[#allocation5 + $0x1f8] sm:$0xff]  }
  0x8b   : > { %1842 = vmatprep.subr.bf16.mxu0 %v2044_v51  ;;  %1334 = vmatprep.mubr.bf16.mxu0 %v805_v33  ;;  %v2061_v51 = vld [vmem:[#allocation5 + $0x118] sm:$0xff]   ;;  %v2079_v5 = vld [vmem:[%s2506_s21 + $0x4] ss:$0 sps:$4 sm:$0x77]   ;;  %v2284_v33 = vmov 0.0  }
  0x8c   : > { %1835 = vmatpush3.bf16.msra.mxu1 %v2043_v50  ;;  %v1715_v35 = vcombine.low %v554_v30, %v595_v31  ;;  %v789_v37 = vrot.slane %v1713_v32, %v2524_v60  ;;  %v2059_v50 = vld [vmem:[#allocation5 + $0x190] sm:$0xff]   ;;  %v2082_v9 = vld [vmem:[%s2506_s21 + $0x10] ss:$0 sps:$4 sm:$0x77]   ;;  %v346_v10 = vshrl.u32 %v2079_v5, 16  ;;  %v348_v11 = vshll.u32 %v2079_v5, 16 }
  0x8d   : > { %1864 = vmatprep.subr.bf16.mxu1 %v2050_v19  ;;  %1335 = vmatmul.mubr.bf16.vlgmr.msra.gmra.mrb[0].mxu0 %v804_v34  ;;  %v2080_v6 = vld [vmem:[%s2506_s21 + $0x8] ss:$0 sps:$4 sm:$0x77]   ;;  %v2081_v8 = vld [vmem:[%s2506_s21 + $0xc] ss:$0 sps:$4 sm:$0x77]  }
  0x8e   : > { %v803_v39 = vrot.slane %v1715_v35, %v2524_v60  ;;  %1843 = vmatpush3.bf16.msra.mxu0 %v2049_v36  ;;  %v353_v12 = vshrl.u32 %v2080_v6, 16  ;;  %v355_v13 = vshll.u32 %v2080_v6, 16  ;;  %v360_v14 = vshrl.u32 %v2081_v8, 16  ;;  %v2083_v20 = vld [vmem:[%s2506_s21 + $0x4] ss:$0 sps:$4 sm:$0x66]  }
  0x8f   : > { %1844 = vmatprep.subr.bf16.mxu0 %v2052_v38  ;;  %v362_v15 = vshll.u32 %v2081_v8, 16  ;;  %v367_v16 = vshrl.u32 %v2082_v9, 16  ;;  %v369_v17 = vshll.u32 %v2082_v9, 16  ;;  %v350_v18 = vrot.slane %v348_v11, 1  ;;  %v2087_v24 = vld [vmem:[#allocation5 + $0x1b8] sm:$0xff]  }
  0x90   : > { %v807_v42 = vcombine.high %v789_v37, %v803_v39  ;;  %v806_v43 = vcombine.low %v789_v37, %v803_v39  ;;  %v357_v19 = vrot.slane %v355_v13, 1  ;;  %v2084_v23 = vld [vmem:[%s2506_s21 + $0x8] ss:$0 sps:$4 sm:$0x66]   ;;  %v385_v31 = vrot.slane %v2083_v20, 1 }
  0x91   : > { %v364_v21 = vrot.slane %v362_v15, 1  ;;  %v371_v22 = vrot.slane %v369_v17, 1  ;;  %v351_v25 = vor.u32 %v350_v18, %v346_v10  ;;  %v2085_v27 = vld [vmem:[%s2506_s21 + $0xc] ss:$0 sps:$4 sm:$0x66]   ;;  %v386_v32 = vrot.slane %v2084_v23, 1 }
  0x92   : > { %1375 = vmatprep.mubr.bf16.mxu1 %v807_v42  ;;  %1845 = vmatpush3.bf16.msra.mxu0 %v2053_v41  ;;  %v358_v26 = vor.u32 %v357_v19, %v353_v12  ;;  %v2086_v28 = vld [vmem:[%s2506_s21 + $0x10] ss:$0 sps:$4 sm:$0x66]   ;;  %v387_v34 = vrot.slane %v2085_v27, 1  ;;  %v2093_v19 = vld [vmem:[#allocation5 + $0x208] sm:$0xff]  }
  0x93   : > { %1376 = vmatmul.mubr.bf16.vlgmr.msra.gmra.mrb[0].mxu1 %v806_v43  ;;  %1846 = vmatprep.subr.bf16.mxu0 %v2056_v45  ;;  %v365_v29 = vor.u32 %v364_v21, %v360_v14  ;;  %v372_v30 = vor.u32 %v371_v22, %v367_v16  ;;  %v388_v35 = vrot.slane %v2086_v28, 1  ;;  %v474_v36 = vcombine.low %v351_v25, %v385_v31  ;;  %v2089_v43 = vld [vmem:[%s2506_s21 + $0xc] ss:$0 sps:$4 sm:$0x77]  }
  0x94   : > { %1865 = vmatpush3.bf16.msra.mxu1 %v2051_v40  ;;  %v515_v37 = vcombine.low %v358_v26, %v386_v32  ;;  %v2088_v40 = vld [vmem:[%s2506_s21 + $0x8] ss:$0 sps:$4 sm:$0x77]   ;;  %v2101_v27 = vld [vmem:[%s2506_s21 + $0xc] ss:$0 sps:$4 sm:$0x66]  }
  0x95   : > { %1866 = vmatprep.subr.bf16.mxu1 %v2054_v44  ;;  %v556_v38 = vcombine.low %v365_v29, %v387_v34  ;;  %v597_v39 = vcombine.low %v372_v30, %v388_v35  ;;  %v482_v41 = vrot.slane %v474_v36, %v2524_v60  ;;  %v2090_v44 = vld [vmem:[%s2506_s21 + $0x10] ss:$0 sps:$4 sm:$0x77]   ;;  %v2100_v26 = vld [vmem:[%s2506_s21 + $0x8] ss:$0 sps:$4 sm:$0x66]  }
  0x96   : > { %1847 = vmatpush3.bf16.msra.mxu0 %v2057_v47  ;;  %v523_v42 = vrot.slane %v515_v37, %v2524_v60  ;;  %v2091_v47 = vld [vmem:[%s2506_s21 + $0x14] ss:$0 sps:$4 sm:$0x77]   ;;  %v2102_v30 = vld [vmem:[%s2506_s21 + $0x10] ss:$0 sps:$4 sm:$0x66]  }
  0x97   : > { %1848 = vmatprep.subr.bf16.mxu0 %v2060_v49  ;;  %v564_v45 = vrot.slane %v556_v38, %v2524_v60  ;;  %v404_v49 = vshll.u32 %v2088_v40, 16  ;;  %v2103_v31 = vld [vmem:[%s2506_s21 + $0x14] ss:$0 sps:$4 sm:$0x66]   ;;  %v441_v34 = vrot.slane %v2100_v26, 1  ;;  %v442_v35 = vrot.slane %v2101_v27, 1 }
  0x98   : > { %1867 = vmatpush3.bf16.msra.mxu1 %v2055_v46  ;;  %v605_v46 = vrot.slane %v597_v39, %v2524_v60  ;;  %v2095_v32 = vld [vmem:[#allocation5 + $0x218] sm:$0xff]   ;;  %v443_v36 = vrot.slane %v2102_v30, 1  ;;  %v444_v37 = vrot.slane %v2103_v31, 1  ;;  %v2096_v38 = vld [vmem:[#allocation5 + $0x220] sm:$0xff]  }
  0x99   : > { %1868 = vmatprep.subr.bf16.mxu1 %v2058_v48  ;;  %v402_v48 = vshrl.u32 %v2088_v40, 16  ;;  %v497_v39 = vrot.slane %v441_v34, %v2524_v60  ;;  %v538_v40 = vrot.slane %v442_v35, %v2524_v60 }
  0x9a   : > { %1849 = vmatpush3.bf16.msra.mxu0 %v2061_v51  ;;  %v1675_v51 = vld [vmem:[%s2506_s21 + $0x8] sm:$0x3] }
  0x9b   : > { %1850 = vmatprep.subr.bf16.mxu0 %v2064_v53  ;;  %v411_v53 = vshll.u32 %v2089_v43, 16 }
  0x9c   : > { %1869 = vmatpush3.bf16.msra.mxu1 %v2059_v50  ;;  %v1716_v50 = vcombine.low %v482_v41, %v523_v42  ;;  %v579_v41 = vrot.slane %v443_v36, %v2524_v60  ;;  %v620_v42 = vrot.slane %v444_v37, %v2524_v60 }
  0x9d   : > { %1870 = vmatprep.subr.bf16.mxu1 %v2062_v52  ;;  %v409_v52 = vshrl.u32 %v2089_v43, 16  ;;  %v2097_v43 = vld [vmem:[#allocation5 + $0x228] sm:$0xff]  }
  0x9e   : > { %1851 = vmatpush3.bf16.msra.mxu0 %v2065_v55  ;;  %v1718_v55 = vcombine.low %v564_v45, %v605_v46  ;;  %v845_v45 = vcombine.low %v579_v41, %v620_v42  ;;  %v2098_v46 = vld [vmem:[#allocation5 + $0x230] sm:$0xff]  }
  0x9f   : > { %1852 = vmatprep.subr.bf16.mxu0 %v2068_v57  ;;  %v406_v57 = vrot.slane %v404_v49, 1  ;;  %v2099_v49 = vld [vmem:[#allocation5 + $0x238] sm:$0xff]  }
  0xa0   : > { %1871 = vmatpush3.bf16.msra.mxu1 %v2063_v54  ;;  %v416_v54 = vshrl.u32 %v2090_v44, 16 }
  0xa1   : > { %1872 = vmatprep.subr.bf16.mxu1 %v2066_v56  ;;  %v1676_v56 = vld [vmem:[%s2506_s21 + $0xc] sm:$0x3] }
  0xa2   : > { %1853 = vmatpush3.bf16.msra.mxu0 %v2069_v59  ;;  %v423_v59 = vshrl.u32 %v2091_v47, 16 }
  0xa3   : > { %1854 = vmatprep.subr.bf16.mxu0 %v2072_v62  ;;  %v1677_v62 = vld [vmem:[%s2506_s21 + $0x10] sm:$0x3] }
  0xa4   : > { %1873 = vmatpush3.bf16.msra.mxu1 %v2067_v58  ;;  %v418_v58 = vshll.u32 %v2090_v44, 16  ;;  %v844_v44 = vcombine.low %v497_v39, %v538_v40 }
  0xa5   : > { %1874 = vmatprep.subr.bf16.mxu1 %v2070_v61  ;;  %v818_v61 = vrot.slane %v1716_v50, %v2524_v60 }
  0xa6   : > { %1855 = vmatpush3.bf16.msra.mxu0 %v2073_v0  ;;  %v425_v0 = vshll.u32 %v2091_v47, 16  ;;  %v852_v47 = vrot.slane %v844_v44, %v2524_v60 }
  0xa7   : > { %1856 = vmatprep.subr.bf16.mxu0 %v2076_v2  ;;  %v1678_v2 = vld [vmem:[%s2506_s21 + $0x14] sm:$0x3] }
  0xa8   : > { %1875 = vmatpush3.bf16.msra.mxu1 %v2071_v63  ;;  %v413_v63 = vrot.slane %v411_v53, 1  ;;  %v427_v6 = vrot.slane %v425_v0, 1 }
  0xa9   : > { %1876 = vmatprep.subr.bf16.mxu1 %v2074_v1  ;;  %v832_v1 = vrot.slane %v1718_v55, %v2524_v60 }
  0xaa   : > { %1857 = vmatpush3.bf16.msra.mxu0 %v2077_v4  ;;  %v420_v4 = vrot.slane %v418_v58, 1  ;;  %v414_v5 = vor.u32 %v413_v63, %v409_v52  ;;  %v428_v12 = vor.u32 %v427_v6, %v423_v59  ;;  %v1711_v52 = vld [vmem:[#allocation7] ss:$0 sm:$0xff] }
  0xab   : > { %1895 = vmatprep.subr.bf16.mxu0 %v2284_v33  ;;  %v841_v8 = vcombine.high %v818_v61, %v832_v1  ;;  %v840_v9 = vcombine.low %v818_v61, %v832_v1 }
  0xac   : > { %1877 = vmatpush3.bf16.msra.mxu1 %v2075_v3  ;;  %v407_v3 = vor.u32 %v406_v57, %v402_v48  ;;  %v421_v10 = vor.u32 %v420_v4, %v416_v54  ;;  %v516_v13 = vcombine.low %v1676_v56, %v414_v5  ;;  %v598_v17 = vcombine.low %v1678_v2, %v428_v12 }
  0xad   : > { %1878 = vmatprep.subr.bf16.mxu1 %v2078_v7  ;;  %v2092_v7 = vld [vmem:[#allocation5 + $0x200] sm:$0xff]   ;;  %1416 = vmatprep.mubr.bf16.mxu0 %v841_v8  ;;  %v859_v48 = vrot.slane %v845_v45, %v2524_v60 }
  0xae   : > { %v475_v11 = vcombine.low %v1675_v51, %v407_v3  ;;  %v557_v15 = vcombine.low %v1677_v62, %v421_v10  ;;  %1417 = vmatmul.mubr.bf16.vlgmr.msra.gmra.mrb[4].mxu0 %v840_v9  ;;  %v530_v16 = vrot.slane %v516_v13, %v2524_v60  ;;  %v612_v20 = vrot.slane %v598_v17, %v2524_v60 }
  0xaf   : > { %1896 = vmatpush3.bf16.msra.mxu0 %v2092_v7  ;;  %1911 = vmatprep.mubr.msk.bf16.mxu0 %vm2285_vm0, %v2284_v33  ;;  %v860_v50 = vcombine.low %v852_v47, %v859_v48 }
  0xb0   : > { %1879 = vmatpush3.bf16.msra.mxu1 %v2087_v24  ;;  %v489_v14 = vrot.slane %v475_v11, %v2524_v60  ;;  %v571_v18 = vrot.slane %v557_v15, %v2524_v60  ;;  %1897 = vmatprep.subr.bf16.mxu0 %v2284_v33  ;;  %v2094_v24 = vld [vmem:[#allocation5 + $0x210] sm:$0xff]  }
  0xb2   : > { %v1717_v21 = vcombine.low %v489_v14, %v530_v16  ;;  %v1719_v22 = vcombine.low %v571_v18, %v612_v20 }
  0xb3   : > { %1898 = vmatpush3.bf16.msra.mxu0 %v2093_v19 }
  0xb4   : > { %v825_v23 = vrot.slane %v1717_v21, %v2524_v60  ;;  %v839_v25 = vrot.slane %v1719_v22, %v2524_v60  ;;  %1899 = vmatprep.subr.bf16.mxu0 %v2284_v33 }
  0xb6   : > { %v843_v28 = vcombine.high %v825_v23, %v839_v25  ;;  %v842_v29 = vcombine.low %v825_v23, %v839_v25 }
  0xb7   : > { %1900 = vmatpush3.bf16.msra.mxu0 %v2094_v24 }
  0xb8   : > { %1457 = vmatprep.mubr.bf16.mxu1 %v843_v28  ;;  %1901 = vmatprep.subr.bf16.mxu0 %v2284_v33 }
  0xb9   : > { %1458 = vmatmul.mubr.bf16.vlgmr.msra.gmra.mrb[4].mxu1 %v842_v29 }
  0xbb   : > { %1902 = vmatpush3.bf16.msra.mxu0 %v2095_v32 }
  0xbc   : > { %1903 = vmatprep.subr.bf16.mxu0 %v2284_v33 }
  0xbf   : > { %1904 = vmatpush3.bf16.msra.mxu0 %v2096_v38 }
  0xc0   : > { %1905 = vmatprep.subr.bf16.mxu0 %v2284_v33 }
  0xc3   : > { %1906 = vmatpush3.bf16.msra.mxu0 %v2097_v43 }
  0xc4   : > { %1907 = vmatprep.subr.bf16.mxu0 %v2284_v33 }
  0xc7   : > { %1908 = vmatpush3.bf16.msra.mxu0 %v2098_v46 }
  0xc8   : > { %1909 = vmatprep.subr.bf16.mxu0 %v2284_v33 }
  0xcb   : > { %1910 = vmatpush3.bf16.msra.mxu0 %v2099_v49 }
  0xce   : > { %1912 = vmatmul.mubr.bf16.vlgmr.msra.gmra.mrb[8].mxu0 %v860_v50 }
 0x160   : > { %v1814_v51 = vpop.f32.mrb[0].mxu0 }
 0x161   : > { %v1815_v53 = vpop.f32.mrb[1].mxu0 }
 0x162   : > { %v1816_v54 = vadd.f32 %v1815_v53, %v1814_v51  ;;  %v1817_v55 = vpop.f32.mrb[2].mxu0 }
 0x163   : > { %v1818_v56 = vpop.f32.mrb[3].mxu0 }
 0x164   : > { %v1337_v57 = vadd.f32 %v1816_v54, %v1711_v52  ;;  %v1819_v59 = vadd.f32 %v1818_v56, %v1817_v55 }
 0x166   : > { %v1836_v58 = vpop.f32.mrb[0].mxu1  ;;  %v1340_v62 = vadd.f32 %v1819_v59, %v1711_v52 }
 0x167   : > { %v1837_v61 = vpop.f32.mrb[1].mxu1 }
 0x168   : > { %v1838_v63 = vadd.f32 %v1837_v61, %v1836_v58  ;;  %v1839_v60 = vpop.f32.mrb[2].mxu1 }
 0x169   : > { %v1840_v0 = vpop.f32.mrb[3].mxu1 }
 0x16a   : > { %v1378_v1 = vadd.f32 %v1838_v63, %v1337_v57  ;;  %v1841_v2 = vadd.f32 %v1840_v0, %v1839_v60 }
 0x16c   : > { %v1381_v33 = vadd.f32 %v1841_v2, %v1340_v62 }
 0x181   : > { %v1858_v3 = vpop.f32.mrb[4].mxu0 }
 0x182   : > { %v1859_v4 = vpop.f32.mrb[5].mxu0 }
 0x183   : > { %v1860_v5 = vadd.f32 %v1859_v4, %v1858_v3  ;;  %v1861_v6 = vpop.f32.mrb[6].mxu0 }
 0x184   : > { %v1862_v7 = vpop.f32.mrb[7].mxu0 }
 0x185   : > { %v1419_v8 = vadd.f32 %v1860_v5, %v1378_v1  ;;  %v1863_v9 = vadd.f32 %v1862_v7, %v1861_v6 }
 0x187   : > { %v1422_v10 = vadd.f32 %v1863_v9, %v1381_v33 }
 0x18c   : > { %v1880_v11 = vpop.f32.mrb[4].mxu1 }
 0x18d   : > { %v1881_v12 = vpop.f32.mrb[5].mxu1 }
 0x18e   : > { %v1882_v13 = vadd.f32 %v1881_v12, %v1880_v11  ;;  %v1883_v14 = vpop.f32.mrb[6].mxu1 }
 0x18f   : > { %v1884_v15 = vpop.f32.mrb[7].mxu1 }
 0x190   : > { %v1885_v16 = vadd.f32 %v1884_v15, %v1883_v14  ;;  %v1460_v17 = vadd.f32 %v1882_v13, %v1419_v8 }
 0x192   : > { %v1463_v18 = vadd.f32 %v1885_v16, %v1422_v10 }
 0x1a1   : > { %v1500_v19 = vpop.f32.mrb[8].mxu0 }
 0x1a2   : > { %v1501_v20 = vadd.f32 %v1500_v19, %v1460_v17  ;;  %v1913_v21 = vpop.f32.mrb[9].mxu0 }
 0x1a3   : > { %v1503_v22 = vpop.f32.mrb[10].mxu0 }
 0x1a4   : > { %v1507_v23 = vmax.f32 %v1501_v20, 0.0  ;;  %v1504_v24 = vadd.f32 %v1503_v22, %v1463_v18  ;;  %v1914_v25 = vpop.f32.mrb[11].mxu0 }
 0x1a6   : > { %v1511_v26 = vcombine.high %v1507_v23, %v1507_v23  ;;  %v1515_v27 = vpack.c.bf16 %v1507_v23, %v1507_v23  ;;  %v1508_v28 = vmax.f32 %v1504_v24, 0.0 }
 0x1a8   : > { %v1516_v29 = vpack.c.bf16 %v1511_v26, %v1511_v26  ;;  %1519 = vst [vmem:[%s229_s22] sm:$0x3] %v1515_v27  ;;  %v1512_v30 = vcombine.high %v1508_v28, %v1508_v28  ;;  %v1517_v31 = vpack.c.bf16 %v1508_v28, %v1508_v28 }
 0x1aa   : > { %1520 = vst [vmem:[%s229_s22 + $0x2] sm:$0x3] %v1516_v29  ;;  %v1518_v32 = vpack.c.bf16 %v1512_v30, %v1512_v30  ;;  %1521 = vst [vmem:[%s229_s22 + $0x4] sm:$0x3] %v1517_v31 }
 0x1ac   : > { %1522 = vst [vmem:[%s229_s22 + $0x6] sm:$0x3] %v1518_v32 }
 0x1ad   : > { %2203 = shalt.err (!%p2200_p2)
}
 0x1ae   : > { %s2204_s28 = scalar_lea.hbm %s2600_s26, 128  ;;  %s2208_s8 = scalar_lea.hbm %s2652_s3, 256 }
 0x1af   : > { %p2205_p0 = scmp.ne.s32.totalorder %s2600_s26, %s2204_s28  ;;  %p2209_p6 = scmp.lt.u32.totalorder %s2600_s26, %s2652_s3 }
 0x1b0   : > { %p2210_p7 = scmp.lt.u32.totalorder %s2208_s8, %s2204_s28  ;;  %p2212_p8 = scmp.lt.u32.totalorder %s2204_s28, %s2600_s26 }
 0x1b1   : > { %p2206_p4 = pnand %p2205_p0, %p2667_p12 }
 0x1b2   : > { %p2211_p11 = por %p2210_p7, %p2209_p6 }
 0x1b3   : > { %p2207_p13 = pneg %p2206_p4 }
 0x1b4   : > { %p2213_p1 = por %p2212_p8, %p2211_p11 }
 0x1b6   : > { %p2214_p10 = pnand %p2213_p1, %p2207_p13 }
 0x1b8   : > { %2217 = shalt.err (!%p2214_p10)
}
 0x1b9   : > { %s2287_s22 = smov 32   ;;  %s2288_s11 = smov 2  }
 0x1ba   : > { %1928 = dma.vmem_to_hbm [thread:$0]  (%p2667_p12), %s2595_s24, 128, %s2600_s26, %s1524_s10, %s2287_s22, %s2287_s22, %s2288_s11  }
 0x1bb PF: > { %s1554_s18 = sand.u32 1, %s2256_s12   ;;  %p2668_p3 = scmp.ne.s32.totalorder %s2660_s23, 0 }
 0x1bc   : > { %p2669_p5 = scmp.ge.s32.totalorder %s2276_s17, 2  ;;  %s1555_s5 = scalar_lea.sflag [#allocation4], %s1554_s18 }
 0x1be   : > { %p1942_p9 = pnand %p2669_p5, %p2668_p3 }
 0x1c0   : > { %2251 = dma.done.wait (!%p1942_p9), %s1555_s5, 128  }
 0x1c1   : > { %2253 = vsyncadd (!%p1942_p9), %s1555_s5, 4294967168  ;;  %s20_s17 = sadd.s32 1, %s2276_s17   ;;  %s2670_s12 = smov %s2260_s13 }
 0x1c2   : > { %p17_p2 = scmp.ge.s32.totalorder %s20_s17, 4   ;;  %s2671_s13 = smov %s2264_s14 }
 0x1c3   : > { %s2672_s14 = smov %s2458_s6  ;;  %s2673_s15 = smov %s2272_s16 }
 0x1c4   : > { %s2674_s16 = smov %s2676_s25  ;;  %19 = sbr.rel (!%p17_p2) target bundleno = 7 (0x7), region = 88 }
 0x1cb   :  { %1560 = vsyncpa [#allocation3], 1 }
 0x1cc   :  { %1562 = vsyncpa [#allocation3 + $0x1], 1 }
 0x1cd   :  { %1563 = vsyncpa [#allocation6], 1 }
 0x1ce   :  { %1564 = vsyncpa [#allocation4], 1 }
 0x1cf   :  { %1566 = vsyncpa [#allocation4 + $0x1], 1 }

// kernel: _lambda_.18
= control target key start
LH: loop header
LB: loop body
LE: loop exit
PB: predicated region body
PF: predicated region fallthrough
CT: control target
= control target key end

     0   :  { %8 = vsyncpa [#allocation4], 0  ;;  %s1016_s0 = inlined_call_operand.hbm [shape: bf16[16,256], index: 0, kind: input, shape index: {}]   ;;  %s1017_s1 = inlined_call_operand.hbm [shape: bf16[256,512], index: 1, kind: input, shape index: {}]   ;;  %s1018_s2 = inlined_call_operand.hbm [shape: f32[1,512], index: 2, kind: input, shape index: {}]   ;;  %s1019_s3 = inlined_call_operand.hbm [shape: bf16[16,512], index: 3, kind: output, shape index: {}]  }
   0x1   :  { %9 = vsyncpa [#allocation7], 0 }
   0x2   :  { %10 = vsyncpa [#allocation5], 0  ;;  %s934_s12 = smov [#allocation6]   ;;  %s840_s16 = scalar_lea.hbm %s1017_s1, 8192 }
   0x3   :  { %s28_s13 = sshll.u32 %s934_s12, 4  ;;  %p841_p0 = scmp.ne.s32.totalorder %s1017_s1, %s840_s16  ;;  %s29_s13 = int_to_ptr.vmem [resolvable:$true] %s28_s13 }
   0x4   :  { %p844_p1 = scmp.lt.u32.totalorder %s840_s16, %s1017_s1 }
   0x6   :  { %p846_p2 = pnand %p844_p1, %p841_p0 }
   0x8   :  { %849 = shalt.err (!%p846_p2)
}
   0x9   :  { %s850_s21 = scalar_lea.vmem %s29_s13, 8192  ;;  %p855_p4 = scmp.lt.s32.totalorder %s29_s13, %s29_s13 }
   0xa   :  { %p851_p3 = scmp.ne.s32.totalorder %s29_s13, %s850_s21  ;;  %p856_p5 = scmp.lt.s32.totalorder %s850_s21, %s850_s21 }
   0xc   :  { %p857_p6 = por %p856_p5, %p855_p4 }
   0xe   :  { %p858_p7 = pnand %p857_p6, %p851_p3 }
  0x10   :  { %861 = shalt.err (!%p858_p7)
}
  0x11   :  { %s935_s22 = smov 256   ;;  %s936_s23 = smov 16  }
  0x12   :  { %34 = dma.hbm_to_vmem [thread:$0]  %s1017_s1, 8192, %s29_s13, [#allocation7], %s935_s22, %s935_s22, %s936_s23  }
  0x13   :  { %s937_s26 = smov [#allocation3]   ;;  %s862_s30 = scalar_lea.hbm %s1016_s0, 256 }
  0x14   :  { %s16_s27 = sshll.u32 %s937_s26, 4  ;;  %p863_p8 = scmp.ne.s32.totalorder %s1016_s0, %s862_s30  ;;  %s17_s27 = int_to_ptr.vmem [resolvable:$true] %s16_s27 }
  0x15   :  { %p866_p9 = scmp.lt.u32.totalorder %s862_s30, %s1016_s0 }
  0x17   :  { %p868_p10 = pnand %p866_p9, %p863_p8 }
  0x19   :  { %871 = shalt.err (!%p868_p10)
}
  0x1a   :  { %s872_s8 = scalar_lea.vmem %s17_s27, 256  ;;  %p877_p12 = scmp.lt.s32.totalorder %s17_s27, %s17_s27 }
  0x1b   :  { %p873_p11 = scmp.ne.s32.totalorder %s17_s27, %s872_s8  ;;  %p878_p13 = scmp.lt.s32.totalorder %s872_s8, %s872_s8 }
  0x1d   :  { %p879_p0 = por %p878_p13, %p877_p12 }
  0x1f   :  { %p880_p1 = pnand %p879_p0, %p873_p11 }
  0x21   :  { %883 = shalt.err (!%p880_p1)
}
  0x22   :  { %s938_s1 = smov 128   ;;  %s939_s9 = smov 8  }
  0x23   :  { %22 = dma.hbm_to_vmem [thread:$0]  %s1016_s0, 256, %s17_s27, [#allocation4], %s938_s1, %s938_s1, %s939_s9  }
  0x24   :  { %s940_s12 = smov [#allocation8]   ;;  %s884_s16 = scalar_lea.hbm %s1018_s2, 64 }
  0x25   :  { %s41_s13 = sshll.u32 %s940_s12, 4  ;;  %p885_p2 = scmp.ne.s32.totalorder %s1018_s2, %s884_s16  ;;  %s42_s13 = int_to_ptr.vmem [resolvable:$true] %s41_s13 }
  0x26   :  { %p888_p3 = scmp.lt.u32.totalorder %s884_s16, %s1018_s2 }
  0x28   :  { %p890_p4 = pnand %p888_p3, %p885_p2 }
  0x2a   :  { %893 = shalt.err (!%p890_p4)
}
  0x2b   :  { %s894_s21 = scalar_lea.vmem %s42_s13, 64  ;;  %p899_p6 = scmp.lt.s32.totalorder %s42_s13, %s42_s13 }
  0x2c   :  { %p895_p5 = scmp.ne.s32.totalorder %s42_s13, %s894_s21  ;;  %p900_p7 = scmp.lt.s32.totalorder %s894_s21, %s894_s21 }
  0x2e   :  { %p901_p8 = por %p900_p7, %p899_p6 }
  0x30   :  { %p902_p9 = pnand %p901_p8, %p895_p5 }
  0x32   :  { %905 = shalt.err (!%p902_p9)
}
  0x33   :  { %44 = dma.hbm_to_vmem [thread:$0]  %s1018_s2, 64, %s42_s13, [#allocation7]  }
  0x34   :  { %928 = dma.done.wait [#allocation4], 256  }
  0x35   :  { %929 = vsyncadd [#allocation4], 4294967040 }
  0x36   :  { %930 = dma.done.wait [#allocation7], 8256  }
  0x37   :  { %931 = vsyncadd [#allocation7], 4294959040  ;;  %v741_v0 = vld [vmem:[#allocation6 + $0x4] ss:$16 sps:$4 sm:$0xff]   ;;  %v743_v1 = vld [vmem:[#allocation6 + $0xc] ss:$16 sps:$4 sm:$0xff]  }
  0x38   :  { %470 = vmatprep.subr.bf16.mxu0 %v741_v0  ;;  %v745_v2 = vld [vmem:[#allocation6] ss:$16 sps:$4 sm:$0xff]   ;;  %v746_v3 = vld [vmem:[#allocation6 + $0x8] ss:$16 sps:$4 sm:$0xff]   ;;  %513 = vmatprep.subr.bf16.mxu1 %v743_v1  ;;  %v747_v4 = vld [vmem:[#allocation6 + $0x24] ss:$16 sps:$4 sm:$0xff]  }
  0x39   :  { %471 = vmatpush1.bf16.msra.mxu0 %v745_v2  ;;  %514 = vmatpush1.bf16.msra.mxu1 %v746_v3  ;;  %v749_v5 = vld [vmem:[#allocation6 + $0x2c] ss:$16 sps:$4 sm:$0xff]   ;;  %v751_v6 = vld [vmem:[#allocation6 + $0x20] ss:$16 sps:$4 sm:$0xff]   ;;  %v752_v7 = vld [vmem:[#allocation6 + $0x28] ss:$16 sps:$4 sm:$0xff]   ;;  %v585_v2 = vlaneseq }
  0x3a   :  { %472 = vmatprep.subr.bf16.mxu0 %v747_v4  ;;  %515 = vmatprep.subr.bf16.mxu1 %v749_v5  ;;  %v753_v8 = vld [vmem:[#allocation6 + $0x44] ss:$16 sps:$4 sm:$0xff]   ;;  %v755_v9 = vld [vmem:[#allocation6 + $0x4c] ss:$16 sps:$4 sm:$0xff]   ;;  %v757_v10 = vld [vmem:[#allocation6 + $0x40] ss:$16 sps:$4 sm:$0xff]  }
  0x3b   :  { %v758_v11 = vld [vmem:[#allocation6 + $0x48] ss:$16 sps:$4 sm:$0xff]   ;;  %v759_v12 = vld [vmem:[#allocation6 + $0x64] ss:$16 sps:$4 sm:$0xff]   ;;  %v761_v13 = vld [vmem:[#allocation6 + $0x6c] ss:$16 sps:$4 sm:$0xff]  }
  0x3c   :  { %v763_v14 = vld [vmem:[#allocation6 + $0x60] ss:$16 sps:$4 sm:$0xff]   ;;  %v764_v15 = vld [vmem:[#allocation6 + $0x68] ss:$16 sps:$4 sm:$0xff]   ;;  %v765_v16 = vld [vmem:[#allocation6 + $0x84] ss:$16 sps:$4 sm:$0xff]  }
  0x3d   :  { %473 = vmatpush1.bf16.msra.mxu0 %v751_v6  ;;  %516 = vmatpush1.bf16.msra.mxu1 %v752_v7  ;;  %v767_v17 = vld [vmem:[#allocation6 + $0x8c] ss:$16 sps:$4 sm:$0xff]   ;;  %v769_v18 = vld [vmem:[#allocation6 + $0x80] ss:$16 sps:$4 sm:$0xff]   ;;  %v770_v19 = vld [vmem:[#allocation6 + $0x88] ss:$16 sps:$4 sm:$0xff]  }
  0x3e   :  { %474 = vmatprep.subr.bf16.mxu0 %v753_v8  ;;  %517 = vmatprep.subr.bf16.mxu1 %v755_v9  ;;  %v771_v20 = vld [vmem:[#allocation6 + $0xa4] ss:$16 sps:$4 sm:$0xff]   ;;  %v773_v21 = vld [vmem:[#allocation6 + $0xac] ss:$16 sps:$4 sm:$0xff]   ;;  %v775_v22 = vld [vmem:[#allocation6 + $0xa0] ss:$16 sps:$4 sm:$0xff]  }
  0x3f   :  { %v776_v23 = vld [vmem:[#allocation6 + $0xa8] ss:$16 sps:$4 sm:$0xff]   ;;  %v777_v24 = vld [vmem:[#allocation6 + $0xc4] ss:$16 sps:$4 sm:$0xff]   ;;  %v779_v25 = vld [vmem:[#allocation6 + $0xcc] ss:$16 sps:$4 sm:$0xff]  }
  0x40   :  { %v781_v26 = vld [vmem:[#allocation6 + $0xc0] ss:$16 sps:$4 sm:$0xff]   ;;  %v782_v27 = vld [vmem:[#allocation6 + $0xc8] ss:$16 sps:$4 sm:$0xff]   ;;  %v783_v28 = vld [vmem:[#allocation6 + $0xe4] ss:$16 sps:$4 sm:$0xff]  }
  0x41   :  { %475 = vmatpush1.bf16.msra.mxu0 %v757_v10  ;;  %518 = vmatpush1.bf16.msra.mxu1 %v758_v11  ;;  %v785_v29 = vld [vmem:[#allocation6 + $0xec] ss:$16 sps:$4 sm:$0xff]   ;;  %v787_v30 = vld [vmem:[#allocation6 + $0xe0] ss:$16 sps:$4 sm:$0xff]   ;;  %v788_v31 = vld [vmem:[#allocation6 + $0xe8] ss:$16 sps:$4 sm:$0xff]  }
  0x42   :  { %476 = vmatprep.subr.bf16.mxu0 %v759_v12  ;;  %519 = vmatprep.subr.bf16.mxu1 %v761_v13  ;;  %v789_v32 = vld [vmem:[#allocation6 + $0x104] ss:$16 sps:$4 sm:$0xff]   ;;  %v791_v33 = vld [vmem:[#allocation6 + $0x10c] ss:$16 sps:$4 sm:$0xff]   ;;  %v793_v34 = vld [vmem:[#allocation6 + $0x100] ss:$16 sps:$4 sm:$0xff]  }
  0x43   :  { %v794_v35 = vld [vmem:[#allocation6 + $0x108] ss:$16 sps:$4 sm:$0xff]   ;;  %v795_v36 = vld [vmem:[#allocation6 + $0x124] ss:$16 sps:$4 sm:$0xff]   ;;  %v797_v37 = vld [vmem:[#allocation6 + $0x12c] ss:$16 sps:$4 sm:$0xff]  }
  0x44   :  { %v799_v38 = vld [vmem:[#allocation6 + $0x120] ss:$16 sps:$4 sm:$0xff]   ;;  %v800_v39 = vld [vmem:[#allocation6 + $0x128] ss:$16 sps:$4 sm:$0xff]   ;;  %v801_v40 = vld [vmem:[#allocation6 + $0x144] ss:$16 sps:$4 sm:$0xff]  }
  0x45   :  { %477 = vmatpush1.bf16.msra.mxu0 %v763_v14  ;;  %520 = vmatpush1.bf16.msra.mxu1 %v764_v15  ;;  %v803_v41 = vld [vmem:[#allocation6 + $0x14c] ss:$16 sps:$4 sm:$0xff]   ;;  %v805_v42 = vld [vmem:[#allocation6 + $0x140] ss:$16 sps:$4 sm:$0xff]   ;;  %v806_v43 = vld [vmem:[#allocation6 + $0x148] ss:$16 sps:$4 sm:$0xff]  }
  0x46   :  { %478 = vmatprep.subr.bf16.mxu0 %v765_v16  ;;  %521 = vmatprep.subr.bf16.mxu1 %v767_v17  ;;  %v807_v44 = vld [vmem:[#allocation6 + $0x164] ss:$16 sps:$4 sm:$0xff]   ;;  %v809_v45 = vld [vmem:[#allocation6 + $0x16c] ss:$16 sps:$4 sm:$0xff]   ;;  %v811_v47 = vld [vmem:[#allocation6 + $0x160] ss:$16 sps:$4 sm:$0xff]  }
  0x47   :  { %v839_v46 = vld [vmem:[#allocation3 + $0x4] ss:$8 sps:$4 sm:$0xff]   ;;  %v812_v48 = vld [vmem:[#allocation6 + $0x168] ss:$16 sps:$4 sm:$0xff]   ;;  %v817_v51 = vld [vmem:[#allocation6 + $0x180] ss:$16 sps:$4 sm:$0xff]  }
  0x48   :  { %v813_v49 = vld [vmem:[#allocation6 + $0x184] ss:$16 sps:$4 sm:$0xff]   ;;  %v815_v50 = vld [vmem:[#allocation6 + $0x18c] ss:$16 sps:$4 sm:$0xff]   ;;  %502 = vmatprep.mubr.bf16.mxu0 %v839_v46  ;;  %545 = vmatprep.mubr.bf16.mxu1 %v839_v46  ;;  %v818_v52 = vld [vmem:[#allocation6 + $0x188] ss:$16 sps:$4 sm:$0xff]  }
  0x49   :  { %479 = vmatpush1.bf16.msra.mxu0 %v769_v18  ;;  %522 = vmatpush1.bf16.msra.mxu1 %v770_v19  ;;  %v819_v53 = vld [vmem:[#allocation6 + $0x1a4] ss:$16 sps:$4 sm:$0xff]   ;;  %v821_v54 = vld [vmem:[#allocation6 + $0x1ac] ss:$16 sps:$4 sm:$0xff]   ;;  %v823_v55 = vld [vmem:[#allocation6 + $0x1a0] ss:$16 sps:$4 sm:$0xff]  }
  0x4a   :  { %480 = vmatprep.subr.bf16.mxu0 %v771_v20  ;;  %523 = vmatprep.subr.bf16.mxu1 %v773_v21  ;;  %v824_v56 = vld [vmem:[#allocation6 + $0x1a8] ss:$16 sps:$4 sm:$0xff]   ;;  %v825_v57 = vld [vmem:[#allocation6 + $0x1c4] ss:$16 sps:$4 sm:$0xff]   ;;  %v827_v58 = vld [vmem:[#allocation6 + $0x1cc] ss:$16 sps:$4 sm:$0xff]  }
  0x4b   :  { %v829_v59 = vld [vmem:[#allocation6 + $0x1c0] ss:$16 sps:$4 sm:$0xff]   ;;  %v830_v60 = vld [vmem:[#allocation6 + $0x1c8] ss:$16 sps:$4 sm:$0xff]   ;;  %v831_v61 = vld [vmem:[#allocation6 + $0x1e4] ss:$16 sps:$4 sm:$0xff]  }
  0x4c   :  { %v833_v62 = vld [vmem:[#allocation6 + $0x1ec] ss:$16 sps:$4 sm:$0xff]   ;;  %v835_v63 = vld [vmem:[#allocation6 + $0x1e0] ss:$16 sps:$4 sm:$0xff]   ;;  %v836_v0 = vld [vmem:[#allocation6 + $0x1e8] ss:$16 sps:$4 sm:$0xff]  }
  0x4d   :  { %481 = vmatpush1.bf16.msra.mxu0 %v775_v22  ;;  %524 = vmatpush1.bf16.msra.mxu1 %v776_v23  ;;  %v837_v1 = vld [vmem:[#allocation3] ss:$8 sps:$4 sm:$0xff]   ;;  %v586_v3 = vshrl.u32 %v585_v2, 7  ;;  %v583_v6 = vld [vmem:[#allocation8] sm:$0xf]  ;;  %s941_s2 = smov [#allocation9]  }
  0x4e   :  { %482 = vmatprep.subr.bf16.mxu0 %v777_v24  ;;  %525 = vmatprep.subr.bf16.mxu1 %v779_v25  ;;  %s646_s25 = sshll.u32 %s941_s2, 4  ;;  %s647_s25 = int_to_ptr.vmem [resolvable:$true] %s646_s25 }
  0x4f   :  { %v587_v4 = vsub.s32 0, %v586_v3  ;;  %v595_v5 = vsub.s32 2, %v586_v3  ;;  %v591_v7 = vsub.s32 1, %v586_v3  ;;  %v599_v8 = vsub.s32 3, %v586_v3  ;;  %s906_s26 = scalar_lea.vmem %s647_s25, 512  ;;  %p911_p11 = scmp.lt.s32.totalorder %s647_s25, %s647_s25 }
  0x50   :  { %p907_p10 = scmp.ne.s32.totalorder %s647_s25, %s906_s26  ;;  %p912_p12 = scmp.lt.s32.totalorder %s906_s26, %s906_s26 }
  0x51   :  { %483 = vmatpush1.bf16.msra.mxu0 %v781_v26  ;;  %526 = vmatpush1.bf16.msra.mxu1 %v782_v27  ;;  %v588_v9 = vrot.slane %v583_v6, %v587_v4  ;;  %v596_v10 = vrot.slane %v583_v6, %v595_v5  ;;  %v592_v11 = vrot.slane %v583_v6, %v591_v7 }
  0x52   :  { %484 = vmatprep.subr.bf16.mxu0 %v783_v28  ;;  %527 = vmatprep.subr.bf16.mxu1 %v785_v29  ;;  %v600_v12 = vrot.slane %v583_v6, %v599_v8  ;;  %p913_p13 = por %p912_p12, %p911_p11 }
  0x54   :  { %p914_p0 = pnand %p913_p13, %p907_p10 }
  0x55   :  { %485 = vmatpush1.bf16.msra.mxu0 %v787_v30  ;;  %528 = vmatpush1.bf16.msra.mxu1 %v788_v31 }
  0x56   :  { %486 = vmatprep.subr.bf16.mxu0 %v789_v32  ;;  %529 = vmatprep.subr.bf16.mxu1 %v791_v33 }
  0x59   :  { %487 = vmatpush1.bf16.msra.mxu0 %v793_v34  ;;  %530 = vmatpush1.bf16.msra.mxu1 %v794_v35 }
  0x5a   :  { %488 = vmatprep.subr.bf16.mxu0 %v795_v36  ;;  %531 = vmatprep.subr.bf16.mxu1 %v797_v37 }
  0x5d   :  { %489 = vmatpush1.bf16.msra.mxu0 %v799_v38  ;;  %532 = vmatpush1.bf16.msra.mxu1 %v800_v39 }
  0x5e   :  { %490 = vmatprep.subr.bf16.mxu0 %v801_v40  ;;  %533 = vmatprep.subr.bf16.mxu1 %v803_v41 }
  0x61   :  { %491 = vmatpush1.bf16.msra.mxu0 %v805_v42  ;;  %534 = vmatpush1.bf16.msra.mxu1 %v806_v43 }
  0x62   :  { %492 = vmatprep.subr.bf16.mxu0 %v807_v44  ;;  %535 = vmatprep.subr.bf16.mxu1 %v809_v45 }
  0x65   :  { %493 = vmatpush1.bf16.msra.mxu0 %v811_v47  ;;  %536 = vmatpush1.bf16.msra.mxu1 %v812_v48 }
  0x66   :  { %494 = vmatprep.subr.bf16.mxu0 %v813_v49  ;;  %537 = vmatprep.subr.bf16.mxu1 %v815_v50 }
  0x69   :  { %495 = vmatpush1.bf16.msra.mxu0 %v817_v51  ;;  %538 = vmatpush1.bf16.msra.mxu1 %v818_v52 }
  0x6a   :  { %496 = vmatprep.subr.bf16.mxu0 %v819_v53  ;;  %539 = vmatprep.subr.bf16.mxu1 %v821_v54 }
  0x6d   :  { %497 = vmatpush1.bf16.msra.mxu0 %v823_v55  ;;  %540 = vmatpush1.bf16.msra.mxu1 %v824_v56 }
  0x6e   :  { %498 = vmatprep.subr.bf16.mxu0 %v825_v57  ;;  %541 = vmatprep.subr.bf16.mxu1 %v827_v58 }
  0x71   :  { %499 = vmatpush1.bf16.msra.mxu0 %v829_v59  ;;  %542 = vmatpush1.bf16.msra.mxu1 %v830_v60 }
  0x72   :  { %500 = vmatprep.subr.bf16.mxu0 %v831_v61  ;;  %543 = vmatprep.subr.bf16.mxu1 %v833_v62 }
  0x75   :  { %501 = vmatpush1.bf16.msra.mxu0 %v835_v63  ;;  %544 = vmatpush1.bf16.msra.mxu1 %v836_v0 }
  0x78   :  { %503 = vmatmul.mubr.bf16.vlgmr.msra.gmra.mrb[0].mxu0 %v837_v1  ;;  %546 = vmatmul.mubr.bf16.vlgmr.msra.gmra.mrb[0].mxu1 %v837_v1 }
 0x14b   :  { %v504_v13 = vpop.f32.mrb[0].mxu0  ;;  %v547_v14 = vpop.f32.mrb[0].mxu1 }
 0x14c   :  { %v605_v15 = vadd.f32 %v588_v9, %v504_v13  ;;  %v607_v16 = vadd.f32 %v596_v10, %v547_v14  ;;  %v506_v17 = vpop.f32.mrb[1].mxu0  ;;  %v549_v18 = vpop.f32.mrb[1].mxu1 }
 0x14d   :  { %v606_v19 = vadd.f32 %v592_v11, %v506_v17  ;;  %v608_v20 = vadd.f32 %v600_v12, %v549_v18  ;;  %v508_v21 = vpop.f32.mrb[2].mxu0  ;;  %v551_v22 = vpop.f32.mrb[2].mxu1 }
 0x14e   :  { %v609_v23 = vadd.f32 %v588_v9, %v508_v21  ;;  %v611_v24 = vadd.f32 %v596_v10, %v551_v22  ;;  %v510_v25 = vpop.f32.mrb[3].mxu0  ;;  %v553_v26 = vpop.f32.mrb[3].mxu1 }
 0x14f   :  { %v729_v27 = vpack.c.bf16 %v606_v19, %v605_v15  ;;  %v730_v28 = vpack.c.bf16 %v608_v20, %v607_v16  ;;  %v610_v29 = vadd.f32 %v592_v11, %v510_v25  ;;  %v612_v30 = vadd.f32 %v600_v12, %v553_v26 }
 0x151   :  { %637 = vst [vmem:[#allocation9] sm:$0xff] %v729_v27  ;;  %638 = vst [vmem:[#allocation9 + $0x8] sm:$0xff] %v730_v28  ;;  %v731_v31 = vpack.c.bf16 %v610_v29, %v609_v23  ;;  %v732_v32 = vpack.c.bf16 %v612_v30, %v611_v24 }
 0x153   :  { %639 = vst [vmem:[#allocation9 + $0x10] sm:$0xff] %v731_v31  ;;  %640 = vst [vmem:[#allocation9 + $0x18] sm:$0xff] %v732_v32 }
 0x154   :  { %917 = shalt.err (!%p914_p0)
}
 0x155   :  { %s918_s29 = scalar_lea.hbm %s1019_s3, 512 }
 0x156   :  { %p919_p1 = scmp.ne.s32.totalorder %s1019_s3, %s918_s29  ;;  %p922_p2 = scmp.lt.u32.totalorder %s918_s29, %s1019_s3 }
 0x158   :  { %p924_p3 = pnand %p922_p2, %p919_p1 }
 0x15a   :  { %927 = shalt.err (!%p924_p3)
}
 0x15b   :  { %652 = dma.vmem_to_hbm [thread:$0]  %s647_s25, 512, %s1019_s3, [#allocation5], %s935_s22, %s935_s22, %s936_s23  }
 0x15c   :  { %932 = dma.done.wait [#allocation5], 512  }
 0x15d   :  { %933 = vsyncadd [#allocation5], 4294966784 }
 0x15e   :  { %656 = vsyncpa [#allocation4], 1 }
 0x15f   :  { %657 = vsyncpa [#allocation7], 1 }
 0x160   :  { %658 = vsyncpa [#allocation5], 1 }

// kernel: _lambda_.16
= control target key start
LH: loop header
LB: loop body
LE: loop exit
PB: predicated region body
PF: predicated region fallthrough
CT: control target
= control target key end

     0   :  { %8 = vsyncpa [#allocation4], 0  ;;  %s626_s0 = inlined_call_operand.hbm [shape: bf16[32,256], index: 0, kind: input, shape index: {}]   ;;  %s627_s1 = inlined_call_operand.hbm [shape: bf16[256,128], index: 1, kind: input, shape index: {}]   ;;  %s628_s2 = inlined_call_operand.hbm [shape: f32[1,128], index: 2, kind: input, shape index: {}]   ;;  %s629_s3 = inlined_call_operand.hbm [shape: bf16[32,128], index: 3, kind: output, shape index: {}]  }
   0x1   :  { %9 = vsyncpa [#allocation7], 0 }
   0x2   :  { %10 = vsyncpa [#allocation5], 0  ;;  %s544_s12 = smov [#allocation6]   ;;  %s450_s16 = scalar_lea.hbm %s627_s1, 2048 }
   0x3   :  { %s28_s13 = sshll.u32 %s544_s12, 4  ;;  %p451_p0 = scmp.ne.s32.totalorder %s627_s1, %s450_s16  ;;  %s29_s13 = int_to_ptr.vmem [resolvable:$true] %s28_s13 }
   0x4   :  { %p454_p1 = scmp.lt.u32.totalorder %s450_s16, %s627_s1 }
   0x6   :  { %p456_p2 = pnand %p454_p1, %p451_p0 }
   0x8   :  { %459 = shalt.err (!%p456_p2)
}
   0x9   :  { %s460_s21 = scalar_lea.vmem %s29_s13, 2048  ;;  %p465_p4 = scmp.lt.s32.totalorder %s29_s13, %s29_s13 }
   0xa   :  { %p461_p3 = scmp.ne.s32.totalorder %s29_s13, %s460_s21  ;;  %p466_p5 = scmp.lt.s32.totalorder %s460_s21, %s460_s21 }
   0xc   :  { %p467_p6 = por %p466_p5, %p465_p4 }
   0xe   :  { %p468_p7 = pnand %p467_p6, %p461_p3 }
  0x10   :  { %471 = shalt.err (!%p468_p7)
}
  0x11   :  { %s545_s22 = smov 64   ;;  %s546_s23 = smov 4  }
  0x12   :  { %34 = dma.hbm_to_vmem [thread:$0]  %s627_s1, 2048, %s29_s13, [#allocation7], %s545_s22, %s545_s22, %s546_s23  }
  0x13   :  { %s547_s26 = smov [#allocation3]   ;;  %s472_s30 = scalar_lea.hbm %s626_s0, 512 }
  0x14   :  { %s16_s27 = sshll.u32 %s547_s26, 4  ;;  %p473_p8 = scmp.ne.s32.totalorder %s626_s0, %s472_s30  ;;  %s17_s27 = int_to_ptr.vmem [resolvable:$true] %s16_s27 }
  0x15   :  { %p476_p9 = scmp.lt.u32.totalorder %s472_s30, %s626_s0 }
  0x17   :  { %p478_p10 = pnand %p476_p9, %p473_p8 }
  0x19   :  { %481 = shalt.err (!%p478_p10)
}
  0x1a   :  { %s482_s8 = scalar_lea.vmem %s17_s27, 512  ;;  %p487_p12 = scmp.lt.s32.totalorder %s17_s27, %s17_s27 }
  0x1b   :  { %p483_p11 = scmp.ne.s32.totalorder %s17_s27, %s482_s8  ;;  %p488_p13 = scmp.lt.s32.totalorder %s482_s8, %s482_s8 }
  0x1d   :  { %p489_p0 = por %p488_p13, %p487_p12 }
  0x1f   :  { %p490_p1 = pnand %p489_p0, %p483_p11 }
  0x21   :  { %493 = shalt.err (!%p490_p1)
}
  0x22   :  { %s548_s1 = smov 128   ;;  %s549_s9 = smov 8  }
  0x23   :  { %22 = dma.hbm_to_vmem [thread:$0]  %s626_s0, 512, %s17_s27, [#allocation4], %s548_s1, %s548_s1, %s549_s9  }
  0x24   :  { %s550_s12 = smov [#allocation8]   ;;  %s494_s16 = scalar_lea.hbm %s628_s2, 16 }
  0x25   :  { %s41_s13 = sshll.u32 %s550_s12, 4  ;;  %p495_p2 = scmp.ne.s32.totalorder %s628_s2, %s494_s16  ;;  %s42_s13 = int_to_ptr.vmem [resolvable:$true] %s41_s13 }
  0x26   :  { %p498_p3 = scmp.lt.u32.totalorder %s494_s16, %s628_s2 }
  0x28   :  { %p500_p4 = pnand %p498_p3, %p495_p2 }
  0x2a   :  { %503 = shalt.err (!%p500_p4)
}
  0x2b   :  { %s504_s21 = scalar_lea.vmem %s42_s13, 16  ;;  %s508_s0 = scalar_lea.vmem %s42_s13, 32 }
  0x2c   :  { %p505_p5 = scmp.ne.s32.totalorder %s42_s13, %s504_s21  ;;  %p509_p6 = scmp.lt.s32.totalorder %s42_s13, %s42_s13 }
  0x2d   :  { %p510_p7 = scmp.lt.s32.totalorder %s508_s0, %s504_s21 }
  0x2f   :  { %p511_p8 = por %p510_p7, %p509_p6 }
  0x31   :  { %p512_p9 = pnand %p511_p8, %p505_p5 }
  0x33   :  { %515 = shalt.err (!%p512_p9)
}
  0x34   :  { %44 = dma.hbm_to_vmem [thread:$0]  %s628_s2, 16, %s42_s13, [#allocation7]  }
  0x35   :  { %538 = dma.done.wait [#allocation4], 512  }
  0x36   :  { %539 = vsyncadd [#allocation4], 4294966784 }
  0x37   :  { %540 = dma.done.wait [#allocation7], 2064  }
  0x38   :  { %541 = vsyncadd [#allocation7], 4294965232  ;;  %v428_v0 = vld [vmem:[#allocation6 + $0x40] sm:$0xff]   ;;  %v430_v2 = vld [vmem:[#allocation6 + $0x48] sm:$0xff]   ;;  %s551_s2 = smov [#allocation9]  }
  0x39   :  { %v429_v1 = vld [vmem:[#allocation6] sm:$0xff]   ;;  %376 = vmatprep.subr.bf16.mxu0 %v428_v0  ;;  %404 = vmatprep.subr.bf16.mxu1 %v428_v0  ;;  %v431_v3 = vld [vmem:[#allocation6 + $0x8] sm:$0xff]   ;;  %v432_v4 = vld [vmem:[#allocation6 + $0x50] sm:$0xff]   ;;  %s323_s26 = sshll.u32 %s551_s2, 4  ;;  %s324_s26 = int_to_ptr.vmem [resolvable:$true] %s323_s26 }
  0x3a   :  { %377 = vmatpush3.bf16.msra.mxu0 %v429_v1  ;;  %412 = vmatpush3.bf16.msra.mxu1 %v429_v1  ;;  %v433_v5 = vld [vmem:[#allocation6 + $0x10] sm:$0xff]   ;;  %v434_v6 = vld [vmem:[#allocation6 + $0x58] sm:$0xff]   ;;  %v436_v8 = vld [vmem:[#allocation6 + $0x60] sm:$0xff]   ;;  %s516_s27 = scalar_lea.vmem %s324_s26, 256  ;;  %p521_p11 = scmp.lt.s32.totalorder %s324_s26, %s324_s26 }
  0x3b   :  { %378 = vmatprep.subr.bf16.mxu0 %v430_v2  ;;  %405 = vmatprep.subr.bf16.mxu1 %v430_v2  ;;  %v435_v7 = vld [vmem:[#allocation6 + $0x18] sm:$0xff]   ;;  %v437_v9 = vld [vmem:[#allocation6 + $0x20] sm:$0xff]   ;;  %v438_v10 = vld [vmem:[#allocation6 + $0x68] sm:$0xff]   ;;  %p517_p10 = scmp.ne.s32.totalorder %s324_s26, %s516_s27  ;;  %p522_p12 = scmp.lt.s32.totalorder %s516_s27, %s516_s27 }
  0x3c   :  { %v446_v11 = vld [vmem:[#allocation3 + $0x4] ss:$8 sps:$4 sm:$0xff]   ;;  %v449_v12 = vld [vmem:[#allocation3 + $0x14] ss:$8 sps:$4 sm:$0xff]   ;;  %v444_v18 = vld [vmem:[#allocation3] ss:$8 sps:$4 sm:$0xff]  }
  0x3d   :  { %v439_v13 = vld [vmem:[#allocation6 + $0x28] sm:$0xff]   ;;  %v440_v14 = vld [vmem:[#allocation6 + $0x70] sm:$0xff]   ;;  %251 = vmatprep.mubr.bf16.mxu0 %v446_v11  ;;  %259 = vmatprep.mubr.bf16.mxu1 %v449_v12  ;;  %v442_v16 = vld [vmem:[#allocation6 + $0x78] sm:$0xff]   ;;  %p523_p13 = por %p522_p12, %p521_p11 }
  0x3e   :  { %379 = vmatpush3.bf16.msra.mxu0 %v431_v3  ;;  %413 = vmatpush3.bf16.msra.mxu1 %v431_v3  ;;  %v441_v15 = vld [vmem:[#allocation6 + $0x30] sm:$0xff]   ;;  %v443_v17 = vld [vmem:[#allocation6 + $0x38] sm:$0xff]   ;;  %v356_v23 = vld [vmem:[#allocation8] ss:$0 sm:$0xff] }
  0x3f   :  { %380 = vmatprep.subr.bf16.mxu0 %v432_v4  ;;  %406 = vmatprep.subr.bf16.mxu1 %v432_v4  ;;  %v447_v19 = vld [vmem:[#allocation3 + $0x10] ss:$8 sps:$4 sm:$0xff]   ;;  %p524_p0 = pnand %p523_p13, %p517_p10 }
  0x42   :  { %381 = vmatpush3.bf16.msra.mxu0 %v433_v5  ;;  %414 = vmatpush3.bf16.msra.mxu1 %v433_v5 }
  0x43   :  { %382 = vmatprep.subr.bf16.mxu0 %v434_v6  ;;  %407 = vmatprep.subr.bf16.mxu1 %v434_v6 }
  0x46   :  { %383 = vmatpush3.bf16.msra.mxu0 %v435_v7  ;;  %415 = vmatpush3.bf16.msra.mxu1 %v435_v7 }
  0x47   :  { %384 = vmatprep.subr.bf16.mxu0 %v436_v8  ;;  %408 = vmatprep.subr.bf16.mxu1 %v436_v8 }
  0x4a   :  { %385 = vmatpush3.bf16.msra.mxu0 %v437_v9  ;;  %416 = vmatpush3.bf16.msra.mxu1 %v437_v9 }
  0x4b   :  { %386 = vmatprep.subr.bf16.mxu0 %v438_v10  ;;  %409 = vmatprep.subr.bf16.mxu1 %v438_v10 }
  0x4e   :  { %387 = vmatpush3.bf16.msra.mxu0 %v439_v13  ;;  %417 = vmatpush3.bf16.msra.mxu1 %v439_v13 }
  0x4f   :  { %388 = vmatprep.subr.bf16.mxu0 %v440_v14  ;;  %410 = vmatprep.subr.bf16.mxu1 %v440_v14 }
  0x52   :  { %389 = vmatpush3.bf16.msra.mxu0 %v441_v15  ;;  %418 = vmatpush3.bf16.msra.mxu1 %v441_v15 }
  0x53   :  { %390 = vmatprep.subr.bf16.mxu0 %v442_v16  ;;  %411 = vmatprep.subr.bf16.mxu1 %v442_v16 }
  0x56   :  { %391 = vmatpush3.bf16.msra.mxu0 %v443_v17  ;;  %419 = vmatpush3.bf16.msra.mxu1 %v443_v17 }
  0x59   :  { %252 = vmatmul.mubr.bf16.vlgmr.msra.gmra.mrb[0].mxu0 %v444_v18  ;;  %260 = vmatmul.mubr.bf16.vlgmr.msra.gmra.mrb[0].mxu1 %v447_v19 }
 0x12c   :  { %v392_v20 = vpop.f32.mrb[0].mxu0  ;;  %v398_v21 = vpop.f32.mrb[0].mxu1 }
 0x12d   :  { %v393_v22 = vpop.f32.mrb[1].mxu0  ;;  %v399_v24 = vpop.f32.mrb[1].mxu1 }
 0x12e   :  { %v394_v25 = vadd.f32 %v393_v22, %v392_v20  ;;  %v400_v26 = vadd.f32 %v399_v24, %v398_v21  ;;  %v395_v27 = vpop.f32.mrb[2].mxu0  ;;  %v401_v28 = vpop.f32.mrb[2].mxu1 }
 0x12f   :  { %v396_v29 = vpop.f32.mrb[3].mxu0  ;;  %v402_v30 = vpop.f32.mrb[3].mxu1 }
 0x130   :  { %v290_v31 = vadd.f32 %v394_v25, %v356_v23  ;;  %v292_v32 = vadd.f32 %v400_v26, %v356_v23  ;;  %v397_v33 = vadd.f32 %v396_v29, %v395_v27  ;;  %v403_v34 = vadd.f32 %v402_v30, %v401_v28 }
 0x132   :  { %v291_v35 = vadd.f32 %v397_v33, %v356_v23  ;;  %v293_v36 = vadd.f32 %v403_v34, %v356_v23  ;;  %v294_v37 = vmax.f32 %v290_v31, 0.0  ;;  %v296_v38 = vmax.f32 %v292_v32, 0.0 }
 0x134   :  { %v295_v39 = vmax.f32 %v291_v35, 0.0  ;;  %v297_v40 = vmax.f32 %v293_v36, 0.0 }
 0x136   :  { %v368_v41 = vpack.c.bf16 %v295_v39, %v294_v37  ;;  %v373_v42 = vpack.c.bf16 %v297_v40, %v296_v38 }
 0x138   :  { %369 = vst [vmem:[#allocation9] sm:$0xff] %v368_v41   ;;  %375 = vst [vmem:[#allocation9 + $0x8] sm:$0xff] %v373_v42  }
 0x139   :  { %527 = shalt.err (!%p524_p0)
}
 0x13a   :  { %s528_s30 = scalar_lea.hbm %s629_s3, 256 }
 0x13b   :  { %p529_p1 = scmp.ne.s32.totalorder %s629_s3, %s528_s30  ;;  %p532_p2 = scmp.lt.u32.totalorder %s528_s30, %s629_s3 }
 0x13d   :  { %p534_p3 = pnand %p532_p2, %p529_p1 }
 0x13f   :  { %537 = shalt.err (!%p534_p3)
}
 0x140   :  { %329 = dma.vmem_to_hbm [thread:$0]  %s324_s26, 256, %s629_s3, [#allocation5], %s545_s22, %s545_s22, %s546_s23  }
 0x141   :  { %542 = dma.done.wait [#allocation5], 256  }
 0x142   :  { %543 = vsyncadd [#allocation5], 4294967040 }
 0x143   :  { %333 = vsyncpa [#allocation4], 1 }
 0x144   :  { %334 = vsyncpa [#allocation7], 1 }
 0x145   :  { %335 = vsyncpa [#allocation5], 1 }

// kernel: _lambda_.19
= control target key start
LH: loop header
LB: loop body
LE: loop exit
PB: predicated region body
PF: predicated region fallthrough
CT: control target
= control target key end

     0   :  { %9 = vsyncpa [#allocation4], 0  ;;  %s839_s0 = inlined_call_operand.hbm [shape: bf16[16,128], index: 0, kind: input, shape index: {}]   ;;  %s840_s1 = inlined_call_operand.hbm [shape: bf16[128,512], index: 1, kind: input, shape index: {}]   ;;  %s841_s2 = inlined_call_operand.hbm [shape: f32[1,512], index: 2, kind: input, shape index: {}]   ;;  %s842_s3 = inlined_call_operand.hbm [shape: bf16[16,512], index: 3, kind: input, shape index: {}]   ;;  %s843_s4 = inlined_call_operand.hbm [shape: bf16[16,512], index: 4, kind: output, shape index: {}]  }
   0x1   :  { %10 = vsyncpa [#allocation7], 0 }
   0x2   :  { %11 = vsyncpa [#allocation10], 0 }
   0x3   :  { %12 = vsyncpa [#allocation5], 0  ;;  %s728_s15 = smov [#allocation6]   ;;  %s610_s19 = scalar_lea.hbm %s840_s1, 4096 }
   0x4   :  { %s30_s16 = sshll.u32 %s728_s15, 4  ;;  %p611_p0 = scmp.ne.s32.totalorder %s840_s1, %s610_s19  ;;  %s31_s16 = int_to_ptr.vmem [resolvable:$true] %s30_s16 }
   0x5   :  { %p614_p1 = scmp.lt.u32.totalorder %s610_s19, %s840_s1 }
   0x7   :  { %p616_p2 = pnand %p614_p1, %p611_p0 }
   0x9   :  { %619 = shalt.err (!%p616_p2)
}
   0xa   :  { %s620_s24 = scalar_lea.vmem %s31_s16, 4096  ;;  %p625_p4 = scmp.lt.s32.totalorder %s31_s16, %s31_s16 }
   0xb   :  { %p621_p3 = scmp.ne.s32.totalorder %s31_s16, %s620_s24  ;;  %p626_p5 = scmp.lt.s32.totalorder %s620_s24, %s620_s24 }
   0xd   :  { %p627_p6 = por %p626_p5, %p625_p4 }
   0xf   :  { %p628_p7 = pnand %p627_p6, %p621_p3 }
  0x11   :  { %631 = shalt.err (!%p628_p7)
}
  0x12   :  { %s729_s25 = smov 256   ;;  %s730_s26 = smov 16  }
  0x13   :  { %36 = dma.hbm_to_vmem [thread:$0]  %s840_s1, 4096, %s31_s16, [#allocation7], %s729_s25, %s729_s25, %s730_s26  }
  0x14   :  { %s731_s29 = smov [#allocation3]   ;;  %s632_s7 = scalar_lea.hbm %s839_s0, 128 }
  0x15   :  { %s18_s30 = sshll.u32 %s731_s29, 4  ;;  %p633_p8 = scmp.ne.s32.totalorder %s839_s0, %s632_s7  ;;  %s19_s30 = int_to_ptr.vmem [resolvable:$true] %s18_s30 }
  0x16   :  { %p636_p9 = scmp.lt.u32.totalorder %s632_s7, %s839_s0 }
  0x18   :  { %p638_p10 = pnand %p636_p9, %p633_p8 }
  0x1a   :  { %641 = shalt.err (!%p638_p10)
}
  0x1b   :  { %s642_s12 = scalar_lea.vmem %s19_s30, 128  ;;  %p647_p12 = scmp.lt.s32.totalorder %s19_s30, %s19_s30 }
  0x1c   :  { %p643_p11 = scmp.ne.s32.totalorder %s19_s30, %s642_s12  ;;  %p648_p13 = scmp.lt.s32.totalorder %s642_s12, %s642_s12 }
  0x1e   :  { %p649_p0 = por %p648_p13, %p647_p12 }
  0x20   :  { %p650_p1 = pnand %p649_p0, %p643_p11 }
  0x22   :  { %653 = shalt.err (!%p650_p1)
}
  0x23   :  { %s732_s1 = smov 64   ;;  %s733_s13 = smov 4  }
  0x24   :  { %24 = dma.hbm_to_vmem [thread:$0]  %s839_s0, 128, %s19_s30, [#allocation4], %s732_s1, %s732_s1, %s733_s13  }
  0x25   :  { %s734_s16 = smov [#allocation8]   ;;  %s735_s18 = smov [#allocation9]  }
  0x26   :  { %s43_s17 = sshll.u32 %s734_s16, 4  ;;  %s52_s19 = sshll.u32 %s735_s18, 4  ;;  %s44_s17 = int_to_ptr.vmem [resolvable:$true] %s43_s17  ;;  %s790_s19 = int_to_ptr.vmem [resolvable:$true] %s52_s19 }
  0x27   :  { %s654_s22 = scalar_lea.hbm %s841_s2, 64 }
  0x28   :  { %p655_p2 = scmp.ne.s32.totalorder %s841_s2, %s654_s22  ;;  %p658_p3 = scmp.lt.u32.totalorder %s654_s22, %s841_s2 }
  0x2a   :  { %p660_p4 = pnand %p658_p3, %p655_p2 }
  0x2c   :  { %663 = shalt.err (!%p660_p4)
}
  0x2d   :  { %s664_s0 = scalar_lea.vmem %s44_s17, 64  ;;  %p669_p6 = scmp.lt.s32.totalorder %s44_s17, %s44_s17 }
  0x2e   :  { %p665_p5 = scmp.ne.s32.totalorder %s44_s17, %s664_s0  ;;  %p670_p7 = scmp.lt.s32.totalorder %s664_s0, %s664_s0 }
  0x30   :  { %p671_p8 = por %p670_p7, %p669_p6 }
  0x32   :  { %p672_p9 = pnand %p671_p8, %p665_p5 }
  0x34   :  { %675 = shalt.err (!%p672_p9)
}
  0x35   :  { %46 = dma.hbm_to_vmem [thread:$0]  %s841_s2, 64, %s44_s17, [#allocation7]  }
  0x36   :  { %s676_s7 = scalar_lea.hbm %s842_s3, 512 }
  0x37   :  { %p677_p10 = scmp.ne.s32.totalorder %s842_s3, %s676_s7  ;;  %p680_p11 = scmp.lt.u32.totalorder %s676_s7, %s842_s3 }
  0x39   :  { %p682_p12 = pnand %p680_p11, %p677_p10 }
  0x3b   :  { %685 = shalt.err (!%p682_p12)
}
  0x3c   :  { %s686_s12 = scalar_lea.vmem %s790_s19, 512  ;;  %p691_p0 = scmp.lt.s32.totalorder %s790_s19, %s790_s19 }
  0x3d   :  { %p687_p13 = scmp.ne.s32.totalorder %s790_s19, %s686_s12  ;;  %p692_p1 = scmp.lt.s32.totalorder %s686_s12, %s686_s12 }
  0x3f   :  { %p693_p2 = por %p692_p1, %p691_p0 }
  0x41   :  { %p694_p3 = pnand %p693_p2, %p687_p13 }
  0x43   :  { %697 = shalt.err (!%p694_p3)
}
  0x44   :  { %58 = dma.hbm_to_vmem [thread:$0]  %s842_s3, 512, %s790_s19, [#allocation10], %s729_s25, %s729_s25, %s730_s26  }
  0x45   :  { %720 = dma.done.wait [#allocation4], 128  }
  0x46   :  { %721 = vsyncadd [#allocation4], 4294967168 }
  0x47   :  { %722 = dma.done.wait [#allocation7], 4160  }
  0x48   :  { %723 = vsyncadd [#allocation7], 4294963136 }
  0x49   :  { %724 = dma.done.wait [#allocation10], 512  }
  0x4a   :  { %725 = vsyncadd [#allocation10], 4294966784  ;;  %v736_v0 = vmov 0   ;;  %v561_v1 = vld [vmem:[#allocation6 + $0x4] ss:$16 sps:$4 sm:$0xff]   ;;  %v609_v33 = vld [vmem:[#allocation3] sm:$0xff]   ;;  %v407_v34 = vlaneseq }
  0x4b   :  { %324 = vmatprep.mubr.bf16.mxu0 %v736_v0  ;;  %367 = vmatprep.mubr.bf16.mxu1 %v736_v0  ;;  %v563_v2 = vld [vmem:[#allocation6 + $0xc] ss:$16 sps:$4 sm:$0xff]   ;;  %v565_v3 = vld [vmem:[#allocation6] ss:$16 sps:$4 sm:$0xff]   ;;  %v566_v4 = vld [vmem:[#allocation6 + $0x8] ss:$16 sps:$4 sm:$0xff]  }
  0x4c   :  { %292 = vmatprep.subr.bf16.mxu0 %v561_v1  ;;  %335 = vmatprep.subr.bf16.mxu1 %v563_v2  ;;  %v567_v5 = vld [vmem:[#allocation6 + $0x24] ss:$16 sps:$4 sm:$0xff]   ;;  %v569_v6 = vld [vmem:[#allocation6 + $0x2c] ss:$16 sps:$4 sm:$0xff]   ;;  %v571_v7 = vld [vmem:[#allocation6 + $0x20] ss:$16 sps:$4 sm:$0xff]  }
  0x4d   :  { %293 = vmatpush1.bf16.msra.mxu0 %v565_v3  ;;  %336 = vmatpush1.bf16.msra.mxu1 %v566_v4  ;;  %v572_v8 = vld [vmem:[#allocation6 + $0x28] ss:$16 sps:$4 sm:$0xff]   ;;  %v573_v9 = vld [vmem:[#allocation6 + $0x44] ss:$16 sps:$4 sm:$0xff]   ;;  %v575_v10 = vld [vmem:[#allocation6 + $0x4c] ss:$16 sps:$4 sm:$0xff]  }
  0x4e   :  { %294 = vmatprep.subr.bf16.mxu0 %v567_v5  ;;  %337 = vmatprep.subr.bf16.mxu1 %v569_v6  ;;  %v577_v11 = vld [vmem:[#allocation6 + $0x40] ss:$16 sps:$4 sm:$0xff]   ;;  %v578_v12 = vld [vmem:[#allocation6 + $0x48] ss:$16 sps:$4 sm:$0xff]   ;;  %v579_v13 = vld [vmem:[#allocation6 + $0x64] ss:$16 sps:$4 sm:$0xff]  }
  0x4f   :  { %v581_v14 = vld [vmem:[#allocation6 + $0x6c] ss:$16 sps:$4 sm:$0xff]   ;;  %v583_v15 = vld [vmem:[#allocation6 + $0x60] ss:$16 sps:$4 sm:$0xff]   ;;  %v584_v16 = vld [vmem:[#allocation6 + $0x68] ss:$16 sps:$4 sm:$0xff]  }
  0x50   :  { %v585_v17 = vld [vmem:[#allocation6 + $0x84] ss:$16 sps:$4 sm:$0xff]   ;;  %v587_v18 = vld [vmem:[#allocation6 + $0x8c] ss:$16 sps:$4 sm:$0xff]   ;;  %v589_v19 = vld [vmem:[#allocation6 + $0x80] ss:$16 sps:$4 sm:$0xff]  }
  0x51   :  { %295 = vmatpush1.bf16.msra.mxu0 %v571_v7  ;;  %338 = vmatpush1.bf16.msra.mxu1 %v572_v8  ;;  %v590_v20 = vld [vmem:[#allocation6 + $0x88] ss:$16 sps:$4 sm:$0xff]   ;;  %v591_v21 = vld [vmem:[#allocation6 + $0xa4] ss:$16 sps:$4 sm:$0xff]   ;;  %v593_v22 = vld [vmem:[#allocation6 + $0xac] ss:$16 sps:$4 sm:$0xff]  }
  0x52   :  { %296 = vmatprep.subr.bf16.mxu0 %v573_v9  ;;  %339 = vmatprep.subr.bf16.mxu1 %v575_v10  ;;  %v595_v23 = vld [vmem:[#allocation6 + $0xa0] ss:$16 sps:$4 sm:$0xff]   ;;  %v596_v24 = vld [vmem:[#allocation6 + $0xa8] ss:$16 sps:$4 sm:$0xff]   ;;  %v597_v25 = vld [vmem:[#allocation6 + $0xc4] ss:$16 sps:$4 sm:$0xff]  }
  0x53   :  { %v599_v26 = vld [vmem:[#allocation6 + $0xcc] ss:$16 sps:$4 sm:$0xff]   ;;  %v601_v27 = vld [vmem:[#allocation6 + $0xc0] ss:$16 sps:$4 sm:$0xff]   ;;  %v602_v28 = vld [vmem:[#allocation6 + $0xc8] ss:$16 sps:$4 sm:$0xff]  }
  0x54   :  { %v603_v29 = vld [vmem:[#allocation6 + $0xe4] ss:$16 sps:$4 sm:$0xff]   ;;  %v605_v30 = vld [vmem:[#allocation6 + $0xec] ss:$16 sps:$4 sm:$0xff]   ;;  %v607_v31 = vld [vmem:[#allocation6 + $0xe0] ss:$16 sps:$4 sm:$0xff]  }
  0x55   :  { %297 = vmatpush1.bf16.msra.mxu0 %v577_v11  ;;  %340 = vmatpush1.bf16.msra.mxu1 %v578_v12  ;;  %v608_v32 = vld [vmem:[#allocation6 + $0xe8] ss:$16 sps:$4 sm:$0xff]   ;;  %v408_v35 = vshrl.u32 %v407_v34, 7  ;;  %v405_v38 = vld [vmem:[#allocation8] sm:$0xf]  ;;  %v436_v42 = vld [vmem:[#allocation9 + $0x8] sm:$0xff] }
  0x56   :  { %298 = vmatprep.subr.bf16.mxu0 %v579_v13  ;;  %341 = vmatprep.subr.bf16.mxu1 %v581_v14  ;;  %v435_v41 = vld [vmem:[#allocation9] sm:$0xff]  ;;  %v437_v47 = vld [vmem:[#allocation9 + $0x10] sm:$0xff]  ;;  %v438_v48 = vld [vmem:[#allocation9 + $0x18] sm:$0xff]  ;;  %v441_v50 = vunpack.c.l.bf16 %v436_v42  ;;  %v442_v54 = vunpack.c.h.bf16 %v436_v42  ;;  %s737_s3 = smov [#allocation11]  }
  0x57   :  { %v409_v36 = vsub.s32 0, %v408_v35  ;;  %v417_v37 = vsub.s32 2, %v408_v35  ;;  %v413_v39 = vsub.s32 1, %v408_v35  ;;  %v421_v40 = vsub.s32 3, %v408_v35  ;;  %s496_s13 = sshll.u32 %s737_s3, 4  ;;  %s497_s13 = int_to_ptr.vmem [resolvable:$true] %s496_s13 }
  0x58   :  { %v439_v49 = vunpack.c.l.bf16 %v435_v41  ;;  %v440_v53 = vunpack.c.h.bf16 %v435_v41  ;;  %v443_v59 = vunpack.c.l.bf16 %v437_v47  ;;  %v445_v60 = vunpack.c.l.bf16 %v438_v48  ;;  %s698_s14 = scalar_lea.vmem %s497_s13, 512  ;;  %p703_p5 = scmp.lt.s32.totalorder %s497_s13, %s497_s13 }
  0x59   :  { %299 = vmatpush1.bf16.msra.mxu0 %v583_v15  ;;  %342 = vmatpush1.bf16.msra.mxu1 %v584_v16  ;;  %v410_v43 = vrot.slane %v405_v38, %v409_v36  ;;  %v418_v44 = vrot.slane %v405_v38, %v417_v37  ;;  %v414_v45 = vrot.slane %v405_v38, %v413_v39  ;;  %v444_v1 = vunpack.c.h.bf16 %v437_v47  ;;  %p699_p4 = scmp.ne.s32.totalorder %s497_s13, %s698_s14  ;;  %p704_p6 = scmp.lt.s32.totalorder %s698_s14, %s698_s14 }
  0x5a   :  { %300 = vmatprep.subr.bf16.mxu0 %v585_v17  ;;  %343 = vmatprep.subr.bf16.mxu1 %v587_v18  ;;  %v422_v46 = vrot.slane %v405_v38, %v421_v40  ;;  %v446_v2 = vunpack.c.h.bf16 %v438_v48 }
  0x5b   :  { %p705_p7 = por %p704_p6, %p703_p5 }
  0x5d   :  { %301 = vmatpush1.bf16.msra.mxu0 %v589_v19  ;;  %344 = vmatpush1.bf16.msra.mxu1 %v590_v20  ;;  %p706_p8 = pnand %p705_p7, %p699_p4 }
  0x5e   :  { %302 = vmatprep.subr.bf16.mxu0 %v591_v21  ;;  %345 = vmatprep.subr.bf16.mxu1 %v593_v22 }
  0x61   :  { %303 = vmatpush1.bf16.msra.mxu0 %v595_v23  ;;  %346 = vmatpush1.bf16.msra.mxu1 %v596_v24 }
  0x62   :  { %304 = vmatprep.subr.bf16.mxu0 %v597_v25  ;;  %347 = vmatprep.subr.bf16.mxu1 %v599_v26 }
  0x65   :  { %305 = vmatpush1.bf16.msra.mxu0 %v601_v27  ;;  %348 = vmatpush1.bf16.msra.mxu1 %v602_v28 }
  0x66   :  { %306 = vmatprep.subr.bf16.mxu0 %v603_v29  ;;  %349 = vmatprep.subr.bf16.mxu1 %v605_v30 }
  0x69   :  { %307 = vmatpush1.bf16.msra.mxu0 %v607_v31  ;;  %350 = vmatpush1.bf16.msra.mxu1 %v608_v32 }
  0x6c   :  { %325 = vmatmul.mubr.bf16.vlgmr.msra.gmra.mrb[0].mxu0 %v609_v33  ;;  %368 = vmatmul.mubr.bf16.vlgmr.msra.gmra.mrb[0].mxu1 %v609_v33 }
 0x13f   :  { %v326_v51 = vpop.f32.mrb[0].mxu0  ;;  %v369_v52 = vpop.f32.mrb[0].mxu1 }
 0x140   :  { %v427_v55 = vadd.f32 %v410_v43, %v326_v51  ;;  %v429_v56 = vadd.f32 %v418_v44, %v369_v52  ;;  %v328_v57 = vpop.f32.mrb[1].mxu0  ;;  %v371_v58 = vpop.f32.mrb[1].mxu1 }
 0x141   :  { %v428_v61 = vadd.f32 %v414_v45, %v328_v57  ;;  %v430_v62 = vadd.f32 %v422_v46, %v371_v58  ;;  %v330_v63 = vpop.f32.mrb[2].mxu0  ;;  %v373_v0 = vpop.f32.mrb[2].mxu1 }
 0x142   :  { %v447_v3 = vadd.f32 %v439_v49, %v427_v55  ;;  %v449_v4 = vadd.f32 %v441_v50, %v429_v56  ;;  %v431_v5 = vadd.f32 %v410_v43, %v330_v63  ;;  %v433_v6 = vadd.f32 %v418_v44, %v373_v0  ;;  %v332_v7 = vpop.f32.mrb[3].mxu0  ;;  %v375_v8 = vpop.f32.mrb[3].mxu1 }
 0x143   :  { %v448_v9 = vadd.f32 %v440_v53, %v428_v61  ;;  %v450_v10 = vadd.f32 %v442_v54, %v430_v62  ;;  %v432_v11 = vadd.f32 %v414_v45, %v332_v7  ;;  %v434_v12 = vadd.f32 %v422_v46, %v375_v8 }
 0x144   :  { %v455_v13 = vmax.f32 %v447_v3, 0.0  ;;  %v457_v14 = vmax.f32 %v449_v4, 0.0  ;;  %v451_v15 = vadd.f32 %v443_v59, %v431_v5  ;;  %v453_v16 = vadd.f32 %v445_v60, %v433_v6 }
 0x145   :  { %v456_v17 = vmax.f32 %v448_v9, 0.0  ;;  %v458_v18 = vmax.f32 %v450_v10, 0.0  ;;  %v452_v19 = vadd.f32 %v444_v1, %v432_v11  ;;  %v454_v20 = vadd.f32 %v446_v2, %v434_v12 }
 0x146   :  { %v459_v21 = vmax.f32 %v451_v15, 0.0  ;;  %v461_v22 = vmax.f32 %v453_v16, 0.0 }
 0x147   :  { %v547_v23 = vpack.c.bf16 %v456_v17, %v455_v13  ;;  %v548_v24 = vpack.c.bf16 %v458_v18, %v457_v14  ;;  %v460_v25 = vmax.f32 %v452_v19, 0.0  ;;  %v462_v26 = vmax.f32 %v454_v20, 0.0 }
 0x149   :  { %487 = vst [vmem:[#allocation11] sm:$0xff] %v547_v23  ;;  %488 = vst [vmem:[#allocation11 + $0x8] sm:$0xff] %v548_v24  ;;  %v549_v27 = vpack.c.bf16 %v460_v25, %v459_v21  ;;  %v550_v28 = vpack.c.bf16 %v462_v26, %v461_v22 }
 0x14b   :  { %489 = vst [vmem:[#allocation11 + $0x10] sm:$0xff] %v549_v27  ;;  %490 = vst [vmem:[#allocation11 + $0x18] sm:$0xff] %v550_v28 }
 0x14c   :  { %709 = shalt.err (!%p706_p8)
}
 0x14d   :  { %s710_s17 = scalar_lea.hbm %s843_s4, 512 }
 0x14e   :  { %p711_p9 = scmp.ne.s32.totalorder %s843_s4, %s710_s17  ;;  %p714_p10 = scmp.lt.u32.totalorder %s710_s17, %s843_s4 }
 0x150   :  { %p716_p11 = pnand %p714_p10, %p711_p9 }
 0x152   :  { %719 = shalt.err (!%p716_p11)
}
 0x153   :  { %502 = dma.vmem_to_hbm [thread:$0]  %s497_s13, 512, %s843_s4, [#allocation5], %s729_s25, %s729_s25, %s730_s26  }
 0x154   :  { %726 = dma.done.wait [#allocation5], 512  }
 0x155   :  { %727 = vsyncadd [#allocation5], 4294966784 }
 0x156   :  { %506 = vsyncpa [#allocation4], 1 }
 0x157   :  { %507 = vsyncpa [#allocation7], 1 }
 0x158   :  { %508 = vsyncpa [#allocation10], 1 }
 0x159   :  { %509 = vsyncpa [#allocation5], 1 }

// kernel: _lambda_.17
= control target key start
LH: loop header
LB: loop body
LE: loop exit
PB: predicated region body
PF: predicated region fallthrough
CT: control target
= control target key end

     0   :  { %8 = vsyncpa [#allocation3], 0  ;;  %s3393_s0 = inlined_call_operand.hbm [shape: bf16[2,3,3,512], index: 0, kind: input, shape index: {}]   ;;  %s3394_s1 = inlined_call_operand.hbm [shape: bf16[2048,128], index: 1, kind: input, shape index: {}]   ;;  %s3395_s2 = inlined_call_operand.hbm [shape: f32[1,128], index: 2, kind: input, shape index: {}]   ;;  %s3396_s3 = inlined_call_operand.hbm [shape: bf16[2,2,2,128], index: 3, kind: output, shape index: {}]  }
   0x1   :  { %10 = vsyncpa [#allocation3 + $0x1], 0 }
   0x2   :  { %11 = vsyncpa [#allocation6], 0 }
   0x3   :  { %12 = vsyncpa [#allocation4], 0 }
   0x4   :  { %14 = vsyncpa [#allocation4 + $0x1], 0  ;;  %s3073_s12 = smov 0   ;;  %s3075_s13 = smov 0  }
   0x5   :  { %s3077_s14 = smov 0   ;;  %s3079_s15 = smov 0  }
   0x6   :  { %s3081_s16 = smov 0   ;;  %s3083_s17 = smov 0  }
   0x7 LB: > { %s2308_s18 = sadd.s32 4294967295, %s3039_s17   ;;  %s2309_s19 = sadd.s32 4294967294, %s3039_s17   ;;  %s3039_s17 = sphi %s3083_s17, %s20_s17   ;;  %s3035_s16 = sphi %s3081_s16, %s3418_s16   ;;  %s3031_s15 = sphi %s3079_s15, %s3417_s15   ;;  %s3027_s14 = sphi %s3077_s14, %s3416_s14   ;;  %s3023_s13 = sphi %s3075_s13, %s3415_s13   ;;  %s3019_s12 = sphi %s3073_s12, %s3414_s12  }
   0x8   : > { %p52_p0 = scmp.ne.s32.totalorder %s3023_s13, %s3019_s12  ;;  %p3107_p1 = scmp.eq.s32.totalorder %s2308_s18, 0 }
   0x9   : > { %p3111_p2 = scmp.eq.s32.totalorder %s2308_s18, 1  ;;  %p126_p3 = scmp.eq.s32.totalorder %s2309_s19, 1 }
   0xa   : > { %s3401_s20 = scalar_select %p3107_p1, 1, 0 }
   0xb   : > { %p3117_p4 = por %p3107_p1, %p52_p0  ;;  %p2310_p5 = scmp.ge.s32.totalorder %s3039_s17, 1 }
   0xc   : > { %p3122_p6 = por %p126_p3, %p52_p0  ;;  %p133_p7 = scmp.lt.s32.totalorder %s3039_s17, 3 }
   0xd   : > { %s3403_s22 = scalar_select %p3117_p4, 1, 0 }
   0xe   : > { %s3404_s23 = scalar_select %p3122_p6, 1, 0 }
   0xf   : > { %p3127_p8 = pnand %p2310_p5, %p133_p7  ;;  %s3041_s25 = smov [#allocation5]  }
  0x10   : > { %s145_s26 = sshll.u32 %s3041_s25, 4  ;;  %s3042_s28 = smov [#allocation7]   ;;  %s3131_s26 = int_to_ptr.vmem [resolvable:$true] %s145_s26 }
  0x11   : > { %p2653_p9 = pneg %p3127_p8  ;;  %s159_s29 = sshll.u32 %s3042_s28, 4  ;;  %s3142_s29 = int_to_ptr.vmem [resolvable:$true] %s159_s29 }
  0x12   : > { %s2867_s5 = scalar_lea.hbm %s3394_s1, 16384 }
  0x13   : > { %p3138_p11 = pnand %p2653_p9, %p3107_p1  ;;  %p2868_p12 = scmp.ne.s32.totalorder %s3394_s1, %s2867_s5 }
  0x14   : > { %p2874_p5 = scmp.lt.u32.totalorder %s2867_s5, %s3394_s1 }
  0x15   : > { %p2869_p13 = pneg %p3138_p11 }
  0x17   : > { %p2870_p0 = pnand %p2869_p13, %p2868_p12 }
  0x19   : > { %p2871_p3 = pneg %p2870_p0 }
  0x1b   : > { %p2876_p7 = pnand %p2874_p5, %p2871_p3 }
  0x1d   : > { %2879 = shalt.err (!%p2876_p7)
}
  0x1e   : > { %s2880_s10 = scalar_lea.vmem %s3131_s26, 16384  ;;  %p2888_p1 = scmp.lt.s32.totalorder %s3131_s26, %s3131_s26 }
  0x1f   : > { %p2881_p9 = scmp.ne.s32.totalorder %s3131_s26, %s2880_s10  ;;  %p2889_p12 = scmp.lt.s32.totalorder %s2880_s10, %s2880_s10 }
  0x21   : > { %p2883_p10 = pnand %p2881_p9, %p2869_p13  ;;  %p2890_p0 = por %p2889_p12, %p2888_p1 }
  0x23   : > { %p2884_p6 = pneg %p2883_p10 }
  0x25   : > { %p2891_p4 = pnand %p2890_p0, %p2884_p6 }
  0x27   : > { %2894 = shalt.err (!%p2891_p4)
}
  0x28   : > { %s3043_s11 = smov 64   ;;  %s3044_s18 = smov 4  }
  0x29   : > { %2656 = dma.hbm_to_vmem [thread:$0]  (!%p3138_p11), %s3394_s1, 16384, %s3131_s26, [#allocation6], %s3043_s11, %s3043_s11, %s3044_s18  }
  0x2a   : > { %s2895_s4 = scalar_lea.hbm %s3395_s2, 16 }
  0x2b   : > { %p2896_p1 = scmp.ne.s32.totalorder %s3395_s2, %s2895_s4  ;;  %p2902_p10 = scmp.lt.u32.totalorder %s2895_s4, %s3395_s2 }
  0x2d   : > { %p2898_p4 = pnand %p2896_p1, %p2869_p13 }
  0x2f   : > { %p2899_p6 = pneg %p2898_p4 }
  0x31   : > { %p2904_p3 = pnand %p2902_p10, %p2899_p6 }
  0x33   : > { %2907 = shalt.err (!%p2904_p3)
}
  0x34   : > { %s2908_s26 = scalar_lea.vmem %s3142_s29, 16  ;;  %s2915_s9 = scalar_lea.vmem %s3142_s29, 32 }
  0x35   : > { %p2909_p5 = scmp.ne.s32.totalorder %s3142_s29, %s2908_s26  ;;  %p2916_p12 = scmp.lt.s32.totalorder %s3142_s29, %s3142_s29 }
  0x36   : > { %p2917_p0 = scmp.lt.s32.totalorder %s2915_s9, %s2908_s26 }
  0x37   : > { %p2911_p7 = pnand %p2909_p5, %p2869_p13 }
  0x38   : > { %p2918_p1 = por %p2917_p0, %p2916_p12 }
  0x39   : > { %p2912_p9 = pneg %p2911_p7 }
  0x3b   : > { %p2919_p4 = pnand %p2918_p1, %p2912_p9 }
  0x3d   : > { %2922 = shalt.err (!%p2919_p4)
}
  0x3e   : > { %2659 = dma.hbm_to_vmem [thread:$0]  (!%p3138_p11), %s3395_s2, 16, %s3142_s29, [#allocation6]  }
  0x3f   : > { %s32_s18 = sadd.s32 1, %s3035_s16  ;;  %s39_s19 = sadd.s32 1, %s3027_s14 }
  0x40   : > { %p34_p13 = scmp.ge.s32.totalorder %s32_s18, 2  ;;  %p46_p6 = scmp.ne.s32.totalorder %s3027_s14, %s3023_s13 }
  0x41   : > { %p47_p10 = scmp.eq.s32.totalorder %s3039_s17, 0  ;;  %p2670_p3 = scmp.lt.s32.totalorder %s3039_s17, 2 }
  0x42   : > { %s3420_s18 = smov (%p34_p13, %s32_s18), 0  ;;  %p3207_p7 = por %p3111_p2, %p46_p6 }
  0x43   : > { %p48_p5 = por %p47_p10, %p46_p6  ;;  %s36_s25 = ssub.s32 %s3035_s16, %s3420_s18 }
  0x44   : > { %s3407_s27 = scalar_select %p3207_p7, 1, 0 }
  0x45   : > { %s170_s28 = sand.u32 1, %s3027_s14   ;;  %p37_p9 = scmp.eq.s32.totalorder %s36_s25, 0 }
  0x46   : > { %s2638_s29 = smul.u32 24, %s170_s28  ;;  %p3214_p11 = pnand %p2670_p3, %p48_p5 }
  0x47   : > { %s3219_s4 = scalar_select %p37_p9, %s3027_s14, %s39_s19  }
  0x48   : > { %s2639_s5 = smul.u32 384, %s3035_s16  ;;  %s174_s6 = scalar_lea.vmem [#allocation2], %s2638_s29 }
  0x49   : > { %s181_s7 = sshll.u32 %s174_s6, 4  ;;  %s3229_s9 = scalar_lea.sflag [#allocation3], %s170_s28  ;;  %s3227_s7 = int_to_ptr.vmem [resolvable:$true] %s181_s7 }
  0x4a   : > { %s3225_s26 = scalar_lea.hbm %s3393_s0, %s2639_s5  ;;  %p2925_p12 = pneg %p3214_p11 }
  0x4b   : > { %s2923_s10 = scalar_lea.hbm %s3225_s26, 384  ;;  %s2928_s25 = scalar_lea.hbm %s3393_s0, 768 }
  0x4c   : > { %p2924_p2 = scmp.ne.s32.totalorder %s3225_s26, %s2923_s10  ;;  %p2929_p4 = scmp.lt.u32.totalorder %s3225_s26, %s3393_s0 }
  0x4d   : > { %p2930_p13 = scmp.lt.u32.totalorder %s2928_s25, %s2923_s10  ;;  %p2932_p10 = scmp.lt.u32.totalorder %s2923_s10, %s3225_s26 }
  0x4e   : > { %p2926_p0 = pnand %p2925_p12, %p2924_p2 }
  0x4f   : > { %p2931_p6 = por %p2930_p13, %p2929_p4 }
  0x50   : > { %p2927_p1 = pneg %p2926_p0 }
  0x51   : > { %p2933_p3 = por %p2932_p10, %p2931_p6 }
  0x53   : > { %p2934_p5 = pnand %p2933_p3, %p2927_p1 }
  0x55   : > { %2937 = shalt.err (!%p2934_p5)
}
  0x56   : > { %s2938_s28 = scalar_lea.vmem %s3227_s7, 384  ;;  %s3045_s6 = smov [#allocation2]  }
  0x57   : > { %p2939_p9 = scmp.ne.s32.totalorder %s3227_s7, %s2938_s28  ;;  %s2943_s21 = sshll.u32 %s3045_s6, 4  ;;  %s2944_s21 = int_to_ptr.vmem [resolvable:$false] %s2943_s21 }
  0x58   : > { %s2945_s8 = scalar_lea.vmem %s2944_s21, 768  ;;  %p2946_p7 = scmp.lt.s32.totalorder %s3227_s7, %s2944_s21 }
  0x59   : > { %p2941_p2 = pnand %p2939_p9, %p2925_p12  ;;  %p2947_p4 = scmp.lt.s32.totalorder %s2945_s8, %s2938_s28 }
  0x5b   : > { %p2942_p0 = pneg %p2941_p2  ;;  %p2948_p13 = por %p2947_p4, %p2946_p7 }
  0x5d   : > { %p2949_p6 = pnand %p2948_p13, %p2942_p0 }
  0x5f   : > { %2952 = shalt.err (!%p2949_p6)
}
  0x60   : > { %s3046_s10 = smov 128   ;;  %s3047_s11 = smov 8  }
  0x61   : > { %2663 = dma.hbm_to_vmem [thread:$0]  (!%p3214_p11), %s3225_s26, 384, %s3227_s7, %s3229_s9, %s3046_s10, %s3046_s10, %s3047_s11  }
  0x62   : > { %193 = sbr.rel (%p3127_p8) target bundleno = 483 (0x1e3), region = 32  ;;  %s3260_s19 = sand.u32 (!%p3127_p8), 1, %s3023_s13  }
  0x63   : > { %s2640_s25 = smul.u32 (!%p3127_p8), 24, %s3260_s19  ;;  %s196_s29 = scalar_lea.sflag (!%p3127_p8), [#allocation3], %s3260_s19 }
  0x64   : > { %p3409_p7 = scmp.ne.s32.totalorder (!%p3127_p8), %s3403_s22, 0 }
  0x65   : > { %s3264_s5 = scalar_lea.vmem (!%p3127_p8), [#allocation2], %s2640_s25 }
  0x69   : > { %3006 = dma.done.wait (%p3409_p7), %s196_s29, 384  }
  0x6a   : > { %3008 = vsyncadd (%p3409_p7), %s196_s29, 4294966912  ;;  %p3410_p11 = scmp.ne.s32.totalorder %s3401_s20, 0 }
  0x6c   : > { %3010 = dma.done.wait (%p3410_p11), [#allocation6], 16400  }
  0x6d   : > { %3012 = vsyncadd (%p3410_p11), [#allocation6], 4294950896  ;;  %v2732_v0 = vld [vmem:[#allocation5 + $0x40] sm:$0xff]   ;;  %v2736_v4 = vld [vmem:[#allocation5 + $0x48] sm:$0xff]   ;;  %v3048_v22 = vmov 1983009808   ;;  %v254_v24 = vlaneseq }
  0x6e   : > { %v2733_v1 = vld [vmem:[#allocation5 + $0xc0] sm:$0xff]   ;;  %2462 = vmatprep.subr.bf16.mxu0 %v2732_v0  ;;  %v2737_v5 = vld [vmem:[#allocation5 + $0xc8] sm:$0xff]   ;;  %v2740_v8 = vld [vmem:[#allocation5 + $0x50] sm:$0xff]   ;;  %v252_v23 = vunpack.c.l.s4 %v3048_v22  ;;  %v3049_v32 = vmov 1966171168   ;;  %s2318_s20 = sshll.u32 %s3260_s19, 1 }
  0x6f   : > { %v2734_v2 = vld [vmem:[#allocation5] sm:$0xff]   ;;  %2484 = vmatprep.subr.bf16.mxu1 %v2733_v1  ;;  %v2738_v6 = vld [vmem:[#allocation5 + $0x8] sm:$0xff]   ;;  %v2741_v9 = vld [vmem:[#allocation5 + $0xd0] sm:$0xff]   ;;  %v255_v30 = vshrl.u32 %v254_v24, 7  ;;  %v509_v33 = vunpack.c.l.s4 %v3049_v32  ;;  %s2461_s22 = sshll.u32 %s3031_s15, 5  ;;  %s229_s24 = scalar_lea.vmem [#allocation8], %s2318_s20 }
  0x70   : > { %v2735_v3 = vld [vmem:[#allocation5 + $0x80] sm:$0xff]   ;;  %2463 = vmatpush3.bf16.msra.mxu0 %v2734_v2  ;;  %v2739_v7 = vld [vmem:[#allocation5 + $0x88] sm:$0xff]   ;;  %v2742_v10 = vld [vmem:[#allocation5 + $0x10] sm:$0xff]   ;;  %v253_v29 = vunpack.c.0.s8 %v252_v23  ;;  %s2199_s30 = sshll.u32 %s229_s24, 4  ;;  %s3342_s9 = scalar_lea.hbm %s3396_s3, %s2461_s22  ;;  %s3344_s30 = int_to_ptr.vmem [resolvable:$true] %s2199_s30 }
  0x71   : > { %2485 = vmatpush3.bf16.msra.mxu1 %v2735_v3  ;;  %2464 = vmatprep.subr.bf16.mxu0 %v2736_v4  ;;  %v2743_v11 = vld [vmem:[#allocation5 + $0x90] sm:$0xff]   ;;  %v2744_v12 = vld [vmem:[#allocation5 + $0x58] sm:$0xff]   ;;  %v2748_v16 = vld [vmem:[#allocation5 + $0x60] sm:$0xff]   ;;  %v510_v39 = vunpack.c.0.s8 %v509_v33  ;;  %s2184_s28 = scalar_lea.sflag [#allocation4], %s3260_s19  ;;  %s2953_s6 = scalar_lea.vmem %s3344_s30, 32 }
  0x72   : > { %2486 = vmatprep.subr.bf16.mxu1 %v2737_v5  ;;  %v2745_v13 = vld [vmem:[#allocation5 + $0xd8] sm:$0xff]   ;;  %v2749_v17 = vld [vmem:[#allocation5 + $0xe0] sm:$0xff]   ;;  %v2752_v20 = vld [vmem:[#allocation5 + $0x68] sm:$0xff]   ;;  %v3274_v37 = vsub.s32 %v253_v29, %v255_v30  ;;  %p2954_p8 = scmp.ne.s32.totalorder %s3344_s30, %s2953_s6  ;;  %p3411_p12 = scmp.ne.s32.totalorder %s3407_s27, 0 }
  0x73   : > { %v2746_v14 = vld [vmem:[#allocation5 + $0x18] sm:$0xff]   ;;  %v2750_v18 = vld [vmem:[#allocation5 + $0x20] sm:$0xff]   ;;  %v2753_v21 = vld [vmem:[#allocation5 + $0xe8] sm:$0xff]   ;;  %v3280_v48 = vsub.s32 %v510_v39, %v255_v30  ;;  %s3050_s15 = smov [#allocation8]  }
  0x74   : > { %2465 = vmatpush3.bf16.msra.mxu0 %v2738_v6  ;;  %v2747_v15 = vld [vmem:[#allocation5 + $0x98] sm:$0xff]   ;;  %v2751_v19 = vld [vmem:[#allocation5 + $0xa0] sm:$0xff]   ;;  %v2754_v25 = vld [vmem:[#allocation5 + $0x28] sm:$0xff]   ;;  %p2955_p1 = pnand %p2954_p8, %p3411_p12  ;;  %s2957_s21 = sshll.u32 %s3050_s15, 4  ;;  %s2958_s21 = int_to_ptr.vmem [resolvable:$false] %s2957_s21 }
  0x75   : > { %2487 = vmatpush3.bf16.msra.mxu1 %v2739_v7  ;;  %2466 = vmatprep.subr.bf16.mxu0 %v2740_v8  ;;  %v2755_v26 = vld [vmem:[#allocation5 + $0xa8] sm:$0xff]   ;;  %v2756_v27 = vld [vmem:[#allocation5 + $0x70] sm:$0xff]   ;;  %v2760_v35 = vld [vmem:[#allocation5 + $0x78] sm:$0xff]   ;;  %s2959_s8 = scalar_lea.vmem %s2958_s21, 64  ;;  %p2960_p3 = scmp.lt.s32.totalorder %s3344_s30, %s2958_s21 }
  0x76   : > { %2488 = vmatprep.subr.bf16.mxu1 %v2741_v9  ;;  %v2757_v28 = vld [vmem:[#allocation5 + $0xf0] sm:$0xff]   ;;  %v2761_v36 = vld [vmem:[#allocation5 + $0xf8] sm:$0xff]   ;;  %v2766_v47 = vld [vmem:[#allocation5 + $0x140] sm:$0xff]   ;;  %p2956_p10 = pneg %p2955_p1  ;;  %p2961_p5 = scmp.lt.s32.totalorder %s2959_s8, %s2953_s6 }
  0x77   : > { %v2758_v31 = vld [vmem:[#allocation5 + $0x30] sm:$0xff]   ;;  %v2762_v38 = vld [vmem:[#allocation5 + $0x38] sm:$0xff]   ;;  %v2767_v49 = vld [vmem:[#allocation5 + $0x1c0] sm:$0xff]  }
  0x78   : > { %2467 = vmatpush3.bf16.msra.mxu0 %v2742_v10  ;;  %v2759_v34 = vld [vmem:[#allocation5 + $0xb0] sm:$0xff]   ;;  %v2763_v40 = vld [vmem:[#allocation5 + $0xb8] sm:$0xff]   ;;  %v2768_v8 = vld [vmem:[#allocation5 + $0x100] sm:$0xff]   ;;  %p2962_p9 = por %p2961_p5, %p2960_p3 }
  0x79   : > { %2489 = vmatpush3.bf16.msra.mxu1 %v2743_v11  ;;  %2468 = vmatprep.subr.bf16.mxu0 %v2744_v12  ;;  %v236_v41 = vld [vmem:[%s3264_s5] sm:$0x55]  ;;  %v237_v42 = vld [vmem:[%s3264_s5 + $0x8] sm:$0x55]  ;;  %v2769_v10 = vld [vmem:[#allocation5 + $0x180] sm:$0xff]  }
  0x7a   : > { %2490 = vmatprep.subr.bf16.mxu1 %v2745_v13  ;;  %v250_v43 = vcombine.high %v236_v41, %v236_v41  ;;  %v257_v44 = vrot.slane %v236_v41, %v3274_v37  ;;  %v267_v45 = vcombine.high %v237_v42, %v237_v42  ;;  %v274_v46 = vrot.slane %v237_v42, %v3274_v37  ;;  %v2770_v12 = vld [vmem:[#allocation5 + $0x148] sm:$0xff]   ;;  %v2779_v22 = vld [vmem:[#allocation5 + $0x1d8] sm:$0xff]   ;;  %v2782_v29 = vld [vmem:[#allocation5 + $0x160] sm:$0xff]   ;;  %p2963_p2 = pnand %p2962_p9, %p2956_p10 }
  0x7b   : > { %v2780_v23 = vld [vmem:[#allocation5 + $0x118] sm:$0xff]   ;;  %v238_v24 = vld [vmem:[%s3264_s5] sm:$0xff]  ;;  %v2783_v32 = vld [vmem:[#allocation5 + $0x1e0] sm:$0xff]  }
  0x7c   : > { %2469 = vmatpush3.bf16.msra.mxu0 %v2746_v14  ;;  %v264_v50 = vrot.slane %v250_v43, %v3274_v37  ;;  %v265_v51 = vcombine.high %v257_v44, %v257_v44  ;;  %v281_v52 = vrot.slane %v267_v45, %v3274_v37  ;;  %v282_v53 = vcombine.high %v274_v46, %v274_v46  ;;  %v2771_v14 = vld [vmem:[#allocation5 + $0x1c8] sm:$0xff]   ;;  %v2784_v33 = vld [vmem:[#allocation5 + $0x120] sm:$0xff]  }
  0x7d   : > { %2491 = vmatpush3.bf16.msra.mxu1 %v2747_v15  ;;  %2470 = vmatprep.subr.bf16.mxu0 %v2748_v16  ;;  %v2772_v15 = vld [vmem:[#allocation5 + $0x108] sm:$0xff]   ;;  %v2785_v43 = vld [vmem:[#allocation5 + $0x1a0] sm:$0xff]  }
  0x7e   : > { %2492 = vmatprep.subr.bf16.mxu1 %v2749_v17  ;;  %v266_v54 = vcombine.high %v264_v50, %v264_v50  ;;  %v283_v55 = vcombine.high %v281_v52, %v281_v52  ;;  %v504_v56 = vcombine.low %v257_v44, %v265_v51  ;;  %v602_v57 = vcombine.low %v274_v46, %v282_v53  ;;  %v2773_v16 = vld [vmem:[#allocation5 + $0x188] sm:$0xff]   ;;  %v2774_v17 = vld [vmem:[#allocation5 + $0x150] sm:$0xff]  }
  0x80   : > { %2471 = vmatpush3.bf16.msra.mxu0 %v2750_v18  ;;  %v505_v58 = vcombine.low %v264_v50, %v266_v54  ;;  %v514_v59 = vrot.slane %v504_v56, %v3280_v48  ;;  %v603_v60 = vcombine.low %v281_v52, %v283_v55  ;;  %v612_v61 = vrot.slane %v602_v57, %v3280_v48  ;;  %v2775_v18 = vld [vmem:[#allocation5 + $0x1d0] sm:$0xff]   ;;  %v2787_v54 = vld [vmem:[#allocation5 + $0x1e8] sm:$0xff]  }
  0x81   : > { %2493 = vmatpush3.bf16.msra.mxu1 %v2751_v19  ;;  %2472 = vmatprep.subr.bf16.mxu0 %v2752_v20  ;;  %v2776_v19 = vld [vmem:[#allocation5 + $0x110] sm:$0xff]  }
  0x82   : > { %2494 = vmatprep.subr.bf16.mxu1 %v2753_v21  ;;  %v521_v62 = vrot.slane %v505_v58, %v3280_v48  ;;  %v619_v63 = vrot.slane %v603_v60, %v3280_v48  ;;  %v2777_v20 = vld [vmem:[#allocation5 + $0x190] sm:$0xff]   ;;  %v2778_v21 = vld [vmem:[#allocation5 + $0x158] sm:$0xff]  }
  0x84   : > { %2473 = vmatpush3.bf16.msra.mxu0 %v2754_v25  ;;  %v536_v0 = vcombine.low %v514_v59, %v521_v62  ;;  %v634_v1 = vcombine.low %v612_v61, %v619_v63  ;;  %v2781_v25 = vld [vmem:[#allocation5 + $0x198] sm:$0xff]   ;;  %v2788_v59 = vld [vmem:[#allocation5 + $0x128] sm:$0xff]  }
  0x85   : > { %2495 = vmatpush3.bf16.msra.mxu1 %v2755_v26  ;;  %2474 = vmatprep.subr.bf16.mxu0 %v2756_v27  ;;  %v239_v26 = vld [vmem:[%s3264_s5 + $0x8] sm:$0xff]  ;;  %v286_v27 = vcombine.high %v238_v24, %v238_v24 }
  0x86   : > { %2496 = vmatprep.subr.bf16.mxu1 %v2757_v28  ;;  %v544_v2 = vrot.slane %v536_v0, %v3280_v48  ;;  %v642_v3 = vrot.slane %v634_v1, %v3280_v48  ;;  %v293_v28 = vrot.slane %v238_v24, %v3274_v37  ;;  %v303_v30 = vcombine.high %v239_v26, %v239_v26  ;;  %v2789_v0 = vld [vmem:[#allocation5 + $0x1a8] sm:$0xff]   ;;  %v2790_v1 = vld [vmem:[#allocation5 + $0x170] sm:$0xff]  }
  0x88   : > { %2475 = vmatpush3.bf16.msra.mxu0 %v2758_v31  ;;  %v2324_v4 = vcombine.low %v544_v2, %v642_v3  ;;  %v310_v31 = vrot.slane %v239_v26, %v3274_v37  ;;  %v317_v39 = vrot.slane %v303_v30, %v3274_v37 }
  0x89   : > { %2497 = vmatpush3.bf16.msra.mxu1 %v2759_v34  ;;  %2476 = vmatprep.subr.bf16.mxu0 %v2760_v35  ;;  %v300_v34 = vrot.slane %v286_v27, %v3274_v37  ;;  %v301_v35 = vcombine.high %v293_v28, %v293_v28 }
  0x8a   : > { %2498 = vmatprep.subr.bf16.mxu1 %v2761_v36  ;;  %v971_v5 = vrot.slane %v2324_v4, %v3280_v48  ;;  %v321_v36 = vshrl.u32 %v293_v28, 16  ;;  %v349_v41 = vshrl.u32 %v310_v31, 16  ;;  %v351_v42 = vshll.u32 %v310_v31, 16 }
  0x8b   : > { %v302_v44 = vcombine.high %v300_v34, %v300_v34  ;;  %v328_v46 = vshrl.u32 %v301_v35, 16  ;;  %v319_v50 = vcombine.high %v317_v39, %v317_v39  ;;  %v335_v51 = vshrl.u32 %v300_v34, 16 }
  0x8c   : > { %2477 = vmatpush3.bf16.msra.mxu0 %v2762_v38  ;;  %v979_v6 = vcombine.high %v971_v5, %v971_v5  ;;  %v987_v7 = vrot.slane %v971_v5, %v3280_v48  ;;  %v323_v38 = vshll.u32 %v293_v28, 16  ;;  %v337_v52 = vshll.u32 %v300_v34, 16  ;;  %v2796_v28 = vld [vmem:[#allocation5 + $0x138] sm:$0xff]  }
  0x8d   : > { %2499 = vmatpush3.bf16.msra.mxu1 %v2763_v40  ;;  %2506 = vmatprep.subr.bf16.mxu0 %v2766_v47  ;;  %v318_v40 = vcombine.high %v310_v31, %v310_v31  ;;  %v330_v47 = vshll.u32 %v301_v35, 16  ;;  %v353_v53 = vrot.slane %v351_v42, 1  ;;  %v342_v57 = vshrl.u32 %v302_v44, 16  ;;  %v2800_v31 = vld [vmem:[#allocation5 + $0x240] sm:$0xff]  }
  0x8e   : > { %2528 = vmatprep.subr.bf16.mxu1 %v2767_v49  ;;  %v1001_v9 = vrot.slane %v979_v6, %v3280_v48  ;;  %v1009_v11 = vcombine.high %v987_v7, %v987_v7  ;;  %v325_v45 = vrot.slane %v323_v38, 1  ;;  %v2786_v49 = vld [vmem:[#allocation5 + $0x168] sm:$0xff]   ;;  %v344_v58 = vshll.u32 %v302_v44, 16  ;;  %v2791_v6 = vld [vmem:[#allocation5 + $0x1f0] sm:$0xff]   ;;  %v2801_v35 = vld [vmem:[#allocation5 + $0x2c0] sm:$0xff]  }
  0x8f   : > { %v332_v56 = vrot.slane %v330_v47, 1  ;;  %v339_v60 = vrot.slane %v337_v52, 1  ;;  %v354_v61 = vor.u32 %v353_v53, %v349_v41  ;;  %v356_v62 = vshrl.u32 %v318_v40, 16  ;;  %v2802_v42 = vld [vmem:[#allocation5 + $0x200] sm:$0xff]   ;;  %v2808_v52 = vld [vmem:[#allocation5 + $0x250] sm:$0xff]  }
  0x90   : > { %1879 = vmatprep.mubr.bf16.mxu0 %v1001_v9  ;;  %v1011_v13 = vcombine.high %v1001_v9, %v1001_v9  ;;  %v326_v55 = vor.u32 %v325_v45, %v321_v36  ;;  %v358_v63 = vshll.u32 %v318_v40, 16  ;;  %v346_v3 = vrot.slane %v344_v58, 1  ;;  %v2803_v44 = vld [vmem:[#allocation5 + $0x280] sm:$0xff]   ;;  %v2319_v53 = vld [vmem:[%s3264_s5 + $0x8] sm:$0x55] }
  0x91   : > { %1880 = vmatmul.mubr.bf16.vlgmr.msra.gmra.mrb[0].mxu0 %v987_v7  ;;  %v333_v2 = vor.u32 %v332_v56, %v328_v46  ;;  %v363_v4 = vshrl.u32 %v317_v39, 16  ;;  %v365_v5 = vshll.u32 %v317_v39, 16  ;;  %v340_v7 = vor.u32 %v339_v60, %v335_v51  ;;  %v2804_v46 = vld [vmem:[#allocation5 + $0x248] sm:$0xff]   ;;  %v2810_v60 = vld [vmem:[#allocation5 + $0x210] sm:$0xff]  }
  0x92   : > { %1919 = vmatprep.mubr.bf16.mxu1 %v1011_v13  ;;  %2507 = vmatpush3.bf16.msra.mxu0 %v2768_v8  ;;  %v360_v8 = vrot.slane %v358_v63, 1  ;;  %v370_v9 = vshrl.u32 %v319_v50, 16  ;;  %v2807_v51 = vld [vmem:[#allocation5 + $0x288] sm:$0xff]   ;;  %v385_v56 = vrot.slane %v2319_v53, %v3274_v37  ;;  %v2812_v63 = vld [vmem:[#allocation5 + $0x258] sm:$0xff]  }
  0x93   : > { %1920 = vmatmul.mubr.bf16.vlgmr.msra.gmra.mrb[0].mxu1 %v1009_v11  ;;  %2508 = vmatprep.subr.bf16.mxu0 %v2770_v12  ;;  %v2792_v11 = vld [vmem:[#allocation5 + $0x130] sm:$0xff]   ;;  %v347_v12 = vor.u32 %v346_v3, %v342_v57  ;;  %v367_v13 = vrot.slane %v365_v5, 1  ;;  %v2813_v5 = vld [vmem:[#allocation5 + $0x2d8] sm:$0xff]  }
  0x94   : > { %2529 = vmatpush3.bf16.msra.mxu1 %v2769_v10  ;;  %v372_v10 = vshll.u32 %v319_v50, 16  ;;  %v2806_v50 = vld [vmem:[#allocation5 + $0x208] sm:$0xff]   ;;  %v2809_v57 = vld [vmem:[#allocation5 + $0x2d0] sm:$0xff]  }
  0x95   : > { %2530 = vmatprep.subr.bf16.mxu1 %v2771_v14  ;;  %v506_v14 = vcombine.low %v326_v55, %v333_v2  ;;  %v378_v55 = vcombine.high %v2319_v53, %v2319_v53  ;;  %v2811_v2 = vld [vmem:[#allocation5 + $0x290] sm:$0xff]  }
  0x96   : > { %2509 = vmatpush3.bf16.msra.mxu0 %v2772_v15  ;;  %v2794_v15 = vld [vmem:[#allocation5 + $0x178] sm:$0xff]   ;;  %v2842_v53 = vld [vmem:[#allocation5 + $0x350] sm:$0xff]  }
  0x97   : > { %2510 = vmatprep.subr.bf16.mxu0 %v2774_v17  ;;  %v374_v17 = vrot.slane %v372_v10, 1 }
  0x98   : > { %2531 = vmatpush3.bf16.msra.mxu1 %v2773_v16  ;;  %v361_v16 = vor.u32 %v360_v8, %v356_v62  ;;  %v393_v62 = vcombine.high %v385_v56, %v385_v56  ;;  %v2814_v8 = vld [vmem:[#allocation5 + $0x218] sm:$0xff]  }
  0x99   : > { %2532 = vmatprep.subr.bf16.mxu1 %v2775_v18  ;;  %v368_v18 = vor.u32 %v367_v13, %v363_v4 }
  0x9a   : > { %2511 = vmatpush3.bf16.msra.mxu0 %v2776_v19  ;;  %v507_v19 = vcombine.low %v340_v7, %v347_v12  ;;  %v553_v4 = vcombine.low %v385_v56, %v393_v62  ;;  %v2843_v56 = vld [vmem:[#allocation5 + $0x3d0] sm:$0xff]  }
  0x9b   : > { %2512 = vmatprep.subr.bf16.mxu0 %v2778_v21  ;;  %v375_v21 = vor.u32 %v374_v17, %v370_v9 }
  0x9c   : > { %2533 = vmatpush3.bf16.msra.mxu1 %v2777_v20  ;;  %v528_v20 = vrot.slane %v506_v14, %v3280_v48  ;;  %v535_v24 = vrot.slane %v507_v19, %v3280_v48  ;;  %v563_v10 = vrot.slane %v553_v4, %v3280_v48  ;;  %v2815_v14 = vld [vmem:[#allocation5 + $0x298] sm:$0xff]  }
  0x9d   : > { %2534 = vmatprep.subr.bf16.mxu1 %v2779_v22  ;;  %v604_v22 = vcombine.low %v354_v61, %v361_v16  ;;  %v605_v26 = vcombine.low %v368_v18, %v375_v21  ;;  %v392_v61 = vrot.slane %v378_v55, %v3274_v37  ;;  %v2817_v16 = vld [vmem:[#allocation5 + $0x2e0] sm:$0xff]  }
  0x9e   : > { %2513 = vmatpush3.bf16.msra.mxu0 %v2780_v23  ;;  %v2793_v23 = vld [vmem:[#allocation5 + $0x1b0] sm:$0xff]   ;;  %v2818_v18 = vld [vmem:[#allocation5 + $0x220] sm:$0xff]  }
  0x9f   : > { %2514 = vmatprep.subr.bf16.mxu0 %v2782_v29  ;;  %v626_v27 = vrot.slane %v604_v22, %v3280_v48  ;;  %v537_v29 = vcombine.low %v528_v20, %v535_v24  ;;  %v633_v30 = vrot.slane %v605_v26, %v3280_v48  ;;  %v394_v3 = vcombine.high %v392_v61, %v392_v61  ;;  %v2820_v20 = vld [vmem:[#allocation5 + $0x268] sm:$0xff]   ;;  %v2819_v22 = vld [vmem:[#allocation5 + $0x2a0] sm:$0xff]  }
  0xa0   : > { %2535 = vmatpush3.bf16.msra.mxu1 %v2781_v25  ;;  %v2795_v25 = vld [vmem:[#allocation5 + $0x1f8] sm:$0xff]   ;;  %v2821_v24 = vld [vmem:[#allocation5 + $0x2e8] sm:$0xff]  }
  0xa1   : > { %2536 = vmatprep.subr.bf16.mxu1 %v2783_v32  ;;  %v2797_v32 = vld [vmem:[#allocation5 + $0x1b8] sm:$0xff]   ;;  %v635_v34 = vcombine.low %v626_v27, %v633_v30  ;;  %v554_v9 = vcombine.low %v392_v61, %v394_v3  ;;  %v2822_v26 = vld [vmem:[#allocation5 + $0x228] sm:$0xff]   ;;  %v2824_v27 = vld [vmem:[#allocation5 + $0x270] sm:$0xff]  }
  0xa2   : > { %2515 = vmatpush3.bf16.msra.mxu0 %v2784_v33  ;;  %v551_v33 = vrot.slane %v537_v29, %v3280_v48  ;;  %v2823_v29 = vld [vmem:[#allocation5 + $0x2a8] sm:$0xff]   ;;  %v2825_v30 = vld [vmem:[#allocation5 + $0x2f0] sm:$0xff]   ;;  %v2322_v55 = vld [vmem:[%s3264_s5 + $0x10] sm:$0xff] }
  0xa3   : > { %2516 = vmatprep.subr.bf16.mxu0 %v2786_v49  ;;  %v3305_v36 = vrot.slane %v635_v34, %v3280_v48  ;;  %v2805_v49 = vld [vmem:[#allocation5 + $0x2c8] sm:$0xff]  }
  0xa4   : > { %2537 = vmatpush3.bf16.msra.mxu1 %v2785_v43 }
  0xa5   : > { %2538 = vmatprep.subr.bf16.mxu1 %v2787_v54  ;;  %v2325_v38 = vcombine.low %v551_v33, %v3305_v36  ;;  %v2320_v54 = vld [vmem:[%s3264_s5 + $0x10] sm:$0x55] }
  0xa6   : > { %2517 = vmatpush3.bf16.msra.mxu0 %v2788_v59  ;;  %v395_v58 = vcombine.high %v2320_v54, %v2320_v54  ;;  %v402_v59 = vrot.slane %v2320_v54, %v3274_v37  ;;  %v2828_v33 = vld [vmem:[#allocation5 + $0x278] sm:$0xff]   ;;  %v2841_v54 = vld [vmem:[#allocation5 + $0x388] sm:$0xff]  }
  0xa7   : > { %2518 = vmatprep.subr.bf16.mxu0 %v2790_v1  ;;  %v978_v39 = vrot.slane %v2325_v38, %v3280_v48  ;;  %v2829_v38 = vld [vmem:[#allocation5 + $0x2f8] sm:$0xff]  }
  0xa8   : > { %2539 = vmatpush3.bf16.msra.mxu1 %v2789_v0  ;;  %v409_v0 = vrot.slane %v395_v58, %v3274_v37  ;;  %v410_v1 = vcombine.high %v402_v59, %v402_v59  ;;  %v438_v58 = vrot.slane %v2322_v55, %v3274_v37 }
  0xa9   : > { %2540 = vmatprep.subr.bf16.mxu1 %v2791_v6  ;;  %v980_v40 = vcombine.high %v978_v39, %v978_v39  ;;  %v994_v41 = vrot.slane %v978_v39, %v3280_v48 }
  0xaa   : > { %2519 = vmatpush3.bf16.msra.mxu0 %v2792_v11  ;;  %v411_v6 = vcombine.high %v409_v0, %v409_v0  ;;  %v651_v7 = vcombine.low %v402_v59, %v410_v1  ;;  %v2816_v11 = vld [vmem:[#allocation5 + $0x260] sm:$0xff]   ;;  %v2844_v59 = vld [vmem:[#allocation5 + $0x310] sm:$0xff]   ;;  %v446_v62 = vcombine.high %v438_v58, %v438_v58 }
  0xab   : > { %2520 = vmatprep.subr.bf16.mxu0 %v2794_v15  ;;  %v1008_v43 = vrot.slane %v980_v40, %v3280_v48  ;;  %v1010_v45 = vcombine.high %v994_v41, %v994_v41  ;;  %v570_v15 = vrot.slane %v554_v9, %v3280_v48  ;;  %v2830_v40 = vld [vmem:[#allocation5 + $0x238] sm:$0xff]   ;;  %v2845_v1 = vld [vmem:[#allocation5 + $0x390] sm:$0xff]  }
  0xac   : > { %2541 = vmatpush3.bf16.msra.mxu1 %v2793_v23  ;;  %v652_v12 = vcombine.low %v409_v0, %v411_v6  ;;  %v661_v13 = vrot.slane %v651_v7, %v3280_v48  ;;  %v479_v0 = vshll.u32 %v438_v58, 16  ;;  %v486_v6 = vshll.u32 %v446_v62, 16  ;;  %v2848_v7 = vld [vmem:[#allocation5 + $0x318] sm:$0xff]  }
  0xad   : > { %2542 = vmatprep.subr.bf16.mxu1 %v2795_v25  ;;  %1959 = vmatprep.mubr.bf16.mxu0 %v1008_v43  ;;  %v1012_v47 = vcombine.high %v1008_v43, %v1008_v43  ;;  %v585_v19 = vcombine.low %v563_v10, %v570_v15  ;;  %v2834_v43 = vld [vmem:[#allocation5 + $0x340] sm:$0xff]   ;;  %v2849_v15 = vld [vmem:[#allocation5 + $0x398] sm:$0xff]  }
  0xae   : > { %2521 = vmatpush3.bf16.msra.mxu0 %v2796_v28  ;;  %v668_v17 = vrot.slane %v652_v12, %v3280_v48  ;;  %v481_v4 = vrot.slane %v479_v0, 1  ;;  %v2850_v10 = vld [vmem:[#allocation5 + $0x360] sm:$0xff]   ;;  %v488_v12 = vrot.slane %v486_v6, 1 }
  0xaf   : > { %2550 = vmatprep.subr.bf16.mxu0 %v2800_v31  ;;  %1999 = vmatprep.mubr.bf16.mxu1 %v1012_v47  ;;  %v593_v23 = vrot.slane %v585_v19, %v3280_v48 }
  0xb0   : > { %2543 = vmatpush3.bf16.msra.mxu1 %v2797_v32  ;;  %v683_v21 = vcombine.low %v661_v13, %v668_v17  ;;  %v2826_v32 = vld [vmem:[#allocation5 + $0x230] sm:$0xff]   ;;  %v2851_v17 = vld [vmem:[#allocation5 + $0x3e0] sm:$0xff]  }
  0xb1   : > { %2572 = vmatprep.subr.bf16.mxu1 %v2801_v35  ;;  %1960 = vmatmul.mubr.bf16.vlgmr.msra.gmra.mrb[4].mxu0 %v994_v41  ;;  %v2827_v35 = vld [vmem:[#allocation5 + $0x2b0] sm:$0xff]  }
  0xb2   : > { %2551 = vmatpush3.bf16.msra.mxu0 %v2802_v42  ;;  %v691_v25 = vrot.slane %v683_v21, %v3280_v48 }
  0xb3   : > { %2000 = vmatmul.mubr.bf16.vlgmr.msra.gmra.mrb[4].mxu1 %v1010_v45  ;;  %2552 = vmatprep.subr.bf16.mxu0 %v2804_v46  ;;  %v2835_v45 = vld [vmem:[#allocation5 + $0x3c0] sm:$0xff]  }
  0xb4   : > { %2573 = vmatpush3.bf16.msra.mxu1 %v2803_v44  ;;  %v2326_v28 = vcombine.low %v593_v23, %v691_v25  ;;  %v2831_v44 = vld [vmem:[#allocation5 + $0x2b8] sm:$0xff]   ;;  %v2836_v46 = vld [vmem:[#allocation5 + $0x300] sm:$0xff]  }
  0xb5   : > { %2574 = vmatprep.subr.bf16.mxu1 %v2805_v49  ;;  %v2838_v49 = vld [vmem:[#allocation5 + $0x348] sm:$0xff]   ;;  %v2853_v25 = vld [vmem:[#allocation5 + $0x3a0] sm:$0xff]  }
  0xb6   : > { %2553 = vmatpush3.bf16.msra.mxu0 %v2806_v50  ;;  %v1021_v31 = vrot.slane %v2326_v28, %v3280_v48  ;;  %v2837_v50 = vld [vmem:[#allocation5 + $0x380] sm:$0xff]  }
  0xb7   : > { %2554 = vmatprep.subr.bf16.mxu0 %v2808_v52  ;;  %v2840_v52 = vld [vmem:[#allocation5 + $0x308] sm:$0xff]  }
  0xb8   : > { %2575 = vmatpush3.bf16.msra.mxu1 %v2807_v51  ;;  %v1029_v34 = vcombine.high %v1021_v31, %v1021_v31  ;;  %v1037_v42 = vrot.slane %v1021_v31, %v3280_v48  ;;  %v2839_v51 = vld [vmem:[#allocation5 + $0x3c8] sm:$0xff]  }
  0xb9   : > { %2576 = vmatprep.subr.bf16.mxu1 %v2809_v57  ;;  %v431_v57 = vcombine.high %v2322_v55, %v2322_v55 }
  0xba   : > { %2555 = vmatpush3.bf16.msra.mxu0 %v2810_v60  ;;  %v1051_v39 = vrot.slane %v1029_v34, %v3280_v48  ;;  %v1059_v47 = vcombine.high %v1037_v42, %v1037_v42  ;;  %v2846_v60 = vld [vmem:[#allocation5 + $0x358] sm:$0xff]  }
  0xbb   : > { %2556 = vmatprep.subr.bf16.mxu0 %v2812_v63  ;;  %v445_v61 = vrot.slane %v431_v57, %v3274_v37  ;;  %v477_v63 = vshrl.u32 %v438_v58, 16 }
  0xbc   : > { %2577 = vmatpush3.bf16.msra.mxu1 %v2811_v2  ;;  %2039 = vmatprep.mubr.bf16.mxu0 %v1051_v39  ;;  %v1061_v41 = vcombine.high %v1051_v39, %v1051_v39  ;;  %v2847_v2 = vld [vmem:[#allocation5 + $0x3d8] sm:$0xff]  }
  0xbd   : > { %2578 = vmatprep.subr.bf16.mxu1 %v2813_v5  ;;  %v447_v3 = vcombine.high %v445_v61, %v445_v61  ;;  %v484_v5 = vshrl.u32 %v446_v62, 16  ;;  %v493_v9 = vshll.u32 %v445_v61, 16 }
  0xbe   : > { %2557 = vmatpush3.bf16.msra.mxu0 %v2814_v8  ;;  %2079 = vmatprep.mubr.bf16.mxu1 %v1061_v41  ;;  %v491_v8 = vshrl.u32 %v445_v61, 16  ;;  %v2863_v41 = vld [vmem:[#allocation5 + $0x3f8] sm:$0xff]  }
  0xbf   : > { %2558 = vmatprep.subr.bf16.mxu0 %v2816_v11  ;;  %v482_v11 = vor.u32 %v481_v4, %v477_v63  ;;  %v498_v13 = vshrl.u32 %v447_v3, 16 }
  0xc0   : > { %2579 = vmatpush3.bf16.msra.mxu1 %v2815_v14  ;;  %v500_v14 = vshll.u32 %v447_v3, 16 }
  0xc1   : > { %2580 = vmatprep.subr.bf16.mxu1 %v2817_v16  ;;  %v495_v16 = vrot.slane %v493_v9, 1 }
  0xc2   : > { %2559 = vmatpush3.bf16.msra.mxu0 %v2818_v18  ;;  %v489_v18 = vor.u32 %v488_v12, %v484_v5  ;;  %v502_v19 = vrot.slane %v500_v14, 1 }
  0xc3   : > { %2560 = vmatprep.subr.bf16.mxu0 %v2820_v20  ;;  %v2852_v20 = vld [vmem:[#allocation5 + $0x320] sm:$0xff]   ;;  %v496_v21 = vor.u32 %v495_v16, %v491_v8 }
  0xc4   : > { %2581 = vmatpush3.bf16.msra.mxu1 %v2819_v22  ;;  %v2854_v22 = vld [vmem:[#allocation5 + $0x368] sm:$0xff]   ;;  %v503_v23 = vor.u32 %v502_v19, %v498_v13 }
  0xc5   : > { %2582 = vmatprep.subr.bf16.mxu1 %v2821_v24  ;;  %v653_v24 = vcombine.low %v482_v11, %v489_v18 }
  0xc6   : > { %2561 = vmatpush3.bf16.msra.mxu0 %v2822_v26  ;;  %v2855_v26 = vld [vmem:[#allocation5 + $0x3e8] sm:$0xff]  }
  0xc7   : > { %2562 = vmatprep.subr.bf16.mxu0 %v2824_v27  ;;  %v654_v27 = vcombine.low %v496_v21, %v503_v23  ;;  %v675_v28 = vrot.slane %v653_v24, %v3280_v48 }
  0xc8   : > { %2583 = vmatpush3.bf16.msra.mxu1 %v2823_v29  ;;  %v2856_v29 = vld [vmem:[#allocation5 + $0x328] sm:$0xff]  }
  0xc9   : > { %2584 = vmatprep.subr.bf16.mxu1 %v2825_v30  ;;  %v2858_v30 = vld [vmem:[#allocation5 + $0x370] sm:$0xff]   ;;  %v682_v31 = vrot.slane %v654_v27, %v3280_v48 }
  0xca   : > { %2563 = vmatpush3.bf16.msra.mxu0 %v2826_v32  ;;  %v2857_v32 = vld [vmem:[#allocation5 + $0x3a8] sm:$0xff]  }
  0xcb   : > { %2564 = vmatprep.subr.bf16.mxu0 %v2828_v33  ;;  %v2859_v33 = vld [vmem:[#allocation5 + $0x3f0] sm:$0xff]   ;;  %v684_v34 = vcombine.low %v675_v28, %v682_v31 }
  0xcc   : > { %2585 = vmatpush3.bf16.msra.mxu1 %v2827_v35  ;;  %v2860_v35 = vld [vmem:[#allocation5 + $0x330] sm:$0xff]  }
  0xcd   : > { %2586 = vmatprep.subr.bf16.mxu1 %v2829_v38  ;;  %v2862_v38 = vld [vmem:[#allocation5 + $0x378] sm:$0xff]   ;;  %v698_v39 = vrot.slane %v684_v34, %v3280_v48 }
  0xce   : > { %2565 = vmatpush3.bf16.msra.mxu0 %v2830_v40  ;;  %v2861_v40 = vld [vmem:[#allocation5 + $0x3b0] sm:$0xff]  }
  0xcf   : > { %2594 = vmatprep.subr.bf16.mxu0 %v2834_v43  ;;  %v2864_v43 = vld [vmem:[#allocation5 + $0x338] sm:$0xff]  }
  0xd0   : > { %2587 = vmatpush3.bf16.msra.mxu1 %v2831_v44 }
  0xd1   : > { %2040 = vmatmul.mubr.bf16.vlgmr.msra.gmra.mrb[8].mxu0 %v1037_v42  ;;  %2616 = vmatprep.subr.bf16.mxu1 %v2835_v45  ;;  %v2327_v42 = vcombine.low %v3305_v36, %v698_v39  ;;  %v2865_v45 = vld [vmem:[#allocation5 + $0x3b8] sm:$0xff]  }
  0xd2   : > { %2595 = vmatpush3.bf16.msra.mxu0 %v2836_v46 }
  0xd3   : > { %2080 = vmatmul.mubr.bf16.vlgmr.msra.gmra.mrb[8].mxu1 %v1059_v47  ;;  %2596 = vmatprep.subr.bf16.mxu0 %v2838_v49  ;;  %v1028_v44 = vrot.slane %v2327_v42, %v3280_v48 }
  0xd4   : > { %2617 = vmatpush3.bf16.msra.mxu1 %v2837_v50 }
  0xd5   : > { %2618 = vmatprep.subr.bf16.mxu1 %v2839_v51  ;;  %v1030_v46 = vcombine.high %v1028_v44, %v1028_v44  ;;  %v1044_v47 = vrot.slane %v1028_v44, %v3280_v48 }
  0xd6   : > { %2597 = vmatpush3.bf16.msra.mxu0 %v2840_v52  ;;  %v2323_v52 = vld [vmem:[#allocation7] ss:$0 sm:$0xff] }
  0xd7   : > { %2598 = vmatprep.subr.bf16.mxu0 %v2842_v53  ;;  %v1058_v49 = vrot.slane %v1030_v46, %v3280_v48  ;;  %v1060_v50 = vcombine.high %v1044_v47, %v1044_v47 }
  0xd8   : > { %2619 = vmatpush3.bf16.msra.mxu1 %v2841_v54 }
  0xd9   : > { %2620 = vmatprep.subr.bf16.mxu1 %v2843_v56  ;;  %2119 = vmatprep.mubr.bf16.mxu0 %v1058_v49  ;;  %v1062_v51 = vcombine.high %v1058_v49, %v1058_v49 }
  0xda   : > { %2599 = vmatpush3.bf16.msra.mxu0 %v2844_v59 }
  0xdb   : > { %2600 = vmatprep.subr.bf16.mxu0 %v2846_v60  ;;  %2159 = vmatprep.mubr.bf16.mxu1 %v1062_v51 }
  0xdc   : > { %2621 = vmatpush3.bf16.msra.mxu1 %v2845_v1 }
  0xdd   : > { %2622 = vmatprep.subr.bf16.mxu1 %v2847_v2 }
  0xde   : > { %2601 = vmatpush3.bf16.msra.mxu0 %v2848_v7 }
  0xdf   : > { %2602 = vmatprep.subr.bf16.mxu0 %v2850_v10 }
  0xe0   : > { %2623 = vmatpush3.bf16.msra.mxu1 %v2849_v15 }
  0xe1   : > { %2624 = vmatprep.subr.bf16.mxu1 %v2851_v17 }
  0xe2   : > { %2603 = vmatpush3.bf16.msra.mxu0 %v2852_v20 }
  0xe3   : > { %2604 = vmatprep.subr.bf16.mxu0 %v2854_v22 }
  0xe4   : > { %2625 = vmatpush3.bf16.msra.mxu1 %v2853_v25 }
  0xe5   : > { %2626 = vmatprep.subr.bf16.mxu1 %v2855_v26 }
  0xe6   : > { %2605 = vmatpush3.bf16.msra.mxu0 %v2856_v29 }
  0xe7   : > { %2606 = vmatprep.subr.bf16.mxu0 %v2858_v30 }
  0xe8   : > { %2627 = vmatpush3.bf16.msra.mxu1 %v2857_v32 }
  0xe9   : > { %2628 = vmatprep.subr.bf16.mxu1 %v2859_v33 }
  0xea   : > { %2607 = vmatpush3.bf16.msra.mxu0 %v2860_v35 }
  0xeb   : > { %2608 = vmatprep.subr.bf16.mxu0 %v2862_v38 }
  0xec   : > { %2629 = vmatpush3.bf16.msra.mxu1 %v2861_v40 }
  0xed   : > { %2630 = vmatprep.subr.bf16.mxu1 %v2863_v41 }
  0xee   : > { %2609 = vmatpush3.bf16.msra.mxu0 %v2864_v43 }
  0xf0   : > { %2631 = vmatpush3.bf16.msra.mxu1 %v2865_v45 }
  0xf1   : > { %2120 = vmatmul.mubr.bf16.vlgmr.msra.gmra.mrb[12].mxu0 %v1044_v47 }
  0xf3   : > { %2160 = vmatmul.mubr.bf16.vlgmr.msra.gmra.mrb[12].mxu1 %v1060_v50 }
 0x164   : > { %v2478_v36 = vpop.f32.mrb[0].mxu0 }
 0x165   : > { %v2479_v53 = vpop.f32.mrb[1].mxu0 }
 0x166   : > { %v2500_v54 = vpop.f32.mrb[0].mxu1  ;;  %v2480_v55 = vadd.f32 %v2479_v53, %v2478_v36  ;;  %v2481_v56 = vpop.f32.mrb[2].mxu0 }
 0x167   : > { %v2501_v57 = vpop.f32.mrb[1].mxu1  ;;  %v2482_v58 = vpop.f32.mrb[3].mxu0 }
 0x168   : > { %v1882_v59 = vadd.f32 %v2480_v55, %v2323_v52  ;;  %v2502_v60 = vadd.f32 %v2501_v57, %v2500_v54  ;;  %v2503_v61 = vpop.f32.mrb[2].mxu1 }
 0x169   : > { %v2504_v62 = vpop.f32.mrb[3].mxu1 }
 0x16a   : > { %v1922_v48 = vadd.f32 %v2502_v60, %v1882_v59 }
 0x184   : > { %v2522_v63 = vpop.f32.mrb[4].mxu0 }
 0x185   : > { %v2523_v0 = vpop.f32.mrb[5].mxu0 }
 0x186   : > { %v2544_v1 = vpop.f32.mrb[4].mxu1  ;;  %v2524_v2 = vadd.f32 %v2523_v0, %v2522_v63  ;;  %v2525_v3 = vpop.f32.mrb[6].mxu0 }
 0x187   : > { %v2545_v4 = vpop.f32.mrb[5].mxu1  ;;  %v2526_v5 = vpop.f32.mrb[7].mxu0 }
 0x188   : > { %v1962_v6 = vadd.f32 %v2524_v2, %v1922_v48  ;;  %v2546_v7 = vadd.f32 %v2545_v4, %v2544_v1  ;;  %v2547_v8 = vpop.f32.mrb[6].mxu1 }
 0x189   : > { %v2548_v9 = vpop.f32.mrb[7].mxu1 }
 0x18a   : > { %v2002_v10 = vadd.f32 %v2546_v7, %v1962_v6 }
 0x1a4   : > { %v2566_v11 = vpop.f32.mrb[8].mxu0 }
 0x1a5   : > { %v2567_v12 = vpop.f32.mrb[9].mxu0 }
 0x1a6   : > { %v2588_v13 = vpop.f32.mrb[8].mxu1  ;;  %v2568_v14 = vadd.f32 %v2567_v12, %v2566_v11  ;;  %v2569_v15 = vpop.f32.mrb[10].mxu0 }
 0x1a7   : > { %v2589_v16 = vpop.f32.mrb[9].mxu1  ;;  %v2570_v17 = vpop.f32.mrb[11].mxu0 }
 0x1a8   : > { %v2042_v18 = vadd.f32 %v2568_v14, %v2002_v10  ;;  %v2590_v19 = vadd.f32 %v2589_v16, %v2588_v13  ;;  %v2591_v20 = vpop.f32.mrb[10].mxu1 }
 0x1a9   : > { %v2592_v21 = vpop.f32.mrb[11].mxu1 }
 0x1aa   : > { %v2082_v22 = vadd.f32 %v2590_v19, %v2042_v18 }
 0x1c4   : > { %v2610_v23 = vpop.f32.mrb[12].mxu0 }
 0x1c5   : > { %v2611_v24 = vpop.f32.mrb[13].mxu0 }
 0x1c6   : > { %v2632_v25 = vpop.f32.mrb[12].mxu1  ;;  %v2612_v26 = vadd.f32 %v2611_v24, %v2610_v23  ;;  %v2613_v27 = vpop.f32.mrb[14].mxu0 }
 0x1c7   : > { %v2633_v28 = vpop.f32.mrb[13].mxu1  ;;  %v2614_v29 = vpop.f32.mrb[15].mxu0 }
 0x1c8   : > { %v2122_v30 = vadd.f32 %v2612_v26, %v2082_v22  ;;  %v2634_v31 = vadd.f32 %v2633_v28, %v2632_v25  ;;  %v2635_v32 = vpop.f32.mrb[14].mxu1 }
 0x1c9   : > { %v2636_v33 = vpop.f32.mrb[15].mxu1 }
 0x1ca   : > { %v2162_v34 = vadd.f32 %v2634_v31, %v2122_v30 }
 0x1cc   : > { %v2167_v35 = vmax.f32 %v2162_v34, 0.0 }
 0x1ce   : > { %v2175_v38 = vrot.slane %v2167_v35, %v3274_v37 }
 0x1d0   : > { %v2176_v39 = vcombine.high %v2175_v38, %v2175_v38  ;;  %v2179_v40 = vpack.c.bf16 %v2175_v38, %v2175_v38 }
 0x1d2   : > { %v2180_v41 = vpack.c.bf16 %v2176_v39, %v2176_v39  ;;  %2181 = vst [vmem:[%s229_s24] sm:$0x1] %v2179_v40 }
 0x1d4   : > { %2182 = vst [vmem:[%s229_s24 + $0x1] sm:$0x1] %v2180_v41 }
 0x1d5   : > { %2966 = shalt.err (!%p2963_p2)
}
 0x1d6   : > { %s2967_s10 = scalar_lea.hbm %s3342_s9, 32  ;;  %s2971_s29 = scalar_lea.hbm %s3396_s3, 64 }
 0x1d7   : > { %p2968_p0 = scmp.ne.s32.totalorder %s3342_s9, %s2967_s10  ;;  %p2972_p6 = scmp.lt.u32.totalorder %s3342_s9, %s3396_s3 }
 0x1d8   : > { %p2973_p7 = scmp.lt.u32.totalorder %s2971_s29, %s2967_s10  ;;  %p2975_p8 = scmp.lt.u32.totalorder %s2967_s10, %s3342_s9 }
 0x1d9   : > { %p2969_p4 = pnand %p2968_p0, %p3411_p12 }
 0x1da   : > { %p2974_p11 = por %p2973_p7, %p2972_p6 }
 0x1db   : > { %p2970_p13 = pneg %p2969_p4 }
 0x1dc   : > { %p2976_p1 = por %p2975_p8, %p2974_p11 }
 0x1de   : > { %p2977_p10 = pnand %p2976_p1, %p2970_p13 }
 0x1e0   : > { %2980 = shalt.err (!%p2977_p10)
}
 0x1e1   : > { %s3051_s22 = smov 16   ;;  %s3052_s24 = smov 1  }
 0x1e2   : > { %2651 = dma.vmem_to_hbm [thread:$0]  (%p3411_p12), %s3344_s30, 32, %s3342_s9, %s2184_s28, %s3051_s22, %s3051_s22, %s3052_s24  }
 0x1e3 PF: > { %s2214_s7 = sand.u32 1, %s3019_s12   ;;  %p3412_p3 = scmp.ne.s32.totalorder %s3404_s23, 0 }
 0x1e4   : > { %p3413_p5 = scmp.ge.s32.totalorder %s3039_s17, 2  ;;  %s2215_s26 = scalar_lea.sflag [#allocation4], %s2214_s7 }
 0x1e6   : > { %p2665_p9 = pnand %p3413_p5, %p3412_p3 }
 0x1e8   : > { %3014 = dma.done.wait (!%p2665_p9), %s2215_s26, 32  }
 0x1e9   : > { %3016 = vsyncadd (!%p2665_p9), %s2215_s26, 4294967264  ;;  %s20_s17 = sadd.s32 1, %s3039_s17   ;;  %s3414_s12 = smov %s3023_s13 }
 0x1ea   : > { %p17_p2 = scmp.ge.s32.totalorder %s20_s17, 4   ;;  %s3415_s13 = smov %s3027_s14 }
 0x1eb   : > { %s3416_s14 = smov %s3219_s4  ;;  %s3417_s15 = smov %s3035_s16 }
 0x1ec   : > { %s3418_s16 = smov %s3420_s18  ;;  %19 = sbr.rel (!%p17_p2) target bundleno = 7 (0x7), region = 87 }
 0x1f3   :  { %2220 = vsyncpa [#allocation3], 1 }
 0x1f4   :  { %2222 = vsyncpa [#allocation3 + $0x1], 1 }
 0x1f5   :  { %2223 = vsyncpa [#allocation6], 1 }
 0x1f6   :  { %2224 = vsyncpa [#allocation4], 1 }
 0x1f7   :  { %2226 = vsyncpa [#allocation4 + $0x1], 1 }

</bundles_post_ra>
